<compile_context>
chip_gen: v7x
topology: tpu7x:2x2x1
jax: 0.10.0
libtpu: 0.0.40
codegen_flags: <defaults>
</compile_context>

<pallas_src>
import math

import jax
import jax.numpy as jnp
import numpy as np
from jax import lax
from jax.experimental import pallas as pl
from jax.experimental.pallas import tpu as pltpu

# --- module hyper-parameters (from the PyTorch file) -------------------------
D_MODEL = 512
NUM_HEADS = 8
D_FF = 2048
D_K = D_MODEL // NUM_HEADS
LN_EPS = 1e-5  # nn.LayerNorm default

# --- small problem sizes for the demo ----------------------------------------
BATCH = 2
SEQ = 16


def _layer_norm(v, gamma, beta):
    """PyTorch nn.LayerNorm over the last axis (biased variance)."""
    mu = jnp.mean(v, axis=-1, keepdims=True)
    var = jnp.mean((v - mu) ** 2, axis=-1, keepdims=True)
    return (v - mu) * lax.rsqrt(var + LN_EPS) * gamma + beta


def encoder_layer_kernel(
    x_ref, maskb_ref,
    wqkv_ref, bqkv_ref, wo_ref,
    w1_ref, b1_ref, w2_ref,
    vec_ref,
    out_ref,
):
    """Single invocation: all B*S tokens, all weights resident in VMEM."""
    B, S, D = x_ref.shape
    f32 = jnp.float32
    bf16 = jnp.bfloat16

    x2d = x_ref[...].astype(f32).reshape(B * S, D)        # (B*S, D) f32 residual
    xb = x2d.astype(bf16)                                  # bf16 MXU operand

    vec = vec_ref[...]                                     # (8, D) stacked params
    bo, g1, be1 = vec[0:1], vec[1:2], vec[2:3]
    b2, g2, be2 = vec[3:4], vec[4:5], vec[5:6]

    # --- fused QKV projection: one (B*S, D) @ (D, 3D) matmul -----------------
    # 1/sqrt(d_k) is already folded into the W_q / b_q columns at pack time.
    qkv = jnp.dot(xb, wqkv_ref[...],
                  preferred_element_type=f32) + bqkv_ref[...]   # (B*S, 3D) f32

    # --- scaled dot-product attention (per batch element, per head) ----------
    attn_rows = []
    for b in range(B):                                    # B is tiny & static
        rows = qkv[b * S:(b + 1) * S]                     # (S, 3D)
        mb = maskb_ref[b]                                 # (S, S) additive bias
        head_outs = []
        for h in range(NUM_HEADS):                        # statically unrolled
            qh = rows[:, h * D_K:(h + 1) * D_K].astype(bf16)
            kh = rows[:, D + h * D_K:D + (h + 1) * D_K].astype(bf16)
            vh = rows[:, 2 * D + h * D_K:2 * D + (h + 1) * D_K].astype(bf16)
            # q @ k^T via dot_general (contract last dims, no explicit .T)
            s = lax.dot_general(qh, kh, (((1,), (1,)), ((), ())),
                                preferred_element_type=f32) + mb
            s = s - jnp.max(s, axis=-1, keepdims=True)    # stable softmax
            p = jnp.exp(s)
            p = p * pl.reciprocal(jnp.sum(p, axis=-1, keepdims=True),
                                  approx=True)
            head_outs.append(jnp.dot(p.astype(bf16), vh,
                                     preferred_element_type=f32))   # (S, d_k)
        attn_rows.append(jnp.concatenate(head_outs, axis=-1))       # (S, D)
    attn2d = jnp.concatenate(attn_rows, axis=0)                     # (B*S, D)

    # --- combine_heads -> single W_o matmul -----------------------------------
    attn_out = jnp.dot(attn2d.astype(bf16), wo_ref[...],
                       preferred_element_type=f32) + bo             # (B*S, D)

    # --- residual + LayerNorm 1 (dropout = identity in eval) -----------------
    y = _layer_norm(x2d + attn_out, g1, be1)

    # --- position-wise feed-forward -------------------------------------------
    h1 = jnp.dot(y.astype(bf16), w1_ref[...],
                 preferred_element_type=f32) + b1_ref[...]
    h1 = jnp.maximum(h1, 0.0)
    ff = jnp.dot(h1.astype(bf16), w2_ref[...],
                 preferred_element_type=f32) + b2

    # --- residual + LayerNorm 2 ------------------------------------------------
    z = _layer_norm(y + ff, g2, be2)
    out_ref[...] = z.reshape(B, S, D).astype(out_ref.dtype)


def encoder_layer(x, mask, kp):
    B, S, D = x.shape
    # Additive mask bias precomputed once in the wrapper (binary mask assumed).
    mask_bias = (mask.astype(jnp.float32) - 1.0) * 1e9

    def vmem_spec():
        # Whole array resident in VMEM; no grid -> single DMA, single-buffered.
        return pl.BlockSpec(memory_space=pltpu.MemorySpace.VMEM)

    return pl.pallas_call(
        encoder_layer_kernel,
        out_shape=jax.ShapeDtypeStruct((B, S, D), x.dtype),
        in_specs=[vmem_spec() for _ in range(9)],
        out_specs=vmem_spec(),
        compiler_params=pltpu.CompilerParams(
            vmem_limit_bytes=24 * 1024 * 1024,    # ~6.3 MiB weights + activations
        ),
    )(
        x, mask_bias,
        kp["wqkv"], kp["bqkv"], kp["wo"],
        kp["w1"], kp["b1"], kp["w2"], kp["vec"],
    )


def reference_encoder_layer(x, mask, p):
    """Pure-JAX f32 reference mirroring the PyTorch forward pass."""
    x = x.astype(jnp.float32)
    B, S, D = x.shape
    q = x @ p["wq"] + p["bq"]
    k = x @ p["wk"] + p["bk"]
    v = x @ p["wv"] + p["bv"]
    split = lambda t: t.reshape(B, S, NUM_HEADS, D_K).transpose(0, 2, 1, 3)
    qh, kh, vh = split(q), split(k), split(v)
    s = jnp.einsum("bhqd,bhkd->bhqk", qh, kh) / math.sqrt(D_K)
    s = jnp.where(mask[:, None, :, :] == 0.0, -1e9, s)
    a = jax.nn.softmax(s, axis=-1)
    o = jnp.einsum("bhqk,bhkd->bhqd", a, vh)
    o = o.transpose(0, 2, 1, 3).reshape(B, S, D)
    attn_out = o @ p["wo"] + p["bo"]
    y = _layer_norm(x + attn_out, p["g1"], p["be1"])
    ff = jnp.maximum(y @ p["w1"] + p["b1"], 0.0) @ p["w2"] + p["b2"]
    return _layer_norm(y + ff, p["g2"], p["be2"])


def make_params(key):
    """f32 master parameters (distinct PRNG keys for each tensor)."""
    ks = jax.random.split(key, 12)
    n = lambda k, shape: (0.02 * jax.random.normal(k, shape)).astype(jnp.float32)
    return {
        "wq": n(ks[0], (D_MODEL, D_MODEL)), "bq": n(ks[1], (D_MODEL,)),
        "wk": n(ks[2], (D_MODEL, D_MODEL)), "bk": n(ks[3], (D_MODEL,)),
        "wv": n(ks[4], (D_MODEL, D_MODEL)), "bv": n(ks[5], (D_MODEL,)),
        "wo": n(ks[6], (D_MODEL, D_MODEL)), "bo": n(ks[7], (D_MODEL,)),
        "g1": jnp.ones((D_MODEL,), jnp.float32),
        "be1": jnp.zeros((D_MODEL,), jnp.float32),
        "w1": n(ks[8], (D_MODEL, D_FF)), "b1": n(ks[9], (D_FF,)),
        "w2": n(ks[10], (D_FF, D_MODEL)), "b2": n(ks[11], (D_MODEL,)),
        "g2": jnp.ones((D_MODEL,), jnp.float32),
        "be2": jnp.zeros((D_MODEL,), jnp.float32),
    }


def pack_kernel_params(p):
    """Rearrange f32 master params into the kernel's fused bf16 layout."""
    bf = jnp.bfloat16
    scale = 1.0 / math.sqrt(D_K)
    # Fused QKV slab; softmax scale folded into the Q columns and Q bias.
    wqkv = jnp.concatenate([p["wq"] * scale, p["wk"], p["wv"]], axis=1).astype(bf)
    bqkv = jnp.concatenate([p["bq"] * scale, p["bk"], p["bv"]]
                           ).reshape(1, 3 * D_MODEL).astype(jnp.float32)
    zeros = jnp.zeros((D_MODEL,), jnp.float32)
    vec = jnp.stack([p["bo"], p["g1"], p["be1"],
                     p["b2"], p["g2"], p["be2"], zeros, zeros])        # (8, D)
    # TODO(synk): on v7x quantize w1/w2 to fp8 (int8 on v6e/v5e) with
    # per-channel scales to further halve the dominant FFN weight DMA.
    return {
        "wqkv": wqkv,                                   # (D, 3D) bf16
        "bqkv": bqkv,                                   # (1, 3D) f32
        "wo": p["wo"].astype(bf),                       # (D, D)  bf16
        "w1": p["w1"].astype(bf),                       # (D, D_FF) bf16
        "b1": p["b1"].reshape(1, D_FF).astype(jnp.float32),
        "w2": p["w2"].astype(bf),                       # (D_FF, D) bf16
        "vec": vec.astype(jnp.float32),                 # (8, D) f32
    }


if __name__ == "__main__":
    key = jax.random.PRNGKey(0)
    kx, kparam = jax.random.split(key)

    x = jax.random.normal(kx, (BATCH, SEQ, D_MODEL), dtype=jnp.float32)

    # mask: 1 = attend, 0 = masked.  Batch 1 has its last 4 key positions padded.
    mask = np.ones((BATCH, SEQ, SEQ), dtype=np.float32)
    mask[1, :, SEQ - 4:] = 0.0
    mask = jnp.asarray(mask)

    params = make_params(kparam)
    kparams = pack_kernel_params(params)

    out = encoder_layer(x, mask, kparams)
    out = jax.block_until_ready(out)

    ref = reference_encoder_layer(x, mask, params)
    # bf16 weights/activations in the matmuls -> looser tolerance vs f32 ref.
    np.testing.assert_allclose(np.asarray(out), np.asarray(ref), rtol=2e-2, atol=2e-2)

    print("KERNEL_OK")
</pallas_src>

<mosaic_0001>
module attributes {stable_mosaic.version = 11 : i64} {
  func.func @encoder_layer_kernel(%arg0: memref<2x16x512xf32, #tpu.memory_space<vmem>>, %arg1: memref<2x16x16xf32, #tpu.memory_space<vmem>>, %arg2: memref<512x1536xbf16, #tpu.memory_space<vmem>>, %arg3: memref<1x1536xf32, #tpu.memory_space<vmem>>, %arg4: memref<512x512xbf16, #tpu.memory_space<vmem>>, %arg5: memref<512x2048xbf16, #tpu.memory_space<vmem>>, %arg6: memref<1x2048xf32, #tpu.memory_space<vmem>>, %arg7: memref<2048x512xbf16, #tpu.memory_space<vmem>>, %arg8: memref<8x512xf32, #tpu.memory_space<vmem>>, %arg9: memref<2x16x512xf32, #tpu.memory_space<vmem>>) attributes {dimension_semantics = [], scalar_prefetch = 0 : i64, scratch_operands = 0 : i64, tpu.core_type = #tpu.core_type<tc>} {
    %c0 = arith.constant 0 : index
    %c0_0 = arith.constant 0 : index
    %c0_1 = arith.constant 0 : index
    %0 = vector.load %arg0[%c0, %c0_0, %c0_1] : memref<2x16x512xf32, #tpu.memory_space<vmem>>, vector<2x16x512xf32>
    %1 = vector.shape_cast %0 : vector<2x16x512xf32> to vector<32x512xf32>
    %2 = arith.truncf %1 : vector<32x512xf32> to vector<32x512xbf16>
    %c0_2 = arith.constant 0 : index
    %c0_3 = arith.constant 0 : index
    %3 = vector.load %arg8[%c0_2, %c0_3] : memref<8x512xf32, #tpu.memory_space<vmem>>, vector<8x512xf32>
    %4 = vector.extract_strided_slice %3 {offsets = [0, 0], sizes = [1, 512], strides = [1, 1]} : vector<8x512xf32> to vector<1x512xf32>
    %5 = vector.extract_strided_slice %3 {offsets = [1, 0], sizes = [1, 512], strides = [1, 1]} : vector<8x512xf32> to vector<1x512xf32>
    %6 = vector.extract_strided_slice %3 {offsets = [2, 0], sizes = [1, 512], strides = [1, 1]} : vector<8x512xf32> to vector<1x512xf32>
    %7 = vector.extract_strided_slice %3 {offsets = [3, 0], sizes = [1, 512], strides = [1, 1]} : vector<8x512xf32> to vector<1x512xf32>
    %8 = vector.extract_strided_slice %3 {offsets = [4, 0], sizes = [1, 512], strides = [1, 1]} : vector<8x512xf32> to vector<1x512xf32>
    %9 = vector.extract_strided_slice %3 {offsets = [5, 0], sizes = [1, 512], strides = [1, 1]} : vector<8x512xf32> to vector<1x512xf32>
    %c0_4 = arith.constant 0 : index
    %c0_5 = arith.constant 0 : index
    %10 = vector.load %arg2[%c0_4, %c0_5] : memref<512x1536xbf16, #tpu.memory_space<vmem>>, vector<512x1536xbf16>
    %cst = arith.constant dense<0.000000e+00> : vector<32x1536xf32>
    %11 = tpu.matmul %2, %10, %cst {dimension_numbers = #tpu.dot_dimension_numbers<[1], [0], [0], [1], [0, 0, 1, 1], [], []>} : vector<32x512xbf16>, vector<512x1536xbf16>, vector<32x1536xf32> -> vector<32x1536xf32>
    %c0_6 = arith.constant 0 : index
    %c0_7 = arith.constant 0 : index
    %12 = vector.load %arg3[%c0_6, %c0_7] : memref<1x1536xf32, #tpu.memory_space<vmem>>, vector<1x1536xf32>
    %13 = vector.broadcast %12 : vector<1x1536xf32> to vector<32x1536xf32>
    %14 = arith.addf %11, %13 : vector<32x1536xf32>
    %15 = vector.extract_strided_slice %14 {offsets = [0, 0], sizes = [16, 1536], strides = [1, 1]} : vector<32x1536xf32> to vector<16x1536xf32>
    %c0_8 = arith.constant 0 : index
    %c0_9 = arith.constant 0 : index
    %c0_10 = arith.constant 0 : index
    %16 = vector.load %arg1[%c0_8, %c0_9, %c0_10] : memref<2x16x16xf32, #tpu.memory_space<vmem>>, vector<1x16x16xf32>
    %17 = vector.shape_cast %16 : vector<1x16x16xf32> to vector<16x16xf32>
    %18 = vector.extract_strided_slice %15 {offsets = [0, 0], sizes = [16, 64], strides = [1, 1]} : vector<16x1536xf32> to vector<16x64xf32>
    %19 = arith.truncf %18 : vector<16x64xf32> to vector<16x64xbf16>
    %20 = vector.extract_strided_slice %15 {offsets = [0, 512], sizes = [16, 64], strides = [1, 1]} : vector<16x1536xf32> to vector<16x64xf32>
    %21 = arith.truncf %20 : vector<16x64xf32> to vector<16x64xbf16>
    %22 = vector.extract_strided_slice %15 {offsets = [0, 1024], sizes = [16, 64], strides = [1, 1]} : vector<16x1536xf32> to vector<16x64xf32>
    %23 = arith.truncf %22 : vector<16x64xf32> to vector<16x64xbf16>
    %cst_11 = arith.constant dense<0.000000e+00> : vector<16x16xf32>
    %24 = tpu.matmul %19, %21, %cst_11 {dimension_numbers = #tpu.dot_dimension_numbers<[1], [1], [0], [0], [0, 0, 1, 0], [], []>} : vector<16x64xbf16>, vector<16x64xbf16>, vector<16x16xf32> -> vector<16x16xf32>
    %25 = arith.addf %24, %17 : vector<16x16xf32>
    %cst_12 = arith.constant dense<0xFF800000> : vector<16xf32>
    %26 = vector.multi_reduction <maximumf>, %25, %cst_12 [1] : vector<16x16xf32> to vector<16xf32>
    %27 = vector.shape_cast %26 : vector<16xf32> to vector<16x1xf32>
    %28 = vector.broadcast %27 : vector<16x1xf32> to vector<16x16xf32>
    %29 = arith.subf %25, %28 : vector<16x16xf32>
    %30 = math.exp %29 : vector<16x16xf32>
    %cst_13 = arith.constant dense<0.000000e+00> : vector<16xf32>
    %31 = vector.multi_reduction <add>, %30, %cst_13 [1] : vector<16x16xf32> to vector<16xf32>
    %32 = vector.shape_cast %31 : vector<16xf32> to vector<16x1xf32>
    %33 = tpu.reciprocal %32 {approx = true} : vector<16x1xf32> -> vector<16x1xf32>
    %34 = vector.broadcast %33 : vector<16x1xf32> to vector<16x16xf32>
    %35 = arith.mulf %30, %34 : vector<16x16xf32>
    %36 = arith.truncf %35 : vector<16x16xf32> to vector<16x16xbf16>
    %cst_14 = arith.constant dense<0.000000e+00> : vector<16x64xf32>
    %37 = tpu.matmul %36, %23, %cst_14 {dimension_numbers = #tpu.dot_dimension_numbers<[1], [0], [0], [1], [0, 0, 1, 1], [], []>} : vector<16x16xbf16>, vector<16x64xbf16>, vector<16x64xf32> -> vector<16x64xf32>
    %38 = vector.extract_strided_slice %15 {offsets = [0, 64], sizes = [16, 64], strides = [1, 1]} : vector<16x1536xf32> to vector<16x64xf32>
    %39 = arith.truncf %38 : vector<16x64xf32> to vector<16x64xbf16>
    %40 = vector.extract_strided_slice %15 {offsets = [0, 576], sizes = [16, 64], strides = [1, 1]} : vector<16x1536xf32> to vector<16x64xf32>
    %41 = arith.truncf %40 : vector<16x64xf32> to vector<16x64xbf16>
    %42 = vector.extract_strided_slice %15 {offsets = [0, 1088], sizes = [16, 64], strides = [1, 1]} : vector<16x1536xf32> to vector<16x64xf32>
    %43 = arith.truncf %42 : vector<16x64xf32> to vector<16x64xbf16>
    %cst_15 = arith.constant dense<0.000000e+00> : vector<16x16xf32>
    %44 = tpu.matmul %39, %41, %cst_15 {dimension_numbers = #tpu.dot_dimension_numbers<[1], [1], [0], [0], [0, 0, 1, 0], [], []>} : vector<16x64xbf16>, vector<16x64xbf16>, vector<16x16xf32> -> vector<16x16xf32>
    %45 = arith.addf %44, %17 : vector<16x16xf32>
    %cst_16 = arith.constant dense<0xFF800000> : vector<16xf32>
    %46 = vector.multi_reduction <maximumf>, %45, %cst_16 [1] : vector<16x16xf32> to vector<16xf32>
    %47 = vector.shape_cast %46 : vector<16xf32> to vector<16x1xf32>
    %48 = vector.broadcast %47 : vector<16x1xf32> to vector<16x16xf32>
    %49 = arith.subf %45, %48 : vector<16x16xf32>
    %50 = math.exp %49 : vector<16x16xf32>
    %cst_17 = arith.constant dense<0.000000e+00> : vector<16xf32>
    %51 = vector.multi_reduction <add>, %50, %cst_17 [1] : vector<16x16xf32> to vector<16xf32>
    %52 = vector.shape_cast %51 : vector<16xf32> to vector<16x1xf32>
    %53 = tpu.reciprocal %52 {approx = true} : vector<16x1xf32> -> vector<16x1xf32>
    %54 = vector.broadcast %53 : vector<16x1xf32> to vector<16x16xf32>
    %55 = arith.mulf %50, %54 : vector<16x16xf32>
    %56 = arith.truncf %55 : vector<16x16xf32> to vector<16x16xbf16>
    %cst_18 = arith.constant dense<0.000000e+00> : vector<16x64xf32>
    %57 = tpu.matmul %56, %43, %cst_18 {dimension_numbers = #tpu.dot_dimension_numbers<[1], [0], [0], [1], [0, 0, 1, 1], [], []>} : vector<16x16xbf16>, vector<16x64xbf16>, vector<16x64xf32> -> vector<16x64xf32>
    %58 = vector.extract_strided_slice %15 {offsets = [0, 128], sizes = [16, 64], strides = [1, 1]} : vector<16x1536xf32> to vector<16x64xf32>
    %59 = arith.truncf %58 : vector<16x64xf32> to vector<16x64xbf16>
    %60 = vector.extract_strided_slice %15 {offsets = [0, 640], sizes = [16, 64], strides = [1, 1]} : vector<16x1536xf32> to vector<16x64xf32>
    %61 = arith.truncf %60 : vector<16x64xf32> to vector<16x64xbf16>
    %62 = vector.extract_strided_slice %15 {offsets = [0, 1152], sizes = [16, 64], strides = [1, 1]} : vector<16x1536xf32> to vector<16x64xf32>
    %63 = arith.truncf %62 : vector<16x64xf32> to vector<16x64xbf16>
    %cst_19 = arith.constant dense<0.000000e+00> : vector<16x16xf32>
    %64 = tpu.matmul %59, %61, %cst_19 {dimension_numbers = #tpu.dot_dimension_numbers<[1], [1], [0], [0], [0, 0, 1, 0], [], []>} : vector<16x64xbf16>, vector<16x64xbf16>, vector<16x16xf32> -> vector<16x16xf32>
    %65 = arith.addf %64, %17 : vector<16x16xf32>
    %cst_20 = arith.constant dense<0xFF800000> : vector<16xf32>
    %66 = vector.multi_reduction <maximumf>, %65, %cst_20 [1] : vector<16x16xf32> to vector<16xf32>
    %67 = vector.shape_cast %66 : vector<16xf32> to vector<16x1xf32>
    %68 = vector.broadcast %67 : vector<16x1xf32> to vector<16x16xf32>
    %69 = arith.subf %65, %68 : vector<16x16xf32>
    %70 = math.exp %69 : vector<16x16xf32>
    %cst_21 = arith.constant dense<0.000000e+00> : vector<16xf32>
    %71 = vector.multi_reduction <add>, %70, %cst_21 [1] : vector<16x16xf32> to vector<16xf32>
    %72 = vector.shape_cast %71 : vector<16xf32> to vector<16x1xf32>
    %73 = tpu.reciprocal %72 {approx = true} : vector<16x1xf32> -> vector<16x1xf32>
    %74 = vector.broadcast %73 : vector<16x1xf32> to vector<16x16xf32>
    %75 = arith.mulf %70, %74 : vector<16x16xf32>
    %76 = arith.truncf %75 : vector<16x16xf32> to vector<16x16xbf16>
    %cst_22 = arith.constant dense<0.000000e+00> : vector<16x64xf32>
    %77 = tpu.matmul %76, %63, %cst_22 {dimension_numbers = #tpu.dot_dimension_numbers<[1], [0], [0], [1], [0, 0, 1, 1], [], []>} : vector<16x16xbf16>, vector<16x64xbf16>, vector<16x64xf32> -> vector<16x64xf32>
    %78 = vector.extract_strided_slice %15 {offsets = [0, 192], sizes = [16, 64], strides = [1, 1]} : vector<16x1536xf32> to vector<16x64xf32>
    %79 = arith.truncf %78 : vector<16x64xf32> to vector<16x64xbf16>
    %80 = vector.extract_strided_slice %15 {offsets = [0, 704], sizes = [16, 64], strides = [1, 1]} : vector<16x1536xf32> to vector<16x64xf32>
    %81 = arith.truncf %80 : vector<16x64xf32> to vector<16x64xbf16>
    %82 = vector.extract_strided_slice %15 {offsets = [0, 1216], sizes = [16, 64], strides = [1, 1]} : vector<16x1536xf32> to vector<16x64xf32>
    %83 = arith.truncf %82 : vector<16x64xf32> to vector<16x64xbf16>
    %cst_23 = arith.constant dense<0.000000e+00> : vector<16x16xf32>
    %84 = tpu.matmul %79, %81, %cst_23 {dimension_numbers = #tpu.dot_dimension_numbers<[1], [1], [0], [0], [0, 0, 1, 0], [], []>} : vector<16x64xbf16>, vector<16x64xbf16>, vector<16x16xf32> -> vector<16x16xf32>
    %85 = arith.addf %84, %17 : vector<16x16xf32>
    %cst_24 = arith.constant dense<0xFF800000> : vector<16xf32>
    %86 = vector.multi_reduction <maximumf>, %85, %cst_24 [1] : vector<16x16xf32> to vector<16xf32>
    %87 = vector.shape_cast %86 : vector<16xf32> to vector<16x1xf32>
    %88 = vector.broadcast %87 : vector<16x1xf32> to vector<16x16xf32>
    %89 = arith.subf %85, %88 : vector<16x16xf32>
    %90 = math.exp %89 : vector<16x16xf32>
    %cst_25 = arith.constant dense<0.000000e+00> : vector<16xf32>
    %91 = vector.multi_reduction <add>, %90, %cst_25 [1] : vector<16x16xf32> to vector<16xf32>
    %92 = vector.shape_cast %91 : vector<16xf32> to vector<16x1xf32>
    %93 = tpu.reciprocal %92 {approx = true} : vector<16x1xf32> -> vector<16x1xf32>
    %94 = vector.broadcast %93 : vector<16x1xf32> to vector<16x16xf32>
    %95 = arith.mulf %90, %94 : vector<16x16xf32>
    %96 = arith.truncf %95 : vector<16x16xf32> to vector<16x16xbf16>
    %cst_26 = arith.constant dense<0.000000e+00> : vector<16x64xf32>
    %97 = tpu.matmul %96, %83, %cst_26 {dimension_numbers = #tpu.dot_dimension_numbers<[1], [0], [0], [1], [0, 0, 1, 1], [], []>} : vector<16x16xbf16>, vector<16x64xbf16>, vector<16x64xf32> -> vector<16x64xf32>
    %98 = vector.extract_strided_slice %15 {offsets = [0, 256], sizes = [16, 64], strides = [1, 1]} : vector<16x1536xf32> to vector<16x64xf32>
    %99 = arith.truncf %98 : vector<16x64xf32> to vector<16x64xbf16>
    %100 = vector.extract_strided_slice %15 {offsets = [0, 768], sizes = [16, 64], strides = [1, 1]} : vector<16x1536xf32> to vector<16x64xf32>
    %101 = arith.truncf %100 : vector<16x64xf32> to vector<16x64xbf16>
    %102 = vector.extract_strided_slice %15 {offsets = [0, 1280], sizes = [16, 64], strides = [1, 1]} : vector<16x1536xf32> to vector<16x64xf32>
    %103 = arith.truncf %102 : vector<16x64xf32> to vector<16x64xbf16>
    %cst_27 = arith.constant dense<0.000000e+00> : vector<16x16xf32>
    %104 = tpu.matmul %99, %101, %cst_27 {dimension_numbers = #tpu.dot_dimension_numbers<[1], [1], [0], [0], [0, 0, 1, 0], [], []>} : vector<16x64xbf16>, vector<16x64xbf16>, vector<16x16xf32> -> vector<16x16xf32>
    %105 = arith.addf %104, %17 : vector<16x16xf32>
    %cst_28 = arith.constant dense<0xFF800000> : vector<16xf32>
    %106 = vector.multi_reduction <maximumf>, %105, %cst_28 [1] : vector<16x16xf32> to vector<16xf32>
    %107 = vector.shape_cast %106 : vector<16xf32> to vector<16x1xf32>
    %108 = vector.broadcast %107 : vector<16x1xf32> to vector<16x16xf32>
    %109 = arith.subf %105, %108 : vector<16x16xf32>
    %110 = math.exp %109 : vector<16x16xf32>
    %cst_29 = arith.constant dense<0.000000e+00> : vector<16xf32>
    %111 = vector.multi_reduction <add>, %110, %cst_29 [1] : vector<16x16xf32> to vector<16xf32>
    %112 = vector.shape_cast %111 : vector<16xf32> to vector<16x1xf32>
    %113 = tpu.reciprocal %112 {approx = true} : vector<16x1xf32> -> vector<16x1xf32>
    %114 = vector.broadcast %113 : vector<16x1xf32> to vector<16x16xf32>
    %115 = arith.mulf %110, %114 : vector<16x16xf32>
    %116 = arith.truncf %115 : vector<16x16xf32> to vector<16x16xbf16>
    %cst_30 = arith.constant dense<0.000000e+00> : vector<16x64xf32>
    %117 = tpu.matmul %116, %103, %cst_30 {dimension_numbers = #tpu.dot_dimension_numbers<[1], [0], [0], [1], [0, 0, 1, 1], [], []>} : vector<16x16xbf16>, vector<16x64xbf16>, vector<16x64xf32> -> vector<16x64xf32>
    %118 = vector.extract_strided_slice %15 {offsets = [0, 320], sizes = [16, 64], strides = [1, 1]} : vector<16x1536xf32> to vector<16x64xf32>
    %119 = arith.truncf %118 : vector<16x64xf32> to vector<16x64xbf16>
    %120 = vector.extract_strided_slice %15 {offsets = [0, 832], sizes = [16, 64], strides = [1, 1]} : vector<16x1536xf32> to vector<16x64xf32>
    %121 = arith.truncf %120 : vector<16x64xf32> to vector<16x64xbf16>
    %122 = vector.extract_strided_slice %15 {offsets = [0, 1344], sizes = [16, 64], strides = [1, 1]} : vector<16x1536xf32> to vector<16x64xf32>
    %123 = arith.truncf %122 : vector<16x64xf32> to vector<16x64xbf16>
    %cst_31 = arith.constant dense<0.000000e+00> : vector<16x16xf32>
    %124 = tpu.matmul %119, %121, %cst_31 {dimension_numbers = #tpu.dot_dimension_numbers<[1], [1], [0], [0], [0, 0, 1, 0], [], []>} : vector<16x64xbf16>, vector<16x64xbf16>, vector<16x16xf32> -> vector<16x16xf32>
    %125 = arith.addf %124, %17 : vector<16x16xf32>
    %cst_32 = arith.constant dense<0xFF800000> : vector<16xf32>
    %126 = vector.multi_reduction <maximumf>, %125, %cst_32 [1] : vector<16x16xf32> to vector<16xf32>
    %127 = vector.shape_cast %126 : vector<16xf32> to vector<16x1xf32>
    %128 = vector.broadcast %127 : vector<16x1xf32> to vector<16x16xf32>
    %129 = arith.subf %125, %128 : vector<16x16xf32>
    %130 = math.exp %129 : vector<16x16xf32>
    %cst_33 = arith.constant dense<0.000000e+00> : vector<16xf32>
    %131 = vector.multi_reduction <add>, %130, %cst_33 [1] : vector<16x16xf32> to vector<16xf32>
    %132 = vector.shape_cast %131 : vector<16xf32> to vector<16x1xf32>
    %133 = tpu.reciprocal %132 {approx = true} : vector<16x1xf32> -> vector<16x1xf32>
    %134 = vector.broadcast %133 : vector<16x1xf32> to vector<16x16xf32>
    %135 = arith.mulf %130, %134 : vector<16x16xf32>
    %136 = arith.truncf %135 : vector<16x16xf32> to vector<16x16xbf16>
    %cst_34 = arith.constant dense<0.000000e+00> : vector<16x64xf32>
    %137 = tpu.matmul %136, %123, %cst_34 {dimension_numbers = #tpu.dot_dimension_numbers<[1], [0], [0], [1], [0, 0, 1, 1], [], []>} : vector<16x16xbf16>, vector<16x64xbf16>, vector<16x64xf32> -> vector<16x64xf32>
    %138 = vector.extract_strided_slice %15 {offsets = [0, 384], sizes = [16, 64], strides = [1, 1]} : vector<16x1536xf32> to vector<16x64xf32>
    %139 = arith.truncf %138 : vector<16x64xf32> to vector<16x64xbf16>
    %140 = vector.extract_strided_slice %15 {offsets = [0, 896], sizes = [16, 64], strides = [1, 1]} : vector<16x1536xf32> to vector<16x64xf32>
    %141 = arith.truncf %140 : vector<16x64xf32> to vector<16x64xbf16>
    %142 = vector.extract_strided_slice %15 {offsets = [0, 1408], sizes = [16, 64], strides = [1, 1]} : vector<16x1536xf32> to vector<16x64xf32>
    %143 = arith.truncf %142 : vector<16x64xf32> to vector<16x64xbf16>
    %cst_35 = arith.constant dense<0.000000e+00> : vector<16x16xf32>
    %144 = tpu.matmul %139, %141, %cst_35 {dimension_numbers = #tpu.dot_dimension_numbers<[1], [1], [0], [0], [0, 0, 1, 0], [], []>} : vector<16x64xbf16>, vector<16x64xbf16>, vector<16x16xf32> -> vector<16x16xf32>
    %145 = arith.addf %144, %17 : vector<16x16xf32>
    %cst_36 = arith.constant dense<0xFF800000> : vector<16xf32>
    %146 = vector.multi_reduction <maximumf>, %145, %cst_36 [1] : vector<16x16xf32> to vector<16xf32>
    %147 = vector.shape_cast %146 : vector<16xf32> to vector<16x1xf32>
    %148 = vector.broadcast %147 : vector<16x1xf32> to vector<16x16xf32>
    %149 = arith.subf %145, %148 : vector<16x16xf32>
    %150 = math.exp %149 : vector<16x16xf32>
    %cst_37 = arith.constant dense<0.000000e+00> : vector<16xf32>
    %151 = vector.multi_reduction <add>, %150, %cst_37 [1] : vector<16x16xf32> to vector<16xf32>
    %152 = vector.shape_cast %151 : vector<16xf32> to vector<16x1xf32>
    %153 = tpu.reciprocal %152 {approx = true} : vector<16x1xf32> -> vector<16x1xf32>
    %154 = vector.broadcast %153 : vector<16x1xf32> to vector<16x16xf32>
    %155 = arith.mulf %150, %154 : vector<16x16xf32>
    %156 = arith.truncf %155 : vector<16x16xf32> to vector<16x16xbf16>
    %cst_38 = arith.constant dense<0.000000e+00> : vector<16x64xf32>
    %157 = tpu.matmul %156, %143, %cst_38 {dimension_numbers = #tpu.dot_dimension_numbers<[1], [0], [0], [1], [0, 0, 1, 1], [], []>} : vector<16x16xbf16>, vector<16x64xbf16>, vector<16x64xf32> -> vector<16x64xf32>
    %158 = vector.extract_strided_slice %15 {offsets = [0, 448], sizes = [16, 64], strides = [1, 1]} : vector<16x1536xf32> to vector<16x64xf32>
    %159 = arith.truncf %158 : vector<16x64xf32> to vector<16x64xbf16>
    %160 = vector.extract_strided_slice %15 {offsets = [0, 960], sizes = [16, 64], strides = [1, 1]} : vector<16x1536xf32> to vector<16x64xf32>
    %161 = arith.truncf %160 : vector<16x64xf32> to vector<16x64xbf16>
    %162 = vector.extract_strided_slice %15 {offsets = [0, 1472], sizes = [16, 64], strides = [1, 1]} : vector<16x1536xf32> to vector<16x64xf32>
    %163 = arith.truncf %162 : vector<16x64xf32> to vector<16x64xbf16>
    %cst_39 = arith.constant dense<0.000000e+00> : vector<16x16xf32>
    %164 = tpu.matmul %159, %161, %cst_39 {dimension_numbers = #tpu.dot_dimension_numbers<[1], [1], [0], [0], [0, 0, 1, 0], [], []>} : vector<16x64xbf16>, vector<16x64xbf16>, vector<16x16xf32> -> vector<16x16xf32>
    %165 = arith.addf %164, %17 : vector<16x16xf32>
    %cst_40 = arith.constant dense<0xFF800000> : vector<16xf32>
    %166 = vector.multi_reduction <maximumf>, %165, %cst_40 [1] : vector<16x16xf32> to vector<16xf32>
    %167 = vector.shape_cast %166 : vector<16xf32> to vector<16x1xf32>
    %168 = vector.broadcast %167 : vector<16x1xf32> to vector<16x16xf32>
    %169 = arith.subf %165, %168 : vector<16x16xf32>
    %170 = math.exp %169 : vector<16x16xf32>
    %cst_41 = arith.constant dense<0.000000e+00> : vector<16xf32>
    %171 = vector.multi_reduction <add>, %170, %cst_41 [1] : vector<16x16xf32> to vector<16xf32>
    %172 = vector.shape_cast %171 : vector<16xf32> to vector<16x1xf32>
    %173 = tpu.reciprocal %172 {approx = true} : vector<16x1xf32> -> vector<16x1xf32>
    %174 = vector.broadcast %173 : vector<16x1xf32> to vector<16x16xf32>
    %175 = arith.mulf %170, %174 : vector<16x16xf32>
    %176 = arith.truncf %175 : vector<16x16xf32> to vector<16x16xbf16>
    %cst_42 = arith.constant dense<0.000000e+00> : vector<16x64xf32>
    %177 = tpu.matmul %176, %163, %cst_42 {dimension_numbers = #tpu.dot_dimension_numbers<[1], [0], [0], [1], [0, 0, 1, 1], [], []>} : vector<16x16xbf16>, vector<16x64xbf16>, vector<16x64xf32> -> vector<16x64xf32>
    %178 = tpu.concatenate %37, %57, %77, %97, %117, %137, %157, %177 in 1 : vector<16x64xf32>, vector<16x64xf32>, vector<16x64xf32>, vector<16x64xf32>, vector<16x64xf32>, vector<16x64xf32>, vector<16x64xf32>, vector<16x64xf32> -> vector<16x512xf32>
    %179 = vector.extract_strided_slice %14 {offsets = [16, 0], sizes = [16, 1536], strides = [1, 1]} : vector<32x1536xf32> to vector<16x1536xf32>
    %c1 = arith.constant 1 : index
    %c0_43 = arith.constant 0 : index
    %c0_44 = arith.constant 0 : index
    %180 = vector.load %arg1[%c1, %c0_43, %c0_44] : memref<2x16x16xf32, #tpu.memory_space<vmem>>, vector<1x16x16xf32>
    %181 = vector.shape_cast %180 : vector<1x16x16xf32> to vector<16x16xf32>
    %182 = vector.extract_strided_slice %179 {offsets = [0, 0], sizes = [16, 64], strides = [1, 1]} : vector<16x1536xf32> to vector<16x64xf32>
    %183 = arith.truncf %182 : vector<16x64xf32> to vector<16x64xbf16>
    %184 = vector.extract_strided_slice %179 {offsets = [0, 512], sizes = [16, 64], strides = [1, 1]} : vector<16x1536xf32> to vector<16x64xf32>
    %185 = arith.truncf %184 : vector<16x64xf32> to vector<16x64xbf16>
    %186 = vector.extract_strided_slice %179 {offsets = [0, 1024], sizes = [16, 64], strides = [1, 1]} : vector<16x1536xf32> to vector<16x64xf32>
    %187 = arith.truncf %186 : vector<16x64xf32> to vector<16x64xbf16>
    %cst_45 = arith.constant dense<0.000000e+00> : vector<16x16xf32>
    %188 = tpu.matmul %183, %185, %cst_45 {dimension_numbers = #tpu.dot_dimension_numbers<[1], [1], [0], [0], [0, 0, 1, 0], [], []>} : vector<16x64xbf16>, vector<16x64xbf16>, vector<16x16xf32> -> vector<16x16xf32>
    %189 = arith.addf %188, %181 : vector<16x16xf32>
    %cst_46 = arith.constant dense<0xFF800000> : vector<16xf32>
    %190 = vector.multi_reduction <maximumf>, %189, %cst_46 [1] : vector<16x16xf32> to vector<16xf32>
    %191 = vector.shape_cast %190 : vector<16xf32> to vector<16x1xf32>
    %192 = vector.broadcast %191 : vector<16x1xf32> to vector<16x16xf32>
    %193 = arith.subf %189, %192 : vector<16x16xf32>
    %194 = math.exp %193 : vector<16x16xf32>
    %cst_47 = arith.constant dense<0.000000e+00> : vector<16xf32>
    %195 = vector.multi_reduction <add>, %194, %cst_47 [1] : vector<16x16xf32> to vector<16xf32>
    %196 = vector.shape_cast %195 : vector<16xf32> to vector<16x1xf32>
    %197 = tpu.reciprocal %196 {approx = true} : vector<16x1xf32> -> vector<16x1xf32>
    %198 = vector.broadcast %197 : vector<16x1xf32> to vector<16x16xf32>
    %199 = arith.mulf %194, %198 : vector<16x16xf32>
    %200 = arith.truncf %199 : vector<16x16xf32> to vector<16x16xbf16>
    %cst_48 = arith.constant dense<0.000000e+00> : vector<16x64xf32>
    %201 = tpu.matmul %200, %187, %cst_48 {dimension_numbers = #tpu.dot_dimension_numbers<[1], [0], [0], [1], [0, 0, 1, 1], [], []>} : vector<16x16xbf16>, vector<16x64xbf16>, vector<16x64xf32> -> vector<16x64xf32>
    %202 = vector.extract_strided_slice %179 {offsets = [0, 64], sizes = [16, 64], strides = [1, 1]} : vector<16x1536xf32> to vector<16x64xf32>
    %203 = arith.truncf %202 : vector<16x64xf32> to vector<16x64xbf16>
    %204 = vector.extract_strided_slice %179 {offsets = [0, 576], sizes = [16, 64], strides = [1, 1]} : vector<16x1536xf32> to vector<16x64xf32>
    %205 = arith.truncf %204 : vector<16x64xf32> to vector<16x64xbf16>
    %206 = vector.extract_strided_slice %179 {offsets = [0, 1088], sizes = [16, 64], strides = [1, 1]} : vector<16x1536xf32> to vector<16x64xf32>
    %207 = arith.truncf %206 : vector<16x64xf32> to vector<16x64xbf16>
    %cst_49 = arith.constant dense<0.000000e+00> : vector<16x16xf32>
    %208 = tpu.matmul %203, %205, %cst_49 {dimension_numbers = #tpu.dot_dimension_numbers<[1], [1], [0], [0], [0, 0, 1, 0], [], []>} : vector<16x64xbf16>, vector<16x64xbf16>, vector<16x16xf32> -> vector<16x16xf32>
    %209 = arith.addf %208, %181 : vector<16x16xf32>
    %cst_50 = arith.constant dense<0xFF800000> : vector<16xf32>
    %210 = vector.multi_reduction <maximumf>, %209, %cst_50 [1] : vector<16x16xf32> to vector<16xf32>
    %211 = vector.shape_cast %210 : vector<16xf32> to vector<16x1xf32>
    %212 = vector.broadcast %211 : vector<16x1xf32> to vector<16x16xf32>
    %213 = arith.subf %209, %212 : vector<16x16xf32>
    %214 = math.exp %213 : vector<16x16xf32>
    %cst_51 = arith.constant dense<0.000000e+00> : vector<16xf32>
    %215 = vector.multi_reduction <add>, %214, %cst_51 [1] : vector<16x16xf32> to vector<16xf32>
    %216 = vector.shape_cast %215 : vector<16xf32> to vector<16x1xf32>
    %217 = tpu.reciprocal %216 {approx = true} : vector<16x1xf32> -> vector<16x1xf32>
    %218 = vector.broadcast %217 : vector<16x1xf32> to vector<16x16xf32>
    %219 = arith.mulf %214, %218 : vector<16x16xf32>
    %220 = arith.truncf %219 : vector<16x16xf32> to vector<16x16xbf16>
    %cst_52 = arith.constant dense<0.000000e+00> : vector<16x64xf32>
    %221 = tpu.matmul %220, %207, %cst_52 {dimension_numbers = #tpu.dot_dimension_numbers<[1], [0], [0], [1], [0, 0, 1, 1], [], []>} : vector<16x16xbf16>, vector<16x64xbf16>, vector<16x64xf32> -> vector<16x64xf32>
    %222 = vector.extract_strided_slice %179 {offsets = [0, 128], sizes = [16, 64], strides = [1, 1]} : vector<16x1536xf32> to vector<16x64xf32>
    %223 = arith.truncf %222 : vector<16x64xf32> to vector<16x64xbf16>
    %224 = vector.extract_strided_slice %179 {offsets = [0, 640], sizes = [16, 64], strides = [1, 1]} : vector<16x1536xf32> to vector<16x64xf32>
    %225 = arith.truncf %224 : vector<16x64xf32> to vector<16x64xbf16>
    %226 = vector.extract_strided_slice %179 {offsets = [0, 1152], sizes = [16, 64], strides = [1, 1]} : vector<16x1536xf32> to vector<16x64xf32>
    %227 = arith.truncf %226 : vector<16x64xf32> to vector<16x64xbf16>
    %cst_53 = arith.constant dense<0.000000e+00> : vector<16x16xf32>
    %228 = tpu.matmul %223, %225, %cst_53 {dimension_numbers = #tpu.dot_dimension_numbers<[1], [1], [0], [0], [0, 0, 1, 0], [], []>} : vector<16x64xbf16>, vector<16x64xbf16>, vector<16x16xf32> -> vector<16x16xf32>
    %229 = arith.addf %228, %181 : vector<16x16xf32>
    %cst_54 = arith.constant dense<0xFF800000> : vector<16xf32>
    %230 = vector.multi_reduction <maximumf>, %229, %cst_54 [1] : vector<16x16xf32> to vector<16xf32>
    %231 = vector.shape_cast %230 : vector<16xf32> to vector<16x1xf32>
    %232 = vector.broadcast %231 : vector<16x1xf32> to vector<16x16xf32>
    %233 = arith.subf %229, %232 : vector<16x16xf32>
    %234 = math.exp %233 : vector<16x16xf32>
    %cst_55 = arith.constant dense<0.000000e+00> : vector<16xf32>
    %235 = vector.multi_reduction <add>, %234, %cst_55 [1] : vector<16x16xf32> to vector<16xf32>
    %236 = vector.shape_cast %235 : vector<16xf32> to vector<16x1xf32>
    %237 = tpu.reciprocal %236 {approx = true} : vector<16x1xf32> -> vector<16x1xf32>
    %238 = vector.broadcast %237 : vector<16x1xf32> to vector<16x16xf32>
    %239 = arith.mulf %234, %238 : vector<16x16xf32>
    %240 = arith.truncf %239 : vector<16x16xf32> to vector<16x16xbf16>
    %cst_56 = arith.constant dense<0.000000e+00> : vector<16x64xf32>
    %241 = tpu.matmul %240, %227, %cst_56 {dimension_numbers = #tpu.dot_dimension_numbers<[1], [0], [0], [1], [0, 0, 1, 1], [], []>} : vector<16x16xbf16>, vector<16x64xbf16>, vector<16x64xf32> -> vector<16x64xf32>
    %242 = vector.extract_strided_slice %179 {offsets = [0, 192], sizes = [16, 64], strides = [1, 1]} : vector<16x1536xf32> to vector<16x64xf32>
    %243 = arith.truncf %242 : vector<16x64xf32> to vector<16x64xbf16>
    %244 = vector.extract_strided_slice %179 {offsets = [0, 704], sizes = [16, 64], strides = [1, 1]} : vector<16x1536xf32> to vector<16x64xf32>
    %245 = arith.truncf %244 : vector<16x64xf32> to vector<16x64xbf16>
    %246 = vector.extract_strided_slice %179 {offsets = [0, 1216], sizes = [16, 64], strides = [1, 1]} : vector<16x1536xf32> to vector<16x64xf32>
    %247 = arith.truncf %246 : vector<16x64xf32> to vector<16x64xbf16>
    %cst_57 = arith.constant dense<0.000000e+00> : vector<16x16xf32>
    %248 = tpu.matmul %243, %245, %cst_57 {dimension_numbers = #tpu.dot_dimension_numbers<[1], [1], [0], [0], [0, 0, 1, 0], [], []>} : vector<16x64xbf16>, vector<16x64xbf16>, vector<16x16xf32> -> vector<16x16xf32>
    %249 = arith.addf %248, %181 : vector<16x16xf32>
    %cst_58 = arith.constant dense<0xFF800000> : vector<16xf32>
    %250 = vector.multi_reduction <maximumf>, %249, %cst_58 [1] : vector<16x16xf32> to vector<16xf32>
    %251 = vector.shape_cast %250 : vector<16xf32> to vector<16x1xf32>
    %252 = vector.broadcast %251 : vector<16x1xf32> to vector<16x16xf32>
    %253 = arith.subf %249, %252 : vector<16x16xf32>
    %254 = math.exp %253 : vector<16x16xf32>
    %cst_59 = arith.constant dense<0.000000e+00> : vector<16xf32>
    %255 = vector.multi_reduction <add>, %254, %cst_59 [1] : vector<16x16xf32> to vector<16xf32>
    %256 = vector.shape_cast %255 : vector<16xf32> to vector<16x1xf32>
    %257 = tpu.reciprocal %256 {approx = true} : vector<16x1xf32> -> vector<16x1xf32>
    %258 = vector.broadcast %257 : vector<16x1xf32> to vector<16x16xf32>
    %259 = arith.mulf %254, %258 : vector<16x16xf32>
    %260 = arith.truncf %259 : vector<16x16xf32> to vector<16x16xbf16>
    %cst_60 = arith.constant dense<0.000000e+00> : vector<16x64xf32>
    %261 = tpu.matmul %260, %247, %cst_60 {dimension_numbers = #tpu.dot_dimension_numbers<[1], [0], [0], [1], [0, 0, 1, 1], [], []>} : vector<16x16xbf16>, vector<16x64xbf16>, vector<16x64xf32> -> vector<16x64xf32>
    %262 = vector.extract_strided_slice %179 {offsets = [0, 256], sizes = [16, 64], strides = [1, 1]} : vector<16x1536xf32> to vector<16x64xf32>
    %263 = arith.truncf %262 : vector<16x64xf32> to vector<16x64xbf16>
    %264 = vector.extract_strided_slice %179 {offsets = [0, 768], sizes = [16, 64], strides = [1, 1]} : vector<16x1536xf32> to vector<16x64xf32>
    %265 = arith.truncf %264 : vector<16x64xf32> to vector<16x64xbf16>
    %266 = vector.extract_strided_slice %179 {offsets = [0, 1280], sizes = [16, 64], strides = [1, 1]} : vector<16x1536xf32> to vector<16x64xf32>
    %267 = arith.truncf %266 : vector<16x64xf32> to vector<16x64xbf16>
    %cst_61 = arith.constant dense<0.000000e+00> : vector<16x16xf32>
    %268 = tpu.matmul %263, %265, %cst_61 {dimension_numbers = #tpu.dot_dimension_numbers<[1], [1], [0], [0], [0, 0, 1, 0], [], []>} : vector<16x64xbf16>, vector<16x64xbf16>, vector<16x16xf32> -> vector<16x16xf32>
    %269 = arith.addf %268, %181 : vector<16x16xf32>
    %cst_62 = arith.constant dense<0xFF800000> : vector<16xf32>
    %270 = vector.multi_reduction <maximumf>, %269, %cst_62 [1] : vector<16x16xf32> to vector<16xf32>
    %271 = vector.shape_cast %270 : vector<16xf32> to vector<16x1xf32>
    %272 = vector.broadcast %271 : vector<16x1xf32> to vector<16x16xf32>
    %273 = arith.subf %269, %272 : vector<16x16xf32>
    %274 = math.exp %273 : vector<16x16xf32>
    %cst_63 = arith.constant dense<0.000000e+00> : vector<16xf32>
    %275 = vector.multi_reduction <add>, %274, %cst_63 [1] : vector<16x16xf32> to vector<16xf32>
    %276 = vector.shape_cast %275 : vector<16xf32> to vector<16x1xf32>
    %277 = tpu.reciprocal %276 {approx = true} : vector<16x1xf32> -> vector<16x1xf32>
    %278 = vector.broadcast %277 : vector<16x1xf32> to vector<16x16xf32>
    %279 = arith.mulf %274, %278 : vector<16x16xf32>
    %280 = arith.truncf %279 : vector<16x16xf32> to vector<16x16xbf16>
    %cst_64 = arith.constant dense<0.000000e+00> : vector<16x64xf32>
    %281 = tpu.matmul %280, %267, %cst_64 {dimension_numbers = #tpu.dot_dimension_numbers<[1], [0], [0], [1], [0, 0, 1, 1], [], []>} : vector<16x16xbf16>, vector<16x64xbf16>, vector<16x64xf32> -> vector<16x64xf32>
    %282 = vector.extract_strided_slice %179 {offsets = [0, 320], sizes = [16, 64], strides = [1, 1]} : vector<16x1536xf32> to vector<16x64xf32>
    %283 = arith.truncf %282 : vector<16x64xf32> to vector<16x64xbf16>
    %284 = vector.extract_strided_slice %179 {offsets = [0, 832], sizes = [16, 64], strides = [1, 1]} : vector<16x1536xf32> to vector<16x64xf32>
    %285 = arith.truncf %284 : vector<16x64xf32> to vector<16x64xbf16>
    %286 = vector.extract_strided_slice %179 {offsets = [0, 1344], sizes = [16, 64], strides = [1, 1]} : vector<16x1536xf32> to vector<16x64xf32>
    %287 = arith.truncf %286 : vector<16x64xf32> to vector<16x64xbf16>
    %cst_65 = arith.constant dense<0.000000e+00> : vector<16x16xf32>
    %288 = tpu.matmul %283, %285, %cst_65 {dimension_numbers = #tpu.dot_dimension_numbers<[1], [1], [0], [0], [0, 0, 1, 0], [], []>} : vector<16x64xbf16>, vector<16x64xbf16>, vector<16x16xf32> -> vector<16x16xf32>
    %289 = arith.addf %288, %181 : vector<16x16xf32>
    %cst_66 = arith.constant dense<0xFF800000> : vector<16xf32>
    %290 = vector.multi_reduction <maximumf>, %289, %cst_66 [1] : vector<16x16xf32> to vector<16xf32>
    %291 = vector.shape_cast %290 : vector<16xf32> to vector<16x1xf32>
    %292 = vector.broadcast %291 : vector<16x1xf32> to vector<16x16xf32>
    %293 = arith.subf %289, %292 : vector<16x16xf32>
    %294 = math.exp %293 : vector<16x16xf32>
    %cst_67 = arith.constant dense<0.000000e+00> : vector<16xf32>
    %295 = vector.multi_reduction <add>, %294, %cst_67 [1] : vector<16x16xf32> to vector<16xf32>
    %296 = vector.shape_cast %295 : vector<16xf32> to vector<16x1xf32>
    %297 = tpu.reciprocal %296 {approx = true} : vector<16x1xf32> -> vector<16x1xf32>
    %298 = vector.broadcast %297 : vector<16x1xf32> to vector<16x16xf32>
    %299 = arith.mulf %294, %298 : vector<16x16xf32>
    %300 = arith.truncf %299 : vector<16x16xf32> to vector<16x16xbf16>
    %cst_68 = arith.constant dense<0.000000e+00> : vector<16x64xf32>
    %301 = tpu.matmul %300, %287, %cst_68 {dimension_numbers = #tpu.dot_dimension_numbers<[1], [0], [0], [1], [0, 0, 1, 1], [], []>} : vector<16x16xbf16>, vector<16x64xbf16>, vector<16x64xf32> -> vector<16x64xf32>
    %302 = vector.extract_strided_slice %179 {offsets = [0, 384], sizes = [16, 64], strides = [1, 1]} : vector<16x1536xf32> to vector<16x64xf32>
    %303 = arith.truncf %302 : vector<16x64xf32> to vector<16x64xbf16>
    %304 = vector.extract_strided_slice %179 {offsets = [0, 896], sizes = [16, 64], strides = [1, 1]} : vector<16x1536xf32> to vector<16x64xf32>
    %305 = arith.truncf %304 : vector<16x64xf32> to vector<16x64xbf16>
    %306 = vector.extract_strided_slice %179 {offsets = [0, 1408], sizes = [16, 64], strides = [1, 1]} : vector<16x1536xf32> to vector<16x64xf32>
    %307 = arith.truncf %306 : vector<16x64xf32> to vector<16x64xbf16>
    %cst_69 = arith.constant dense<0.000000e+00> : vector<16x16xf32>
    %308 = tpu.matmul %303, %305, %cst_69 {dimension_numbers = #tpu.dot_dimension_numbers<[1], [1], [0], [0], [0, 0, 1, 0], [], []>} : vector<16x64xbf16>, vector<16x64xbf16>, vector<16x16xf32> -> vector<16x16xf32>
    %309 = arith.addf %308, %181 : vector<16x16xf32>
    %cst_70 = arith.constant dense<0xFF800000> : vector<16xf32>
    %310 = vector.multi_reduction <maximumf>, %309, %cst_70 [1] : vector<16x16xf32> to vector<16xf32>
    %311 = vector.shape_cast %310 : vector<16xf32> to vector<16x1xf32>
    %312 = vector.broadcast %311 : vector<16x1xf32> to vector<16x16xf32>
    %313 = arith.subf %309, %312 : vector<16x16xf32>
    %314 = math.exp %313 : vector<16x16xf32>
    %cst_71 = arith.constant dense<0.000000e+00> : vector<16xf32>
    %315 = vector.multi_reduction <add>, %314, %cst_71 [1] : vector<16x16xf32> to vector<16xf32>
    %316 = vector.shape_cast %315 : vector<16xf32> to vector<16x1xf32>
    %317 = tpu.reciprocal %316 {approx = true} : vector<16x1xf32> -> vector<16x1xf32>
    %318 = vector.broadcast %317 : vector<16x1xf32> to vector<16x16xf32>
    %319 = arith.mulf %314, %318 : vector<16x16xf32>
    %320 = arith.truncf %319 : vector<16x16xf32> to vector<16x16xbf16>
    %cst_72 = arith.constant dense<0.000000e+00> : vector<16x64xf32>
    %321 = tpu.matmul %320, %307, %cst_72 {dimension_numbers = #tpu.dot_dimension_numbers<[1], [0], [0], [1], [0, 0, 1, 1], [], []>} : vector<16x16xbf16>, vector<16x64xbf16>, vector<16x64xf32> -> vector<16x64xf32>
    %322 = vector.extract_strided_slice %179 {offsets = [0, 448], sizes = [16, 64], strides = [1, 1]} : vector<16x1536xf32> to vector<16x64xf32>
    %323 = arith.truncf %322 : vector<16x64xf32> to vector<16x64xbf16>
    %324 = vector.extract_strided_slice %179 {offsets = [0, 960], sizes = [16, 64], strides = [1, 1]} : vector<16x1536xf32> to vector<16x64xf32>
    %325 = arith.truncf %324 : vector<16x64xf32> to vector<16x64xbf16>
    %326 = vector.extract_strided_slice %179 {offsets = [0, 1472], sizes = [16, 64], strides = [1, 1]} : vector<16x1536xf32> to vector<16x64xf32>
    %327 = arith.truncf %326 : vector<16x64xf32> to vector<16x64xbf16>
    %cst_73 = arith.constant dense<0.000000e+00> : vector<16x16xf32>
    %328 = tpu.matmul %323, %325, %cst_73 {dimension_numbers = #tpu.dot_dimension_numbers<[1], [1], [0], [0], [0, 0, 1, 0], [], []>} : vector<16x64xbf16>, vector<16x64xbf16>, vector<16x16xf32> -> vector<16x16xf32>
    %329 = arith.addf %328, %181 : vector<16x16xf32>
    %cst_74 = arith.constant dense<0xFF800000> : vector<16xf32>
    %330 = vector.multi_reduction <maximumf>, %329, %cst_74 [1] : vector<16x16xf32> to vector<16xf32>
    %331 = vector.shape_cast %330 : vector<16xf32> to vector<16x1xf32>
    %332 = vector.broadcast %331 : vector<16x1xf32> to vector<16x16xf32>
    %333 = arith.subf %329, %332 : vector<16x16xf32>
    %334 = math.exp %333 : vector<16x16xf32>
    %cst_75 = arith.constant dense<0.000000e+00> : vector<16xf32>
    %335 = vector.multi_reduction <add>, %334, %cst_75 [1] : vector<16x16xf32> to vector<16xf32>
    %336 = vector.shape_cast %335 : vector<16xf32> to vector<16x1xf32>
    %337 = tpu.reciprocal %336 {approx = true} : vector<16x1xf32> -> vector<16x1xf32>
    %338 = vector.broadcast %337 : vector<16x1xf32> to vector<16x16xf32>
    %339 = arith.mulf %334, %338 : vector<16x16xf32>
    %340 = arith.truncf %339 : vector<16x16xf32> to vector<16x16xbf16>
    %cst_76 = arith.constant dense<0.000000e+00> : vector<16x64xf32>
    %341 = tpu.matmul %340, %327, %cst_76 {dimension_numbers = #tpu.dot_dimension_numbers<[1], [0], [0], [1], [0, 0, 1, 1], [], []>} : vector<16x16xbf16>, vector<16x64xbf16>, vector<16x64xf32> -> vector<16x64xf32>
    %342 = tpu.concatenate %201, %221, %241, %261, %281, %301, %321, %341 in 1 : vector<16x64xf32>, vector<16x64xf32>, vector<16x64xf32>, vector<16x64xf32>, vector<16x64xf32>, vector<16x64xf32>, vector<16x64xf32>, vector<16x64xf32> -> vector<16x512xf32>
    %343 = tpu.concatenate %178, %342 in 0 : vector<16x512xf32>, vector<16x512xf32> -> vector<32x512xf32>
    %344 = arith.truncf %343 : vector<32x512xf32> to vector<32x512xbf16>
    %c0_77 = arith.constant 0 : index
    %c0_78 = arith.constant 0 : index
    %345 = vector.load %arg4[%c0_77, %c0_78] : memref<512x512xbf16, #tpu.memory_space<vmem>>, vector<512x512xbf16>
    %cst_79 = arith.constant dense<0.000000e+00> : vector<32x512xf32>
    %346 = tpu.matmul %344, %345, %cst_79 {dimension_numbers = #tpu.dot_dimension_numbers<[1], [0], [0], [1], [0, 0, 1, 1], [], []>} : vector<32x512xbf16>, vector<512x512xbf16>, vector<32x512xf32> -> vector<32x512xf32>
    %347 = vector.broadcast %4 : vector<1x512xf32> to vector<32x512xf32>
    %348 = arith.addf %346, %347 : vector<32x512xf32>
    %349 = arith.addf %1, %348 : vector<32x512xf32>
    %cst_80 = arith.constant dense<0.000000e+00> : vector<32xf32>
    %350 = vector.multi_reduction <add>, %349, %cst_80 [1] : vector<32x512xf32> to vector<32xf32>
    %351 = vector.shape_cast %350 : vector<32xf32> to vector<32x1xf32>
    %cst_81 = arith.constant 5.120000e+02 : f32
    %352 = vector.broadcast %cst_81 : f32 to vector<32x1xf32>
    %353 = arith.divf %351, %352 : vector<32x1xf32>
    %354 = vector.broadcast %353 : vector<32x1xf32> to vector<32x512xf32>
    %355 = arith.subf %349, %354 : vector<32x512xf32>
    %356 = arith.mulf %355, %355 : vector<32x512xf32>
    %cst_82 = arith.constant dense<0.000000e+00> : vector<32xf32>
    %357 = vector.multi_reduction <add>, %356, %cst_82 [1] : vector<32x512xf32> to vector<32xf32>
    %358 = vector.shape_cast %357 : vector<32xf32> to vector<32x1xf32>
    %cst_83 = arith.constant 5.120000e+02 : f32
    %359 = vector.broadcast %cst_83 : f32 to vector<32x1xf32>
    %360 = arith.divf %358, %359 : vector<32x1xf32>
    %361 = vector.broadcast %353 : vector<32x1xf32> to vector<32x512xf32>
    %362 = arith.subf %349, %361 : vector<32x512xf32>
    %cst_84 = arith.constant 9.99999974E-6 : f32
    %363 = vector.broadcast %cst_84 : f32 to vector<32x1xf32>
    %364 = arith.addf %360, %363 : vector<32x1xf32>
    %365 = math.rsqrt %364 : vector<32x1xf32>
    %366 = vector.broadcast %365 : vector<32x1xf32> to vector<32x512xf32>
    %367 = arith.mulf %362, %366 : vector<32x512xf32>
    %368 = vector.broadcast %5 : vector<1x512xf32> to vector<32x512xf32>
    %369 = arith.mulf %367, %368 : vector<32x512xf32>
    %370 = vector.broadcast %6 : vector<1x512xf32> to vector<32x512xf32>
    %371 = arith.addf %369, %370 : vector<32x512xf32>
    %372 = arith.truncf %371 : vector<32x512xf32> to vector<32x512xbf16>
    %c0_85 = arith.constant 0 : index
    %c0_86 = arith.constant 0 : index
    %373 = vector.load %arg5[%c0_85, %c0_86] : memref<512x2048xbf16, #tpu.memory_space<vmem>>, vector<512x2048xbf16>
    %cst_87 = arith.constant dense<0.000000e+00> : vector<32x2048xf32>
    %374 = tpu.matmul %372, %373, %cst_87 {dimension_numbers = #tpu.dot_dimension_numbers<[1], [0], [0], [1], [0, 0, 1, 1], [], []>} : vector<32x512xbf16>, vector<512x2048xbf16>, vector<32x2048xf32> -> vector<32x2048xf32>
    %c0_88 = arith.constant 0 : index
    %c0_89 = arith.constant 0 : index
    %375 = vector.load %arg6[%c0_88, %c0_89] : memref<1x2048xf32, #tpu.memory_space<vmem>>, vector<1x2048xf32>
    %376 = vector.broadcast %375 : vector<1x2048xf32> to vector<32x2048xf32>
    %377 = arith.addf %374, %376 : vector<32x2048xf32>
    %cst_90 = arith.constant 0.000000e+00 : f32
    %378 = vector.broadcast %cst_90 : f32 to vector<32x2048xf32>
    %379 = arith.maximumf %377, %378 : vector<32x2048xf32>
    %380 = arith.truncf %379 : vector<32x2048xf32> to vector<32x2048xbf16>
    %c0_91 = arith.constant 0 : index
    %c0_92 = arith.constant 0 : index
    %381 = vector.load %arg7[%c0_91, %c0_92] : memref<2048x512xbf16, #tpu.memory_space<vmem>>, vector<2048x512xbf16>
    %cst_93 = arith.constant dense<0.000000e+00> : vector<32x512xf32>
    %382 = tpu.matmul %380, %381, %cst_93 {dimension_numbers = #tpu.dot_dimension_numbers<[1], [0], [0], [1], [0, 0, 1, 1], [], []>} : vector<32x2048xbf16>, vector<2048x512xbf16>, vector<32x512xf32> -> vector<32x512xf32>
    %383 = vector.broadcast %7 : vector<1x512xf32> to vector<32x512xf32>
    %384 = arith.addf %382, %383 : vector<32x512xf32>
    %385 = arith.addf %371, %384 : vector<32x512xf32>
    %cst_94 = arith.constant dense<0.000000e+00> : vector<32xf32>
    %386 = vector.multi_reduction <add>, %385, %cst_94 [1] : vector<32x512xf32> to vector<32xf32>
    %387 = vector.shape_cast %386 : vector<32xf32> to vector<32x1xf32>
    %cst_95 = arith.constant 5.120000e+02 : f32
    %388 = vector.broadcast %cst_95 : f32 to vector<32x1xf32>
    %389 = arith.divf %387, %388 : vector<32x1xf32>
    %390 = vector.broadcast %389 : vector<32x1xf32> to vector<32x512xf32>
    %391 = arith.subf %385, %390 : vector<32x512xf32>
    %392 = arith.mulf %391, %391 : vector<32x512xf32>
    %cst_96 = arith.constant dense<0.000000e+00> : vector<32xf32>
    %393 = vector.multi_reduction <add>, %392, %cst_96 [1] : vector<32x512xf32> to vector<32xf32>
    %394 = vector.shape_cast %393 : vector<32xf32> to vector<32x1xf32>
    %cst_97 = arith.constant 5.120000e+02 : f32
    %395 = vector.broadcast %cst_97 : f32 to vector<32x1xf32>
    %396 = arith.divf %394, %395 : vector<32x1xf32>
    %397 = vector.broadcast %389 : vector<32x1xf32> to vector<32x512xf32>
    %398 = arith.subf %385, %397 : vector<32x512xf32>
    %cst_98 = arith.constant 9.99999974E-6 : f32
    %399 = vector.broadcast %cst_98 : f32 to vector<32x1xf32>
    %400 = arith.addf %396, %399 : vector<32x1xf32>
    %401 = math.rsqrt %400 : vector<32x1xf32>
    %402 = vector.broadcast %401 : vector<32x1xf32> to vector<32x512xf32>
    %403 = arith.mulf %398, %402 : vector<32x512xf32>
    %404 = vector.broadcast %8 : vector<1x512xf32> to vector<32x512xf32>
    %405 = arith.mulf %403, %404 : vector<32x512xf32>
    %406 = vector.broadcast %9 : vector<1x512xf32> to vector<32x512xf32>
    %407 = arith.addf %405, %406 : vector<32x512xf32>
    %408 = vector.shape_cast %407 : vector<32x512xf32> to vector<2x16x512xf32>
    %c0_99 = arith.constant 0 : index
    %c0_100 = arith.constant 0 : index
    %c0_101 = arith.constant 0 : index
    %409 = vector.load %arg9[%c0_99, %c0_100, %c0_101] : memref<2x16x512xf32, #tpu.memory_space<vmem>>, vector<2x16x512xf32>
    tpu.vector_store %arg9[%c0_99, %c0_100, %c0_101], %408 {strides = array<i32>} : memref<2x16x512xf32, #tpu.memory_space<vmem>>, vector<2x16x512xf32>,
    return
  }
}

</mosaic_0001>

<bundles_post_ra>
// kernel: tpu_custom_call.1
= control target key start
LH: loop header
LB: loop body
LE: loop exit
PB: predicated region body
PF: predicated region fallthrough
CT: control target
= control target key end

     0   :  { %14 = vsyncpa [#allocation3], 0  ;;  %s20649_s0 = inlined_call_operand.hbm [shape: f32[2,16,512], index: 0, kind: input, shape index: {}]   ;;  %s20650_s1 = inlined_call_operand.hbm [shape: f32[2,16,16], index: 1, kind: input, shape index: {}]   ;;  %s20651_s2 = inlined_call_operand.hbm [shape: bf16[512,1536], index: 2, kind: input, shape index: {}]   ;;  %s20652_s3 = inlined_call_operand.hbm [shape: f32[1,1536], index: 3, kind: input, shape index: {}]   ;;  %s20653_s4 = inlined_call_operand.hbm [shape: bf16[512,512], index: 4, kind: input, shape index: {}]   ;;  %s20654_s5 = inlined_call_operand.hbm [shape: bf16[512,2048], index: 5, kind: input, shape index: {}]   ;;  %s20655_s6 = inlined_call_operand.hbm [shape: f32[1,2048], index: 6, kind: input, shape index: {}]   ;;  %s20656_s7 = inlined_call_operand.hbm [shape: bf16[2048,512], index: 7, kind: input, shape index: {}]   ;;  %s20657_s8 = inlined_call_operand.hbm [shape: f32[8,512], index: 8, kind: input, shape index: {}]   ;;  %s20658_s9 = inlined_call_operand.hbm [shape: f32[2,16,512], index: 9, kind: output, shape index: {}]  }
   0x1   :  { %15 = vsyncpa [#allocation6], 0 }
   0x2   :  { %16 = vsyncpa [#allocation9], 0 }
   0x3   :  { %17 = vsyncpa [#allocation12], 0 }
   0x4   :  { %18 = vsyncpa [#allocation15], 0 }
   0x5   :  { %19 = vsyncpa [#allocation4], 0  ;;  %s18855_s30 = smov [#allocation5]   ;;  %s18623_s13 = scalar_lea.hbm %s20650_s1, 512 }
   0x6   :  { %s37_s10 = sshll.u32 %s18855_s30, 4  ;;  %p18624_p0 = scmp.ne.s32.totalorder %s20650_s1, %s18623_s13  ;;  %s38_s10 = int_to_ptr.vmem [resolvable:$true] %s37_s10 }
   0x7   :  { %p18627_p1 = scmp.lt.u32.totalorder %s18623_s13, %s20650_s1 }
   0x9   :  { %p18629_p2 = pnand %p18627_p1, %p18624_p0 }
   0xb   :  { %18632 = shalt.err (!%p18629_p2)
}
   0xc   :  { %s18633_s18 = scalar_lea.vmem %s38_s10, 512  ;;  %p18638_p4 = scmp.lt.s32.totalorder %s38_s10, %s38_s10 }
   0xd   :  { %p18634_p3 = scmp.ne.s32.totalorder %s38_s10, %s18633_s18  ;;  %p18639_p5 = scmp.lt.s32.totalorder %s18633_s18, %s18633_s18 }
   0xf   :  { %p18640_p6 = por %p18639_p5, %p18638_p4 }
  0x11   :  { %p18641_p7 = pnand %p18640_p6, %p18634_p3 }
  0x13   :  { %18644 = shalt.err (!%p18641_p7)
}
  0x14   :  { %s18856_s19 = smov 128   ;;  %s18857_s20 = smov 8  }
  0x15   :  { %43 = dma.hbm_to_vmem [thread:$0]  %s20650_s1, 512, %s38_s10, [#allocation6], %s18856_s19, %s18856_s19, %s18857_s20  }
  0x16   :  { %s18858_s23 = smov [#allocation8]   ;;  %s18859_s25 = smov [#allocation11]  }
  0x17   :  { %s62_s24 = sshll.u32 %s18858_s23, 4  ;;  %s83_s26 = sshll.u32 %s18859_s25, 4  ;;  %s63_s24 = int_to_ptr.vmem [resolvable:$true] %s62_s24  ;;  %s84_s26 = int_to_ptr.vmem [resolvable:$true] %s83_s26 }
  0x18   :  { %s18645_s29 = scalar_lea.hbm %s20652_s3, 192 }
  0x19   :  { %p18646_p8 = scmp.ne.s32.totalorder %s20652_s3, %s18645_s29  ;;  %p18649_p9 = scmp.lt.u32.totalorder %s18645_s29, %s20652_s3 }
  0x1b   :  { %p18651_p10 = pnand %p18649_p9, %p18646_p8 }
  0x1d   :  { %18654 = shalt.err (!%p18651_p10)
}
  0x1e   :  { %s18655_s1 = scalar_lea.vmem %s63_s24, 192  ;;  %p18660_p12 = scmp.lt.s32.totalorder %s63_s24, %s63_s24 }
  0x1f   :  { %p18656_p11 = scmp.ne.s32.totalorder %s63_s24, %s18655_s1  ;;  %p18661_p13 = scmp.lt.s32.totalorder %s18655_s1, %s18655_s1 }
  0x21   :  { %p18662_p0 = por %p18661_p13, %p18660_p12 }
  0x23   :  { %p18663_p1 = pnand %p18662_p0, %p18656_p11 }
  0x25   :  { %18666 = shalt.err (!%p18663_p1)
}
  0x26   :  { %65 = dma.hbm_to_vmem [thread:$0]  %s20652_s3, 192, %s63_s24, [#allocation9]  }
  0x27   :  { %s18667_s17 = scalar_lea.hbm %s20654_s5, 65536 }
  0x28   :  { %p18668_p2 = scmp.ne.s32.totalorder %s20654_s5, %s18667_s17  ;;  %p18671_p3 = scmp.lt.u32.totalorder %s18667_s17, %s20654_s5 }
  0x2a   :  { %p18673_p4 = pnand %p18671_p3, %p18668_p2 }
  0x2c   :  { %18676 = shalt.err (!%p18673_p4)
}
  0x2d   :  { %s18677_s22 = scalar_lea.vmem %s84_s26, 65536  ;;  %p18682_p6 = scmp.lt.s32.totalorder %s84_s26, %s84_s26 }
  0x2e   :  { %p18678_p5 = scmp.ne.s32.totalorder %s84_s26, %s18677_s22  ;;  %p18683_p7 = scmp.lt.s32.totalorder %s18677_s22, %s18677_s22 }
  0x30   :  { %p18684_p8 = por %p18683_p7, %p18682_p6 }
  0x32   :  { %p18685_p9 = pnand %p18684_p8, %p18678_p5 }
  0x34   :  { %18688 = shalt.err (!%p18685_p9)
}
  0x35   :  { %s18860_s3 = smov 1024   ;;  %s18861_s23 = smov 64  }
  0x36   :  { %89 = dma.hbm_to_vmem [thread:$0]  %s20654_s5, 65536, %s84_s26, [#allocation12], %s18860_s3, %s18860_s3, %s18861_s23  }
  0x37   :  { %s18862_s27 = smov [#allocation14]   ;;  %s18863_s29 = smov [#allocation2]  }
  0x38   :  { %s105_s28 = sshll.u32 %s18862_s27, 4  ;;  %s25_s30 = sshll.u32 %s18863_s29, 4  ;;  %s106_s28 = int_to_ptr.vmem [resolvable:$true] %s105_s28  ;;  %s26_s30 = int_to_ptr.vmem [resolvable:$true] %s25_s30 }
  0x39   :  { %s18689_s13 = scalar_lea.hbm %s20656_s7, 65536 }
  0x3a   :  { %p18690_p10 = scmp.ne.s32.totalorder %s20656_s7, %s18689_s13  ;;  %p18693_p11 = scmp.lt.u32.totalorder %s18689_s13, %s20656_s7 }
  0x3c   :  { %p18695_p12 = pnand %p18693_p11, %p18690_p10 }
  0x3e   :  { %18698 = shalt.err (!%p18695_p12)
}
  0x3f   :  { %s18699_s5 = scalar_lea.vmem %s106_s28, 65536  ;;  %p18704_p0 = scmp.lt.s32.totalorder %s106_s28, %s106_s28 }
  0x40   :  { %p18700_p13 = scmp.ne.s32.totalorder %s106_s28, %s18699_s5  ;;  %p18705_p1 = scmp.lt.s32.totalorder %s18699_s5, %s18699_s5 }
  0x42   :  { %p18706_p2 = por %p18705_p1, %p18704_p0 }
  0x44   :  { %p18707_p3 = pnand %p18706_p2, %p18700_p13 }
  0x46   :  { %18710 = shalt.err (!%p18707_p3)
}
  0x47   :  { %s18864_s26 = smov 256   ;;  %s18865_s16 = smov 16  }
  0x48   :  { %111 = dma.hbm_to_vmem [thread:$0]  %s20656_s7, 65536, %s106_s28, [#allocation15], %s18864_s26, %s18864_s26, %s18865_s16  }
  0x49   :  { %s18711_s21 = scalar_lea.hbm %s20649_s0, 2048 }
  0x4a   :  { %p18712_p4 = scmp.ne.s32.totalorder %s20649_s0, %s18711_s21  ;;  %p18715_p5 = scmp.lt.u32.totalorder %s18711_s21, %s20649_s0 }
  0x4c   :  { %p18717_p6 = pnand %p18715_p5, %p18712_p4 }
  0x4e   :  { %18720 = shalt.err (!%p18717_p6)
}
  0x4f   :  { %s18721_s27 = scalar_lea.vmem %s26_s30, 2048  ;;  %p18726_p8 = scmp.lt.s32.totalorder %s26_s30, %s26_s30 }
  0x50   :  { %p18722_p7 = scmp.ne.s32.totalorder %s26_s30, %s18721_s27  ;;  %p18727_p9 = scmp.lt.s32.totalorder %s18721_s27, %s18721_s27 }
  0x52   :  { %p18728_p10 = por %p18727_p9, %p18726_p8 }
  0x54   :  { %p18729_p11 = pnand %p18728_p10, %p18722_p7 }
  0x56   :  { %18732 = shalt.err (!%p18729_p11)
}
  0x57   :  { %s18866_s7 = smov 512   ;;  %s18867_s28 = smov 32  }
  0x58   :  { %31 = dma.hbm_to_vmem [thread:$0]  %s20649_s0, 2048, %s26_s30, [#allocation3], %s18866_s7, %s18866_s7, %s18867_s28  }
  0x59   :  { %s18868_s12 = smov [#allocation7]   ;;  %s18733_s14 = scalar_lea.hbm %s20651_s2, 49152 }
  0x5a   :  { %s49_s13 = sshll.u32 %s18868_s12, 4  ;;  %p18734_p12 = scmp.ne.s32.totalorder %s20651_s2, %s18733_s14  ;;  %s50_s13 = int_to_ptr.vmem [resolvable:$true] %s49_s13 }
  0x5b   :  { %p18737_p13 = scmp.lt.u32.totalorder %s18733_s14, %s20651_s2 }
  0x5d   :  { %p18739_p0 = pnand %p18737_p13, %p18734_p12 }
  0x5f   :  { %18742 = shalt.err (!%p18739_p0)
}
  0x60   :  { %s18743_s19 = scalar_lea.vmem %s50_s13, 49152  ;;  %p18748_p2 = scmp.lt.s32.totalorder %s50_s13, %s50_s13 }
  0x61   :  { %p18744_p1 = scmp.ne.s32.totalorder %s50_s13, %s18743_s19  ;;  %p18749_p3 = scmp.lt.s32.totalorder %s18743_s19, %s18743_s19 }
  0x63   :  { %p18750_p4 = por %p18749_p3, %p18748_p2 }
  0x65   :  { %p18751_p5 = pnand %p18750_p4, %p18744_p1 }
  0x67   :  { %18754 = shalt.err (!%p18751_p5)
}
  0x68   :  { %s18869_s0 = smov 768   ;;  %s18870_s30 = smov 48  }
  0x69   :  { %55 = dma.hbm_to_vmem [thread:$0]  %s20651_s2, 49152, %s50_s13, [#allocation6], %s18869_s0, %s18869_s0, %s18870_s30  }
  0x6a   :  { %s18871_s22 = smov [#allocation10]   ;;  %s18872_s24 = smov [#allocation13]  }
  0x6b   :  { %s71_s3 = sshll.u32 %s18871_s22, 4  ;;  %s96_s25 = sshll.u32 %s18872_s24, 4  ;;  %s72_s3 = int_to_ptr.vmem [resolvable:$true] %s71_s3  ;;  %s97_s25 = int_to_ptr.vmem [resolvable:$true] %s96_s25 }
  0x6c   :  { %s18755_s11 = scalar_lea.hbm %s20653_s4, 16384 }
  0x6d   :  { %p18756_p6 = scmp.ne.s32.totalorder %s20653_s4, %s18755_s11  ;;  %p18759_p7 = scmp.lt.u32.totalorder %s18755_s11, %s20653_s4 }
  0x6f   :  { %p18761_p8 = pnand %p18759_p7, %p18756_p6 }
  0x71   :  { %18764 = shalt.err (!%p18761_p8)
}
  0x72   :  { %s18765_s2 = scalar_lea.vmem %s72_s3, 16384  ;;  %p18770_p10 = scmp.lt.s32.totalorder %s72_s3, %s72_s3 }
  0x73   :  { %p18766_p9 = scmp.ne.s32.totalorder %s72_s3, %s18765_s2  ;;  %p18771_p11 = scmp.lt.s32.totalorder %s18765_s2, %s18765_s2 }
  0x75   :  { %p18772_p12 = por %p18771_p11, %p18770_p10 }
  0x77   :  { %p18773_p13 = pnand %p18772_p12, %p18766_p9 }
  0x79   :  { %18776 = shalt.err (!%p18773_p13)
}
  0x7a   :  { %77 = dma.hbm_to_vmem [thread:$0]  %s20653_s4, 16384, %s72_s3, [#allocation9], %s18864_s26, %s18864_s26, %s18865_s16  }
  0x7b   :  { %s18777_s18 = scalar_lea.hbm %s20655_s6, 256 }
  0x7c   :  { %p18778_p0 = scmp.ne.s32.totalorder %s20655_s6, %s18777_s18  ;;  %p18781_p1 = scmp.lt.u32.totalorder %s18777_s18, %s20655_s6 }
  0x7e   :  { %p18783_p2 = pnand %p18781_p1, %p18778_p0 }
  0x80   :  { %18786 = shalt.err (!%p18783_p2)
}
  0x81   :  { %s18787_s21 = scalar_lea.vmem %s97_s25, 256  ;;  %p18792_p4 = scmp.lt.s32.totalorder %s97_s25, %s97_s25 }
  0x82   :  { %p18788_p3 = scmp.ne.s32.totalorder %s97_s25, %s18787_s21  ;;  %p18793_p5 = scmp.lt.s32.totalorder %s18787_s21, %s18787_s21 }
  0x84   :  { %p18794_p6 = por %p18793_p5, %p18792_p4 }
  0x86   :  { %p18795_p7 = pnand %p18794_p6, %p18788_p3 }
  0x88   :  { %18798 = shalt.err (!%p18795_p7)
}
  0x89   :  { %99 = dma.hbm_to_vmem [thread:$0]  %s20655_s6, 256, %s97_s25, [#allocation12]  }
  0x8a   :  { %s18873_s16 = smov [#allocation16]   ;;  %s18799_s27 = scalar_lea.hbm %s20657_s8, 512 }
  0x8b   :  { %s118_s22 = sshll.u32 %s18873_s16, 4  ;;  %p18800_p8 = scmp.ne.s32.totalorder %s20657_s8, %s18799_s27  ;;  %s119_s22 = int_to_ptr.vmem [resolvable:$true] %s118_s22 }
  0x8c   :  { %p18803_p9 = scmp.lt.u32.totalorder %s18799_s27, %s20657_s8 }
  0x8e   :  { %p18805_p10 = pnand %p18803_p9, %p18800_p8 }
  0x90   :  { %18808 = shalt.err (!%p18805_p10)
}
  0x91   :  { %s18809_s10 = scalar_lea.vmem %s119_s22, 512  ;;  %p18814_p12 = scmp.lt.s32.totalorder %s119_s22, %s119_s22 }
  0x92   :  { %p18810_p11 = scmp.ne.s32.totalorder %s119_s22, %s18809_s10  ;;  %p18815_p13 = scmp.lt.s32.totalorder %s18809_s10, %s18809_s10 }
  0x94   :  { %p18816_p0 = por %p18815_p13, %p18814_p12 }
  0x96   :  { %p18817_p1 = pnand %p18816_p0, %p18810_p11 }
  0x98   :  { %18820 = shalt.err (!%p18817_p1)
}
  0x99   :  { %121 = dma.hbm_to_vmem [thread:$0]  %s20657_s8, 512, %s119_s22, [#allocation15]  }
  0x9a   :  { %18843 = dma.done.wait [#allocation3], 2048  }
  0x9b   :  { %18844 = vsyncadd [#allocation3], 4294965248 }
  0x9c   :  { %18845 = dma.done.wait [#allocation6], 49664  }
  0x9d   :  { %18846 = vsyncadd [#allocation6], 4294917632 }
  0x9e   :  { %18847 = dma.done.wait [#allocation9], 16576  }
  0x9f   :  { %18848 = vsyncadd [#allocation9], 4294950720 }
  0xa0   :  { %18849 = dma.done.wait [#allocation12], 65792  }
  0xa1   :  { %18850 = vsyncadd [#allocation12], 4294901504 }
  0xa2   :  { %18851 = dma.done.wait [#allocation15], 66048  }
  0xa3   :  { %18852 = vsyncadd [#allocation15], 4294901248  ;;  %v16921_v0 = vld [vmem:[#allocation7 + $0x4] ss:$48 sps:$4 sm:$0xff]   ;;  %v16923_v1 = vld [vmem:[#allocation7] ss:$48 sps:$4 sm:$0xff]  }
  0xa4   :  { %2546 = vmatprep.subr.bf16.mxu0 %v16921_v0  ;;  %v16924_v2 = vld [vmem:[#allocation7 + $0x64] ss:$48 sps:$4 sm:$0xff]   ;;  %v16926_v3 = vld [vmem:[#allocation7 + $0x60] ss:$48 sps:$4 sm:$0xff]   ;;  %v16927_v4 = vld [vmem:[#allocation7 + $0xc] ss:$48 sps:$4 sm:$0xff]  }
  0xa5   :  { %2547 = vmatpush1.bf16.msra.mxu0 %v16923_v1  ;;  %v16929_v5 = vld [vmem:[#allocation7 + $0xc4] ss:$48 sps:$4 sm:$0xff]   ;;  %v16931_v6 = vld [vmem:[#allocation7 + $0x8] ss:$48 sps:$4 sm:$0xff]   ;;  %2652 = vmatprep.subr.bf16.mxu1 %v16927_v4  ;;  %v16933_v7 = vld [vmem:[#allocation7 + $0x6c] ss:$48 sps:$4 sm:$0xff]  }
  0xa6   :  { %2548 = vmatprep.subr.bf16.mxu0 %v16924_v2  ;;  %2653 = vmatpush1.bf16.msra.mxu1 %v16931_v6  ;;  %v16932_v8 = vld [vmem:[#allocation7 + $0xc0] ss:$48 sps:$4 sm:$0xff]   ;;  %v16935_v9 = vld [vmem:[#allocation7 + $0x124] ss:$48 sps:$4 sm:$0xff]   ;;  %v16937_v10 = vld [vmem:[#allocation7 + $0x68] ss:$48 sps:$4 sm:$0xff]  }
  0xa7   :  { %2654 = vmatprep.subr.bf16.mxu1 %v16933_v7  ;;  %v16939_v11 = vld [vmem:[#allocation7 + $0xcc] ss:$48 sps:$4 sm:$0xff]   ;;  %v16938_v12 = vld [vmem:[#allocation7 + $0x120] ss:$48 sps:$4 sm:$0xff]   ;;  %v16943_v13 = vld [vmem:[#allocation7 + $0xc8] ss:$48 sps:$4 sm:$0xff]  }
  0xa8   :  { %v16945_v14 = vld [vmem:[#allocation7 + $0x12c] ss:$48 sps:$4 sm:$0xff]   ;;  %v16941_v15 = vld [vmem:[#allocation7 + $0x184] ss:$48 sps:$4 sm:$0xff]   ;;  %v16949_v16 = vld [vmem:[#allocation7 + $0x128] ss:$48 sps:$4 sm:$0xff]  }
  0xa9   :  { %2549 = vmatpush1.bf16.msra.mxu0 %v16926_v3  ;;  %v16944_v17 = vld [vmem:[#allocation7 + $0x180] ss:$48 sps:$4 sm:$0xff]   ;;  %v16951_v18 = vld [vmem:[#allocation7 + $0x18c] ss:$48 sps:$4 sm:$0xff]   ;;  %v16947_v19 = vld [vmem:[#allocation7 + $0x1e4] ss:$48 sps:$4 sm:$0xff]  }
  0xaa   :  { %2550 = vmatprep.subr.bf16.mxu0 %v16929_v5  ;;  %2655 = vmatpush1.bf16.msra.mxu1 %v16937_v10  ;;  %v16950_v20 = vld [vmem:[#allocation7 + $0x1e0] ss:$48 sps:$4 sm:$0xff]   ;;  %v16955_v21 = vld [vmem:[#allocation7 + $0x188] ss:$48 sps:$4 sm:$0xff]   ;;  %v16957_v22 = vld [vmem:[#allocation7 + $0x1ec] ss:$48 sps:$4 sm:$0xff]  }
  0xab   :  { %2656 = vmatprep.subr.bf16.mxu1 %v16939_v11  ;;  %v16953_v23 = vld [vmem:[#allocation7 + $0x244] ss:$48 sps:$4 sm:$0xff]   ;;  %v16961_v24 = vld [vmem:[#allocation7 + $0x1e8] ss:$48 sps:$4 sm:$0xff]   ;;  %v16956_v25 = vld [vmem:[#allocation7 + $0x240] ss:$48 sps:$4 sm:$0xff]  }
  0xac   :  { %v16963_v26 = vld [vmem:[#allocation7 + $0x24c] ss:$48 sps:$4 sm:$0xff]   ;;  %v16959_v27 = vld [vmem:[#allocation7 + $0x2a4] ss:$48 sps:$4 sm:$0xff]   ;;  %v16962_v28 = vld [vmem:[#allocation7 + $0x2a0] ss:$48 sps:$4 sm:$0xff]  }
  0xad   :  { %2551 = vmatpush1.bf16.msra.mxu0 %v16932_v8  ;;  %v16967_v29 = vld [vmem:[#allocation7 + $0x248] ss:$48 sps:$4 sm:$0xff]   ;;  %v16969_v30 = vld [vmem:[#allocation7 + $0x2ac] ss:$48 sps:$4 sm:$0xff]   ;;  %v16965_v31 = vld [vmem:[#allocation7 + $0x304] ss:$48 sps:$4 sm:$0xff]  }
  0xae   :  { %2552 = vmatprep.subr.bf16.mxu0 %v16935_v9  ;;  %2657 = vmatpush1.bf16.msra.mxu1 %v16943_v13  ;;  %v16973_v32 = vld [vmem:[#allocation7 + $0x2a8] ss:$48 sps:$4 sm:$0xff]   ;;  %v16968_v33 = vld [vmem:[#allocation7 + $0x300] ss:$48 sps:$4 sm:$0xff]   ;;  %v16975_v34 = vld [vmem:[#allocation7 + $0x30c] ss:$48 sps:$4 sm:$0xff]  }
  0xaf   :  { %2658 = vmatprep.subr.bf16.mxu1 %v16945_v14  ;;  %v16971_v35 = vld [vmem:[#allocation7 + $0x364] ss:$48 sps:$4 sm:$0xff]   ;;  %v16974_v36 = vld [vmem:[#allocation7 + $0x360] ss:$48 sps:$4 sm:$0xff]   ;;  %v16979_v37 = vld [vmem:[#allocation7 + $0x308] ss:$48 sps:$4 sm:$0xff]  }
  0xb0   :  { %v16981_v38 = vld [vmem:[#allocation7 + $0x36c] ss:$48 sps:$4 sm:$0xff]   ;;  %v16977_v39 = vld [vmem:[#allocation7 + $0x3c4] ss:$48 sps:$4 sm:$0xff]   ;;  %v16985_v40 = vld [vmem:[#allocation7 + $0x368] ss:$48 sps:$4 sm:$0xff]  }
  0xb1   :  { %2553 = vmatpush1.bf16.msra.mxu0 %v16938_v12  ;;  %v16980_v41 = vld [vmem:[#allocation7 + $0x3c0] ss:$48 sps:$4 sm:$0xff]   ;;  %v16987_v42 = vld [vmem:[#allocation7 + $0x3cc] ss:$48 sps:$4 sm:$0xff]   ;;  %v16983_v43 = vld [vmem:[#allocation7 + $0x424] ss:$48 sps:$4 sm:$0xff]  }
  0xb2   :  { %2554 = vmatprep.subr.bf16.mxu0 %v16941_v15  ;;  %2659 = vmatpush1.bf16.msra.mxu1 %v16949_v16  ;;  %v151_v44 = vld [vmem:[#allocation2 + $0x8] sm:$0xff]  ;;  %v16986_v48 = vld [vmem:[#allocation7 + $0x420] ss:$48 sps:$4 sm:$0xff]   ;;  %v16989_v50 = vld [vmem:[#allocation7 + $0x484] ss:$48 sps:$4 sm:$0xff]   ;;  %vm18875_vm0 = vmmov 0  }
  0xb3   :  { %2660 = vmatprep.subr.bf16.mxu1 %v16951_v18  ;;  %v155_v45 = vld [vmem:[#allocation2 + $0x28] sm:$0xff]  ;;  %v16992_v52 = vld [vmem:[#allocation7 + $0x480] ss:$48 sps:$4 sm:$0xff]   ;;  %v16995_v54 = vld [vmem:[#allocation7 + $0x4e4] ss:$48 sps:$4 sm:$0xff]   ;;  %vm3187_vm1 = vcmask 523264  }
  0xb4   :  { %v16991_v46 = vld [vmem:[#allocation7 + $0x3c8] ss:$48 sps:$4 sm:$0xff]   ;;  %v19045_v47 = vpack.c.bf16 %v155_v45, %v151_v44  ;;  %v16993_v49 = vld [vmem:[#allocation7 + $0x42c] ss:$48 sps:$4 sm:$0xff]   ;;  %v16998_v56 = vld [vmem:[#allocation7 + $0x4e0] ss:$48 sps:$4 sm:$0xff]  }
  0xb5   :  { %2555 = vmatpush1.bf16.msra.mxu0 %v16944_v17  ;;  %v16997_v51 = vld [vmem:[#allocation7 + $0x428] ss:$48 sps:$4 sm:$0xff]   ;;  %v16999_v53 = vld [vmem:[#allocation7 + $0x48c] ss:$48 sps:$4 sm:$0xff]   ;;  %v17001_v58 = vld [vmem:[#allocation7 + $0x544] ss:$48 sps:$4 sm:$0xff]  }
  0xb6   :  { %2556 = vmatprep.subr.bf16.mxu0 %v16947_v19  ;;  %2661 = vmatpush1.bf16.msra.mxu1 %v16955_v21  ;;  %v17003_v55 = vld [vmem:[#allocation7 + $0x488] ss:$48 sps:$4 sm:$0xff]   ;;  %v17005_v57 = vld [vmem:[#allocation7 + $0x4ec] ss:$48 sps:$4 sm:$0xff]   ;;  %v17004_v60 = vld [vmem:[#allocation7 + $0x540] ss:$48 sps:$4 sm:$0xff]  }
  0xb7   :  { %2662 = vmatprep.subr.bf16.mxu1 %v16957_v22  ;;  %2578 = vmatprep.mubr.bf16.mxu0 %v19045_v47  ;;  %v17009_v59 = vld [vmem:[#allocation7 + $0x4e8] ss:$48 sps:$4 sm:$0xff]   ;;  %v17011_v61 = vld [vmem:[#allocation7 + $0x54c] ss:$48 sps:$4 sm:$0xff]   ;;  %v17007_v62 = vld [vmem:[#allocation7 + $0x5a4] ss:$48 sps:$4 sm:$0xff]  }
  0xb8   :  { %2684 = vmatprep.mubr.bf16.mxu1 %v19045_v47  ;;  %v17010_v63 = vld [vmem:[#allocation7 + $0x5a0] ss:$48 sps:$4 sm:$0xff]   ;;  %v17016_v0 = vld [vmem:[#allocation7 + $0x548] ss:$48 sps:$4 sm:$0xff]   ;;  %v17017_v3 = vld [vmem:[#allocation7 + $0x5ac] ss:$48 sps:$4 sm:$0xff]  }
  0xb9   :  { %2557 = vmatpush1.bf16.msra.mxu0 %v16950_v20  ;;  %v150_v1 = vld [vmem:[#allocation2] sm:$0xff]  ;;  %v17022_v6 = vld [vmem:[#allocation7 + $0x5a8] ss:$48 sps:$4 sm:$0xff]   ;;  %v17025_v8 = vld [vmem:[#allocation7 + $0x60c] ss:$48 sps:$4 sm:$0xff]   ;;  %vm3235_vm2 = vcmask 130048  }
  0xba   :  { %2558 = vmatprep.subr.bf16.mxu0 %v16953_v23  ;;  %2663 = vmatpush1.bf16.msra.mxu1 %v16961_v24  ;;  %v154_v2 = vld [vmem:[#allocation2 + $0x20] sm:$0xff]  ;;  %v17023_v10 = vld [vmem:[#allocation7 + $0x608] ss:$48 sps:$4 sm:$0xff]   ;;  %v17031_v12 = vld [vmem:[#allocation7 + $0x66c] ss:$48 sps:$4 sm:$0xff]   ;;  %s18876_s8 = smov [#allocation17]  }
  0xbb   :  { %2664 = vmatprep.subr.bf16.mxu1 %v16963_v26  ;;  %v17015_v4 = vld [vmem:[#allocation7 + $0x604] ss:$48 sps:$4 sm:$0xff]   ;;  %v19049_v5 = vpack.c.bf16 %v154_v2, %v150_v1  ;;  %v17013_v7 = vld [vmem:[#allocation7 + $0x600] ss:$48 sps:$4 sm:$0xff]   ;;  %v17029_v14 = vld [vmem:[#allocation7 + $0x668] ss:$48 sps:$4 sm:$0xff]  }
  0xbc   :  { %v17021_v9 = vld [vmem:[#allocation7 + $0x664] ss:$48 sps:$4 sm:$0xff]   ;;  %v17019_v11 = vld [vmem:[#allocation7 + $0x660] ss:$48 sps:$4 sm:$0xff]   ;;  %v17037_v16 = vld [vmem:[#allocation7 + $0x6cc] ss:$48 sps:$4 sm:$0xff]  }
  0xbd   :  { %2559 = vmatpush1.bf16.msra.mxu0 %v16956_v25  ;;  %v17028_v13 = vld [vmem:[#allocation7 + $0x6c4] ss:$48 sps:$4 sm:$0xff]   ;;  %v17026_v15 = vld [vmem:[#allocation7 + $0x6c0] ss:$48 sps:$4 sm:$0xff]   ;;  %v17035_v18 = vld [vmem:[#allocation7 + $0x6c8] ss:$48 sps:$4 sm:$0xff]  }
  0xbe   :  { %2560 = vmatprep.subr.bf16.mxu0 %v16959_v27  ;;  %2665 = vmatpush1.bf16.msra.mxu1 %v16967_v29  ;;  %v17034_v17 = vld [vmem:[#allocation7 + $0x724] ss:$48 sps:$4 sm:$0xff]   ;;  %v17032_v19 = vld [vmem:[#allocation7 + $0x720] ss:$48 sps:$4 sm:$0xff]   ;;  %v17043_v20 = vld [vmem:[#allocation7 + $0x72c] ss:$48 sps:$4 sm:$0xff]  }
  0xbf   :  { %2666 = vmatprep.subr.bf16.mxu1 %v16969_v30  ;;  %v17040_v21 = vld [vmem:[#allocation7 + $0x784] ss:$48 sps:$4 sm:$0xff]   ;;  %v17038_v22 = vld [vmem:[#allocation7 + $0x780] ss:$48 sps:$4 sm:$0xff]   ;;  %v17041_v23 = vld [vmem:[#allocation7 + $0x728] ss:$48 sps:$4 sm:$0xff]  }
  0xc0   :  { %v17049_v24 = vld [vmem:[#allocation7 + $0x78c] ss:$48 sps:$4 sm:$0xff]   ;;  %v17046_v27 = vld [vmem:[#allocation7 + $0x7e4] ss:$48 sps:$4 sm:$0xff]   ;;  %v17056_v44 = vld [vmem:[#allocation7 + $0x8a0] ss:$48 sps:$4 sm:$0xff]  }
  0xc1   :  { %2561 = vmatpush1.bf16.msra.mxu0 %v16962_v28  ;;  %v159_v25 = vld [vmem:[#allocation2 + $0x48] sm:$0xff]  ;;  %v158_v29 = vld [vmem:[#allocation2 + $0x40] sm:$0xff] }
  0xc2   :  { %2562 = vmatprep.subr.bf16.mxu0 %v16965_v31  ;;  %2667 = vmatpush1.bf16.msra.mxu1 %v16973_v32  ;;  %v163_v26 = vld [vmem:[#allocation2 + $0x68] sm:$0xff]  ;;  %v162_v30 = vld [vmem:[#allocation2 + $0x60] sm:$0xff] }
  0xc3   :  { %2668 = vmatprep.subr.bf16.mxu1 %v16975_v34  ;;  %v19053_v28 = vpack.c.bf16 %v163_v26, %v159_v25  ;;  %v17047_v31 = vld [vmem:[#allocation7 + $0x788] ss:$48 sps:$4 sm:$0xff]   ;;  %v19056_v32 = vpack.c.bf16 %v162_v30, %v158_v29  ;;  %v17055_v34 = vld [vmem:[#allocation7 + $0x7ec] ss:$48 sps:$4 sm:$0xff]   ;;  %v17086_v1 = vld [vmem:[#allocation7 + $0xa80] ss:$48 sps:$4 sm:$0xff]  }
  0xc4   :  { %v17067_v45 = vld [vmem:[#allocation7 + $0x8ac] ss:$48 sps:$4 sm:$0xff]   ;;  %v17119_v29 = vld [vmem:[#allocation7 + $0x18] ss:$48 sps:$4 sm:$0xff]   ;;  %v160_v30 = vld [vmem:[#allocation2 + $0x50] sm:$0xff] }
  0xc5   :  { %2563 = vmatpush1.bf16.msra.mxu0 %v16968_v33  ;;  %v17044_v33 = vld [vmem:[#allocation7 + $0x7e0] ss:$48 sps:$4 sm:$0xff]   ;;  %v17097_v2 = vld [vmem:[#allocation7 + $0xa8c] ss:$48 sps:$4 sm:$0xff]  }
  0xc6   :  { %2564 = vmatprep.subr.bf16.mxu0 %v16971_v35  ;;  %2669 = vmatpush1.bf16.msra.mxu1 %v16979_v37  ;;  %v17052_v35 = vld [vmem:[#allocation7 + $0x844] ss:$48 sps:$4 sm:$0xff]   ;;  %v157_v37 = vld [vmem:[#allocation2 + $0x38] sm:$0xff] }
  0xc7   :  { %2670 = vmatprep.subr.bf16.mxu1 %v16981_v38  ;;  %v17053_v38 = vld [vmem:[#allocation7 + $0x7e8] ss:$48 sps:$4 sm:$0xff]   ;;  %v17121_v26 = vld [vmem:[#allocation7 + $0x1c] ss:$48 sps:$4 sm:$0xff]  }
  0xc9   :  { %2565 = vmatpush1.bf16.msra.mxu0 %v16974_v36  ;;  %v153_v36 = vld [vmem:[#allocation2 + $0x18] sm:$0xff] }
  0xca   :  { %2566 = vmatprep.subr.bf16.mxu0 %v16977_v39  ;;  %2671 = vmatpush1.bf16.msra.mxu1 %v16985_v40  ;;  %v19060_v39 = vpack.c.bf16 %v157_v37, %v153_v36  ;;  %v17050_v40 = vld [vmem:[#allocation7 + $0x840] ss:$48 sps:$4 sm:$0xff]   ;;  %v17125_v36 = vld [vmem:[#allocation7 + $0x78] ss:$48 sps:$4 sm:$0xff]  }
  0xcb   :  { %2672 = vmatprep.subr.bf16.mxu1 %v16987_v42  ;;  %v17058_v42 = vld [vmem:[#allocation7 + $0x8a4] ss:$48 sps:$4 sm:$0xff]   ;;  %v17122_v37 = vld [vmem:[#allocation7 + $0xd0] ss:$48 sps:$4 sm:$0xff]  }
  0xcd   :  { %2567 = vmatpush1.bf16.msra.mxu0 %v16980_v41  ;;  %v17061_v41 = vld [vmem:[#allocation7 + $0x84c] ss:$48 sps:$4 sm:$0xff]  }
  0xce   :  { %2568 = vmatprep.subr.bf16.mxu0 %v16983_v43  ;;  %2673 = vmatpush1.bf16.msra.mxu1 %v16991_v46  ;;  %v17059_v43 = vld [vmem:[#allocation7 + $0x848] ss:$48 sps:$4 sm:$0xff]   ;;  %v17064_v46 = vld [vmem:[#allocation7 + $0x904] ss:$48 sps:$4 sm:$0xff]  }
  0xcf   :  { %2674 = vmatprep.subr.bf16.mxu1 %v16993_v49  ;;  %v17062_v49 = vld [vmem:[#allocation7 + $0x900] ss:$48 sps:$4 sm:$0xff]  }
  0xd1   :  { %2569 = vmatpush1.bf16.msra.mxu0 %v16986_v48  ;;  %v17065_v48 = vld [vmem:[#allocation7 + $0x8a8] ss:$48 sps:$4 sm:$0xff]  }
  0xd2   :  { %2570 = vmatprep.subr.bf16.mxu0 %v16989_v50  ;;  %2675 = vmatpush1.bf16.msra.mxu1 %v16997_v51  ;;  %v17073_v50 = vld [vmem:[#allocation7 + $0x90c] ss:$48 sps:$4 sm:$0xff]   ;;  %v17070_v51 = vld [vmem:[#allocation7 + $0x964] ss:$48 sps:$4 sm:$0xff]  }
  0xd3   :  { %2676 = vmatprep.subr.bf16.mxu1 %v16999_v53  ;;  %v17068_v53 = vld [vmem:[#allocation7 + $0x960] ss:$48 sps:$4 sm:$0xff]  }
  0xd5   :  { %2571 = vmatpush1.bf16.msra.mxu0 %v16992_v52  ;;  %v17071_v52 = vld [vmem:[#allocation7 + $0x908] ss:$48 sps:$4 sm:$0xff]  }
  0xd6   :  { %2572 = vmatprep.subr.bf16.mxu0 %v16995_v54  ;;  %2677 = vmatpush1.bf16.msra.mxu1 %v17003_v55  ;;  %v17079_v54 = vld [vmem:[#allocation7 + $0x96c] ss:$48 sps:$4 sm:$0xff]   ;;  %v17076_v55 = vld [vmem:[#allocation7 + $0x9c4] ss:$48 sps:$4 sm:$0xff]  }
  0xd7   :  { %2678 = vmatprep.subr.bf16.mxu1 %v17005_v57  ;;  %v17074_v57 = vld [vmem:[#allocation7 + $0x9c0] ss:$48 sps:$4 sm:$0xff]  }
  0xd9   :  { %2573 = vmatpush1.bf16.msra.mxu0 %v16998_v56  ;;  %v17077_v56 = vld [vmem:[#allocation7 + $0x968] ss:$48 sps:$4 sm:$0xff]  }
  0xda   :  { %2574 = vmatprep.subr.bf16.mxu0 %v17001_v58  ;;  %2679 = vmatpush1.bf16.msra.mxu1 %v17009_v59  ;;  %v17085_v58 = vld [vmem:[#allocation7 + $0x9cc] ss:$48 sps:$4 sm:$0xff]   ;;  %v17082_v59 = vld [vmem:[#allocation7 + $0xa24] ss:$48 sps:$4 sm:$0xff]  }
  0xdb   :  { %2680 = vmatprep.subr.bf16.mxu1 %v17011_v61  ;;  %v17080_v61 = vld [vmem:[#allocation7 + $0xa20] ss:$48 sps:$4 sm:$0xff]  }
  0xdd   :  { %2575 = vmatpush1.bf16.msra.mxu0 %v17004_v60  ;;  %v17083_v60 = vld [vmem:[#allocation7 + $0x9c8] ss:$48 sps:$4 sm:$0xff]  }
  0xde   :  { %2576 = vmatprep.subr.bf16.mxu0 %v17007_v62  ;;  %2681 = vmatpush1.bf16.msra.mxu1 %v17016_v0  ;;  %v17091_v62 = vld [vmem:[#allocation7 + $0xa2c] ss:$48 sps:$4 sm:$0xff]   ;;  %v17089_v0 = vld [vmem:[#allocation7 + $0xa28] ss:$48 sps:$4 sm:$0xff]  }
  0xdf   :  { %2682 = vmatprep.subr.bf16.mxu1 %v17017_v3  ;;  %v17094_v3 = vld [vmem:[#allocation7 + $0xae4] ss:$48 sps:$4 sm:$0xff]  }
  0xe1   :  { %2577 = vmatpush1.bf16.msra.mxu0 %v17010_v63  ;;  %v17088_v63 = vld [vmem:[#allocation7 + $0xa84] ss:$48 sps:$4 sm:$0xff]  }
  0xe2   :  { %2599 = vmatprep.subr.bf16.mxu0 %v17015_v4  ;;  %2683 = vmatpush1.bf16.msra.mxu1 %v17022_v6  ;;  %v17095_v4 = vld [vmem:[#allocation7 + $0xa88] ss:$48 sps:$4 sm:$0xff]   ;;  %v17092_v6 = vld [vmem:[#allocation7 + $0xae0] ss:$48 sps:$4 sm:$0xff]  }
  0xe3   :  { %2705 = vmatprep.subr.bf16.mxu1 %v17025_v8  ;;  %v17100_v8 = vld [vmem:[#allocation7 + $0xb44] ss:$48 sps:$4 sm:$0xff]  }
  0xe4   :  { %2579 = vmatmul.mubr.bf16.vlgmr.msra.gmra.mrb[0].mxu0 %v19049_v5 }
  0xe5   :  { %2600 = vmatpush1.bf16.msra.mxu0 %v17013_v7  ;;  %2685 = vmatmul.mubr.bf16.vlgmr.msra.gmra.mrb[0].mxu1 %v19049_v5  ;;  %v17103_v7 = vld [vmem:[#allocation7 + $0xaec] ss:$48 sps:$4 sm:$0xff]  }
  0xe6   :  { %2601 = vmatprep.subr.bf16.mxu0 %v17021_v9  ;;  %2706 = vmatpush1.bf16.msra.mxu1 %v17023_v10  ;;  %v17098_v9 = vld [vmem:[#allocation7 + $0xb40] ss:$48 sps:$4 sm:$0xff]   ;;  %v17101_v10 = vld [vmem:[#allocation7 + $0xae8] ss:$48 sps:$4 sm:$0xff]  }
  0xe7   :  { %2707 = vmatprep.subr.bf16.mxu1 %v17031_v12  ;;  %2588 = vmatprep.mubr.bf16.mxu0 %v19053_v28  ;;  %v17109_v12 = vld [vmem:[#allocation7 + $0xb4c] ss:$48 sps:$4 sm:$0xff]  }
  0xe8   :  { %2694 = vmatprep.mubr.bf16.mxu1 %v19053_v28 }
  0xe9   :  { %2602 = vmatpush1.bf16.msra.mxu0 %v17019_v11  ;;  %v17106_v11 = vld [vmem:[#allocation7 + $0xba4] ss:$48 sps:$4 sm:$0xff]  }
  0xea   :  { %2603 = vmatprep.subr.bf16.mxu0 %v17028_v13  ;;  %2708 = vmatpush1.bf16.msra.mxu1 %v17029_v14  ;;  %v17107_v13 = vld [vmem:[#allocation7 + $0xb48] ss:$48 sps:$4 sm:$0xff]   ;;  %v17104_v14 = vld [vmem:[#allocation7 + $0xba0] ss:$48 sps:$4 sm:$0xff]  }
  0xeb   :  { %2709 = vmatprep.subr.bf16.mxu1 %v17037_v16  ;;  %v156_v16 = vld [vmem:[#allocation2 + $0x30] sm:$0xff] }
  0xec   :  { %2589 = vmatmul.mubr.bf16.gmra.mrb[4].mxu0 %v19056_v32 }
  0xed   :  { %2604 = vmatpush1.bf16.msra.mxu0 %v17026_v15  ;;  %2631 = vmatprep.mubr.bf16.mxu0 %v19060_v39  ;;  %v152_v15 = vld [vmem:[#allocation2 + $0x10] sm:$0xff] }
  0xee   :  { %2605 = vmatprep.subr.bf16.mxu0 %v17034_v17  ;;  %2710 = vmatpush1.bf16.msra.mxu1 %v17035_v18  ;;  %v17112_v17 = vld [vmem:[#allocation7 + $0x14] ss:$48 sps:$4 sm:$0xff]   ;;  %v17115_v18 = vld [vmem:[#allocation7 + $0xbac] ss:$48 sps:$4 sm:$0xff]  }
  0xef   :  { %2711 = vmatprep.subr.bf16.mxu1 %v17043_v20  ;;  %2695 = vmatmul.mubr.bf16.gmra.mrb[4].mxu1 %v19056_v32  ;;  %v165_v20 = vld [vmem:[#allocation2 + $0x78] sm:$0xff] }
  0xf0   :  { %2737 = vmatprep.mubr.bf16.mxu1 %v19060_v39 }
  0xf1   :  { %2606 = vmatpush1.bf16.msra.mxu0 %v17032_v19  ;;  %v161_v19 = vld [vmem:[#allocation2 + $0x58] sm:$0xff] }
  0xf2   :  { %2607 = vmatprep.subr.bf16.mxu0 %v17040_v21  ;;  %2712 = vmatpush1.bf16.msra.mxu1 %v17041_v23  ;;  %v19065_v21 = vpack.c.bf16 %v156_v16, %v152_v15  ;;  %v17110_v23 = vld [vmem:[#allocation7 + $0x10] ss:$48 sps:$4 sm:$0xff]   ;;  %v19067_v25 = vpack.c.bf16 %v165_v20, %v161_v19  ;;  %v17185_v15 = vld [vmem:[#allocation7 + $0x438] ss:$48 sps:$4 sm:$0xff]  }
  0xf3   :  { %2713 = vmatprep.subr.bf16.mxu1 %v17049_v24  ;;  %v17118_v24 = vld [vmem:[#allocation7 + $0x74] ss:$48 sps:$4 sm:$0xff]   ;;  %v17182_v16 = vld [vmem:[#allocation7 + $0x490] ss:$48 sps:$4 sm:$0xff]   ;;  %v17191_v19 = vld [vmem:[#allocation7 + $0x498] ss:$48 sps:$4 sm:$0xff]  }
  0xf4   :  { %v17188_v20 = vld [vmem:[#allocation7 + $0x4f0] ss:$48 sps:$4 sm:$0xff]  }
  0xf5   :  { %2608 = vmatpush1.bf16.msra.mxu0 %v17038_v22  ;;  %v17113_v22 = vld [vmem:[#allocation7 + $0xba8] ss:$48 sps:$4 sm:$0xff]  }
  0xf6   :  { %2609 = vmatprep.subr.bf16.mxu0 %v17046_v27  ;;  %2714 = vmatpush1.bf16.msra.mxu1 %v17047_v31  ;;  %v17116_v27 = vld [vmem:[#allocation7 + $0x70] ss:$48 sps:$4 sm:$0xff]  }
  0xf7   :  { %2715 = vmatprep.subr.bf16.mxu1 %v17055_v34  ;;  %v164_v31 = vld [vmem:[#allocation2 + $0x70] sm:$0xff] }
  0xf8   :  { %v17124_v34 = vld [vmem:[#allocation7 + $0xd4] ss:$48 sps:$4 sm:$0xff]  }
  0xf9   :  { %2610 = vmatpush1.bf16.msra.mxu0 %v17044_v33  ;;  %v17127_v33 = vld [vmem:[#allocation7 + $0x7c] ss:$48 sps:$4 sm:$0xff]  }
  0xfa   :  { %2611 = vmatprep.subr.bf16.mxu0 %v17052_v35  ;;  %2716 = vmatpush1.bf16.msra.mxu1 %v17053_v38  ;;  %v19072_v35 = vpack.c.bf16 %v164_v31, %v160_v30  ;;  %v17133_v38 = vld [vmem:[#allocation7 + $0xdc] ss:$48 sps:$4 sm:$0xff]   ;;  %v17203_v30 = vld [vmem:[#allocation7 + $0x558] ss:$48 sps:$4 sm:$0xff]   ;;  %v17200_v31 = vld [vmem:[#allocation7 + $0x5b0] ss:$48 sps:$4 sm:$0xff]  }
  0xfb   :  { %2717 = vmatprep.subr.bf16.mxu1 %v17061_v41  ;;  %v17131_v41 = vld [vmem:[#allocation7 + $0xd8] ss:$48 sps:$4 sm:$0xff]  }
  0xfd   :  { %2612 = vmatpush1.bf16.msra.mxu0 %v17050_v40  ;;  %v17130_v40 = vld [vmem:[#allocation7 + $0x134] ss:$48 sps:$4 sm:$0xff]  }
  0xfe   :  { %2613 = vmatprep.subr.bf16.mxu0 %v17058_v42  ;;  %2718 = vmatpush1.bf16.msra.mxu1 %v17059_v43  ;;  %v17128_v42 = vld [vmem:[#allocation7 + $0x130] ss:$48 sps:$4 sm:$0xff]   ;;  %v17139_v43 = vld [vmem:[#allocation7 + $0x13c] ss:$48 sps:$4 sm:$0xff]  }
  0xff   :  { %2719 = vmatprep.subr.bf16.mxu1 %v17067_v45  ;;  %v17137_v45 = vld [vmem:[#allocation7 + $0x138] ss:$48 sps:$4 sm:$0xff]  }
 0x101   :  { %2614 = vmatpush1.bf16.msra.mxu0 %v17056_v44  ;;  %v17136_v44 = vld [vmem:[#allocation7 + $0x194] ss:$48 sps:$4 sm:$0xff]  }
 0x102   :  { %2615 = vmatprep.subr.bf16.mxu0 %v17064_v46  ;;  %2720 = vmatpush1.bf16.msra.mxu1 %v17065_v48  ;;  %v17134_v46 = vld [vmem:[#allocation7 + $0x190] ss:$48 sps:$4 sm:$0xff]   ;;  %v17145_v48 = vld [vmem:[#allocation7 + $0x19c] ss:$48 sps:$4 sm:$0xff]  }
 0x103   :  { %2721 = vmatprep.subr.bf16.mxu1 %v17073_v50  ;;  %v17143_v50 = vld [vmem:[#allocation7 + $0x198] ss:$48 sps:$4 sm:$0xff]  }
 0x105   :  { %2616 = vmatpush1.bf16.msra.mxu0 %v17062_v49  ;;  %v17142_v49 = vld [vmem:[#allocation7 + $0x1f4] ss:$48 sps:$4 sm:$0xff]  }
 0x106   :  { %2617 = vmatprep.subr.bf16.mxu0 %v17070_v51  ;;  %2722 = vmatpush1.bf16.msra.mxu1 %v17071_v52  ;;  %v17140_v51 = vld [vmem:[#allocation7 + $0x1f0] ss:$48 sps:$4 sm:$0xff]   ;;  %v17151_v52 = vld [vmem:[#allocation7 + $0x1fc] ss:$48 sps:$4 sm:$0xff]  }
 0x107   :  { %2723 = vmatprep.subr.bf16.mxu1 %v17079_v54  ;;  %v17149_v54 = vld [vmem:[#allocation7 + $0x1f8] ss:$48 sps:$4 sm:$0xff]  }
 0x109   :  { %2618 = vmatpush1.bf16.msra.mxu0 %v17068_v53  ;;  %v17148_v53 = vld [vmem:[#allocation7 + $0x254] ss:$48 sps:$4 sm:$0xff]  }
 0x10a   :  { %2619 = vmatprep.subr.bf16.mxu0 %v17076_v55  ;;  %2724 = vmatpush1.bf16.msra.mxu1 %v17077_v56  ;;  %v17146_v55 = vld [vmem:[#allocation7 + $0x250] ss:$48 sps:$4 sm:$0xff]   ;;  %v17157_v56 = vld [vmem:[#allocation7 + $0x25c] ss:$48 sps:$4 sm:$0xff]  }
 0x10b   :  { %2725 = vmatprep.subr.bf16.mxu1 %v17085_v58  ;;  %v17155_v58 = vld [vmem:[#allocation7 + $0x258] ss:$48 sps:$4 sm:$0xff]  }
 0x10d   :  { %2620 = vmatpush1.bf16.msra.mxu0 %v17074_v57  ;;  %v17154_v57 = vld [vmem:[#allocation7 + $0x2b4] ss:$48 sps:$4 sm:$0xff]  }
 0x10e   :  { %2621 = vmatprep.subr.bf16.mxu0 %v17082_v59  ;;  %2726 = vmatpush1.bf16.msra.mxu1 %v17083_v60  ;;  %v17152_v59 = vld [vmem:[#allocation7 + $0x2b0] ss:$48 sps:$4 sm:$0xff]   ;;  %v17163_v60 = vld [vmem:[#allocation7 + $0x2bc] ss:$48 sps:$4 sm:$0xff]  }
 0x10f   :  { %2727 = vmatprep.subr.bf16.mxu1 %v17091_v62  ;;  %v17161_v62 = vld [vmem:[#allocation7 + $0x2b8] ss:$48 sps:$4 sm:$0xff]  }
 0x111   :  { %2622 = vmatpush1.bf16.msra.mxu0 %v17080_v61  ;;  %v17160_v61 = vld [vmem:[#allocation7 + $0x314] ss:$48 sps:$4 sm:$0xff]  }
 0x112   :  { %2623 = vmatprep.subr.bf16.mxu0 %v17088_v63  ;;  %2728 = vmatpush1.bf16.msra.mxu1 %v17089_v0  ;;  %v17158_v63 = vld [vmem:[#allocation7 + $0x310] ss:$48 sps:$4 sm:$0xff]   ;;  %v17169_v0 = vld [vmem:[#allocation7 + $0x31c] ss:$48 sps:$4 sm:$0xff]  }
 0x113   :  { %2729 = vmatprep.subr.bf16.mxu1 %v17097_v2  ;;  %v17167_v2 = vld [vmem:[#allocation7 + $0x318] ss:$48 sps:$4 sm:$0xff]  }
 0x115   :  { %2624 = vmatpush1.bf16.msra.mxu0 %v17086_v1  ;;  %v17166_v1 = vld [vmem:[#allocation7 + $0x374] ss:$48 sps:$4 sm:$0xff]  }
 0x116   :  { %2625 = vmatprep.subr.bf16.mxu0 %v17094_v3  ;;  %2730 = vmatpush1.bf16.msra.mxu1 %v17095_v4  ;;  %v17164_v3 = vld [vmem:[#allocation7 + $0x370] ss:$48 sps:$4 sm:$0xff]   ;;  %v17175_v4 = vld [vmem:[#allocation7 + $0x37c] ss:$48 sps:$4 sm:$0xff]  }
 0x117   :  { %2731 = vmatprep.subr.bf16.mxu1 %v17103_v7  ;;  %v17173_v7 = vld [vmem:[#allocation7 + $0x378] ss:$48 sps:$4 sm:$0xff]  }
 0x119   :  { %2626 = vmatpush1.bf16.msra.mxu0 %v17092_v6  ;;  %v17172_v6 = vld [vmem:[#allocation7 + $0x3d4] ss:$48 sps:$4 sm:$0xff]  }
 0x11a   :  { %2627 = vmatprep.subr.bf16.mxu0 %v17100_v8  ;;  %2732 = vmatpush1.bf16.msra.mxu1 %v17101_v10  ;;  %v17170_v8 = vld [vmem:[#allocation7 + $0x3d0] ss:$48 sps:$4 sm:$0xff]   ;;  %v17178_v10 = vld [vmem:[#allocation7 + $0x434] ss:$48 sps:$4 sm:$0xff]  }
 0x11b   :  { %2733 = vmatprep.subr.bf16.mxu1 %v17109_v12  ;;  %v17176_v12 = vld [vmem:[#allocation7 + $0x430] ss:$48 sps:$4 sm:$0xff]  }
 0x11d   :  { %2628 = vmatpush1.bf16.msra.mxu0 %v17098_v9  ;;  %v17181_v9 = vld [vmem:[#allocation7 + $0x3dc] ss:$48 sps:$4 sm:$0xff]  }
 0x11e   :  { %2629 = vmatprep.subr.bf16.mxu0 %v17106_v11  ;;  %2734 = vmatpush1.bf16.msra.mxu1 %v17107_v13  ;;  %v17179_v11 = vld [vmem:[#allocation7 + $0x3d8] ss:$48 sps:$4 sm:$0xff]   ;;  %v17187_v13 = vld [vmem:[#allocation7 + $0x43c] ss:$48 sps:$4 sm:$0xff]  }
 0x11f   :  { %2735 = vmatprep.subr.bf16.mxu1 %v17115_v18  ;;  %v17190_v18 = vld [vmem:[#allocation7 + $0x4f4] ss:$48 sps:$4 sm:$0xff]  }
 0x121   :  { %2630 = vmatpush1.bf16.msra.mxu0 %v17104_v14  ;;  %v17184_v14 = vld [vmem:[#allocation7 + $0x494] ss:$48 sps:$4 sm:$0xff]  }
 0x122   :  { %2758 = vmatprep.subr.bf16.mxu0 %v17112_v17  ;;  %2736 = vmatpush1.bf16.msra.mxu1 %v17113_v22  ;;  %v17193_v17 = vld [vmem:[#allocation7 + $0x49c] ss:$48 sps:$4 sm:$0xff]  }
 0x123   :  { %2864 = vmatprep.subr.bf16.mxu1 %v17121_v26  ;;  %v17199_v22 = vld [vmem:[#allocation7 + $0x4fc] ss:$48 sps:$4 sm:$0xff]   ;;  %v17194_v26 = vld [vmem:[#allocation7 + $0x550] ss:$48 sps:$4 sm:$0xff]  }
 0x124   :  { %2632 = vmatmul.mubr.bf16.vlgmr.msra.gmra.mrb[0].mxu0 %v19065_v21 }
 0x125   :  { %2759 = vmatpush1.bf16.msra.mxu0 %v17110_v23  ;;  %2641 = vmatprep.mubr.bf16.mxu0 %v19067_v25  ;;  %v17196_v23 = vld [vmem:[#allocation7 + $0x554] ss:$48 sps:$4 sm:$0xff]  }
 0x126   :  { %2760 = vmatprep.subr.bf16.mxu0 %v17118_v24  ;;  %2738 = vmatmul.mubr.bf16.vlgmr.msra.gmra.mrb[0].mxu1 %v19065_v21  ;;  %v17197_v24 = vld [vmem:[#allocation7 + $0x4f8] ss:$48 sps:$4 sm:$0xff]  }
 0x127   :  { %2865 = vmatpush1.bf16.msra.mxu1 %v17119_v29  ;;  %2747 = vmatprep.mubr.bf16.mxu1 %v19067_v25  ;;  %v17202_v29 = vld [vmem:[#allocation7 + $0x5b4] ss:$48 sps:$4 sm:$0xff]  }
 0x128   :  { %2866 = vmatprep.subr.bf16.mxu1 %v17127_v33  ;;  %v17211_v33 = vld [vmem:[#allocation7 + $0x5bc] ss:$48 sps:$4 sm:$0xff]  }
 0x129   :  { %2761 = vmatpush1.bf16.msra.mxu0 %v17116_v27  ;;  %v17205_v27 = vld [vmem:[#allocation7 + $0x55c] ss:$48 sps:$4 sm:$0xff]  }
 0x12a   :  { %2762 = vmatprep.subr.bf16.mxu0 %v17124_v34  ;;  %v17208_v34 = vld [vmem:[#allocation7 + $0x614] ss:$48 sps:$4 sm:$0xff]  }
 0x12b   :  { %2867 = vmatpush1.bf16.msra.mxu1 %v17125_v36  ;;  %v17206_v36 = vld [vmem:[#allocation7 + $0x610] ss:$48 sps:$4 sm:$0xff]  }
 0x12c   :  { %2642 = vmatmul.mubr.bf16.gmra.mrb[4].mxu0 %v19072_v35  ;;  %2868 = vmatprep.subr.bf16.mxu1 %v17133_v38  ;;  %v17214_v38 = vld [vmem:[#allocation7 + $0x674] ss:$48 sps:$4 sm:$0xff]  }
 0x12d   :  { %2763 = vmatpush1.bf16.msra.mxu0 %v17122_v37  ;;  %2790 = vmatprep.mubr.bf16.mxu0 %v19045_v47  ;;  %v17209_v37 = vld [vmem:[#allocation7 + $0x5b8] ss:$48 sps:$4 sm:$0xff]  }
 0x12e   :  { %2764 = vmatprep.subr.bf16.mxu0 %v17130_v40  ;;  %2748 = vmatmul.mubr.bf16.gmra.mrb[4].mxu1 %v19072_v35  ;;  %v17217_v40 = vld [vmem:[#allocation7 + $0x61c] ss:$48 sps:$4 sm:$0xff]  }
 0x12f   :  { %2869 = vmatpush1.bf16.msra.mxu1 %v17131_v41  ;;  %2896 = vmatprep.mubr.bf16.mxu1 %v19045_v47  ;;  %v17215_v41 = vld [vmem:[#allocation7 + $0x618] ss:$48 sps:$4 sm:$0xff]  }
 0x130   :  { %2870 = vmatprep.subr.bf16.mxu1 %v17139_v43  ;;  %v17223_v43 = vld [vmem:[#allocation7 + $0x67c] ss:$48 sps:$4 sm:$0xff]  }
 0x131   :  { %2765 = vmatpush1.bf16.msra.mxu0 %v17128_v42  ;;  %v17212_v42 = vld [vmem:[#allocation7 + $0x670] ss:$48 sps:$4 sm:$0xff]  }
 0x132   :  { %2766 = vmatprep.subr.bf16.mxu0 %v17136_v44  ;;  %v17220_v44 = vld [vmem:[#allocation7 + $0x6d4] ss:$48 sps:$4 sm:$0xff]  }
 0x133   :  { %2871 = vmatpush1.bf16.msra.mxu1 %v17137_v45  ;;  %v17221_v45 = vld [vmem:[#allocation7 + $0x678] ss:$48 sps:$4 sm:$0xff]  }
 0x134   :  { %2872 = vmatprep.subr.bf16.mxu1 %v17145_v48  ;;  %v17229_v48 = vld [vmem:[#allocation7 + $0x6dc] ss:$48 sps:$4 sm:$0xff]  }
 0x135   :  { %2767 = vmatpush1.bf16.msra.mxu0 %v17134_v46  ;;  %v17218_v46 = vld [vmem:[#allocation7 + $0x6d0] ss:$48 sps:$4 sm:$0xff]  }
 0x136   :  { %2768 = vmatprep.subr.bf16.mxu0 %v17142_v49  ;;  %v17226_v49 = vld [vmem:[#allocation7 + $0x734] ss:$48 sps:$4 sm:$0xff]  }
 0x137   :  { %2873 = vmatpush1.bf16.msra.mxu1 %v17143_v50  ;;  %v17227_v50 = vld [vmem:[#allocation7 + $0x6d8] ss:$48 sps:$4 sm:$0xff]  }
 0x138   :  { %2874 = vmatprep.subr.bf16.mxu1 %v17151_v52  ;;  %v17235_v52 = vld [vmem:[#allocation7 + $0x73c] ss:$48 sps:$4 sm:$0xff]  }
 0x139   :  { %2769 = vmatpush1.bf16.msra.mxu0 %v17140_v51  ;;  %v17224_v51 = vld [vmem:[#allocation7 + $0x730] ss:$48 sps:$4 sm:$0xff]  }
 0x13a   :  { %2770 = vmatprep.subr.bf16.mxu0 %v17148_v53  ;;  %v17232_v53 = vld [vmem:[#allocation7 + $0x794] ss:$48 sps:$4 sm:$0xff]  }
 0x13b   :  { %2875 = vmatpush1.bf16.msra.mxu1 %v17149_v54  ;;  %v17233_v54 = vld [vmem:[#allocation7 + $0x738] ss:$48 sps:$4 sm:$0xff]  }
 0x13c   :  { %2876 = vmatprep.subr.bf16.mxu1 %v17157_v56  ;;  %v17241_v56 = vld [vmem:[#allocation7 + $0x79c] ss:$48 sps:$4 sm:$0xff]  }
 0x13d   :  { %2771 = vmatpush1.bf16.msra.mxu0 %v17146_v55  ;;  %v17230_v55 = vld [vmem:[#allocation7 + $0x790] ss:$48 sps:$4 sm:$0xff]  }
 0x13e   :  { %2772 = vmatprep.subr.bf16.mxu0 %v17154_v57  ;;  %v17238_v57 = vld [vmem:[#allocation7 + $0x7f4] ss:$48 sps:$4 sm:$0xff]  }
 0x13f   :  { %2877 = vmatpush1.bf16.msra.mxu1 %v17155_v58  ;;  %v17239_v58 = vld [vmem:[#allocation7 + $0x798] ss:$48 sps:$4 sm:$0xff]  }
 0x140   :  { %2878 = vmatprep.subr.bf16.mxu1 %v17163_v60  ;;  %v17244_v60 = vld [vmem:[#allocation7 + $0x854] ss:$48 sps:$4 sm:$0xff]  }
 0x141   :  { %2773 = vmatpush1.bf16.msra.mxu0 %v17152_v59  ;;  %v17236_v59 = vld [vmem:[#allocation7 + $0x7f0] ss:$48 sps:$4 sm:$0xff]  }
 0x142   :  { %2774 = vmatprep.subr.bf16.mxu0 %v17160_v61  ;;  %v17247_v61 = vld [vmem:[#allocation7 + $0x7fc] ss:$48 sps:$4 sm:$0xff]  }
 0x143   :  { %2879 = vmatpush1.bf16.msra.mxu1 %v17161_v62  ;;  %v17245_v62 = vld [vmem:[#allocation7 + $0x7f8] ss:$48 sps:$4 sm:$0xff]  }
 0x144   :  { %2880 = vmatprep.subr.bf16.mxu1 %v17169_v0  ;;  %v17250_v0 = vld [vmem:[#allocation7 + $0x8b4] ss:$48 sps:$4 sm:$0xff]  }
 0x145   :  { %2775 = vmatpush1.bf16.msra.mxu0 %v17158_v63  ;;  %v17242_v63 = vld [vmem:[#allocation7 + $0x850] ss:$48 sps:$4 sm:$0xff]  }
 0x146   :  { %2776 = vmatprep.subr.bf16.mxu0 %v17166_v1  ;;  %v17253_v1 = vld [vmem:[#allocation7 + $0x85c] ss:$48 sps:$4 sm:$0xff]  }
 0x147   :  { %2881 = vmatpush1.bf16.msra.mxu1 %v17167_v2  ;;  %v17251_v2 = vld [vmem:[#allocation7 + $0x858] ss:$48 sps:$4 sm:$0xff]  }
 0x148   :  { %2882 = vmatprep.subr.bf16.mxu1 %v17175_v4  ;;  %v17256_v4 = vld [vmem:[#allocation7 + $0x914] ss:$48 sps:$4 sm:$0xff]  }
 0x149   :  { %2777 = vmatpush1.bf16.msra.mxu0 %v17164_v3  ;;  %v17248_v3 = vld [vmem:[#allocation7 + $0x8b0] ss:$48 sps:$4 sm:$0xff]  }
 0x14a   :  { %2778 = vmatprep.subr.bf16.mxu0 %v17172_v6  ;;  %v17259_v6 = vld [vmem:[#allocation7 + $0x8bc] ss:$48 sps:$4 sm:$0xff]  }
 0x14b   :  { %2883 = vmatpush1.bf16.msra.mxu1 %v17173_v7  ;;  %v17257_v7 = vld [vmem:[#allocation7 + $0x8b8] ss:$48 sps:$4 sm:$0xff]  }
 0x14c   :  { %2884 = vmatprep.subr.bf16.mxu1 %v17181_v9  ;;  %v17265_v9 = vld [vmem:[#allocation7 + $0x91c] ss:$48 sps:$4 sm:$0xff]  }
 0x14d   :  { %2779 = vmatpush1.bf16.msra.mxu0 %v17170_v8  ;;  %v17254_v8 = vld [vmem:[#allocation7 + $0x910] ss:$48 sps:$4 sm:$0xff]  }
 0x14e   :  { %2780 = vmatprep.subr.bf16.mxu0 %v17178_v10  ;;  %v17262_v10 = vld [vmem:[#allocation7 + $0x974] ss:$48 sps:$4 sm:$0xff]  }
 0x14f   :  { %2885 = vmatpush1.bf16.msra.mxu1 %v17179_v11  ;;  %v17263_v11 = vld [vmem:[#allocation7 + $0x918] ss:$48 sps:$4 sm:$0xff]  }
 0x150   :  { %2886 = vmatprep.subr.bf16.mxu1 %v17187_v13  ;;  %v17271_v13 = vld [vmem:[#allocation7 + $0x97c] ss:$48 sps:$4 sm:$0xff]  }
 0x151   :  { %2781 = vmatpush1.bf16.msra.mxu0 %v17176_v12  ;;  %v17260_v12 = vld [vmem:[#allocation7 + $0x970] ss:$48 sps:$4 sm:$0xff]  }
 0x152   :  { %2782 = vmatprep.subr.bf16.mxu0 %v17184_v14  ;;  %v17268_v14 = vld [vmem:[#allocation7 + $0x9d4] ss:$48 sps:$4 sm:$0xff]  }
 0x153   :  { %2887 = vmatpush1.bf16.msra.mxu1 %v17185_v15  ;;  %v17269_v15 = vld [vmem:[#allocation7 + $0x978] ss:$48 sps:$4 sm:$0xff]  }
 0x154   :  { %2888 = vmatprep.subr.bf16.mxu1 %v17193_v17  ;;  %v17277_v17 = vld [vmem:[#allocation7 + $0x9dc] ss:$48 sps:$4 sm:$0xff]  }
 0x155   :  { %2783 = vmatpush1.bf16.msra.mxu0 %v17182_v16  ;;  %v17266_v16 = vld [vmem:[#allocation7 + $0x9d0] ss:$48 sps:$4 sm:$0xff]  }
 0x156   :  { %2784 = vmatprep.subr.bf16.mxu0 %v17190_v18  ;;  %v17274_v18 = vld [vmem:[#allocation7 + $0xa34] ss:$48 sps:$4 sm:$0xff]  }
 0x157   :  { %2889 = vmatpush1.bf16.msra.mxu1 %v17191_v19  ;;  %v17275_v19 = vld [vmem:[#allocation7 + $0x9d8] ss:$48 sps:$4 sm:$0xff]  }
 0x158   :  { %2890 = vmatprep.subr.bf16.mxu1 %v17199_v22  ;;  %v17280_v22 = vld [vmem:[#allocation7 + $0xa94] ss:$48 sps:$4 sm:$0xff]  }
 0x159   :  { %2785 = vmatpush1.bf16.msra.mxu0 %v17188_v20  ;;  %v17272_v20 = vld [vmem:[#allocation7 + $0xa30] ss:$48 sps:$4 sm:$0xff]  }
 0x15a   :  { %2786 = vmatprep.subr.bf16.mxu0 %v17196_v23  ;;  %v17283_v23 = vld [vmem:[#allocation7 + $0xa3c] ss:$48 sps:$4 sm:$0xff]  }
 0x15b   :  { %2891 = vmatpush1.bf16.msra.mxu1 %v17197_v24  ;;  %v17281_v24 = vld [vmem:[#allocation7 + $0xa38] ss:$48 sps:$4 sm:$0xff]  }
 0x15c   :  { %2892 = vmatprep.subr.bf16.mxu1 %v17205_v27  ;;  %v17286_v27 = vld [vmem:[#allocation7 + $0xaf4] ss:$48 sps:$4 sm:$0xff]  }
 0x15d   :  { %2787 = vmatpush1.bf16.msra.mxu0 %v17194_v26  ;;  %v17278_v26 = vld [vmem:[#allocation7 + $0xa90] ss:$48 sps:$4 sm:$0xff]  }
 0x15e   :  { %2788 = vmatprep.subr.bf16.mxu0 %v17202_v29  ;;  %v17289_v29 = vld [vmem:[#allocation7 + $0xa9c] ss:$48 sps:$4 sm:$0xff]  }
 0x15f   :  { %2893 = vmatpush1.bf16.msra.mxu1 %v17203_v30  ;;  %v17287_v30 = vld [vmem:[#allocation7 + $0xa98] ss:$48 sps:$4 sm:$0xff]  }
 0x160   :  { %2894 = vmatprep.subr.bf16.mxu1 %v17211_v33  ;;  %v17292_v33 = vld [vmem:[#allocation7 + $0xb54] ss:$48 sps:$4 sm:$0xff]  }
 0x161   :  { %2789 = vmatpush1.bf16.msra.mxu0 %v17200_v31  ;;  %v17284_v31 = vld [vmem:[#allocation7 + $0xaf0] ss:$48 sps:$4 sm:$0xff]  }
 0x162   :  { %2811 = vmatprep.subr.bf16.mxu0 %v17208_v34  ;;  %v17295_v34 = vld [vmem:[#allocation7 + $0xafc] ss:$48 sps:$4 sm:$0xff]  }
 0x163   :  { %2895 = vmatpush1.bf16.msra.mxu1 %v17209_v37  ;;  %v17290_v37 = vld [vmem:[#allocation7 + $0xb50] ss:$48 sps:$4 sm:$0xff]  }
 0x164   :  { %2791 = vmatmul.mubr.bf16.vlgmr.msra.gmra.mrb[8].mxu0 %v19049_v5  ;;  %2917 = vmatprep.subr.bf16.mxu1 %v17217_v40  ;;  %v17301_v40 = vld [vmem:[#allocation7 + $0xb5c] ss:$48 sps:$4 sm:$0xff]  }
 0x165   :  { %2812 = vmatpush1.bf16.msra.mxu0 %v17206_v36  ;;  %2800 = vmatprep.mubr.bf16.mxu0 %v19053_v28  ;;  %v17293_v36 = vld [vmem:[#allocation7 + $0xaf8] ss:$48 sps:$4 sm:$0xff]  }
 0x166   :  { %2813 = vmatprep.subr.bf16.mxu0 %v17214_v38  ;;  %2897 = vmatmul.mubr.bf16.vlgmr.msra.gmra.mrb[8].mxu1 %v19049_v5  ;;  %v17298_v38 = vld [vmem:[#allocation7 + $0xbb4] ss:$48 sps:$4 sm:$0xff]  }
 0x167   :  { %2918 = vmatpush1.bf16.msra.mxu1 %v17215_v41  ;;  %2906 = vmatprep.mubr.bf16.mxu1 %v19053_v28  ;;  %v17299_v41 = vld [vmem:[#allocation7 + $0xb58] ss:$48 sps:$4 sm:$0xff]  }
 0x168   :  { %2919 = vmatprep.subr.bf16.mxu1 %v17223_v43  ;;  %v17304_v43 = vld [vmem:[#allocation7 + $0xbbc] ss:$48 sps:$4 sm:$0xff]  }
 0x169   :  { %2814 = vmatpush1.bf16.msra.mxu0 %v17212_v42  ;;  %v17296_v42 = vld [vmem:[#allocation7 + $0xbb0] ss:$48 sps:$4 sm:$0xff]  }
 0x16a   :  { %2815 = vmatprep.subr.bf16.mxu0 %v17220_v44  ;;  %v17307_v44 = vld [vmem:[#allocation7 + $0x24] ss:$48 sps:$4 sm:$0xff]  }
 0x16b   :  { %2920 = vmatpush1.bf16.msra.mxu1 %v17221_v45  ;;  %v17302_v45 = vld [vmem:[#allocation7 + $0xbb8] ss:$48 sps:$4 sm:$0xff]  }
 0x16c   :  { %2801 = vmatmul.mubr.bf16.gmra.mrb[12].mxu0 %v19056_v32  ;;  %2921 = vmatprep.subr.bf16.mxu1 %v17229_v48  ;;  %v17310_v48 = vld [vmem:[#allocation7 + $0x84] ss:$48 sps:$4 sm:$0xff]  }
 0x16d   :  { %2816 = vmatpush1.bf16.msra.mxu0 %v17218_v46  ;;  %2843 = vmatprep.mubr.bf16.mxu0 %v19060_v39  ;;  %v17305_v46 = vld [vmem:[#allocation7 + $0x20] ss:$48 sps:$4 sm:$0xff]  }
 0x16e   :  { %2817 = vmatprep.subr.bf16.mxu0 %v17226_v49  ;;  %2907 = vmatmul.mubr.bf16.gmra.mrb[12].mxu1 %v19056_v32  ;;  %v17308_v49 = vld [vmem:[#allocation7 + $0x80] ss:$48 sps:$4 sm:$0xff]  }
 0x16f   :  { %2922 = vmatpush1.bf16.msra.mxu1 %v17227_v50  ;;  %2949 = vmatprep.mubr.bf16.mxu1 %v19060_v39  ;;  %v17313_v50 = vld [vmem:[#allocation7 + $0xe4] ss:$48 sps:$4 sm:$0xff]  }
 0x170   :  { %2923 = vmatprep.subr.bf16.mxu1 %v17235_v52  ;;  %v17316_v52 = vld [vmem:[#allocation7 + $0x144] ss:$48 sps:$4 sm:$0xff]  }
 0x171   :  { %2818 = vmatpush1.bf16.msra.mxu0 %v17224_v51  ;;  %v17311_v51 = vld [vmem:[#allocation7 + $0xe0] ss:$48 sps:$4 sm:$0xff]  }
 0x172   :  { %2819 = vmatprep.subr.bf16.mxu0 %v17232_v53  ;;  %v17314_v53 = vld [vmem:[#allocation7 + $0x140] ss:$48 sps:$4 sm:$0xff]  }
 0x173   :  { %2924 = vmatpush1.bf16.msra.mxu1 %v17233_v54  ;;  %v17319_v54 = vld [vmem:[#allocation7 + $0x1a4] ss:$48 sps:$4 sm:$0xff]  }
 0x174   :  { %2925 = vmatprep.subr.bf16.mxu1 %v17241_v56  ;;  %v17322_v56 = vld [vmem:[#allocation7 + $0x204] ss:$48 sps:$4 sm:$0xff]  }
 0x175   :  { %2820 = vmatpush1.bf16.msra.mxu0 %v17230_v55  ;;  %v17317_v55 = vld [vmem:[#allocation7 + $0x1a0] ss:$48 sps:$4 sm:$0xff]  }
 0x176   :  { %2821 = vmatprep.subr.bf16.mxu0 %v17238_v57  ;;  %v17320_v57 = vld [vmem:[#allocation7 + $0x200] ss:$48 sps:$4 sm:$0xff]  }
 0x177   :  { %2926 = vmatpush1.bf16.msra.mxu1 %v17239_v58  ;;  %v17325_v58 = vld [vmem:[#allocation7 + $0x264] ss:$48 sps:$4 sm:$0xff]  }
 0x178   :  { %2927 = vmatprep.subr.bf16.mxu1 %v17247_v61  ;;  %v17326_v61 = vld [vmem:[#allocation7 + $0x2c0] ss:$48 sps:$4 sm:$0xff]  }
 0x179   :  { %2822 = vmatpush1.bf16.msra.mxu0 %v17236_v59  ;;  %v17323_v59 = vld [vmem:[#allocation7 + $0x260] ss:$48 sps:$4 sm:$0xff]  }
 0x17a   :  { %2823 = vmatprep.subr.bf16.mxu0 %v17244_v60  ;;  %v17328_v60 = vld [vmem:[#allocation7 + $0x2c4] ss:$48 sps:$4 sm:$0xff]  }
 0x17b   :  { %2928 = vmatpush1.bf16.msra.mxu1 %v17245_v62  ;;  %v17331_v62 = vld [vmem:[#allocation7 + $0x324] ss:$48 sps:$4 sm:$0xff]  }
 0x17c   :  { %2929 = vmatprep.subr.bf16.mxu1 %v17253_v1  ;;  %v17332_v1 = vld [vmem:[#allocation7 + $0x380] ss:$48 sps:$4 sm:$0xff]  }
 0x17d   :  { %2824 = vmatpush1.bf16.msra.mxu0 %v17242_v63  ;;  %v17329_v63 = vld [vmem:[#allocation7 + $0x320] ss:$48 sps:$4 sm:$0xff]  }
 0x17e   :  { %2825 = vmatprep.subr.bf16.mxu0 %v17250_v0  ;;  %v17334_v0 = vld [vmem:[#allocation7 + $0x384] ss:$48 sps:$4 sm:$0xff]  }
 0x17f   :  { %2930 = vmatpush1.bf16.msra.mxu1 %v17251_v2  ;;  %v17335_v2 = vld [vmem:[#allocation7 + $0x3e0] ss:$48 sps:$4 sm:$0xff]  }
 0x180   :  { %2931 = vmatprep.subr.bf16.mxu1 %v17259_v6  ;;  %v17343_v6 = vld [vmem:[#allocation7 + $0x4a4] ss:$48 sps:$4 sm:$0xff]  }
 0x181   :  { %2826 = vmatpush1.bf16.msra.mxu0 %v17248_v3  ;;  %v17340_v3 = vld [vmem:[#allocation7 + $0x444] ss:$48 sps:$4 sm:$0xff]  }
 0x182   :  { %2827 = vmatprep.subr.bf16.mxu0 %v17256_v4  ;;  %v17338_v4 = vld [vmem:[#allocation7 + $0x440] ss:$48 sps:$4 sm:$0xff]  }
 0x183   :  { %2932 = vmatpush1.bf16.msra.mxu1 %v17257_v7  ;;  %v17341_v7 = vld [vmem:[#allocation7 + $0x4a0] ss:$48 sps:$4 sm:$0xff]  }
 0x184   :  { %2933 = vmatprep.subr.bf16.mxu1 %v17265_v9  ;;  %v17344_v9 = vld [vmem:[#allocation7 + $0x500] ss:$48 sps:$4 sm:$0xff]  }
 0x185   :  { %2828 = vmatpush1.bf16.msra.mxu0 %v17254_v8  ;;  %v17346_v8 = vld [vmem:[#allocation7 + $0x504] ss:$48 sps:$4 sm:$0xff]  }
 0x186   :  { %2829 = vmatprep.subr.bf16.mxu0 %v17262_v10  ;;  %v17349_v10 = vld [vmem:[#allocation7 + $0x564] ss:$48 sps:$4 sm:$0xff]  }
 0x187   :  { %2934 = vmatpush1.bf16.msra.mxu1 %v17263_v11  ;;  %v17347_v11 = vld [vmem:[#allocation7 + $0x560] ss:$48 sps:$4 sm:$0xff]  }
 0x188   :  { %2935 = vmatprep.subr.bf16.mxu1 %v17271_v13  ;;  %v17350_v13 = vld [vmem:[#allocation7 + $0x5c0] ss:$48 sps:$4 sm:$0xff]  }
 0x189   :  { %2830 = vmatpush1.bf16.msra.mxu0 %v17260_v12  ;;  %v17352_v12 = vld [vmem:[#allocation7 + $0x5c4] ss:$48 sps:$4 sm:$0xff]  }
 0x18a   :  { %2831 = vmatprep.subr.bf16.mxu0 %v17268_v14  ;;  %v17355_v14 = vld [vmem:[#allocation7 + $0x624] ss:$48 sps:$4 sm:$0xff]  }
 0x18b   :  { %2936 = vmatpush1.bf16.msra.mxu1 %v17269_v15  ;;  %v17353_v15 = vld [vmem:[#allocation7 + $0x620] ss:$48 sps:$4 sm:$0xff]  }
 0x18c   :  { %2937 = vmatprep.subr.bf16.mxu1 %v17277_v17  ;;  %v17356_v17 = vld [vmem:[#allocation7 + $0x680] ss:$48 sps:$4 sm:$0xff]  }
 0x18d   :  { %2832 = vmatpush1.bf16.msra.mxu0 %v17266_v16  ;;  %v17358_v16 = vld [vmem:[#allocation7 + $0x684] ss:$48 sps:$4 sm:$0xff]  }
 0x18e   :  { %2833 = vmatprep.subr.bf16.mxu0 %v17274_v18  ;;  %v17361_v18 = vld [vmem:[#allocation7 + $0x6e4] ss:$48 sps:$4 sm:$0xff]  }
 0x18f   :  { %2938 = vmatpush1.bf16.msra.mxu1 %v17275_v19  ;;  %v17359_v19 = vld [vmem:[#allocation7 + $0x6e0] ss:$48 sps:$4 sm:$0xff]  }
 0x190   :  { %2939 = vmatprep.subr.bf16.mxu1 %v17283_v23  ;;  %v17362_v23 = vld [vmem:[#allocation7 + $0x740] ss:$48 sps:$4 sm:$0xff]  }
 0x191   :  { %2834 = vmatpush1.bf16.msra.mxu0 %v17272_v20  ;;  %v17364_v20 = vld [vmem:[#allocation7 + $0x744] ss:$48 sps:$4 sm:$0xff]  }
 0x192   :  { %2835 = vmatprep.subr.bf16.mxu0 %v17280_v22  ;;  %v566_v22 = vlaneseq }
 0x193   :  { %2940 = vmatpush1.bf16.msra.mxu1 %v17281_v24  ;;  %v17367_v24 = vld [vmem:[#allocation7 + $0x7a4] ss:$48 sps:$4 sm:$0xff]  }
 0x194   :  { %2941 = vmatprep.subr.bf16.mxu1 %v17289_v29  ;;  %v17370_v29 = vld [vmem:[#allocation7 + $0x804] ss:$48 sps:$4 sm:$0xff]  }
 0x195   :  { %2836 = vmatpush1.bf16.msra.mxu0 %v17278_v26  ;;  %v19099_v26 = vshrl.u32 %v566_v22, 7 }
 0x196   :  { %2837 = vmatprep.subr.bf16.mxu0 %v17286_v27  ;;  %v17365_v27 = vld [vmem:[#allocation7 + $0x7a0] ss:$48 sps:$4 sm:$0xff]  }
 0x197   :  { %2942 = vmatpush1.bf16.msra.mxu1 %v17287_v30  ;;  %v562_v30 = vld [vmem:[#allocation8] sm:$0xff] }
 0x198   :  { %2943 = vmatprep.subr.bf16.mxu1 %v17295_v34  ;;  %v19108_v34 = vsub.s32 2, %v19099_v26 }
 0x199   :  { %2838 = vmatpush1.bf16.msra.mxu0 %v17284_v31  ;;  %v19102_v31 = vsub.s32 0, %v19099_v26 }
 0x19a   :  { %2839 = vmatprep.subr.bf16.mxu0 %v17292_v33  ;;  %v19105_v33 = vsub.s32 1, %v19099_v26 }
 0x19b   :  { %2944 = vmatpush1.bf16.msra.mxu1 %v17293_v36  ;;  %v17368_v36 = vld [vmem:[#allocation7 + $0x800] ss:$48 sps:$4 sm:$0xff]  }
 0x19c   :  { %2945 = vmatprep.subr.bf16.mxu1 %v17301_v40  ;;  %v569_v40 = vrot.slane %v562_v30, %v19102_v31 }
 0x19d   :  { %2840 = vmatpush1.bf16.msra.mxu0 %v17290_v37  ;;  %v19111_v37 = vsub.s32 3, %v19099_v26 }
 0x19e   :  { %2841 = vmatprep.subr.bf16.mxu0 %v17298_v38  ;;  %v17373_v38 = vld [vmem:[#allocation7 + $0x864] ss:$48 sps:$4 sm:$0xff]  }
 0x19f   :  { %2946 = vmatpush1.bf16.msra.mxu1 %v17299_v41 }
 0x1a0   :  { %2947 = vmatprep.subr.bf16.mxu1 %v17304_v43  ;;  %v577_v43 = vrot.slane %v562_v30, %v19108_v34 }
 0x1a1   :  { %2842 = vmatpush1.bf16.msra.mxu0 %v17296_v42  ;;  %v573_v42 = vrot.slane %v562_v30, %v19105_v33 }
 0x1a2   :  { %2970 = vmatprep.subr.bf16.mxu0 %v17307_v44  ;;  %v17371_v44 = vld [vmem:[#allocation7 + $0x860] ss:$48 sps:$4 sm:$0xff]  }
 0x1a3   :  { %2948 = vmatpush1.bf16.msra.mxu1 %v17302_v45 }
 0x1a4   :  { %2844 = vmatmul.mubr.bf16.vlgmr.msra.gmra.mrb[8].mxu0 %v19065_v21 }
 0x1a5   :  { %2853 = vmatprep.mubr.bf16.mxu0 %v19067_v25  ;;  %2971 = vmatpush1.bf16.msra.mxu0 %v17305_v46  ;;  %v581_v46 = vrot.slane %v562_v30, %v19111_v37 }
 0x1a6   :  { %2972 = vmatprep.subr.bf16.mxu0 %v17310_v48  ;;  %2950 = vmatmul.mubr.bf16.vlgmr.msra.gmra.mrb[8].mxu1 %v19065_v21  ;;  %v17376_v48 = vld [vmem:[#allocation7 + $0x8c4] ss:$48 sps:$4 sm:$0xff]  }
 0x1a7   :  { %2959 = vmatprep.mubr.bf16.mxu1 %v19067_v25 }
 0x1a9   :  { %2973 = vmatpush1.bf16.msra.mxu0 %v17308_v49 }
 0x1aa   :  { %2974 = vmatprep.subr.bf16.mxu0 %v17313_v50 }
 0x1ac   :  { %2854 = vmatmul.mubr.bf16.gmra.mrb[12].mxu0 %v19072_v35 }
 0x1ad   :  { %2975 = vmatpush1.bf16.msra.mxu0 %v17311_v51  ;;  %3002 = vmatprep.mubr.bf16.mxu0 %v19045_v47 }
 0x1ae   :  { %2976 = vmatprep.subr.bf16.mxu0 %v17316_v52  ;;  %2960 = vmatmul.mubr.bf16.gmra.mrb[12].mxu1 %v19072_v35 }
 0x1af   :  { %3108 = vmatprep.mubr.bf16.mxu1 %v19045_v47  ;;  %v17337_v47 = vld [vmem:[#allocation7 + $0x3e4] ss:$48 sps:$4 sm:$0xff]  }
 0x1b1   :  { %2977 = vmatpush1.bf16.msra.mxu0 %v17314_v53 }
 0x1b2   :  { %2978 = vmatprep.subr.bf16.mxu0 %v17319_v54 }
 0x1b5   :  { %2979 = vmatpush1.bf16.msra.mxu0 %v17317_v55 }
 0x1b6   :  { %2980 = vmatprep.subr.bf16.mxu0 %v17322_v56 }
 0x1b9   :  { %2981 = vmatpush1.bf16.msra.mxu0 %v17320_v57 }
 0x1ba   :  { %2982 = vmatprep.subr.bf16.mxu0 %v17325_v58  ;;  %v17374_v58 = vld [vmem:[#allocation7 + $0x8c0] ss:$48 sps:$4 sm:$0xff]  }
 0x1bd   :  { %2983 = vmatpush1.bf16.msra.mxu0 %v17323_v59 }
 0x1be   :  { %2984 = vmatprep.subr.bf16.mxu0 %v17328_v60 }
 0x1c1   :  { %2985 = vmatpush1.bf16.msra.mxu0 %v17326_v61  ;;  %v17379_v61 = vld [vmem:[#allocation7 + $0x924] ss:$48 sps:$4 sm:$0xff]  }
 0x1c2   :  { %2986 = vmatprep.subr.bf16.mxu0 %v17331_v62 }
 0x1c5   :  { %2987 = vmatpush1.bf16.msra.mxu0 %v17329_v63 }
 0x1c6   :  { %2988 = vmatprep.subr.bf16.mxu0 %v17334_v0 }
 0x1c9   :  { %2989 = vmatpush1.bf16.msra.mxu0 %v17332_v1 }
 0x1ca   :  { %2990 = vmatprep.subr.bf16.mxu0 %v17337_v47 }
 0x1cd   :  { %2991 = vmatpush1.bf16.msra.mxu0 %v17335_v2 }
 0x1ce   :  { %2992 = vmatprep.subr.bf16.mxu0 %v17340_v3  ;;  %v17377_v3 = vld [vmem:[#allocation7 + $0x920] ss:$48 sps:$4 sm:$0xff]  }
 0x1d1   :  { %2993 = vmatpush1.bf16.msra.mxu0 %v17338_v4 }
 0x1d2   :  { %2994 = vmatprep.subr.bf16.mxu0 %v17343_v6 }
 0x1d5   :  { %2995 = vmatpush1.bf16.msra.mxu0 %v17341_v7  ;;  %v17382_v7 = vld [vmem:[#allocation7 + $0x984] ss:$48 sps:$4 sm:$0xff]  }
 0x1d6   :  { %2996 = vmatprep.subr.bf16.mxu0 %v17346_v8 }
 0x1d9   :  { %2997 = vmatpush1.bf16.msra.mxu0 %v17344_v9 }
 0x1da   :  { %2998 = vmatprep.subr.bf16.mxu0 %v17349_v10 }
 0x1dd   :  { %2999 = vmatpush1.bf16.msra.mxu0 %v17347_v11 }
 0x1de   :  { %3000 = vmatprep.subr.bf16.mxu0 %v17352_v12 }
 0x1e1   :  { %3001 = vmatpush1.bf16.msra.mxu0 %v17350_v13 }
 0x1e2   :  { %3023 = vmatprep.subr.bf16.mxu0 %v17355_v14 }
 0x1e4   :  { %3003 = vmatmul.mubr.bf16.vlgmr.msra.gmra.mrb[16].mxu0 %v19049_v5 }
 0x1e5   :  { %3024 = vmatpush1.bf16.msra.mxu0 %v17353_v15  ;;  %3012 = vmatprep.mubr.bf16.mxu0 %v19053_v28 }
 0x1e6   :  { %3025 = vmatprep.subr.bf16.mxu0 %v17358_v16  ;;  %v17380_v16 = vld [vmem:[#allocation7 + $0x980] ss:$48 sps:$4 sm:$0xff]  }
 0x1e9   :  { %3026 = vmatpush1.bf16.msra.mxu0 %v17356_v17 }
 0x1ea   :  { %3027 = vmatprep.subr.bf16.mxu0 %v17361_v18 }
 0x1ec   :  { %3013 = vmatmul.mubr.bf16.gmra.mrb[20].mxu0 %v19056_v32 }
 0x1ed   :  { %3028 = vmatpush1.bf16.msra.mxu0 %v17359_v19  ;;  %3055 = vmatprep.mubr.bf16.mxu0 %v19060_v39  ;;  %v17385_v19 = vld [vmem:[#allocation7 + $0x9e4] ss:$48 sps:$4 sm:$0xff]  }
 0x1ee   :  { %3029 = vmatprep.subr.bf16.mxu0 %v17364_v20 }
 0x1f1   :  { %3030 = vmatpush1.bf16.msra.mxu0 %v17362_v23 }
 0x1f2   :  { %3031 = vmatprep.subr.bf16.mxu0 %v17367_v24 }
 0x1f5   :  { %3032 = vmatpush1.bf16.msra.mxu0 %v17365_v27 }
 0x1f6   :  { %3033 = vmatprep.subr.bf16.mxu0 %v17370_v29 }
 0x1f7   :  { %v2633_v41 = vpop.f32.mrb[0].mxu0 }
 0x1f8   :  { %v2635_v45 = vpop.f32.mrb[1].mxu0  ;;  %v16475_v50 = vadd.f32 %v2633_v41, %v569_v40 }
 0x1f9   :  { %v2637_v49 = vpop.f32.mrb[2].mxu0  ;;  %3034 = vmatpush1.bf16.msra.mxu0 %v17368_v36  ;;  %v2739_v53 = vpop.f32.mrb[0].mxu1  ;;  %v16476_v54 = vadd.f32 %v2635_v45, %v573_v42  ;;  %v17383_v36 = vld [vmem:[#allocation7 + $0x9e0] ss:$48 sps:$4 sm:$0xff]  }
 0x1fa   :  { %v16477_v51 = vadd.f32 %v2637_v49, %v569_v40  ;;  %v2639_v52 = vpop.f32.mrb[3].mxu0  ;;  %3035 = vmatprep.subr.bf16.mxu0 %v17373_v38  ;;  %v16483_v56 = vadd.f32 %v2739_v53, %v577_v43  ;;  %v2741_v57 = vpop.f32.mrb[1].mxu1  ;;  %v17389_v45 = vld [vmem:[#allocation7 + $0xaa0] ss:$48 sps:$4 sm:$0xff]   ;;  %v17397_v49 = vld [vmem:[#allocation7 + $0xb64] ss:$48 sps:$4 sm:$0xff]  }
 0x1fb   :  { %v16478_v55 = vadd.f32 %v2639_v52, %v573_v42  ;;  %v16484_v59 = vadd.f32 %v2741_v57, %v581_v46  ;;  %v2743_v60 = vpop.f32.mrb[2].mxu1  ;;  %v17403_v52 = vld [vmem:[#allocation7 + $0x2c] ss:$48 sps:$4 sm:$0xff]   ;;  %v18874_v57 = vmov 0.0  }
 0x1fc   :  { %v19117_v62 = vpack.c.bf16 %v16477_v51, %v16475_v50  ;;  %v16485_v63 = vadd.f32 %v2743_v60, %v577_v43  ;;  %v2745_v0 = vpop.f32.mrb[3].mxu1  ;;  %v17400_v50 = vld [vmem:[#allocation7 + $0xbc4] ss:$48 sps:$4 sm:$0xff]   ;;  %v17401_v51 = vld [vmem:[#allocation7 + $0x28] ss:$48 sps:$4 sm:$0xff]   ;;  %3076 = vmatprep.subr.bf16.mxu1 %v17403_v52 }
 0x1fd   :  { %3036 = vmatpush1.bf16.msra.mxu0 %v17371_v44  ;;  %v19119_v1 = vpack.c.bf16 %v16478_v55, %v16476_v54  ;;  %v16486_v47 = vadd.f32 %v2745_v0, %v581_v46  ;;  %v17391_v44 = vld [vmem:[#allocation7 + $0xaa4] ss:$48 sps:$4 sm:$0xff]   ;;  %v17406_v53 = vld [vmem:[#allocation7 + $0x8c] ss:$48 sps:$4 sm:$0xff]   ;;  %v17398_v54 = vld [vmem:[#allocation7 + $0xbc0] ss:$48 sps:$4 sm:$0xff]   ;;  %3077 = vmatpush1.bf16.msra.mxu1 %v17401_v51 }
 0x1fe   :  { %3037 = vmatprep.subr.bf16.mxu0 %v17376_v48  ;;  %v19121_v4 = vpack.c.bf16 %v16485_v63, %v16483_v56  ;;  %v17394_v48 = vld [vmem:[#allocation7 + $0xb04] ss:$48 sps:$4 sm:$0xff]   ;;  %v17404_v55 = vld [vmem:[#allocation7 + $0x88] ss:$48 sps:$4 sm:$0xff]   ;;  %3078 = vmatprep.subr.bf16.mxu1 %v17406_v53  ;;  %v17409_v56 = vld [vmem:[#allocation7 + $0xec] ss:$48 sps:$4 sm:$0xff]  }
 0x1ff   :  { %v2643_v2 = vpop.f32.mrb[4].mxu0  ;;  %v19123_v8 = vpack.c.bf16 %v16486_v47, %v16484_v59  ;;  %v17412_v59 = vld [vmem:[#allocation7 + $0x14c] ss:$48 sps:$4 sm:$0xff]   ;;  %v17410_v60 = vld [vmem:[#allocation7 + $0x148] ss:$48 sps:$4 sm:$0xff]   ;;  %v19153_v51 = vsub.s32 7, %v19099_v26 }
 0x200   :  { %v2645_v6 = vpop.f32.mrb[5].mxu0  ;;  %v16479_v10 = vadd.f32 %v2643_v2, %v569_v40  ;;  %v17413_v63 = vld [vmem:[#allocation7 + $0x1a8] ss:$48 sps:$4 sm:$0xff]   ;;  %v17418_v0 = vld [vmem:[#allocation7 + $0x20c] ss:$48 sps:$4 sm:$0xff]  }
 0x201   :  { %v2647_v9 = vpop.f32.mrb[6].mxu0  ;;  %3038 = vmatpush1.bf16.msra.mxu0 %v17374_v58  ;;  %v2749_v13 = vpop.f32.mrb[4].mxu1  ;;  %v16480_v14 = vadd.f32 %v2645_v6, %v573_v42  ;;  %3079 = vmatpush1.bf16.msra.mxu1 %v17404_v55  ;;  %v17407_v58 = vld [vmem:[#allocation7 + $0xe8] ss:$48 sps:$4 sm:$0xff]   ;;  %v17421_v2 = vld [vmem:[#allocation7 + $0x26c] ss:$48 sps:$4 sm:$0xff]  }
 0x202   :  { %v16481_v11 = vadd.f32 %v2647_v9, %v569_v40  ;;  %v2649_v12 = vpop.f32.mrb[7].mxu0  ;;  %3039 = vmatprep.subr.bf16.mxu0 %v17379_v61  ;;  %v16487_v17 = vadd.f32 %v2749_v13, %v577_v43  ;;  %v2751_v18 = vpop.f32.mrb[5].mxu1  ;;  %v17388_v40 = vld [vmem:[#allocation7 + $0xa44] ss:$48 sps:$4 sm:$0xff]   ;;  %3080 = vmatprep.subr.bf16.mxu1 %v17409_v56  ;;  %v17415_v61 = vld [vmem:[#allocation7 + $0x1ac] ss:$48 sps:$4 sm:$0xff]  }
 0x203   :  { %v16482_v15 = vadd.f32 %v2649_v12, %v573_v42  ;;  %v16488_v20 = vadd.f32 %v2751_v18, %v581_v46  ;;  %v2753_v22 = vpop.f32.mrb[6].mxu1  ;;  %v17386_v42 = vld [vmem:[#allocation7 + $0xa40] ss:$48 sps:$4 sm:$0xff]   ;;  %v17416_v47 = vld [vmem:[#allocation7 + $0x208] ss:$48 sps:$4 sm:$0xff]  }
 0x204   :  { %v19125_v23 = vpack.c.bf16 %v16481_v11, %v16479_v10  ;;  %v16489_v24 = vadd.f32 %v2753_v22, %v577_v43  ;;  %v2755_v27 = vpop.f32.mrb[7].mxu1  ;;  %v17392_v43 = vld [vmem:[#allocation7 + $0xb00] ss:$48 sps:$4 sm:$0xff]   ;;  %v17424_v6 = vld [vmem:[#allocation7 + $0x2cc] ss:$48 sps:$4 sm:$0xff]  }
 0x205   :  { %3040 = vmatpush1.bf16.msra.mxu0 %v17377_v3  ;;  %v19127_v29 = vpack.c.bf16 %v16482_v15, %v16480_v14  ;;  %v16490_v30 = vadd.f32 %v2755_v27, %v581_v46  ;;  %v17395_v46 = vld [vmem:[#allocation7 + $0xb60] ss:$48 sps:$4 sm:$0xff]   ;;  %3081 = vmatpush1.bf16.msra.mxu1 %v17407_v58  ;;  %v17419_v3 = vld [vmem:[#allocation7 + $0x268] ss:$48 sps:$4 sm:$0xff]   ;;  %v17427_v9 = vld [vmem:[#allocation7 + $0x32c] ss:$48 sps:$4 sm:$0xff]  }
 0x206   :  { %3041 = vmatprep.subr.bf16.mxu0 %v17382_v7  ;;  %v19129_v38 = vpack.c.bf16 %v16489_v24, %v16487_v17  ;;  %3082 = vmatprep.subr.bf16.mxu1 %v17412_v59  ;;  %v17422_v7 = vld [vmem:[#allocation7 + $0x2c8] ss:$48 sps:$4 sm:$0xff]   ;;  %v17430_v11 = vld [vmem:[#allocation7 + $0x38c] ss:$48 sps:$4 sm:$0xff]  }
 0x207   :  { %v19131_v41 = vpack.c.bf16 %v16490_v30, %v16488_v20  ;;  %v17425_v10 = vld [vmem:[#allocation7 + $0x328] ss:$48 sps:$4 sm:$0xff]   ;;  %v17433_v13 = vld [vmem:[#allocation7 + $0x3ec] ss:$48 sps:$4 sm:$0xff]  }
 0x208   :  { %v17428_v12 = vld [vmem:[#allocation7 + $0x388] ss:$48 sps:$4 sm:$0xff]   ;;  %v17436_v15 = vld [vmem:[#allocation7 + $0x44c] ss:$48 sps:$4 sm:$0xff]  }
 0x209   :  { %3042 = vmatpush1.bf16.msra.mxu0 %v17380_v16  ;;  %3083 = vmatpush1.bf16.msra.mxu1 %v17410_v60  ;;  %v17431_v14 = vld [vmem:[#allocation7 + $0x3e8] ss:$48 sps:$4 sm:$0xff]   ;;  %v17439_v17 = vld [vmem:[#allocation7 + $0x4ac] ss:$48 sps:$4 sm:$0xff]  }
 0x20a   :  { %3043 = vmatprep.subr.bf16.mxu0 %v17385_v19  ;;  %3084 = vmatprep.subr.bf16.mxu1 %v17415_v61  ;;  %v17434_v16 = vld [vmem:[#allocation7 + $0x448] ss:$48 sps:$4 sm:$0xff]   ;;  %v17442_v19 = vld [vmem:[#allocation7 + $0x50c] ss:$48 sps:$4 sm:$0xff]  }
 0x20b   :  { %v17437_v18 = vld [vmem:[#allocation7 + $0x4a8] ss:$48 sps:$4 sm:$0xff]   ;;  %v17445_v22 = vld [vmem:[#allocation7 + $0x56c] ss:$48 sps:$4 sm:$0xff]  }
 0x20c   :  { %v17440_v20 = vld [vmem:[#allocation7 + $0x508] ss:$48 sps:$4 sm:$0xff]   ;;  %v17448_v27 = vld [vmem:[#allocation7 + $0x5cc] ss:$48 sps:$4 sm:$0xff]  }
 0x20d   :  { %3044 = vmatpush1.bf16.msra.mxu0 %v17383_v36  ;;  %3085 = vmatpush1.bf16.msra.mxu1 %v17413_v63  ;;  %v17443_v24 = vld [vmem:[#allocation7 + $0x568] ss:$48 sps:$4 sm:$0xff]   ;;  %v17451_v36 = vld [vmem:[#allocation7 + $0x62c] ss:$48 sps:$4 sm:$0xff]  }
 0x20e   :  { %3045 = vmatprep.subr.bf16.mxu0 %v17388_v40  ;;  %3086 = vmatprep.subr.bf16.mxu1 %v17418_v0  ;;  %v17446_v30 = vld [vmem:[#allocation7 + $0x5c8] ss:$48 sps:$4 sm:$0xff]   ;;  %v17466_v56 = vld [vmem:[#allocation7 + $0x80c] ss:$48 sps:$4 sm:$0xff]  }
 0x20f   :  { %v17449_v40 = vld [vmem:[#allocation7 + $0x628] ss:$48 sps:$4 sm:$0xff]  }
 0x210   :  { %v17464_v60 = vld [vmem:[#allocation7 + $0x808] ss:$48 sps:$4 sm:$0xff]  }
 0x211   :  { %3046 = vmatpush1.bf16.msra.mxu0 %v17386_v42  ;;  %3087 = vmatpush1.bf16.msra.mxu1 %v17416_v47  ;;  %v17454_v42 = vld [vmem:[#allocation7 + $0x68c] ss:$48 sps:$4 sm:$0xff]  }
 0x212   :  { %3047 = vmatprep.subr.bf16.mxu0 %v17391_v44  ;;  %3088 = vmatprep.subr.bf16.mxu1 %v17421_v2  ;;  %v17452_v44 = vld [vmem:[#allocation7 + $0x688] ss:$48 sps:$4 sm:$0xff]  }
 0x215   :  { %3048 = vmatpush1.bf16.msra.mxu0 %v17389_v45  ;;  %3089 = vmatpush1.bf16.msra.mxu1 %v17419_v3  ;;  %v17457_v45 = vld [vmem:[#allocation7 + $0x6ec] ss:$48 sps:$4 sm:$0xff]  }
 0x216   :  { %3049 = vmatprep.subr.bf16.mxu0 %v17394_v48  ;;  %3090 = vmatprep.subr.bf16.mxu1 %v17424_v6  ;;  %v17455_v48 = vld [vmem:[#allocation7 + $0x6e8] ss:$48 sps:$4 sm:$0xff]  }
 0x219   :  { %3050 = vmatpush1.bf16.msra.mxu0 %v17392_v43  ;;  %3091 = vmatpush1.bf16.msra.mxu1 %v17422_v7  ;;  %v17460_v43 = vld [vmem:[#allocation7 + $0x74c] ss:$48 sps:$4 sm:$0xff]  }
 0x21a   :  { %3051 = vmatprep.subr.bf16.mxu0 %v17397_v49  ;;  %3092 = vmatprep.subr.bf16.mxu1 %v17427_v9  ;;  %v17458_v49 = vld [vmem:[#allocation7 + $0x748] ss:$48 sps:$4 sm:$0xff]   ;;  %v17469_v9 = vld [vmem:[#allocation7 + $0x86c] ss:$48 sps:$4 sm:$0xff]  }
 0x21d   :  { %3052 = vmatpush1.bf16.msra.mxu0 %v17395_v46  ;;  %3093 = vmatpush1.bf16.msra.mxu1 %v17425_v10  ;;  %v19144_v46 = vsub.s32 4, %v19099_v26 }
 0x21e   :  { %3053 = vmatprep.subr.bf16.mxu0 %v17400_v50  ;;  %3094 = vmatprep.subr.bf16.mxu1 %v17430_v11  ;;  %v17463_v50 = vld [vmem:[#allocation7 + $0x7ac] ss:$48 sps:$4 sm:$0xff]  }
 0x221   :  { %3054 = vmatpush1.bf16.msra.mxu0 %v17398_v54  ;;  %3095 = vmatpush1.bf16.msra.mxu1 %v17428_v12 }
 0x222   :  { %16283 = vmatprep.subr.bf16.mxu0 %v18874_v57  ;;  %3096 = vmatprep.subr.bf16.mxu1 %v17433_v13  ;;  %v17467_v13 = vld [vmem:[#allocation7 + $0x868] ss:$48 sps:$4 sm:$0xff]  }
 0x224   :  { %3056 = vmatmul.mubr.bf16.vlgmr.msra.gmra.mrb[16].mxu0 %v19065_v21 }
 0x225   :  { %3065 = vmatprep.mubr.bf16.mxu0 %v19067_v25  ;;  %3097 = vmatpush1.bf16.msra.mxu1 %v17431_v14 }
 0x226   :  { %3098 = vmatprep.subr.bf16.mxu1 %v17436_v15 }
 0x229   :  { %3099 = vmatpush1.bf16.msra.mxu1 %v17434_v16 }
 0x22a   :  { %3100 = vmatprep.subr.bf16.mxu1 %v17439_v17 }
 0x22c   :  { %3066 = vmatmul.mubr.bf16.gmra.mrb[20].mxu0 %v19072_v35 }
 0x22d   :  { %16285 = vmatprep.mubr.msk.bf16.mxu0 %vm18875_vm0, %v18874_v57  ;;  %3101 = vmatpush1.bf16.msra.mxu1 %v17437_v18 }
 0x22e   :  { %3102 = vmatprep.subr.bf16.mxu1 %v17442_v19 }
 0x231   :  { %3103 = vmatpush1.bf16.msra.mxu1 %v17440_v20 }
 0x232   :  { %3104 = vmatprep.subr.bf16.mxu1 %v17445_v22  ;;  %v17472_v22 = vld [vmem:[#allocation7 + $0x8cc] ss:$48 sps:$4 sm:$0xff]  }
 0x235   :  { %3105 = vmatpush1.bf16.msra.mxu1 %v17443_v24 }
 0x236   :  { %3106 = vmatprep.subr.bf16.mxu1 %v17448_v27 }
 0x239   :  { %3107 = vmatpush1.bf16.msra.mxu1 %v17446_v30  ;;  %v17470_v30 = vld [vmem:[#allocation7 + $0x8c8] ss:$48 sps:$4 sm:$0xff]  }
 0x23a   :  { %3129 = vmatprep.subr.bf16.mxu1 %v17451_v36 }
 0x23c   :  { %3109 = vmatmul.mubr.bf16.vlgmr.msra.gmra.mrb[16].mxu1 %v19049_v5  ;;  %v19147_v5 = vsub.s32 5, %v19099_v26 }
 0x23d   :  { %3130 = vmatpush1.bf16.msra.mxu1 %v17449_v40  ;;  %3118 = vmatprep.mubr.bf16.mxu1 %v19053_v28  ;;  %v19150_v28 = vsub.s32 6, %v19099_v26 }
 0x23e   :  { %3131 = vmatprep.subr.bf16.mxu1 %v17454_v42 }
 0x241   :  { %3132 = vmatpush1.bf16.msra.mxu1 %v17452_v44 }
 0x242   :  { %3133 = vmatprep.subr.bf16.mxu1 %v17457_v45 }
 0x244   :  { %3119 = vmatmul.mubr.bf16.gmra.mrb[20].mxu1 %v19056_v32  ;;  %v17461_v32 = vld [vmem:[#allocation7 + $0x7a8] ss:$48 sps:$4 sm:$0xff]  }
 0x245   :  { %3134 = vmatpush1.bf16.msra.mxu1 %v17455_v48  ;;  %3161 = vmatprep.mubr.bf16.mxu1 %v19060_v39  ;;  %v18601_v39 = vld [vmem:[#allocation8] sm:$0xff] }
 0x246   :  { %3135 = vmatprep.subr.bf16.mxu1 %v17460_v43  ;;  %v585_v52 = vrot.slane %v18601_v39, %v19144_v46  ;;  %v589_v54 = vrot.slane %v18601_v39, %v19147_v5  ;;  %v593_v55 = vrot.slane %v18601_v39, %v19150_v28  ;;  %v597_v59 = vrot.slane %v18601_v39, %v19153_v51 }
 0x249   :  { %3136 = vmatpush1.bf16.msra.mxu1 %v17458_v49 }
 0x24a   :  { %3137 = vmatprep.subr.bf16.mxu1 %v17463_v50 }
 0x24d   :  { %3138 = vmatpush1.bf16.msra.mxu1 %v17461_v32  ;;  %v17475_v32 = vld [vmem:[#allocation7 + $0x92c] ss:$48 sps:$4 sm:$0xff]  }
 0x24e   :  { %3139 = vmatprep.subr.bf16.mxu1 %v17466_v56 }
 0x251   :  { %3140 = vmatpush1.bf16.msra.mxu1 %v17464_v60 }
 0x252   :  { %3141 = vmatprep.subr.bf16.mxu1 %v17469_v9  ;;  %v17488_v9 = vld [vmem:[#allocation7 + $0xb08] ss:$48 sps:$4 sm:$0xff]  }
 0x255   :  { %3142 = vmatpush1.bf16.msra.mxu1 %v17467_v13  ;;  %v17494_v13 = vld [vmem:[#allocation7 + $0xbc8] ss:$48 sps:$4 sm:$0xff]  }
 0x256   :  { %3143 = vmatprep.subr.bf16.mxu1 %v17472_v22 }
 0x259   :  { %3144 = vmatpush1.bf16.msra.mxu1 %v17470_v30 }
 0x25a   :  { %3145 = vmatprep.subr.bf16.mxu1 %v17475_v32 }
 0x277   :  { %v2845_v53 = vpop.f32.mrb[8].mxu0 }
 0x278   :  { %v2847_v58 = vpop.f32.mrb[9].mxu0  ;;  %v16491_v26 = vadd.f32 %v2845_v53, %v585_v52 }
 0x279   :  { %v2849_v61 = vpop.f32.mrb[10].mxu0  ;;  %v2951_v47 = vpop.f32.mrb[8].mxu1  ;;  %v16492_v2 = vadd.f32 %v2847_v58, %v589_v54  ;;  %v17473_v58 = vld [vmem:[#allocation7 + $0x928] ss:$48 sps:$4 sm:$0xff]  }
 0x27a   :  { %v16493_v63 = vadd.f32 %v2849_v61, %v585_v52  ;;  %v2851_v0 = vpop.f32.mrb[11].mxu0  ;;  %v16499_v6 = vadd.f32 %v2951_v47, %v593_v55  ;;  %v2953_v7 = vpop.f32.mrb[9].mxu1  ;;  %3146 = vmatpush1.bf16.msra.mxu1 %v17473_v58  ;;  %v17484_v47 = vld [vmem:[#allocation7 + $0xa4c] ss:$48 sps:$4 sm:$0xff]  }
 0x27b   :  { %v16494_v3 = vadd.f32 %v2851_v0, %v589_v54  ;;  %v16500_v11 = vadd.f32 %v2953_v7, %v597_v59  ;;  %v2955_v12 = vpop.f32.mrb[10].mxu1  ;;  %v17490_v7 = vld [vmem:[#allocation7 + $0xb0c] ss:$48 sps:$4 sm:$0xff]  }
 0x27c   :  { %v3185_v10 = vpack.c.bf16 %v16493_v63, %v16491_v26  ;;  %v16501_v15 = vadd.f32 %v2955_v12, %v593_v55  ;;  %v2957_v16 = vpop.f32.mrb[11].mxu1  ;;  %v17478_v63 = vld [vmem:[#allocation7 + $0x98c] ss:$48 sps:$4 sm:$0xff]  }
 0x27d   :  { %v19159_v14 = vpack.c.bf16 %v16494_v3, %v16492_v2  ;;  %v16502_v18 = vadd.f32 %v2957_v16, %v597_v59  ;;  %3147 = vmatprep.subr.bf16.mxu1 %v17478_v63  ;;  %v17482_v2 = vld [vmem:[#allocation7 + $0xa48] ss:$48 sps:$4 sm:$0xff]   ;;  %v17487_v3 = vld [vmem:[#allocation7 + $0xaac] ss:$48 sps:$4 sm:$0xff]  }
 0x27e   :  { %3307 = vrot.lane.b32.xlu0 %v3185_v10, %s18861_s23  ;;  %v3192_v17 = vsel %vm3187_vm1, %v3185_v10, 0  ;;  %v19165_v20 = vpack.c.bf16 %v16501_v15, %v16499_v6  ;;  %v17485_v6 = vld [vmem:[#allocation7 + $0xaa8] ss:$48 sps:$4 sm:$0xff]   ;;  %v17493_v10 = vld [vmem:[#allocation7 + $0xb6c] ss:$48 sps:$4 sm:$0xff]  }
 0x27f   :  { %v2855_v19 = vpop.f32.mrb[12].mxu0  ;;  %3548 = vrot.lane.b32.xlu1 %v19159_v14, %s18861_s23  ;;  %16284 = vmatpush3.bf16.xpose.msra.mxu0 %v3192_v17  ;;  %v19167_v27 = vpack.c.bf16 %v16502_v18, %v16500_v11  ;;  %v17491_v11 = vld [vmem:[#allocation7 + $0xb68] ss:$48 sps:$4 sm:$0xff]   ;;  %v17496_v12 = vld [vmem:[#allocation7 + $0xbcc] ss:$48 sps:$4 sm:$0xff]  }
 0x280   :  { %v2857_v24 = vpop.f32.mrb[13].mxu0  ;;  %16295 = vmatprep.subr.bf16.mxu0 %v18874_v57  ;;  %v16495_v40 = vadd.f32 %v2855_v19, %v585_v52  ;;  %v19217_v17 = vld [vmem:[#allocation8 + $0x8] sm:$0xf] }
 0x281   :  { %v2859_v36 = vpop.f32.mrb[14].mxu0  ;;  %v2961_v45 = vpop.f32.mrb[12].mxu1  ;;  %v16496_v48 = vadd.f32 %v2857_v24, %v589_v54  ;;  %v601_v18 = vrot.slane %v19217_v17, %v19102_v31  ;;  %v3434_v24 = vsel %vm3187_vm1, %v19159_v14, 0 }
 0x282   :  { %v16497_v42 = vadd.f32 %v2859_v36, %v585_v52  ;;  %v2861_v44 = vpop.f32.mrb[15].mxu0  ;;  %3304 = vrot.lane.b32.xlu0 %v19117_v62, %s18861_s23  ;;  %v16503_v49 = vadd.f32 %v2961_v45, %v593_v55  ;;  %v2963_v50 = vpop.f32.mrb[13].mxu1 }
 0x283   :  { %v16498_v43 = vadd.f32 %v2861_v44, %v589_v54  ;;  %3545 = vrot.lane.b32.xlu1 %v19119_v1, %s18861_s23  ;;  %v16504_v53 = vadd.f32 %v2963_v50, %v597_v59  ;;  %v2965_v56 = vpop.f32.mrb[14].mxu1 }
 0x284   :  { %v19174_v39 = vpack.c.bf16 %v16497_v42, %v16495_v40  ;;  %v16505_v60 = vadd.f32 %v2965_v56, %v593_v55  ;;  %v2967_v61 = vpop.f32.mrb[15].mxu1  ;;  %v17476_v55 = vld [vmem:[#allocation7 + $0x988] ss:$48 sps:$4 sm:$0xff]  }
 0x285   :  { %v19176_v52 = vpack.c.bf16 %v16498_v43, %v16496_v48  ;;  %v16506_v54 = vadd.f32 %v2967_v61, %v597_v59  ;;  %3148 = vmatpush1.bf16.msra.mxu1 %v17476_v55  ;;  %v17479_v59 = vld [vmem:[#allocation7 + $0x9e8] ss:$48 sps:$4 sm:$0xff]  }
 0x286   :  { %3789 = vrot.lane.b32.xlu0 %v19165_v20, %s18861_s23  ;;  %16286 = vmatmul.mubr.msk.bf16.vlgmr.msra.gmra.mrb[24].mxu0 %vm3187_vm1, %v19117_v62  ;;  %v19184_v26 = vpack.c.bf16 %v16505_v60, %v16503_v49  ;;  %v17481_v62 = vld [vmem:[#allocation7 + $0x9ec] ss:$48 sps:$4 sm:$0xff]  }
 0x287   :  { %3786 = vrot.lane.b32.xlu1 %v19121_v4, %s18861_s23  ;;  %16297 = vmatprep.mubr.msk.bf16.mxu0 %vm18875_vm0, %v18874_v57  ;;  %v19188_v0 = vpack.c.bf16 %v16506_v54, %v16504_v53 }
 0x288   :  { %3149 = vmatprep.subr.bf16.mxu1 %v17481_v62 }
 0x289   :  { %3150 = vmatpush1.bf16.msra.mxu1 %v17479_v59 }
 0x28a   :  { %4030 = vrot.lane.b32.xlu0 %v19167_v27, %s18861_s23  ;;  %3151 = vmatprep.subr.bf16.mxu1 %v17484_v47 }
 0x28b   :  { %4027 = vrot.lane.b32.xlu1 %v19123_v8, %s18861_s23 }
 0x28d   :  { %3152 = vmatpush1.bf16.msra.mxu1 %v17482_v2 }
 0x28e   :  { %4314 = vrot.lane.b32.xlu0 %v19174_v39, %s18861_s23  ;;  %3153 = vmatprep.subr.bf16.mxu1 %v17487_v3 }
 0x28f   :  { %4311 = vrot.lane.b32.xlu1 %v19125_v23, %s18861_s23 }
 0x291   :  { %3154 = vmatpush1.bf16.msra.mxu1 %v17485_v6 }
 0x292   :  { %4555 = vrot.lane.b32.xlu0 %v19176_v52, %s18861_s23  ;;  %3155 = vmatprep.subr.bf16.mxu1 %v17490_v7 }
 0x293   :  { %4552 = vrot.lane.b32.xlu1 %v19127_v29, %s18861_s23 }
 0x295   :  { %3156 = vmatpush1.bf16.msra.mxu1 %v17488_v9 }
 0x296   :  { %4796 = vrot.lane.b32.xlu0 %v19184_v26, %s18861_s23  ;;  %3157 = vmatprep.subr.bf16.mxu1 %v17493_v10 }
 0x297   :  { %4793 = vrot.lane.b32.xlu1 %v19129_v38, %s18861_s23 }
 0x299   :  { %3158 = vmatpush1.bf16.msra.mxu1 %v17491_v11 }
 0x29a   :  { %5037 = vrot.lane.b32.xlu0 %v19188_v0, %s18861_s23  ;;  %3159 = vmatprep.subr.bf16.mxu1 %v17496_v12  ;;  %v19304_v12 = vld [vmem:[#allocation5] sm:$0xff] }
 0x29b   :  { %5034 = vrot.lane.b32.xlu1 %v19131_v41, %s18861_s23 }
 0x29d   :  { %3160 = vmatpush1.bf16.msra.mxu1 %v17494_v13 }
 0x29e   :  { %16289 = vmatprep.subr.bf16.mxu1 %v18874_v57 }
 0x2a0   :  { %3162 = vmatmul.mubr.bf16.vlgmr.msra.gmra.mrb[16].mxu1 %v19065_v21  ;;  %v605_v21 = vrot.slane %v19217_v17, %v19105_v33 }
 0x2a1   :  { %3171 = vmatprep.mubr.bf16.mxu1 %v19067_v25 }
 0x2a8   :  { %3172 = vmatmul.mubr.bf16.gmra.mrb[20].mxu1 %v19072_v35 }
 0x2a9   :  { %16291 = vmatprep.mubr.msk.bf16.mxu1 %vm18875_vm0, %v18874_v57 }
 0x2f0   :  { %v3308_v15 = vpop.permute.xlu0 %3307 }
 0x2f1   :  { %v3313_v16 = vsel %vm3187_vm1, %v3308_v15, 0  ;;  %v3549_v43 = vpop.permute.xlu1 %3548  ;;  %v4923_v15 = vsel %vm3187_vm1, %v19188_v0, 0 }
 0x2f2   :  { %16296 = vmatpush3.bf16.xpose.msra.mxu0 %v3313_v16  ;;  %v3554_v32 = vsel %vm3187_vm1, %v3549_v43, 0  ;;  %v19309_v16 = vld [vmem:[#allocation5 + $0x8] sm:$0xff] }
 0x2f3   :  { %16307 = vmatprep.subr.bf16.mxu0 %v18874_v57 }
 0x2f4   :  { %v3305_v19 = vpop.permute.xlu0 %3304 }
 0x2f5   :  { %v3546_v55 = vpop.permute.xlu1 %3545 }
 0x2f7   :  { %v3057_v25 = vpop.f32.mrb[16].mxu0 }
 0x2f8   :  { %v16507_v35 = vadd.f32 %v3057_v25, %v601_v18  ;;  %v3059_v22 = vpop.f32.mrb[17].mxu0  ;;  %v3790_v62 = vpop.permute.xlu0 %3789 }
 0x2f9   :  { %16298 = vmatmul.mubr.msk.bf16.vlgmr.msra.gmra.mrb[28].mxu0 %vm3187_vm1, %v3305_v19  ;;  %v16508_v30 = vadd.f32 %v3059_v22, %v605_v21  ;;  %v3061_v36 = vpop.f32.mrb[18].mxu0  ;;  %v3795_v59 = vsel %vm3187_vm1, %v3790_v62, 0  ;;  %v3787_v47 = vpop.permute.xlu1 %3786 }
 0x2fa   :  { %16308 = vmatpush3.bf16.xpose.msra.mxu0 %v3434_v24  ;;  %16309 = vmatprep.mubr.msk.bf16.mxu0 %vm18875_vm0, %v18874_v57  ;;  %v16509_v40 = vadd.f32 %v3061_v36, %v601_v18  ;;  %v3063_v42 = vpop.f32.mrb[19].mxu0 }
 0x2fb   :  { %16319 = vmatprep.subr.bf16.mxu0 %v18874_v57  ;;  %v16510_v44 = vadd.f32 %v3063_v42, %v605_v21 }
 0x2fc   :  { %v3186_v45 = vpack.c.bf16 %v16509_v40, %v16507_v35  ;;  %v4031_v2 = vpop.permute.xlu0 %4030 }
 0x2fd   :  { %v19230_v48 = vpack.c.bf16 %v16510_v44, %v16508_v30  ;;  %v4028_v3 = vpop.permute.xlu1 %4027 }
 0x2fe   :  { %16290 = vmatpush3.bf16.msra.mxu1 %v3186_v45  ;;  %3380 = vrot.lane.b32.xlu1 %v3186_v45, %s18861_s23 }
 0x2ff   :  { %v3067_v49 = vpop.f32.mrb[20].mxu0  ;;  %16301 = vmatprep.subr.bf16.mxu1 %v18874_v57 }
 0x300   :  { %v16511_v14 = vadd.f32 %v3067_v49, %v601_v18  ;;  %v3069_v50 = vpop.f32.mrb[21].mxu0  ;;  %v4315_v6 = vpop.permute.xlu0 %4314 }
 0x301   :  { %16310 = vmatmul.mubr.msk.bf16.vlgmr.msra.gmra.mrb[32].mxu0 %vm3187_vm1, %v19119_v1  ;;  %v16512_v53 = vadd.f32 %v3069_v50, %v605_v21  ;;  %v3071_v56 = vpop.f32.mrb[22].mxu0  ;;  %v3675_v1 = vsel %vm3187_vm1, %v19165_v20, 0  ;;  %v3916_v20 = vsel %vm3187_vm1, %v19167_v27, 0  ;;  %v4200_v27 = vsel %vm3187_vm1, %v19174_v39, 0  ;;  %v4312_v7 = vpop.permute.xlu1 %4311 }
 0x302   :  { %16320 = vmatpush3.bf16.xpose.msra.mxu0 %v3554_v32  ;;  %16321 = vmatprep.mubr.msk.bf16.mxu0 %vm18875_vm0, %v18874_v57  ;;  %v16513_v58 = vadd.f32 %v3071_v56, %v601_v18  ;;  %v3073_v60 = vpop.f32.mrb[23].mxu0  ;;  %v4441_v39 = vsel %vm3187_vm1, %v19176_v52, 0  ;;  %v4682_v52 = vsel %vm3187_vm1, %v19184_v26, 0 }
 0x303   :  { %16331 = vmatprep.subr.bf16.mxu0 %v18874_v57  ;;  %v16514_v61 = vadd.f32 %v3073_v60, %v605_v21 }
 0x304   :  { %v19240_v54 = vpack.c.bf16 %v16513_v58, %v16511_v14  ;;  %v4556_v9 = vpop.permute.xlu0 %4555 }
 0x305   :  { %v19242_v63 = vpack.c.bf16 %v16514_v61, %v16512_v53  ;;  %v4553_v10 = vpop.permute.xlu1 %4552 }
 0x308   :  { %v4797_v11 = vpop.permute.xlu0 %4796 }
 0x309   :  { %16322 = vmatmul.mubr.msk.bf16.vlgmr.msra.gmra.mrb[36].mxu0 %vm3187_vm1, %v3546_v55  ;;  %v4794_v26 = vpop.permute.xlu1 %4793  ;;  %v19345_v55 = vrot.slane %v19217_v17, %v19108_v34 }
 0x30a   :  { %16332 = vmatpush3.bf16.xpose.msra.mxu0 %v3675_v1  ;;  %16333 = vmatprep.mubr.msk.bf16.mxu0 %vm18875_vm0, %v18874_v57  ;;  %v19349_v1 = vrot.slane %v19217_v17, %v19111_v37 }
 0x30b   :  { %16343 = vmatprep.subr.bf16.mxu0 %v18874_v57 }
 0x30c   :  { %v5038_v35 = vpop.permute.xlu0 %5037 }
 0x30d   :  { %v5043_v24 = vsel %vm3187_vm1, %v5038_v35, 0  ;;  %v5035_v30 = vpop.permute.xlu1 %5034 }
 0x311   :  { %16334 = vmatmul.mubr.msk.bf16.vlgmr.msra.gmra.mrb[40].mxu0 %vm3187_vm1, %v19121_v4  ;;  %v4036_v4 = vsel %vm3187_vm1, %v4031_v2, 0 }
 0x312   :  { %16344 = vmatpush3.bf16.xpose.msra.mxu0 %v3795_v59  ;;  %16345 = vmatprep.mubr.msk.bf16.mxu0 %vm18875_vm0, %v18874_v57 }
 0x313   :  { %16355 = vmatprep.subr.bf16.mxu0 %v18874_v57 }
 0x319   :  { %16346 = vmatmul.mubr.msk.bf16.vlgmr.msra.gmra.mrb[44].mxu0 %vm3187_vm1, %v3787_v47 }
 0x31a   :  { %16356 = vmatpush3.bf16.xpose.msra.mxu0 %v3916_v20  ;;  %16357 = vmatprep.mubr.msk.bf16.mxu0 %vm18875_vm0, %v18874_v57 }
 0x31b   :  { %16367 = vmatprep.subr.bf16.mxu0 %v18874_v57 }
 0x321   :  { %16358 = vmatmul.mubr.msk.bf16.vlgmr.msra.gmra.mrb[48].mxu0 %vm3187_vm1, %v19123_v8  ;;  %v4320_v8 = vsel %vm3187_vm1, %v4315_v6, 0 }
 0x322   :  { %16368 = vmatpush3.bf16.xpose.msra.mxu0 %v4036_v4  ;;  %16369 = vmatprep.mubr.msk.bf16.mxu0 %vm18875_vm0, %v18874_v57 }
 0x323   :  { %16379 = vmatprep.subr.bf16.mxu0 %v18874_v57 }
 0x329   :  { %16370 = vmatmul.mubr.msk.bf16.vlgmr.msra.gmra.mrb[52].mxu0 %vm3187_vm1, %v4028_v3 }
 0x32a   :  { %16380 = vmatpush3.bf16.xpose.msra.mxu0 %v4200_v27  ;;  %16381 = vmatprep.mubr.msk.bf16.mxu0 %vm18875_vm0, %v18874_v57 }
 0x32b   :  { %16391 = vmatprep.subr.bf16.mxu0 %v18874_v57 }
 0x331   :  { %16382 = vmatmul.mubr.msk.bf16.vlgmr.msra.gmra.mrb[56].mxu0 %vm3187_vm1, %v19125_v23  ;;  %v4561_v23 = vsel %vm3187_vm1, %v4556_v9, 0 }
 0x332   :  { %16392 = vmatpush3.bf16.xpose.msra.mxu0 %v4320_v8  ;;  %16393 = vmatprep.mubr.msk.bf16.mxu0 %vm18875_vm0, %v18874_v57 }
 0x333   :  { %16403 = vmatprep.subr.bf16.mxu0 %v18874_v57 }
 0x339   :  { %16394 = vmatmul.mubr.msk.bf16.vlgmr.msra.gmra.mrb[60].mxu0 %vm3187_vm1, %v4312_v7 }
 0x33a   :  { %16404 = vmatpush3.bf16.xpose.msra.mxu0 %v4441_v39  ;;  %16405 = vmatprep.mubr.msk.bf16.mxu0 %vm18875_vm0, %v18874_v57 }
 0x33b   :  { %16415 = vmatprep.subr.bf16.mxu0 %v18874_v57 }
 0x341   :  { %16406 = vmatmul.mubr.msk.bf16.vlgmr.msra.gmra.mrb[64].mxu0 %vm3187_vm1, %v19127_v29  ;;  %v4802_v29 = vsel %vm3187_vm1, %v4797_v11, 0 }
 0x342   :  { %16416 = vmatpush3.bf16.xpose.msra.mxu0 %v4561_v23  ;;  %16417 = vmatprep.mubr.msk.bf16.mxu0 %vm18875_vm0, %v18874_v57 }
 0x343   :  { %16427 = vmatprep.subr.bf16.mxu0 %v18874_v57 }
 0x349   :  { %16418 = vmatmul.mubr.msk.bf16.vlgmr.msra.gmra.mrb[68].mxu0 %vm3187_vm1, %v4553_v10 }
 0x34a   :  { %16428 = vmatpush3.bf16.xpose.msra.mxu0 %v4682_v52  ;;  %16429 = vmatprep.mubr.msk.bf16.mxu0 %vm18875_vm0, %v18874_v57 }
 0x34b   :  { %16439 = vmatprep.subr.bf16.mxu0 %v18874_v57 }
 0x351   :  { %16430 = vmatmul.mubr.msk.bf16.vlgmr.msra.gmra.mrb[72].mxu0 %vm3187_vm1, %v19129_v38 }
 0x352   :  { %16440 = vmatpush3.bf16.xpose.msra.mxu0 %v4802_v29  ;;  %16441 = vmatprep.mubr.msk.bf16.mxu0 %vm18875_vm0, %v18874_v57 }
 0x353   :  { %16451 = vmatprep.subr.bf16.mxu0 %v18874_v57 }
 0x359   :  { %v3228_v13 = vpop.f32.mrb[24].mxu0  ;;  %16442 = vmatmul.mubr.msk.bf16.vlgmr.msra.gmra.mrb[76].mxu0 %vm3187_vm1, %v4794_v26 }
 0x35a   :  { %v19312_v38 = vadd.f32 %v3228_v13, %v19304_v12  ;;  %v16287_v18 = vpop.f32.mrb[25].mxu0  ;;  %16452 = vmatpush3.bf16.xpose.msra.mxu0 %v4923_v15  ;;  %16453 = vmatprep.mubr.msk.bf16.mxu0 %vm18875_vm0, %v18874_v57 }
 0x35b   :  { %v3231_v21 = vpop.f32.mrb[26].mxu0  ;;  %16463 = vmatprep.subr.bf16.mxu0 %v18874_v57 }
 0x35c   :  { %v19318_v25 = vadd.f32 %v3231_v21, %v19309_v16  ;;  %v16288_v19 = vpop.f32.mrb[27].mxu0  ;;  %v3236_v0 = vsel %vm3235_vm2, %v19312_v38, -inf }
 0x35d   :  { %3237 = vmax.xlane.f32.xlu0 %v3236_v0 }
 0x35e   :  { %v3239_v22 = vsel %vm3235_vm2, %v19318_v25, -inf }
 0x35f   :  { %3240 = vmax.xlane.f32.xlu1 %v3239_v22 }
 0x361   :  { %16454 = vmatmul.mubr.msk.bf16.vlgmr.msra.gmra.mrb[80].mxu0 %vm3187_vm1, %v19131_v41 }
 0x362   :  { %16464 = vmatpush3.bf16.xpose.msra.mxu0 %v5043_v24  ;;  %16465 = vmatprep.mubr.msk.bf16.mxu0 %vm18875_vm0, %v18874_v57 }
 0x369   :  { %16466 = vmatmul.mubr.msk.bf16.vlgmr.msra.gmra.mrb[84].mxu0 %vm3187_vm1, %v5035_v30 }
 0x370   :  { %v19384_v0 = vpop.permute.xlu1 %3380 }
 0x373   :  { %v3163_v36 = vpop.f32.mrb[16].mxu1 }
 0x374   :  { %v3165_v40 = vpop.f32.mrb[17].mxu1  ;;  %v16515_v2 = vadd.f32 %v3163_v36, %v19345_v55 }
 0x375   :  { %v3167_v42 = vpop.f32.mrb[18].mxu1  ;;  %v16516_v4 = vadd.f32 %v3165_v40, %v19349_v1 }
 0x376   :  { %v3169_v44 = vpop.f32.mrb[19].mxu1  ;;  %v16517_v3 = vadd.f32 %v3167_v42, %v19345_v55 }
 0x377   :  { %v16518_v17 = vadd.f32 %v3169_v44, %v19349_v1 }
 0x378   :  { %v19365_v39 = vpack.c.bf16 %v16517_v3, %v16515_v2 }
 0x379   :  { %v19367_v9 = vpack.c.bf16 %v16518_v17, %v16516_v4 }
 0x3cc   :  { %v3349_v45 = vpop.f32.mrb[28].mxu0 }
 0x3cd   :  { %v19331_v43 = vadd.f32 %v3349_v45, %v19304_v12  ;;  %v16299_v49 = vpop.f32.mrb[29].mxu0 }
 0x3ce   :  { %v3352_v14 = vpop.f32.mrb[30].mxu0 }
 0x3cf   :  { %v19334_v50 = vadd.f32 %v3352_v14, %v19309_v16  ;;  %v16300_v41 = vpop.f32.mrb[31].mxu0  ;;  %v3356_v32 = vsel %vm3235_vm2, %v19331_v43, -inf }
 0x3d0   :  { %3357 = vmax.xlane.f32.xlu0 %v3356_v32 }
 0x3d1   :  { %v3359_v53 = vsel %vm3235_vm2, %v19334_v50, -inf }
 0x3d4   :  { %3360 = vmax.xlane.f32.xlu0 %v3359_v53  ;;  %v3470_v56 = vpop.f32.mrb[32].mxu0 }
 0x3d5   :  { %v19341_v58 = vadd.f32 %v3470_v56, %v19304_v12  ;;  %v16311_v60 = vpop.f32.mrb[33].mxu0 }
 0x3d6   :  { %v3473_v61 = vpop.f32.mrb[34].mxu0 }
 0x3d7   :  { %v19352_v62 = vadd.f32 %v3473_v61, %v19309_v16  ;;  %v16312_v59 = vpop.f32.mrb[35].mxu0  ;;  %v3477_v47 = vsel %vm3235_vm2, %v19341_v58, -inf }
 0x3d8   :  { %3478 = vmax.xlane.f32.xlu1 %v3477_v47 }
 0x3d9   :  { %v3480_v20 = vsel %vm3235_vm2, %v19352_v62, -inf }
 0x3da   :  { %3481 = vmax.xlane.f32.xlu0 %v3480_v20 }
 0x3dc   :  { %v3590_v27 = vpop.f32.mrb[36].mxu0 }
 0x3dd   :  { %v19363_v6 = vadd.f32 %v3590_v27, %v19304_v12  ;;  %v16323_v8 = vpop.f32.mrb[37].mxu0 }
 0x3de   :  { %v3593_v7 = vpop.f32.mrb[38].mxu0 }
 0x3df   :  { %v19370_v23 = vadd.f32 %v3593_v7, %v19309_v16  ;;  %v16324_v10 = vpop.f32.mrb[39].mxu0  ;;  %v3597_v52 = vsel %vm3235_vm2, %v19363_v6, -inf }
 0x3e0   :  { %3598 = vmax.xlane.f32.xlu1 %v3597_v52 }
 0x3e1   :  { %v3600_v11 = vsel %vm3235_vm2, %v19370_v23, -inf }
 0x3e2   :  { %3601 = vmax.xlane.f32.xlu0 %v3600_v11 }
 0x3e4   :  { %v3711_v29 = vpop.f32.mrb[40].mxu0 }
 0x3e5   :  { %v19377_v26 = vadd.f32 %v3711_v29, %v19304_v12  ;;  %v16335_v13 = vpop.f32.mrb[41].mxu0 }
 0x3e6   :  { %v3714_v15 = vpop.f32.mrb[42].mxu0 }
 0x3e7   :  { %v19380_v18 = vadd.f32 %v3714_v15, %v19309_v16  ;;  %v16336_v21 = vpop.f32.mrb[43].mxu0  ;;  %v3718_v19 = vsel %vm3235_vm2, %v19377_v26, -inf }
 0x3e8   :  { %3719 = vmax.xlane.f32.xlu1 %v3718_v19  ;;  %v19428_v21 = vld [vmem:[#allocation5 + $0x10] sm:$0xff] }
 0x3e9   :  { %v3721_v35 = vsel %vm3235_vm2, %v19380_v18, -inf }
 0x3ea   :  { %v3238_v22 = vpop.xlane.xlu0 %3237  ;;  %3722 = vmax.xlane.f32.xlu0 %v3721_v35 }
 0x3eb   :  { %v3242_v24 = vsub.f32 %v19312_v38, %v3238_v22 }
 0x3ec   :  { %v3241_v30 = vpop.xlane.xlu1 %3240  ;;  %v3831_v36 = vpop.f32.mrb[44].mxu0 }
 0x3ed   :  { %v3244_v40 = vmul.f32 1.442695, %v3242_v24  ;;  %v3243_v42 = vsub.f32 %v19318_v25, %v3241_v30  ;;  %v19391_v44 = vadd.f32 %v3831_v36, %v19304_v12  ;;  %v16347_v45 = vpop.f32.mrb[45].mxu0 }
 0x3ee   :  { %v3834_v49 = vpop.f32.mrb[46].mxu0 }
 0x3ef   :  { %18457 = vpow2.f32 %v3244_v40  ;;  %v3246_v14 = vmul.f32 1.442695, %v3243_v42  ;;  %v19394_v41 = vadd.f32 %v3834_v49, %v19309_v16  ;;  %v16348_v32 = vpop.f32.mrb[47].mxu0  ;;  %v3838_v53 = vsel %vm3235_vm2, %v19391_v44, -inf }
 0x3f0   :  { %3839 = vmax.xlane.f32.xlu1 %v3838_v53  ;;  %v3173_v32 = vpop.f32.mrb[20].mxu1 }
 0x3f1   :  { %18459 = vpow2.f32 %v3246_v14  ;;  %v3841_v38 = vsel %vm3235_vm2, %v19394_v41, -inf }
 0x3f2   :  { %3842 = vmax.xlane.f32.xlu0 %v3841_v38 }
 0x3f4   :  { %v3952_v25 = vpop.f32.mrb[48].mxu0 }
 0x3f5   :  { %v19401_v56 = vadd.f32 %v3952_v25, %v19304_v12  ;;  %v16359_v60 = vpop.f32.mrb[49].mxu0 }
 0x3f6   :  { %v3955_v61 = vpop.f32.mrb[50].mxu0  ;;  %v3175_v60 = vpop.f32.mrb[21].mxu1 }
 0x3f7   :  { %v19404_v59 = vadd.f32 %v3955_v61, %v19309_v16  ;;  %v16360_v47 = vpop.f32.mrb[51].mxu0  ;;  %v3959_v20 = vsel %vm3235_vm2, %v19401_v56, -inf  ;;  %v3177_v61 = vpop.f32.mrb[22].mxu1 }
 0x3f8   :  { %3960 = vmax.xlane.f32.xlu1 %v3959_v20  ;;  %v3179_v20 = vpop.f32.mrb[23].mxu1 }
 0x3f9   :  { %v19408_v2 = vpop.eup %18457  ;;  %v3962_v4 = vsel %vm3235_vm2, %v19404_v59, -inf }
 0x3fa   :  { %3963 = vmax.xlane.f32.xlu0 %v3962_v4  ;;  %v3248_v3 = vsel %vm3235_vm2, %v19408_v2, 0.0  ;;  %v16519_v4 = vadd.f32 %v3173_v32, %v19345_v55 }
 0x3fb   :  { %v19414_v17 = vpop.eup %18459 }
 0x3fc   :  { %3249 = vadd.xlane.f32.xlu1 %v3248_v3  ;;  %v4072_v27 = vpop.f32.mrb[52].mxu0  ;;  %v3251_v8 = vsel %vm3235_vm2, %v19414_v17, 0.0  ;;  %v16520_v3 = vadd.f32 %v3175_v60, %v19349_v1 }
 0x3fd   :  { %v19419_v7 = vadd.f32 %v4072_v27, %v19304_v12  ;;  %v16371_v10 = vpop.f32.mrb[53].mxu0  ;;  %v19430_v12 = vld [vmem:[#allocation5 + $0x18] sm:$0xff]  ;;  %v16521_v27 = vadd.f32 %v3177_v61, %v19345_v55 }
 0x3fe   :  { %3252 = vadd.xlane.f32.xlu0 %v3251_v8  ;;  %v4075_v52 = vpop.f32.mrb[54].mxu0  ;;  %v16522_v8 = vadd.f32 %v3179_v20, %v19349_v1 }
 0x3ff   :  { %v19422_v11 = vadd.f32 %v4075_v52, %v19309_v16  ;;  %v16372_v29 = vpop.f32.mrb[55].mxu0  ;;  %v4079_v13 = vsel %vm3235_vm2, %v19419_v7, -inf }
 0x400   :  { %4080 = vmax.xlane.f32.xlu1 %v4079_v13  ;;  %v19459_v13 = vpack.c.bf16 %v16521_v27, %v16519_v4 }
 0x401   :  { %v4082_v15 = vsel %vm3235_vm2, %v19422_v11, -inf }
 0x402   :  { %4083 = vmax.xlane.f32.xlu0 %v4082_v15  ;;  %v19461_v15 = vpack.c.bf16 %v16522_v8, %v16520_v3 }
 0x404   :  { %v4236_v19 = vpop.f32.mrb[56].mxu0 }
 0x405   :  { %v19433_v35 = vadd.f32 %v4236_v19, %v19428_v21  ;;  %v16383_v22 = vpop.f32.mrb[57].mxu0 }
 0x406   :  { %v4239_v16 = vpop.f32.mrb[58].mxu0 }
 0x407   :  { %v19436_v24 = vadd.f32 %v4239_v16, %v19430_v12  ;;  %v16384_v30 = vpop.f32.mrb[59].mxu0  ;;  %v4243_v36 = vsel %vm3235_vm2, %v19433_v35, -inf }
 0x408   :  { %4244 = vmax.xlane.f32.xlu1 %v4243_v36 }
 0x409   :  { %v4246_v40 = vsel %vm3235_vm2, %v19436_v24, -inf }
 0x40a   :  { %4247 = vmax.xlane.f32.xlu0 %v4246_v40 }
 0x40c   :  { %v4356_v42 = vpop.f32.mrb[60].mxu0 }
 0x40d   :  { %v19443_v45 = vadd.f32 %v4356_v42, %v19428_v21  ;;  %v16395_v49 = vpop.f32.mrb[61].mxu0 }
 0x40e   :  { %v4359_v14 = vpop.f32.mrb[62].mxu0 }
 0x40f   :  { %v19446_v53 = vadd.f32 %v4359_v14, %v19430_v12  ;;  %v16396_v38 = vpop.f32.mrb[63].mxu0  ;;  %v4363_v25 = vsel %vm3235_vm2, %v19443_v45, -inf }
 0x410   :  { %4364 = vmax.xlane.f32.xlu1 %v4363_v25 }
 0x411   :  { %v4366_v47 = vsel %vm3235_vm2, %v19446_v53, -inf }
 0x412   :  { %4367 = vmax.xlane.f32.xlu0 %v4366_v47 }
 0x414   :  { %v4477_v10 = vpop.f32.mrb[64].mxu0 }
 0x415   :  { %v19457_v52 = vadd.f32 %v4477_v10, %v19428_v21  ;;  %v16407_v29 = vpop.f32.mrb[65].mxu0 }
 0x416   :  { %v4480_v19 = vpop.f32.mrb[66].mxu0 }
 0x417   :  { %v19464_v22 = vadd.f32 %v4480_v19, %v19430_v12  ;;  %v16408_v16 = vpop.f32.mrb[67].mxu0  ;;  %v4484_v30 = vsel %vm3235_vm2, %v19457_v52, -inf }
 0x418   :  { %4485 = vmax.xlane.f32.xlu1 %v4484_v30 }
 0x419   :  { %v4487_v55 = vsel %vm3235_vm2, %v19464_v22, -inf }
 0x41a   :  { %4488 = vmax.xlane.f32.xlu0 %v4487_v55 }
 0x41c   :  { %v4597_v1 = vpop.f32.mrb[68].mxu0 }
 0x41d   :  { %v19471_v36 = vadd.f32 %v4597_v1, %v19428_v21  ;;  %v16419_v40 = vpop.f32.mrb[69].mxu0 }
 0x41e   :  { %v4600_v42 = vpop.f32.mrb[70].mxu0 }
 0x41f   :  { %v19474_v49 = vadd.f32 %v4600_v42, %v19430_v12  ;;  %v16420_v14 = vpop.f32.mrb[71].mxu0  ;;  %v4604_v32 = vsel %vm3235_vm2, %v19471_v36, -inf }
 0x420   :  { %4605 = vmax.xlane.f32.xlu1 %v4604_v32 }
 0x421   :  { %v4607_v38 = vsel %vm3235_vm2, %v19474_v49, -inf }
 0x422   :  { %4608 = vmax.xlane.f32.xlu0 %v4607_v38 }
 0x424   :  { %v4718_v25 = vpop.f32.mrb[72].mxu0 }
 0x425   :  { %v19481_v60 = vadd.f32 %v4718_v25, %v19428_v21  ;;  %v16431_v61 = vpop.f32.mrb[73].mxu0 }
 0x426   :  { %v4721_v47 = vpop.f32.mrb[74].mxu0 }
 0x427   :  { %v19484_v20 = vadd.f32 %v4721_v47, %v19430_v12  ;;  %v16432_v4 = vpop.f32.mrb[75].mxu0  ;;  %v4725_v3 = vsel %vm3235_vm2, %v19481_v60, -inf }
 0x428   :  { %4726 = vmax.xlane.f32.xlu0 %v4725_v3 }
 0x429   :  { %v4728_v27 = vsel %vm3235_vm2, %v19484_v20, -inf }
 0x42c   :  { %4729 = vmax.xlane.f32.xlu0 %v4728_v27  ;;  %v4838_v8 = vpop.f32.mrb[76].mxu0 }
 0x42d   :  { %v19491_v10 = vadd.f32 %v4838_v8, %v19428_v21  ;;  %v16443_v29 = vpop.f32.mrb[77].mxu0 }
 0x42e   :  { %v4841_v19 = vpop.f32.mrb[78].mxu0 }
 0x42f   :  { %v19494_v16 = vadd.f32 %v4841_v19, %v19430_v12  ;;  %v16444_v30 = vpop.f32.mrb[79].mxu0  ;;  %v4845_v55 = vsel %vm3235_vm2, %v19491_v10, -inf }
 0x430   :  { %4846 = vmax.xlane.f32.xlu0 %v4845_v55 }
 0x431   :  { %v4848_v1 = vsel %vm3235_vm2, %v19494_v16, -inf }
 0x434   :  { %4849 = vmax.xlane.f32.xlu0 %v4848_v1  ;;  %v4959_v40 = vpop.f32.mrb[80].mxu0 }
 0x435   :  { %v19501_v42 = vadd.f32 %v4959_v40, %v19428_v21  ;;  %v16455_v14 = vpop.f32.mrb[81].mxu0 }
 0x436   :  { %v4962_v32 = vpop.f32.mrb[82].mxu0 }
 0x437   :  { %v19504_v38 = vadd.f32 %v4962_v32, %v19430_v12  ;;  %v16456_v25 = vpop.f32.mrb[83].mxu0 }
 0x43c   :  { %v5079_v61 = vpop.f32.mrb[84].mxu0 }
 0x43d   :  { %v19507_v47 = vadd.f32 %v5079_v61, %v19428_v21  ;;  %v16467_v4 = vpop.f32.mrb[85].mxu0 }
 0x43e   :  { %v5082_v3 = vpop.f32.mrb[86].mxu0 }
 0x43f   :  { %v19510_v27 = vadd.f32 %v5082_v3, %v19430_v12  ;;  %v16468_v8 = vpop.f32.mrb[87].mxu0 }
 0x45d   :  { %v3358_v29 = vpop.xlane.xlu0 %3357 }
 0x45e   :  { %v3362_v19 = vsub.f32 %v19331_v43, %v3358_v29 }
 0x460   :  { %v3364_v30 = vmul.f32 1.442695, %v3362_v19 }
 0x461   :  { %v3361_v55 = vpop.xlane.xlu0 %3360 }
 0x462   :  { %18461 = vpow2.f32 %v3364_v30  ;;  %v3363_v1 = vsub.f32 %v19334_v50, %v3361_v55 }
 0x464   :  { %v3366_v40 = vmul.f32 1.442695, %v3363_v1 }
 0x465   :  { %v3479_v14 = vpop.xlane.xlu1 %3478 }
 0x466   :  { %18463 = vpow2.f32 %v3366_v40  ;;  %v3483_v21 = vsub.f32 %v19341_v58, %v3479_v14 }
 0x467   :  { %v3482_v32 = vpop.xlane.xlu0 %3481 }
 0x468   :  { %v3485_v25 = vmul.f32 1.442695, %v3483_v21  ;;  %v3484_v61 = vsub.f32 %v19352_v62, %v3482_v32 }
 0x46a   :  { %18465 = vpow2.f32 %v3485_v25  ;;  %v3487_v12 = vmul.f32 1.442695, %v3484_v61 }
 0x46c   :  { %v19516_v4 = vpop.eup %18461  ;;  %18467 = vpow2.f32 %v3487_v12 }
 0x46d   :  { %v3599_v43 = vpop.xlane.xlu1 %3598  ;;  %v3368_v3 = vsel %vm3235_vm2, %v19516_v4, 0.0 }
 0x46e   :  { %v3603_v50 = vsub.f32 %v19363_v6, %v3599_v43  ;;  %3369 = vadd.xlane.f32.xlu1 %v3368_v3  ;;  %v4966_v43 = vsel %vm3235_vm2, %v19501_v42, -inf }
 0x46f   :  { %v3602_v8 = vpop.xlane.xlu0 %3601 }
 0x470   :  { %v19521_v29 = vpop.eup %18463  ;;  %v3605_v58 = vmul.f32 1.442695, %v3603_v50  ;;  %v3604_v19 = vsub.f32 %v19370_v23, %v3602_v8  ;;  %v4969_v8 = vsel %vm3235_vm2, %v19504_v38, -inf }
 0x471   :  { %v3371_v62 = vsel %vm3235_vm2, %v19521_v29, 0.0 }
 0x472   :  { %18469 = vpow2.f32 %v3605_v58  ;;  %v3607_v30 = vmul.f32 1.442695, %v3604_v19  ;;  %3372 = vadd.xlane.f32.xlu0 %v3371_v62  ;;  %v5086_v62 = vsel %vm3235_vm2, %v19507_v47, -inf }
 0x474   :  { %v19526_v55 = vpop.eup %18465  ;;  %18471 = vpow2.f32 %v3607_v30 }
 0x475   :  { %v3489_v1 = vsel %vm3235_vm2, %v19526_v55, 0.0  ;;  %v3720_v14 = vpop.xlane.xlu1 %3719 }
 0x476   :  { %v19530_v6 = vpop.eup %18467  ;;  %3490 = vadd.xlane.f32.xlu1 %v3489_v1  ;;  %v5089_v1 = vsel %vm3235_vm2, %v19510_v27, -inf }
 0x477   :  { %v3492_v40 = vsel %vm3235_vm2, %v19530_v6, 0.0  ;;  %v3723_v25 = vpop.xlane.xlu0 %3722 }
 0x478   :  { %3493 = vadd.xlane.f32.xlu0 %v3492_v40 }
 0x47c   :  { %v19534_v23 = vpop.eup %18469 }
 0x47d   :  { %v3609_v21 = vsel %vm3235_vm2, %v19534_v23, 0.0  ;;  %v3840_v12 = vpop.xlane.xlu1 %3839 }
 0x47e   :  { %v19538_v32 = vpop.eup %18471  ;;  %3610 = vadd.xlane.f32.xlu1 %v3609_v21 }
 0x47f   :  { %v3612_v61 = vsel %vm3235_vm2, %v19538_v32, 0.0  ;;  %v3843_v3 = vpop.xlane.xlu0 %3842 }
 0x480   :  { %3613 = vadd.xlane.f32.xlu0 %v3612_v61 }
 0x482   :  { %4967 = vmax.xlane.f32.xlu1 %v4966_v43 }
 0x485   :  { %v3961_v50 = vpop.xlane.xlu1 %3960 }
 0x486   :  { %4970 = vmax.xlane.f32.xlu1 %v4969_v8 }
 0x487   :  { %v3964_v58 = vpop.xlane.xlu0 %3963 }
 0x489   :  { %v3250_v19 = vpop.xlane.xlu1 %3249 }
 0x48a   :  { %5087 = vmax.xlane.f32.xlu1 %v5086_v62  ;;  %18473 = vrcp.f32 %v3250_v19  ;;  %v3725_v19 = vsub.f32 %v19380_v18, %v3723_v25 }
 0x48b   :  { %v3253_v30 = vpop.xlane.xlu0 %3252 }
 0x48c   :  { %18475 = vrcp.f32 %v3253_v30  ;;  %v3728_v62 = vmul.f32 1.442695, %v3725_v19  ;;  %v3845_v30 = vsub.f32 %v19394_v41, %v3843_v3  ;;  %v3965_v41 = vsub.f32 %v19401_v56, %v3961_v50 }
 0x48e   :  { %5090 = vmax.xlane.f32.xlu1 %v5089_v1  ;;  %18477 = vpow2.f32 %v3728_v62  ;;  %v4081_v1 = vpop.xlane.xlu1 %4080 }
 0x48f   :  { %v4085_v25 = vsub.f32 %v19419_v7, %v4081_v1 }
 0x491   :  { %v4087_v3 = vmul.f32 1.442695, %v4085_v25 }
 0x494   :  { %v18474_v40 = vpop.eup %18473 }
 0x495   :  { %v3256_v61 = vmul.f32 %v18474_v40, %v19408_v2  ;;  %v3844_v2 = vsub.f32 %v19391_v44, %v3840_v12  ;;  %v3966_v40 = vsub.f32 %v19404_v59, %v3964_v58 }
 0x496   :  { %3621 = vrot.lane.b32.xlu0 %v19230_v48, %s18861_s23  ;;  %v18476_v21 = vpop.eup %18475 }
 0x497   :  { %v3257_v43 = vmul.f32 %v18476_v21, %v19414_v17  ;;  %v3846_v17 = vmul.f32 1.442695, %v3844_v2  ;;  %v4084_v21 = vpop.xlane.xlu0 %4083  ;;  %v3969_v18 = vmul.f32 1.442695, %v3966_v40 }
 0x498   :  { %v19567_v44 = vpop.eup %18477  ;;  %v4086_v7 = vsub.f32 %v19422_v11, %v4084_v21 }
 0x499   :  { %v3258_v8 = vpack.c.bf16 %v3257_v43, %v3256_v61  ;;  %18479 = vpow2.f32 %v3846_v17  ;;  %v4245_v61 = vpop.xlane.xlu1 %4244  ;;  %v3724_v43 = vsub.f32 %v19377_v26, %v3720_v14  ;;  %v3733_v58 = vsel %vm3235_vm2, %v19567_v44, 0.0 }
 0x49a   :  { %v3967_v14 = vmul.f32 1.442695, %v3965_v41  ;;  %v4249_v1 = vsub.f32 %v19433_v35, %v4245_v61 }
 0x49b   :  { %16292 = vmatmul.mubr.msk.bf16.vlgmr.msra.gmra.mrb[24].mxu1 %vm3235_vm2, %v3258_v8  ;;  %v4248_v8 = vpop.xlane.xlu0 %4247  ;;  %v3726_v12 = vmul.f32 1.442695, %v3724_v43 }
 0x49c   :  { %16302 = vmatpush3.bf16.msra.mxu1 %v19384_v0  ;;  %16303 = vmatprep.mubr.msk.bf16.mxu1 %vm18875_vm0, %v18874_v57  ;;  %v3848_v0 = vmul.f32 1.442695, %v3845_v30  ;;  %v4089_v30 = vmul.f32 1.442695, %v4086_v7  ;;  %v4251_v43 = vmul.f32 1.442695, %v4249_v1 }
 0x49d   :  { %16313 = vmatprep.subr.bf16.mxu1 %v18874_v57  ;;  %v4365_v19 = vpop.xlane.xlu1 %4364 }
 0x49e   :  { %18481 = vpow2.f32 %v3848_v0  ;;  %v4369_v62 = vsub.f32 %v19443_v45, %v4365_v19 }
 0x49f   :  { %3862 = vrot.lane.b32.xlu1 %v19365_v39, %s18861_s23  ;;  %18483 = vpow2.f32 %v3969_v18  ;;  %v4368_v59 = vpop.xlane.xlu0 %4367  ;;  %v4250_v18 = vsub.f32 %v19436_v24, %v4248_v8 }
 0x4a0   :  { %18485 = vpow2.f32 %v3726_v12  ;;  %v4371_v2 = vmul.f32 1.442695, %v4369_v62  ;;  %v4370_v17 = vsub.f32 %v19446_v53, %v4368_v59 }
 0x4a1   :  { %18487 = vpow2.f32 %v4087_v3  ;;  %v4253_v41 = vmul.f32 1.442695, %v4250_v18 }
 0x4a2   :  { %18489 = vpow2.f32 %v3967_v14  ;;  %v4373_v0 = vmul.f32 1.442695, %v4370_v17 }
 0x4a3   :  { %v19573_v26 = vpop.eup %18479  ;;  %18491 = vpow2.f32 %v4371_v2 }
 0x4a4   :  { %v3850_v50 = vsel %vm3235_vm2, %v19573_v26, 0.0  ;;  %18493 = vpow2.f32 %v4089_v30 }
 0x4a5   :  { %v4486_v56 = vpop.xlane.xlu1 %4485  ;;  %18495 = vpow2.f32 %v4373_v0 }
 0x4a6   :  { %v4490_v11 = vsub.f32 %v19457_v52, %v4486_v56  ;;  %18497 = vpow2.f32 %v4251_v43 }
 0x4a7   :  { %v4489_v40 = vpop.xlane.xlu0 %4488 }
 0x4a8   :  { %v19579_v45 = vpop.eup %18481  ;;  %v4492_v35 = vmul.f32 1.442695, %v4490_v11  ;;  %v4491_v61 = vsub.f32 %v19464_v22, %v4489_v40 }
 0x4a9   :  { %v3853_v21 = vsel %vm3235_vm2, %v19579_v45, 0.0  ;;  %v19585_v53 = vpop.eup %18483 }
 0x4aa   :  { %v19588_v25 = vpop.eup %18485  ;;  %v3974_v52 = vsel %vm3235_vm2, %v19585_v53, 0.0  ;;  %18499 = vpow2.f32 %v4492_v35  ;;  %v4494_v8 = vmul.f32 1.442695, %v4491_v61 }
 0x4ab   :  { %v19593_v12 = vpop.eup %18487  ;;  %v3730_v3 = vsel %vm3235_vm2, %v19588_v25, 0.0  ;;  %18501 = vpow2.f32 %v4253_v41 }
 0x4ac   :  { %v19597_v24 = vpop.eup %18489  ;;  %v4091_v22 = vsel %vm3235_vm2, %v19593_v12, 0.0  ;;  %18503 = vpow2.f32 %v4494_v8 }
 0x4ad   :  { %v4606_v19 = vpop.xlane.xlu1 %4605  ;;  %v19602_v59 = vpop.eup %18491 }
 0x4ae   :  { %v4610_v62 = vsub.f32 %v19471_v36, %v4606_v19  ;;  %v19606_v14 = vpop.eup %18493  ;;  %v4375_v2 = vsel %vm3235_vm2, %v19602_v59, 0.0 }
 0x4af   :  { %v19610_v36 = vpop.eup %18495  ;;  %v4094_v17 = vsel %vm3235_vm2, %v19606_v14, 0.0  ;;  %v4609_v61 = vpop.xlane.xlu0 %4608 }
 0x4b0   :  { %v4612_v7 = vmul.f32 1.442695, %v4610_v62  ;;  %v19614_v56 = vpop.eup %18497  ;;  %v4611_v41 = vsub.f32 %v19474_v49, %v4609_v61 }
 0x4b1   :  { %v4255_v1 = vsel %vm3235_vm2, %v19614_v56, 0.0 }
 0x4b2   :  { %18505 = vpow2.f32 %v4612_v7  ;;  %v4614_v62 = vmul.f32 1.442695, %v4611_v41 }
 0x4b4   :  { %v19618_v30 = vpop.eup %18499  ;;  %18507 = vpow2.f32 %v4614_v62 }
 0x4b5   :  { %3734 = vadd.xlane.f32.xlu0 %v3733_v58  ;;  %v3971_v58 = vsel %vm3235_vm2, %v19597_v24, 0.0  ;;  %v19622_v0 = vpop.eup %18501  ;;  %v4496_v11 = vsel %vm3235_vm2, %v19618_v30, 0.0  ;;  %v4727_v19 = vpop.xlane.xlu0 %4726 }
 0x4b6   :  { %v19626_v40 = vpop.eup %18503 }
 0x4b7   :  { %v4499_v43 = vsel %vm3235_vm2, %v19626_v40, 0.0 }
 0x4b9   :  { %3851 = vadd.xlane.f32.xlu0 %v3850_v50  ;;  %v4378_v50 = vsel %vm3235_vm2, %v19610_v36, 0.0 }
 0x4bc   :  { %v19632_v18 = vpop.eup %18505 }
 0x4bd   :  { %3854 = vadd.xlane.f32.xlu0 %v3853_v21  ;;  %v4258_v21 = vsel %vm3235_vm2, %v19622_v0, 0.0  ;;  %v4616_v35 = vsel %vm3235_vm2, %v19632_v18, 0.0 }
 0x4c1   :  { %3975 = vadd.xlane.f32.xlu0 %v3974_v52  ;;  %v4730_v52 = vpop.xlane.xlu0 %4729 }
 0x4c2   :  { %v4732_v8 = vsub.f32 %v19484_v20, %v4730_v52 }
 0x4c3   :  { %3731 = vadd.xlane.f32.xlu1 %v3730_v3 }
 0x4c5   :  { %4092 = vadd.xlane.f32.xlu0 %v4091_v22  ;;  %v4847_v3 = vpop.xlane.xlu0 %4846  ;;  %v4735_v22 = vmul.f32 1.442695, %v4732_v8 }
 0x4c6   :  { %v4851_v7 = vsub.f32 %v19491_v10, %v4847_v3 }
 0x4c7   :  { %3972 = vadd.xlane.f32.xlu1 %v3971_v58  ;;  %18509 = vpow2.f32 %v4735_v22 }
 0x4c9   :  { %4376 = vadd.xlane.f32.xlu0 %v4375_v2  ;;  %v4850_v58 = vpop.xlane.xlu0 %4849  ;;  %v4731_v2 = vsub.f32 %v19481_v60, %v4727_v19 }
 0x4cb   :  { %4095 = vadd.xlane.f32.xlu1 %v4094_v17  ;;  %v4733_v49 = vmul.f32 1.442695, %v4731_v2 }
 0x4cd   :  { %4379 = vadd.xlane.f32.xlu0 %v4378_v50  ;;  %v4852_v50 = vsub.f32 %v19494_v16, %v4850_v58 }
 0x4cf   :  { %4256 = vadd.xlane.f32.xlu1 %v4255_v1  ;;  %v4853_v1 = vmul.f32 1.442695, %v4851_v7 }
 0x4d1   :  { %4497 = vadd.xlane.f32.xlu0 %v4496_v11 }
 0x4d3   :  { %4259 = vadd.xlane.f32.xlu1 %v4258_v21  ;;  %v4855_v21 = vmul.f32 1.442695, %v4852_v50 }
 0x4d5   :  { %4500 = vadd.xlane.f32.xlu0 %v4499_v43  ;;  %v19647_v43 = vpop.eup %18507 }
 0x4d6   :  { %v19649_v60 = vpop.eup %18509  ;;  %v4619_v16 = vsel %vm3235_vm2, %v19647_v43, 0.0 }
 0x4d7   :  { %v4740_v3 = vsel %vm3235_vm2, %v19649_v60, 0.0 }
 0x4d9   :  { %4617 = vadd.xlane.f32.xlu0 %v4616_v35 }
 0x4e4   :  { %4103 = vrot.lane.b32.xlu1 %v19367_v9, %s18861_s23 }
 0x4ef   :  { %4387 = vrot.lane.b32.xlu0 %v19240_v54, %s18861_s23 }
 0x4f3   :  { %4628 = vrot.lane.b32.xlu0 %v19242_v63, %s18861_s23 }
 0x4fb   :  { %v3370_v17 = vpop.xlane.xlu1 %3369 }
 0x4fc   :  { %18511 = vrcp.f32 %v3370_v17 }
 0x4ff   :  { %v3373_v11 = vpop.xlane.xlu0 %3372 }
 0x500   :  { %18513 = vrcp.f32 %v3373_v11 }
 0x501   :  { %18515 = vpow2.f32 %v4853_v1 }
 0x502   :  { %18517 = vpow2.f32 %v4733_v49 }
 0x503   :  { %v3491_v20 = vpop.xlane.xlu1 %3490  ;;  %18519 = vpow2.f32 %v4855_v21 }
 0x504   :  { %18521 = vrcp.f32 %v3491_v20 }
 0x505   :  { %v3494_v10 = vpop.xlane.xlu0 %3493 }
 0x506   :  { %18523 = vrcp.f32 %v3494_v10  ;;  %v18512_v35 = vpop.eup %18511 }
 0x507   :  { %v3376_v19 = vmul.f32 %v18512_v35, %v19516_v4 }
 0x508   :  { %4620 = vadd.xlane.f32.xlu1 %v4619_v16 }
 0x50a   :  { %v18514_v61 = vpop.eup %18513 }
 0x50b   :  { %v3377_v52 = vmul.f32 %v18514_v61, %v19521_v29  ;;  %v3611_v41 = vpop.xlane.xlu1 %3610  ;;  %v19657_v8 = vpop.eup %18515 }
 0x50c   :  { %4741 = vadd.xlane.f32.xlu1 %v4740_v3  ;;  %v19659_v62 = vpop.eup %18517  ;;  %18525 = vrcp.f32 %v3611_v41  ;;  %v4857_v29 = vsel %vm3235_vm2, %v19657_v8, 0.0 }
 0x50d   :  { %v3614_v22 = vpop.xlane.xlu0 %3613  ;;  %v3378_v58 = vpack.c.bf16 %v3377_v52, %v3376_v19  ;;  %v19661_v7 = vpop.eup %18519  ;;  %v4737_v49 = vsel %vm3235_vm2, %v19659_v62, 0.0 }
 0x50e   :  { %18527 = vrcp.f32 %v3614_v22  ;;  %v18522_v2 = vpop.eup %18521 }
 0x50f   :  { %16304 = vmatmul.mubr.msk.bf16.vlgmr.msra.gmra.mrb[28].mxu1 %vm3235_vm2, %v3378_v58  ;;  %v4968_v4 = vpop.xlane.xlu1 %4967  ;;  %v3497_v21 = vmul.f32 %v18522_v2, %v19526_v55 }
 0x510   :  { %v18524_v17 = vpop.eup %18523  ;;  %16314 = vmatpush3.bf16.msra.mxu1 %v19230_v48  ;;  %v4972_v50 = vsub.f32 %v19501_v42, %v4968_v4  ;;  %4858 = vadd.xlane.f32.xlu1 %v4857_v29  ;;  %v4860_v48 = vsel %vm3235_vm2, %v19661_v7, 0.0 }
 0x511   :  { %v3498_v1 = vmul.f32 %v18524_v17, %v19530_v6  ;;  %16315 = vmatprep.mubr.msk.bf16.mxu1 %vm18875_vm0, %v18874_v57  ;;  %16325 = vmatprep.subr.bf16.mxu1 %v18874_v57  ;;  %v3622_v35 = vpop.permute.xlu0 %3621 }
 0x512   :  { %v4974_v11 = vmul.f32 1.442695, %v4972_v50  ;;  %4738 = vadd.xlane.f32.xlu0 %v4737_v49 }
 0x513   :  { %v4971_v20 = vpop.xlane.xlu1 %4970  ;;  %v3499_v6 = vpack.c.bf16 %v3498_v1, %v3497_v21 }
 0x514   :  { %18529 = vpow2.f32 %v4974_v11  ;;  %v4973_v42 = vsub.f32 %v19504_v38, %v4971_v20  ;;  %4861 = vadd.xlane.f32.xlu1 %v4860_v48 }
 0x516   :  { %v4976_v10 = vmul.f32 1.442695, %v4973_v42  ;;  %v18526_v16 = vpop.eup %18525 }
 0x517   :  { %16316 = vmatmul.mubr.msk.bf16.vlgmr.msra.gmra.mrb[32].mxu1 %vm3235_vm2, %v3499_v6  ;;  %v5088_v61 = vpop.xlane.xlu1 %5087  ;;  %v3617_v41 = vmul.f32 %v18526_v16, %v19534_v23 }
 0x518   :  { %v18528_v19 = vpop.eup %18527  ;;  %18531 = vpow2.f32 %v4976_v10  ;;  %16326 = vmatpush3.bf16.msra.mxu1 %v3622_v35  ;;  %v5092_v55 = vsub.f32 %v19507_v47, %v5088_v61  ;;  %16327 = vmatprep.mubr.msk.bf16.mxu1 %vm18875_vm0, %v18874_v57 }
 0x519   :  { %v3618_v52 = vmul.f32 %v18528_v19, %v19538_v32  ;;  %16337 = vmatprep.subr.bf16.mxu1 %v18874_v57 }
 0x51a   :  { %v5094_v38 = vmul.f32 1.442695, %v5092_v55 }
 0x51b   :  { %v5091_v3 = vpop.xlane.xlu1 %5090  ;;  %v3619_v58 = vpack.c.bf16 %v3618_v52, %v3617_v41 }
 0x51c   :  { %18533 = vpow2.f32 %v5094_v38  ;;  %v5093_v22 = vsub.f32 %v19510_v27, %v5091_v3 }
 0x51e   :  { %v19686_v2 = vpop.eup %18529  ;;  %v5096_v4 = vmul.f32 1.442695, %v5093_v22 }
 0x51f   :  { %16328 = vmatmul.mubr.msk.bf16.vlgmr.msra.gmra.mrb[36].mxu1 %vm3235_vm2, %v3619_v58  ;;  %v4978_v47 = vsel %vm3235_vm2, %v19686_v2, 0.0  ;;  %v3863_v49 = vpop.permute.xlu1 %3862 }
 0x520   :  { %18535 = vpow2.f32 %v5096_v4  ;;  %16338 = vmatpush3.bf16.msra.mxu1 %v19365_v39  ;;  %4979 = vadd.xlane.f32.xlu1 %v4978_v47 }
 0x521   :  { %16339 = vmatprep.mubr.msk.bf16.mxu1 %vm18875_vm0, %v18874_v57  ;;  %16349 = vmatprep.subr.bf16.mxu1 %v18874_v57 }
 0x522   :  { %v19695_v23 = vpop.eup %18531 }
 0x523   :  { %v4981_v27 = vsel %vm3235_vm2, %v19695_v23, 0.0 }
 0x524   :  { %4982 = vadd.xlane.f32.xlu1 %v4981_v27 }
 0x526   :  { %v19699_v32 = vpop.eup %18533 }
 0x527   :  { %v5098_v29 = vsel %vm3235_vm2, %v19699_v32, 0.0 }
 0x528   :  { %5099 = vadd.xlane.f32.xlu1 %v5098_v29 }
 0x52a   :  { %v19703_v17 = vpop.eup %18535 }
 0x52b   :  { %v5101_v39 = vsel %vm3235_vm2, %v19703_v17, 0.0 }
 0x52c   :  { %5102 = vadd.xlane.f32.xlu0 %v5101_v39 }
 0x539   :  { %4869 = vrot.lane.b32.xlu1 %v19459_v13, %s18861_s23 }
 0x542   :  { %5110 = vrot.lane.b32.xlu0 %v19461_v15, %s18861_s23  ;;  %v3735_v50 = vpop.xlane.xlu0 %3734 }
 0x543   :  { %18537 = vrcp.f32 %v3735_v50 }
 0x546   :  { %v3852_v1 = vpop.xlane.xlu0 %3851 }
 0x54a   :  { %v3855_v11 = vpop.xlane.xlu0 %3854 }
 0x54d   :  { %v18538_v42 = vpop.eup %18537 }
 0x54e   :  { %v3976_v20 = vpop.xlane.xlu0 %3975  ;;  %v3739_v10 = vmul.f32 %v18538_v42, %v19567_v44 }
 0x550   :  { %v3732_v21 = vpop.xlane.xlu1 %3731 }
 0x551   :  { %18539 = vrcp.f32 %v3732_v21 }
 0x552   :  { %18541 = vrcp.f32 %v3855_v11  ;;  %v4093_v35 = vpop.xlane.xlu0 %4092 }
 0x553   :  { %18543 = vrcp.f32 %v3852_v1 }
 0x554   :  { %v3973_v48 = vpop.xlane.xlu1 %3972 }
 0x555   :  { %18545 = vrcp.f32 %v3973_v48 }
 0x556   :  { %18547 = vrcp.f32 %v3976_v20  ;;  %v4377_v41 = vpop.xlane.xlu0 %4376 }
 0x558   :  { %v4096_v61 = vpop.xlane.xlu1 %4095 }
 0x559   :  { %18549 = vrcp.f32 %v4096_v61 }
 0x55a   :  { %18551 = vrcp.f32 %v4093_v35  ;;  %v4380_v58 = vpop.xlane.xlu0 %4379 }
 0x55b   :  { %v18540_v6 = vpop.eup %18539 }
 0x55c   :  { %v3738_v16 = vmul.f32 %v18540_v6, %v19588_v25  ;;  %v18542_v55 = vpop.eup %18541  ;;  %v4257_v25 = vpop.xlane.xlu1 %4256 }
 0x55d   :  { %v18544_v52 = vpop.eup %18543  ;;  %v3859_v38 = vmul.f32 %v18542_v55, %v19579_v45 }
 0x55e   :  { %v3740_v19 = vpack.c.bf16 %v3739_v10, %v3738_v16  ;;  %v3858_v44 = vmul.f32 %v18544_v52, %v19573_v26  ;;  %v4498_v27 = vpop.xlane.xlu0 %4497 }
 0x55f   :  { %v18546_v22 = vpop.eup %18545 }
 0x560   :  { %16340 = vmatmul.mubr.msk.bf16.vlgmr.msra.gmra.mrb[40].mxu1 %vm3235_vm2, %v3740_v19  ;;  %v3860_v3 = vpack.c.bf16 %v3859_v38, %v3858_v44  ;;  %v18548_v4 = vpop.eup %18547  ;;  %v3979_v45 = vmul.f32 %v18546_v22, %v19597_v24  ;;  %v4260_v47 = vpop.xlane.xlu1 %4259 }
 0x561   :  { %16350 = vmatpush3.bf16.msra.mxu1 %v3863_v49  ;;  %16351 = vmatprep.mubr.msk.bf16.mxu1 %vm18875_vm0, %v18874_v57  ;;  %v3980_v26 = vmul.f32 %v18548_v4, %v19585_v53  ;;  %18553 = vrcp.f32 %v4260_v47 }
 0x562   :  { %16361 = vmatprep.subr.bf16.mxu1 %v18874_v57  ;;  %18555 = vrcp.f32 %v4257_v25  ;;  %v4501_v20 = vpop.xlane.xlu0 %4500 }
 0x563   :  { %v3981_v29 = vpack.c.bf16 %v3980_v26, %v3979_v45  ;;  %v18550_v39 = vpop.eup %18549  ;;  %18557 = vrcp.f32 %v4380_v58 }
 0x564   :  { %v4104_v1 = vpop.permute.xlu1 %4103  ;;  %v4100_v53 = vmul.f32 %v18550_v39, %v19606_v14  ;;  %18559 = vrcp.f32 %v4377_v41  ;;  %v17497_v39 = vld [vmem:[#allocation10] ss:$16 sps:$4 sm:$0xff]  }
 0x565   :  { %18561 = vrcp.f32 %v4501_v20 }
 0x566   :  { %v4618_v10 = vpop.xlane.xlu0 %4617  ;;  %18563 = vrcp.f32 %v4498_v27 }
 0x567   :  { %18565 = vrcp.f32 %v4618_v10 }
 0x568   :  { %16352 = vmatmul.mubr.msk.bf16.vlgmr.msra.gmra.mrb[44].mxu1 %vm3235_vm2, %v3860_v3 }
 0x569   :  { %16362 = vmatpush3.bf16.msra.mxu1 %v19367_v9  ;;  %16363 = vmatprep.mubr.msk.bf16.mxu1 %vm18875_vm0, %v18874_v57  ;;  %v18552_v9 = vpop.eup %18551 }
 0x56a   :  { %16373 = vmatprep.subr.bf16.mxu1 %v18874_v57  ;;  %v4099_v21 = vmul.f32 %v18552_v9, %v19593_v12  ;;  %v4388_v61 = vpop.permute.xlu0 %4387 }
 0x56b   :  { %v18554_v42 = vpop.eup %18553 }
 0x56c   :  { %v4101_v48 = vpack.c.bf16 %v4100_v53, %v4099_v21  ;;  %v18556_v6 = vpop.eup %18555  ;;  %v4264_v14 = vmul.f32 %v18554_v42, %v19622_v0 }
 0x56d   :  { %v4263_v12 = vmul.f32 %v18556_v6, %v19614_v56  ;;  %v18558_v35 = vpop.eup %18557  ;;  %v17509_v6 = vld [vmem:[#allocation10 + $0x40] ss:$16 sps:$4 sm:$0xff]  }
 0x56e   :  { %v19726_v50 = vpop.f32.mrb[24].mxu1  ;;  %v18560_v19 = vpop.eup %18559 }
 0x56f   :  { %v16293_v49 = vpop.f32.mrb[25].mxu1  ;;  %v4265_v16 = vpack.c.bf16 %v4264_v14, %v4263_v12  ;;  %v4383_v0 = vmul.f32 %v18560_v19, %v19602_v59  ;;  %v18562_v56 = vpop.eup %18561  ;;  %v17511_v14 = vld [vmem:[#allocation10 + $0x44] ss:$16 sps:$4 sm:$0xff]   ;;  %v17502_v19 = vld [vmem:[#allocation10 + $0xc] ss:$16 sps:$4 sm:$0xff]  }
 0x570   :  { %16364 = vmatmul.mubr.msk.bf16.vlgmr.msra.gmra.mrb[48].mxu1 %vm3235_vm2, %v3981_v29  ;;  %v19729_v11 = vpop.f32.mrb[26].mxu1  ;;  %v18564_v52 = vpop.eup %18563  ;;  %v4505_v38 = vmul.f32 %v18562_v56, %v19626_v40 }
 0x571   :  { %16374 = vmatpush3.bf16.msra.mxu1 %v4104_v1  ;;  %16375 = vmatprep.mubr.msk.bf16.mxu1 %vm18875_vm0, %v18874_v57  ;;  %v16294_v24 = vpop.f32.mrb[27].mxu1  ;;  %v4629_v44 = vpop.permute.xlu0 %4628  ;;  %v17499_v1 = vld [vmem:[#allocation10 + $0x4] ss:$16 sps:$4 sm:$0xff]  }
 0x572   :  { %16385 = vmatprep.subr.bf16.mxu1 %v18874_v57  ;;  %v18566_v25 = vpop.eup %18565  ;;  %5989 = vmatprep.subr.bf16.mxu0 %v17499_v1  ;;  %v17563_v1 = vld [vmem:[#allocation10 + $0x160] ss:$16 sps:$4 sm:$0xff]  }
 0x573   :  { %5990 = vmatpush1.bf16.msra.mxu0 %v17497_v39  ;;  %v17538_v39 = vld [vmem:[#allocation10 + $0xcc] ss:$16 sps:$4 sm:$0xff]  }
 0x578   :  { %16376 = vmatmul.mubr.msk.bf16.vlgmr.msra.gmra.mrb[52].mxu1 %vm3235_vm2, %v4101_v48 }
 0x579   :  { %16386 = vmatpush3.bf16.msra.mxu1 %v19240_v54  ;;  %16387 = vmatprep.mubr.msk.bf16.mxu1 %vm18875_vm0, %v18874_v57  ;;  %v4384_v54 = vmul.f32 %v18558_v35, %v19610_v36  ;;  %v4504_v36 = vmul.f32 %v18564_v52, %v19618_v30  ;;  %v4624_v30 = vmul.f32 %v18566_v25, %v19632_v18  ;;  %v17541_v25 = vld [vmem:[#allocation10 + $0xe4] ss:$16 sps:$4 sm:$0xff]  }
 0x57a   :  { %16397 = vmatprep.subr.bf16.mxu1 %v18874_v57 }
 0x57b   :  { %v4385_v55 = vpack.c.bf16 %v4384_v54, %v4383_v0  ;;  %v4506_v41 = vpack.c.bf16 %v4505_v38, %v4504_v36  ;;  %v17521_v54 = vld [vmem:[#allocation10 + $0x80] ss:$16 sps:$4 sm:$0xff]   ;;  %v17523_v0 = vld [vmem:[#allocation10 + $0x84] ss:$16 sps:$4 sm:$0xff]   ;;  %v17500_v36 = vld [vmem:[#allocation10 + $0x8] ss:$16 sps:$4 sm:$0xff]  }
 0x580   :  { %16388 = vmatmul.mubr.msk.bf16.vlgmr.msra.gmra.mrb[56].mxu1 %vm3235_vm2, %v4265_v16  ;;  %v17515_v16 = vld [vmem:[#allocation10 + $0x60] ss:$16 sps:$4 sm:$0xff]  }
 0x581   :  { %16398 = vmatpush3.bf16.msra.mxu1 %v4388_v61  ;;  %16399 = vmatprep.mubr.msk.bf16.mxu1 %vm18875_vm0, %v18874_v57 }
 0x582   :  { %16409 = vmatprep.subr.bf16.mxu1 %v18874_v57 }
 0x588   :  { %16400 = vmatmul.mubr.msk.bf16.vlgmr.msra.gmra.mrb[60].mxu1 %vm3235_vm2, %v4385_v55 }
 0x589   :  { %16410 = vmatpush3.bf16.msra.mxu1 %v19242_v63  ;;  %16411 = vmatprep.mubr.msk.bf16.mxu1 %vm18875_vm0, %v18874_v57 }
 0x58a   :  { %16421 = vmatprep.subr.bf16.mxu1 %v18874_v57 }
 0x590   :  { %16412 = vmatmul.mubr.msk.bf16.vlgmr.msra.gmra.mrb[64].mxu1 %vm3235_vm2, %v4506_v41 }
 0x591   :  { %16422 = vmatpush3.bf16.msra.mxu1 %v4629_v44  ;;  %16423 = vmatprep.mubr.msk.bf16.mxu1 %vm18875_vm0, %v18874_v57  ;;  %v17508_v44 = vld [vmem:[#allocation10 + $0x2c] ss:$16 sps:$4 sm:$0xff]  }
 0x592   :  { %16433 = vmatprep.subr.bf16.mxu1 %v18874_v57 }
 0x595   :  { %v4621_v63 = vpop.xlane.xlu1 %4620 }
 0x596   :  { %18567 = vrcp.f32 %v4621_v63  ;;  %v17533_v63 = vld [vmem:[#allocation10 + $0xc0] ss:$16 sps:$4 sm:$0xff]  }
 0x599   :  { %v4742_v59 = vpop.xlane.xlu1 %4741 }
 0x59a   :  { %18569 = vrcp.f32 %v4742_v59  ;;  %v17535_v59 = vld [vmem:[#allocation10 + $0xc4] ss:$16 sps:$4 sm:$0xff]  }
 0x59d   :  { %v4859_v58 = vpop.xlane.xlu1 %4858 }
 0x59f   :  { %v4739_v40 = vpop.xlane.xlu0 %4738 }
 0x5a0   :  { %v18568_v3 = vpop.eup %18567  ;;  %18571 = vrcp.f32 %v4739_v40  ;;  %v17539_v40 = vld [vmem:[#allocation10 + $0xe0] ss:$16 sps:$4 sm:$0xff]  }
 0x5a1   :  { %v4625_v22 = vmul.f32 %v18568_v3, %v19647_v43  ;;  %v4862_v45 = vpop.xlane.xlu1 %4861  ;;  %v17512_v3 = vld [vmem:[#allocation10 + $0x48] ss:$16 sps:$4 sm:$0xff]  }
 0x5a2   :  { %18573 = vrcp.f32 %v4862_v45  ;;  %v17526_v45 = vld [vmem:[#allocation10 + $0x8c] ss:$16 sps:$4 sm:$0xff]  }
 0x5a3   :  { %v4626_v4 = vpack.c.bf16 %v4625_v22, %v4624_v30  ;;  %18575 = vrcp.f32 %v4859_v58  ;;  %v17545_v30 = vld [vmem:[#allocation10 + $0x100] ss:$16 sps:$4 sm:$0xff]   ;;  %v17547_v22 = vld [vmem:[#allocation10 + $0x104] ss:$16 sps:$4 sm:$0xff]   ;;  %v17518_v58 = vld [vmem:[#allocation10 + $0x68] ss:$16 sps:$4 sm:$0xff]  }
 0x5a4   :  { %v18570_v47 = vpop.eup %18569 }
 0x5a5   :  { %16424 = vmatmul.mubr.msk.bf16.vlgmr.msra.gmra.mrb[68].mxu1 %vm3235_vm2, %v4626_v4  ;;  %v4746_v27 = vmul.f32 %v18570_v47, %v19649_v60  ;;  %v17503_v60 = vld [vmem:[#allocation10 + $0x20] ss:$16 sps:$4 sm:$0xff]   ;;  %v17553_v4 = vld [vmem:[#allocation10 + $0x124] ss:$16 sps:$4 sm:$0xff]  }
 0x5a6   :  { %16434 = vmatpush3.bf16.msra.mxu1 %v19459_v13  ;;  %16435 = vmatprep.mubr.msk.bf16.mxu1 %vm18875_vm0, %v18874_v57  ;;  %v17551_v47 = vld [vmem:[#allocation10 + $0x120] ss:$16 sps:$4 sm:$0xff]  }
 0x5a7   :  { %16445 = vmatprep.subr.bf16.mxu1 %v18874_v57 }
 0x5aa   :  { %v18572_v26 = vpop.eup %18571 }
 0x5ab   :  { %v4745_v18 = vmul.f32 %v18572_v26, %v19659_v62  ;;  %v17505_v62 = vld [vmem:[#allocation10 + $0x24] ss:$16 sps:$4 sm:$0xff]   ;;  %v17524_v26 = vld [vmem:[#allocation10 + $0x88] ss:$16 sps:$4 sm:$0xff]  }
 0x5ac   :  { %v18574_v49 = vpop.eup %18573  ;;  %5991 = vmatprep.subr.bf16.mxu0 %v17505_v62  ;;  %v17569_v62 = vld [vmem:[#allocation10 + $0x180] ss:$16 sps:$4 sm:$0xff]  }
 0x5ad   :  { %v4980_v43 = vpop.xlane.xlu1 %4979  ;;  %v4747_v29 = vpack.c.bf16 %v4746_v27, %v4745_v18  ;;  %v18576_v53 = vpop.eup %18575  ;;  %v4866_v24 = vmul.f32 %v18574_v49, %v19661_v7  ;;  %5992 = vmatpush1.bf16.msra.mxu0 %v17503_v60  ;;  %v17532_v27 = vld [vmem:[#allocation10 + $0xac] ss:$16 sps:$4 sm:$0xff]   ;;  %v17557_v18 = vld [vmem:[#allocation10 + $0x140] ss:$16 sps:$4 sm:$0xff]  }
 0x5ae   :  { %v4865_v21 = vmul.f32 %v18576_v53, %v19657_v8  ;;  %5993 = vmatprep.subr.bf16.mxu0 %v17511_v14  ;;  %v17517_v8 = vld [vmem:[#allocation10 + $0x64] ss:$16 sps:$4 sm:$0xff]   ;;  %v17544_v53 = vld [vmem:[#allocation10 + $0xec] ss:$16 sps:$4 sm:$0xff]  }
 0x5af   :  { %16436 = vmatmul.mubr.msk.bf16.vlgmr.msra.gmra.mrb[72].mxu1 %vm3235_vm2, %v4747_v29  ;;  %v17530_v29 = vld [vmem:[#allocation10 + $0xa8] ss:$16 sps:$4 sm:$0xff]   ;;  %v17550_v14 = vld [vmem:[#allocation10 + $0x10c] ss:$16 sps:$4 sm:$0xff]  }
 0x5b0   :  { %16447 = vmatprep.mubr.msk.bf16.mxu1 %vm18875_vm0, %v18874_v57  ;;  %v4867_v42 = vpack.c.bf16 %v4866_v24, %v4865_v21  ;;  %v17571_v24 = vld [vmem:[#allocation10 + $0x184] ss:$16 sps:$4 sm:$0xff]  }
 0x5b1   :  { %v4983_v13 = vpop.xlane.xlu1 %4982  ;;  %5994 = vmatpush1.bf16.msra.mxu0 %v17509_v6  ;;  %v17577_v6 = vld [vmem:[#allocation10 + $0x1a4] ss:$16 sps:$4 sm:$0xff]  }
 0x5b2   :  { %18577 = vrcp.f32 %v4983_v13  ;;  %5995 = vmatprep.subr.bf16.mxu0 %v17517_v8  ;;  %v17565_v13 = vld [vmem:[#allocation10 + $0x164] ss:$16 sps:$4 sm:$0xff]   ;;  %v17548_v8 = vld [vmem:[#allocation10 + $0x108] ss:$16 sps:$4 sm:$0xff]  }
 0x5b3   :  { %18579 = vrcp.f32 %v4980_v43  ;;  %v17559_v43 = vld [vmem:[#allocation10 + $0x144] ss:$16 sps:$4 sm:$0xff]  }
 0x5b5   :  { %v5100_v9 = vpop.xlane.xlu1 %5099  ;;  %5996 = vmatpush1.bf16.msra.mxu0 %v17515_v16 }
 0x5b6   :  { %5997 = vmatprep.subr.bf16.mxu0 %v17523_v0  ;;  %v17554_v0 = vld [vmem:[#allocation10 + $0x128] ss:$16 sps:$4 sm:$0xff]  }
 0x5b9   :  { %v5103_v20 = vpop.xlane.xlu0 %5102  ;;  %v4870_v48 = vpop.permute.xlu1 %4869  ;;  %5998 = vmatpush1.bf16.msra.mxu0 %v17521_v54 }
 0x5ba   :  { %18581 = vrcp.f32 %v5103_v20  ;;  %16446 = vmatpush3.bf16.msra.mxu1 %v4870_v48 }
 0x5bb   :  { %16457 = vmatprep.subr.bf16.mxu1 %v18874_v57  ;;  %18583 = vrcp.f32 %v5100_v9  ;;  %v17536_v9 = vld [vmem:[#allocation10 + $0xc8] ss:$16 sps:$4 sm:$0xff]  }
 0x5bc   :  { %v18578_v10 = vpop.eup %18577 }
 0x5bd   :  { %16448 = vmatmul.mubr.msk.bf16.vlgmr.msra.gmra.mrb[76].mxu1 %vm3235_vm2, %v4867_v42  ;;  %v18580_v12 = vpop.eup %18579  ;;  %v4987_v7 = vmul.f32 %v18578_v10, %v19695_v23  ;;  %v17529_v23 = vld [vmem:[#allocation10 + $0xa4] ss:$16 sps:$4 sm:$0xff]   ;;  %v17542_v42 = vld [vmem:[#allocation10 + $0xe8] ss:$16 sps:$4 sm:$0xff]   ;;  %v17575_v10 = vld [vmem:[#allocation10 + $0x1a0] ss:$16 sps:$4 sm:$0xff]  }
 0x5be   :  { %16458 = vmatpush3.bf16.msra.mxu1 %v19461_v15  ;;  %16459 = vmatprep.mubr.msk.bf16.mxu1 %vm18875_vm0, %v18874_v57  ;;  %v4986_v35 = vmul.f32 %v18580_v12, %v19686_v2  ;;  %v5111_v15 = vpop.permute.xlu0 %5110  ;;  %v17527_v2 = vld [vmem:[#allocation10 + $0xa0] ss:$16 sps:$4 sm:$0xff]  }
 0x5bf   :  { %16469 = vmatprep.subr.bf16.mxu1 %v18874_v57  ;;  %5999 = vmatprep.subr.bf16.mxu0 %v17529_v23 }
 0x5c0   :  { %v4988_v61 = vpack.c.bf16 %v4987_v7, %v4986_v35  ;;  %6000 = vmatpush1.bf16.msra.mxu0 %v17527_v2  ;;  %v17583_v7 = vld [vmem:[#allocation10 + $0x1c4] ss:$16 sps:$4 sm:$0xff]   ;;  %v17556_v35 = vld [vmem:[#allocation10 + $0x12c] ss:$16 sps:$4 sm:$0xff]  }
 0x5c1   :  { %6001 = vmatprep.subr.bf16.mxu0 %v17535_v59  ;;  %v17574_v59 = vld [vmem:[#allocation10 + $0x18c] ss:$16 sps:$4 sm:$0xff]  }
 0x5c4   :  { %v18582_v55 = vpop.eup %18581  ;;  %6002 = vmatpush1.bf16.msra.mxu0 %v17533_v63  ;;  %v17566_v63 = vld [vmem:[#allocation10 + $0x168] ss:$16 sps:$4 sm:$0xff]  }
 0x5c5   :  { %16460 = vmatmul.mubr.msk.bf16.vlgmr.msra.gmra.mrb[80].mxu1 %vm3235_vm2, %v4988_v61  ;;  %v18584_v56 = vpop.eup %18583  ;;  %v5107_v52 = vmul.f32 %v18582_v55, %v19703_v17  ;;  %v17514_v17 = vld [vmem:[#allocation10 + $0x4c] ss:$16 sps:$4 sm:$0xff]   ;;  %6003 = vmatprep.subr.bf16.mxu0 %v17541_v25  ;;  %v17581_v61 = vld [vmem:[#allocation10 + $0x1c0] ss:$16 sps:$4 sm:$0xff]  }
 0x5c6   :  { %16470 = vmatpush3.bf16.msra.mxu1 %v5111_v15  ;;  %16471 = vmatprep.mubr.msk.bf16.mxu1 %vm18875_vm0, %v18874_v57  ;;  %v5106_v38 = vmul.f32 %v18584_v56, %v19699_v32  ;;  %v17506_v57 = vld [vmem:[#allocation10 + $0x28] ss:$16 sps:$4 sm:$0xff]   ;;  %v17520_v32 = vld [vmem:[#allocation10 + $0x6c] ss:$16 sps:$4 sm:$0xff]   ;;  %v17589_v15 = vld [vmem:[#allocation10 + $0x1e4] ss:$16 sps:$4 sm:$0xff]  }
 0x5c7   :  { %6095 = vmatprep.subr.bf16.mxu1 %v17502_v19  ;;  %v17562_v55 = vld [vmem:[#allocation10 + $0x14c] ss:$16 sps:$4 sm:$0xff]   ;;  %v17587_v56 = vld [vmem:[#allocation10 + $0x1e0] ss:$16 sps:$4 sm:$0xff]  }
 0x5c8   :  { %v5108_v41 = vpack.c.bf16 %v5107_v52, %v5106_v38  ;;  %6004 = vmatpush1.bf16.msra.mxu0 %v17539_v40  ;;  %v17560_v52 = vld [vmem:[#allocation10 + $0x148] ss:$16 sps:$4 sm:$0xff]   ;;  %v17568_v38 = vld [vmem:[#allocation10 + $0x16c] ss:$16 sps:$4 sm:$0xff]  }
 0x5c9   :  { %6005 = vmatprep.subr.bf16.mxu0 %v17547_v22  ;;  %v17580_v25 = vld [vmem:[#allocation10 + $0x1ac] ss:$16 sps:$4 sm:$0xff]   ;;  %v17595_v22 = vld [vmem:[#allocation10 + $0x204] ss:$16 sps:$4 sm:$0xff]  }
 0x5ca   :  { %v17586_v40 = vld [vmem:[#allocation10 + $0x1cc] ss:$16 sps:$4 sm:$0xff]  }
 0x5cc   :  { %6006 = vmatpush1.bf16.msra.mxu0 %v17545_v30  ;;  %v17590_v30 = vld [vmem:[#allocation10 + $0x1e8] ss:$16 sps:$4 sm:$0xff]  }
 0x5cd   :  { %16472 = vmatmul.mubr.msk.bf16.vlgmr.msra.gmra.mrb[84].mxu1 %vm3235_vm2, %v5108_v41  ;;  %6007 = vmatprep.subr.bf16.mxu0 %v17553_v4 }
 0x5ce   :  { %6096 = vmatpush1.bf16.msra.mxu1 %v17500_v36 }
 0x5cf   :  { %6097 = vmatprep.subr.bf16.mxu1 %v17508_v44 }
 0x5d0   :  { %6008 = vmatpush1.bf16.msra.mxu0 %v17551_v47 }
 0x5d1   :  { %6009 = vmatprep.subr.bf16.mxu0 %v17559_v43 }
 0x5d2   :  { %6098 = vmatpush1.bf16.msra.mxu1 %v17506_v57  ;;  %v17572_v57 = vld [vmem:[#allocation10 + $0x188] ss:$16 sps:$4 sm:$0xff]  }
 0x5d3   :  { %6099 = vmatprep.subr.bf16.mxu1 %v17514_v17  ;;  %v17578_v17 = vld [vmem:[#allocation10 + $0x1a8] ss:$16 sps:$4 sm:$0xff]  }
 0x5d4   :  { %6010 = vmatpush1.bf16.msra.mxu0 %v17557_v18 }
 0x5d5   :  { %6011 = vmatprep.subr.bf16.mxu0 %v17565_v13 }
 0x5d6   :  { %6100 = vmatpush1.bf16.msra.mxu1 %v17512_v3  ;;  %v17584_v3 = vld [vmem:[#allocation10 + $0x1c8] ss:$16 sps:$4 sm:$0xff]  }
 0x5d7   :  { %6101 = vmatprep.subr.bf16.mxu1 %v17520_v32  ;;  %v17592_v32 = vld [vmem:[#allocation10 + $0x1ec] ss:$16 sps:$4 sm:$0xff]  }
 0x5d8   :  { %6012 = vmatpush1.bf16.msra.mxu0 %v17563_v1 }
 0x5d9   :  { %6013 = vmatprep.subr.bf16.mxu0 %v17571_v24 }
 0x5da   :  { %6102 = vmatpush1.bf16.msra.mxu1 %v17518_v58  ;;  %v17598_v58 = vld [vmem:[#allocation10 + $0x20c] ss:$16 sps:$4 sm:$0xff]  }
 0x5db   :  { %6103 = vmatprep.subr.bf16.mxu1 %v17526_v45 }
 0x5dc   :  { %6014 = vmatpush1.bf16.msra.mxu0 %v17569_v62 }
 0x5dd   :  { %6015 = vmatprep.subr.bf16.mxu0 %v17577_v6 }
 0x5de   :  { %6104 = vmatpush1.bf16.msra.mxu1 %v17524_v26 }
 0x5df   :  { %6105 = vmatprep.subr.bf16.mxu1 %v17532_v27 }
 0x5e0   :  { %6016 = vmatpush1.bf16.msra.mxu0 %v17575_v10 }
 0x5e1   :  { %6017 = vmatprep.subr.bf16.mxu0 %v17583_v7 }
 0x5e2   :  { %v3420_v49 = vpop.f32.mrb[28].mxu1  ;;  %6106 = vmatpush1.bf16.msra.mxu1 %v17530_v29 }
 0x5e3   :  { %v16305_v60 = vpop.f32.mrb[29].mxu1  ;;  %6107 = vmatprep.subr.bf16.mxu1 %v17538_v39 }
 0x5e4   :  { %v3423_v21 = vpop.f32.mrb[30].mxu1  ;;  %6018 = vmatpush1.bf16.msra.mxu0 %v17581_v61 }
 0x5e5   :  { %v16886_v20 = vpack.i.bf16 %v3423_v21, %v3420_v49  ;;  %v16306_v48 = vpop.f32.mrb[31].mxu1  ;;  %6019 = vmatprep.subr.bf16.mxu0 %v17589_v15 }
 0x5e6   :  { %6108 = vmatpush1.bf16.msra.mxu1 %v17536_v9 }
 0x5e7   :  { %6109 = vmatprep.subr.bf16.mxu1 %v17544_v53 }
 0x5e8   :  { %6020 = vmatpush1.bf16.msra.mxu0 %v17587_v56 }
 0x5e9   :  { %6042 = vmatprep.subr.bf16.mxu0 %v17595_v22 }
 0x5ea   :  { %v19788_v12 = vpop.f32.mrb[32].mxu1  ;;  %6110 = vmatpush1.bf16.msra.mxu1 %v17542_v42 }
 0x5eb   :  { %v16317_v16 = vpop.f32.mrb[33].mxu1  ;;  %6111 = vmatprep.subr.bf16.mxu1 %v17550_v14 }
 0x5ec   :  { %v19790_v19 = vpop.f32.mrb[34].mxu1 }
 0x5ed   :  { %v16318_v54 = vpop.f32.mrb[35].mxu1 }
 0x5ee   :  { %6112 = vmatpush1.bf16.msra.mxu1 %v17548_v8 }
 0x5ef   :  { %6113 = vmatprep.subr.bf16.mxu1 %v17556_v35 }
 0x5f2   :  { %v3661_v23 = vpop.f32.mrb[36].mxu1  ;;  %6114 = vmatpush1.bf16.msra.mxu1 %v17554_v0 }
 0x5f3   :  { %v16329_v2 = vpop.f32.mrb[37].mxu1  ;;  %6115 = vmatprep.subr.bf16.mxu1 %v17562_v55 }
 0x5f4   :  { %v3664_v36 = vpop.f32.mrb[38].mxu1 }
 0x5f5   :  { %v16881_v41 = vpack.i.bf16 %v3664_v36, %v3661_v23  ;;  %v16330_v44 = vpop.f32.mrb[39].mxu1 }
 0x5f6   :  { %6116 = vmatpush1.bf16.msra.mxu1 %v17560_v52 }
 0x5f7   :  { %16882 = vrot.lane.b32.xlu1 %v16881_v41, %s18861_s23  ;;  %6117 = vmatprep.subr.bf16.mxu1 %v17568_v38 }
 0x5fa   :  { %6118 = vmatpush1.bf16.msra.mxu1 %v17566_v63 }
 0x5fb   :  { %16887 = vrot.lane.b32.xlu1 %v16886_v20, %s18861_s23  ;;  %6119 = vmatprep.subr.bf16.mxu1 %v17574_v59  ;;  %v17593_v59 = vld [vmem:[#allocation10 + $0x200] ss:$16 sps:$4 sm:$0xff]  }
 0x5fe   :  { %6120 = vmatpush1.bf16.msra.mxu1 %v17572_v57  ;;  %v17596_v57 = vld [vmem:[#allocation10 + $0x208] ss:$16 sps:$4 sm:$0xff]  }
 0x5ff   :  { %6121 = vmatprep.subr.bf16.mxu1 %v17580_v25 }
 0x602   :  { %6122 = vmatpush1.bf16.msra.mxu1 %v17578_v17  ;;  %v17601_v17 = vld [vmem:[#allocation10 + $0x224] ss:$16 sps:$4 sm:$0xff]  }
 0x603   :  { %6123 = vmatprep.subr.bf16.mxu1 %v17586_v40  ;;  %v17602_v40 = vld [vmem:[#allocation10 + $0x228] ss:$16 sps:$4 sm:$0xff]  }
 0x606   :  { %6124 = vmatpush1.bf16.msra.mxu1 %v17584_v3  ;;  %v17607_v3 = vld [vmem:[#allocation10 + $0x244] ss:$16 sps:$4 sm:$0xff]  }
 0x607   :  { %6125 = vmatprep.subr.bf16.mxu1 %v17592_v32  ;;  %v17610_v32 = vld [vmem:[#allocation10 + $0x24c] ss:$16 sps:$4 sm:$0xff]  }
 0x60a   :  { %6126 = vmatpush1.bf16.msra.mxu1 %v17590_v30 }
 0x60b   :  { %6148 = vmatprep.subr.bf16.mxu1 %v17598_v58  ;;  %v17613_v58 = vld [vmem:[#allocation10 + $0x264] ss:$16 sps:$4 sm:$0xff]  }
 0x633   :  { %v19794_v4 = vpop.f32.mrb[40].mxu1 }
 0x634   :  { %v16341_v45 = vpop.f32.mrb[41].mxu1 }
 0x635   :  { %v19796_v47 = vpop.f32.mrb[42].mxu1 }
 0x636   :  { %v16342_v26 = vpop.f32.mrb[43].mxu1 }
 0x637   :  { %v17616_v26 = vld [vmem:[#allocation10 + $0x26c] ss:$16 sps:$4 sm:$0xff]  }
 0x63b   :  { %v3902_v27 = vpop.f32.mrb[44].mxu1 }
 0x63c   :  { %v16353_v18 = vpop.f32.mrb[45].mxu1 }
 0x63d   :  { %v3905_v43 = vpop.f32.mrb[46].mxu1 }
 0x63e   :  { %v16906_v29 = vpack.i.bf16 %v3905_v43, %v3902_v27  ;;  %v16354_v13 = vpop.f32.mrb[47].mxu1  ;;  %v17611_v43 = vld [vmem:[#allocation10 + $0x260] ss:$16 sps:$4 sm:$0xff]  }
 0x63f   :  { %v17619_v13 = vld [vmem:[#allocation10 + $0x284] ss:$16 sps:$4 sm:$0xff]  }
 0x643   :  { %v19798_v39 = vpop.f32.mrb[48].mxu1 }
 0x644   :  { %v16365_v1 = vpop.f32.mrb[49].mxu1 }
 0x645   :  { %v19800_v49 = vpop.f32.mrb[50].mxu1  ;;  %v17622_v1 = vld [vmem:[#allocation10 + $0x28c] ss:$16 sps:$4 sm:$0xff]  }
 0x646   :  { %v16366_v9 = vpop.f32.mrb[51].mxu1 }
 0x647   :  { %v17617_v9 = vld [vmem:[#allocation10 + $0x280] ss:$16 sps:$4 sm:$0xff]  }
 0x64b   :  { %v19802_v53 = vpop.f32.mrb[52].mxu1 }
 0x64c   :  { %v16377_v60 = vpop.f32.mrb[53].mxu1 }
 0x64d   :  { %v19804_v62 = vpop.f32.mrb[54].mxu1  ;;  %v17620_v60 = vld [vmem:[#allocation10 + $0x288] ss:$16 sps:$4 sm:$0xff]  }
 0x64e   :  { %v16901_v24 = vpack.i.bf16 %v19804_v62, %v19802_v53  ;;  %v16378_v21 = vpop.f32.mrb[55].mxu1  ;;  %v17629_v53 = vld [vmem:[#allocation10 + $0x2c0] ss:$16 sps:$4 sm:$0xff]   ;;  %v17632_v62 = vld [vmem:[#allocation10 + $0x2c8] ss:$16 sps:$4 sm:$0xff]  }
 0x64f   :  { %v17625_v21 = vld [vmem:[#allocation10 + $0x2a4] ss:$16 sps:$4 sm:$0xff]  }
 0x653   :  { %v19808_v20 = vpop.f32.mrb[56].mxu1 }
 0x654   :  { %v16389_v48 = vpop.f32.mrb[57].mxu1 }
 0x655   :  { %v19810_v42 = vpop.f32.mrb[58].mxu1  ;;  %v17628_v48 = vld [vmem:[#allocation10 + $0x2ac] ss:$16 sps:$4 sm:$0xff]  }
 0x656   :  { %v16390_v6 = vpop.f32.mrb[59].mxu1 }
 0x65b   :  { %v4427_v14 = vpop.f32.mrb[60].mxu1 }
 0x65c   :  { %v16401_v10 = vpop.f32.mrb[61].mxu1 }
 0x65d   :  { %v4430_v8 = vpop.f32.mrb[62].mxu1 }
 0x65e   :  { %v16896_v7 = vpack.i.bf16 %v4430_v8, %v4427_v14  ;;  %v16402_v16 = vpop.f32.mrb[63].mxu1  ;;  %v17623_v8 = vld [vmem:[#allocation10 + $0x2a0] ss:$16 sps:$4 sm:$0xff]  }
 0x660   :  { %16897 = vrot.lane.b32.xlu1 %v16896_v7, %s18861_s23  ;;  %v17626_v7 = vld [vmem:[#allocation10 + $0x2a8] ss:$16 sps:$4 sm:$0xff]  }
 0x663   :  { %v19813_v35 = vpop.f32.mrb[64].mxu1 }
 0x664   :  { %16907 = vrot.lane.b32.xlu1 %v16906_v29, %s18861_s23  ;;  %v16413_v61 = vpop.f32.mrb[65].mxu1  ;;  %v17614_v29 = vld [vmem:[#allocation10 + $0x268] ss:$16 sps:$4 sm:$0xff]  }
 0x665   :  { %v19816_v54 = vpop.f32.mrb[66].mxu1  ;;  %v17631_v61 = vld [vmem:[#allocation10 + $0x2c4] ss:$16 sps:$4 sm:$0xff]  }
 0x666   :  { %v16414_v0 = vpop.f32.mrb[67].mxu1 }
 0x667   :  { %v17634_v0 = vld [vmem:[#allocation10 + $0x2cc] ss:$16 sps:$4 sm:$0xff]  }
 0x669   :  { %v16883_v55 = vpop.permute.xlu1 %16882 }
 0x66a   :  { %v16885_v15 = vunpack.i.h.bf16 %v16883_v55  ;;  %v16884_v56 = vunpack.i.l.bf16 %v16883_v55  ;;  %v17640_v55 = vld [vmem:[#allocation10 + $0x2ec] ss:$16 sps:$4 sm:$0xff]  }
 0x66c   :  { %v4184_v23 = vsel %vm3187_vm1, %v19788_v12, %v16884_v56  ;;  %v4185_v52 = vsel %vm3187_vm1, %v19790_v19, %v16885_v15  ;;  %v17604_v12 = vld [vmem:[#allocation10 + $0x22c] ss:$16 sps:$4 sm:$0xff]   ;;  %v17599_v19 = vld [vmem:[#allocation10 + $0x220] ss:$16 sps:$4 sm:$0xff]   ;;  %v17638_v56 = vld [vmem:[#allocation10 + $0x2e8] ss:$16 sps:$4 sm:$0xff]  }
 0x66d   :  { %v16888_v2 = vpop.permute.xlu1 %16887  ;;  %v5198_v38 = vpack.c.bf16 %v4185_v52, %v4184_v23  ;;  %v17635_v15 = vld [vmem:[#allocation10 + $0x2e0] ss:$16 sps:$4 sm:$0xff]   ;;  %v17643_v23 = vld [vmem:[#allocation10 + $0x304] ss:$16 sps:$4 sm:$0xff]   ;;  %v17646_v52 = vld [vmem:[#allocation10 + $0x30c] ss:$16 sps:$4 sm:$0xff]  }
 0x66e   :  { %v16890_v36 = vunpack.i.h.bf16 %v16888_v2  ;;  %v16889_v41 = vunpack.i.l.bf16 %v16888_v2 }
 0x66f   :  { %6021 = vmatprep.mubr.bf16.mxu0 %v5198_v38  ;;  %6127 = vmatprep.mubr.bf16.mxu1 %v5198_v38  ;;  %v17641_v38 = vld [vmem:[#allocation10 + $0x300] ss:$16 sps:$4 sm:$0xff]  }
 0x670   :  { %v4183_v44 = vsel %vm3187_vm1, %v19729_v11, %v16890_v36  ;;  %v4182_v63 = vsel %vm3187_vm1, %v19726_v50, %v16889_v41  ;;  %v17605_v11 = vld [vmem:[#allocation10 + $0x240] ss:$16 sps:$4 sm:$0xff]   ;;  %v17608_v50 = vld [vmem:[#allocation10 + $0x248] ss:$16 sps:$4 sm:$0xff]  }
 0x671   :  { %v5197_v25 = vpack.c.bf16 %v4183_v44, %v4182_v63  ;;  %v17644_v36 = vld [vmem:[#allocation10 + $0x308] ss:$16 sps:$4 sm:$0xff]   ;;  %v17649_v44 = vld [vmem:[#allocation10 + $0x324] ss:$16 sps:$4 sm:$0xff]  }
 0x673   :  { %6022 = vmatmul.mubr.bf16.vlgmr.msra.gmra.mrb[88].mxu0 %v5197_v25  ;;  %6128 = vmatmul.mubr.bf16.vlgmr.msra.gmra.mrb[88].mxu1 %v5197_v25 }
 0x674   :  { %6043 = vmatpush1.bf16.msra.mxu0 %v17593_v59  ;;  %6149 = vmatpush1.bf16.msra.mxu1 %v17596_v57  ;;  %v17652_v59 = vld [vmem:[#allocation10 + $0x32c] ss:$16 sps:$4 sm:$0xff]  }
 0x675   :  { %6044 = vmatprep.subr.bf16.mxu0 %v17601_v17  ;;  %6150 = vmatprep.subr.bf16.mxu1 %v17604_v12  ;;  %v17647_v17 = vld [vmem:[#allocation10 + $0x320] ss:$16 sps:$4 sm:$0xff]   ;;  %v17650_v12 = vld [vmem:[#allocation10 + $0x328] ss:$16 sps:$4 sm:$0xff]  }
 0x678   :  { %v4668_v30 = vpop.f32.mrb[68].mxu1  ;;  %6045 = vmatpush1.bf16.msra.mxu0 %v17599_v19  ;;  %6151 = vmatpush1.bf16.msra.mxu1 %v17602_v40  ;;  %v17655_v19 = vld [vmem:[#allocation10 + $0x344] ss:$16 sps:$4 sm:$0xff]   ;;  %v17658_v40 = vld [vmem:[#allocation10 + $0x34c] ss:$16 sps:$4 sm:$0xff]  }
 0x679   :  { %v16425_v22 = vpop.f32.mrb[69].mxu1  ;;  %6046 = vmatprep.subr.bf16.mxu0 %v17607_v3  ;;  %6152 = vmatprep.subr.bf16.mxu1 %v17610_v32  ;;  %v17653_v32 = vld [vmem:[#allocation10 + $0x340] ss:$16 sps:$4 sm:$0xff]  }
 0x67a   :  { %v4671_v45 = vpop.f32.mrb[70].mxu1  ;;  %v17664_v22 = vld [vmem:[#allocation10 + $0x36c] ss:$16 sps:$4 sm:$0xff]  }
 0x67b   :  { %v16891_v27 = vpack.i.bf16 %v4671_v45, %v4668_v30  ;;  %v16426_v18 = vpop.f32.mrb[71].mxu1  ;;  %v17656_v30 = vld [vmem:[#allocation10 + $0x348] ss:$16 sps:$4 sm:$0xff]  }
 0x67c   :  { %6047 = vmatpush1.bf16.msra.mxu0 %v17605_v11  ;;  %6153 = vmatpush1.bf16.msra.mxu1 %v17608_v50  ;;  %v17661_v50 = vld [vmem:[#allocation10 + $0x364] ss:$16 sps:$4 sm:$0xff]  }
 0x67d   :  { %16892 = vrot.lane.b32.xlu0 %v16891_v27, %s18861_s23  ;;  %6048 = vmatprep.subr.bf16.mxu0 %v17613_v58  ;;  %v17662_v27 = vld [vmem:[#allocation10 + $0x368] ss:$16 sps:$4 sm:$0xff]   ;;  %v17667_v18 = vld [vmem:[#allocation10 + $0x384] ss:$16 sps:$4 sm:$0xff]  }
 0x67e   :  { %6154 = vmatprep.subr.bf16.mxu1 %v17616_v26  ;;  %v17659_v26 = vld [vmem:[#allocation10 + $0x360] ss:$16 sps:$4 sm:$0xff]  }
 0x680   :  { %6049 = vmatpush1.bf16.msra.mxu0 %v17611_v43  ;;  %6155 = vmatpush1.bf16.msra.mxu1 %v17614_v29  ;;  %v17670_v43 = vld [vmem:[#allocation10 + $0x38c] ss:$16 sps:$4 sm:$0xff]  }
 0x681   :  { %16902 = vrot.lane.b32.xlu0 %v16901_v24, %s18861_s23  ;;  %6050 = vmatprep.subr.bf16.mxu0 %v17619_v13  ;;  %v17637_v24 = vld [vmem:[#allocation10 + $0x2e4] ss:$16 sps:$4 sm:$0xff]   ;;  %v17665_v13 = vld [vmem:[#allocation10 + $0x380] ss:$16 sps:$4 sm:$0xff]  }
 0x682   :  { %v19831_v6 = vpop.f32.mrb[72].mxu1  ;;  %6156 = vmatprep.subr.bf16.mxu1 %v17622_v1  ;;  %v17668_v1 = vld [vmem:[#allocation10 + $0x388] ss:$16 sps:$4 sm:$0xff]  }
 0x683   :  { %v16437_v14 = vpop.f32.mrb[73].mxu1 }
 0x684   :  { %v19833_v10 = vpop.f32.mrb[74].mxu1  ;;  %6051 = vmatpush1.bf16.msra.mxu0 %v17617_v9  ;;  %6157 = vmatpush1.bf16.msra.mxu1 %v17620_v60  ;;  %v17673_v60 = vld [vmem:[#allocation10 + $0x3a4] ss:$16 sps:$4 sm:$0xff]  }
 0x685   :  { %v16438_v16 = vpop.f32.mrb[75].mxu1  ;;  %6052 = vmatprep.subr.bf16.mxu0 %v17625_v21  ;;  %6158 = vmatprep.subr.bf16.mxu1 %v17628_v48  ;;  %v17676_v48 = vld [vmem:[#allocation10 + $0x3ac] ss:$16 sps:$4 sm:$0xff]  }
 0x686   :  { %v17674_v16 = vld [vmem:[#allocation10 + $0x3a8] ss:$16 sps:$4 sm:$0xff]  }
 0x688   :  { %6053 = vmatpush1.bf16.msra.mxu0 %v17623_v8  ;;  %6159 = vmatpush1.bf16.msra.mxu1 %v17626_v7  ;;  %v17671_v7 = vld [vmem:[#allocation10 + $0x3a0] ss:$16 sps:$4 sm:$0xff]  }
 0x689   :  { %6054 = vmatprep.subr.bf16.mxu0 %v17631_v61  ;;  %6160 = vmatprep.subr.bf16.mxu1 %v17634_v0  ;;  %v17679_v61 = vld [vmem:[#allocation10 + $0x3c4] ss:$16 sps:$4 sm:$0xff]   ;;  %v17682_v0 = vld [vmem:[#allocation10 + $0x3cc] ss:$16 sps:$4 sm:$0xff]  }
 0x68c   :  { %6055 = vmatpush1.bf16.msra.mxu0 %v17629_v53  ;;  %6161 = vmatpush1.bf16.msra.mxu1 %v17632_v62  ;;  %v17677_v53 = vld [vmem:[#allocation10 + $0x3c0] ss:$16 sps:$4 sm:$0xff]   ;;  %v17680_v62 = vld [vmem:[#allocation10 + $0x3c8] ss:$16 sps:$4 sm:$0xff]  }
 0x68d   :  { %6056 = vmatprep.subr.bf16.mxu0 %v17637_v24  ;;  %6162 = vmatprep.subr.bf16.mxu1 %v17640_v55  ;;  %v17685_v24 = vld [vmem:[#allocation10 + $0x3e4] ss:$16 sps:$4 sm:$0xff]   ;;  %v17688_v55 = vld [vmem:[#allocation10 + $0x3ec] ss:$16 sps:$4 sm:$0xff]  }
 0x690   :  { %v4909_v2 = vpop.f32.mrb[76].mxu1  ;;  %6057 = vmatpush1.bf16.msra.mxu0 %v17635_v15  ;;  %6163 = vmatpush1.bf16.msra.mxu1 %v17638_v56  ;;  %v17683_v15 = vld [vmem:[#allocation10 + $0x3e0] ss:$16 sps:$4 sm:$0xff]   ;;  %v17686_v56 = vld [vmem:[#allocation10 + $0x3e8] ss:$16 sps:$4 sm:$0xff]  }
 0x691   :  { %v16449_v41 = vpop.f32.mrb[77].mxu1  ;;  %6058 = vmatprep.subr.bf16.mxu0 %v17643_v23  ;;  %6164 = vmatprep.subr.bf16.mxu1 %v17646_v52 }
 0x692   :  { %v4912_v63 = vpop.f32.mrb[78].mxu1 }
 0x693   :  { %v16916_v57 = vpack.i.bf16 %v4912_v63, %v4909_v2  ;;  %v16450_v25 = vpop.f32.mrb[79].mxu1 }
 0x694   :  { %6059 = vmatpush1.bf16.msra.mxu0 %v17641_v38  ;;  %6165 = vmatpush1.bf16.msra.mxu1 %v17644_v36 }
 0x695   :  { %16917 = vrot.lane.b32.xlu1 %v16916_v57, %s18861_s23  ;;  %6060 = vmatprep.subr.bf16.mxu0 %v17649_v44 }
 0x696   :  { %6166 = vmatprep.subr.bf16.mxu1 %v17652_v59 }
 0x698   :  { %v19836_v3 = vpop.f32.mrb[80].mxu1  ;;  %6061 = vmatpush1.bf16.msra.mxu0 %v17647_v17  ;;  %6167 = vmatpush1.bf16.msra.mxu1 %v17650_v12 }
 0x699   :  { %v16461_v11 = vpop.f32.mrb[81].mxu1  ;;  %6062 = vmatprep.subr.bf16.mxu0 %v17655_v19  ;;  %6168 = vmatprep.subr.bf16.mxu1 %v17658_v40 }
 0x69a   :  { %v19838_v58 = vpop.f32.mrb[82].mxu1 }
 0x69b   :  { %v16462_v45 = vpop.f32.mrb[83].mxu1 }
 0x69c   :  { %6063 = vmatpush1.bf16.msra.mxu0 %v17653_v32  ;;  %6169 = vmatpush1.bf16.msra.mxu1 %v17656_v30 }
 0x69d   :  { %6064 = vmatprep.subr.bf16.mxu0 %v17661_v50  ;;  %6170 = vmatprep.subr.bf16.mxu1 %v17664_v22 }
 0x6a0   :  { %v5150_v29 = vpop.f32.mrb[84].mxu1  ;;  %6065 = vmatpush1.bf16.msra.mxu0 %v17659_v26  ;;  %6171 = vmatpush1.bf16.msra.mxu1 %v17662_v27 }
 0x6a1   :  { %v16473_v9 = vpop.f32.mrb[85].mxu1  ;;  %6066 = vmatprep.subr.bf16.mxu0 %v17667_v18  ;;  %6172 = vmatprep.subr.bf16.mxu1 %v17670_v43 }
 0x6a2   :  { %v5153_v21 = vpop.f32.mrb[86].mxu1  ;;  %v19865_v9 = vld [vmem:[#allocation16] sm:$0xff] }
 0x6a3   :  { %v16911_v14 = vpack.i.bf16 %v5153_v21, %v5150_v29  ;;  %v16474_v8 = vpop.f32.mrb[87].mxu1  ;;  %v19871_v21 = vld [vmem:[#allocation16 + $0x18] sm:$0xff] }
 0x6a4   :  { %6067 = vmatpush1.bf16.msra.mxu0 %v17665_v13  ;;  %6173 = vmatpush1.bf16.msra.mxu1 %v17668_v1  ;;  %v19878_v8 = vrot.slane %v19871_v21, %v19102_v31 }
 0x6a5   :  { %16912 = vrot.lane.b32.xlu0 %v16911_v14, %s18861_s23  ;;  %6068 = vmatprep.subr.bf16.mxu0 %v17673_v60  ;;  %v19867_v60 = vld [vmem:[#allocation16 + $0x8] sm:$0xff]  ;;  %s14635_s23 = sshll.u32 %s18876_s8, 4  ;;  %s14636_s23 = int_to_ptr.vmem [resolvable:$true] %s14635_s23 }
 0x6a6   :  { %6174 = vmatprep.subr.bf16.mxu1 %v17676_v48  ;;  %s18821_s14 = scalar_lea.vmem %s14636_s23, 2048  ;;  %p18826_p3 = scmp.lt.s32.totalorder %s14636_s23, %s14636_s23 }
 0x6a7   :  { %p18822_p2 = scmp.ne.s32.totalorder %s14636_s23, %s18821_s14  ;;  %p18827_p4 = scmp.lt.s32.totalorder %s18821_s14, %s18821_s14 }
 0x6a8   :  { %6069 = vmatpush1.bf16.msra.mxu0 %v17671_v7  ;;  %6175 = vmatpush1.bf16.msra.mxu1 %v17674_v16 }
 0x6a9   :  { %6070 = vmatprep.subr.bf16.mxu0 %v17679_v61  ;;  %6176 = vmatprep.subr.bf16.mxu1 %v17682_v0  ;;  %p18828_p5 = por %p18827_p4, %p18826_p3 }
 0x6ab   :  { %p18829_p6 = pnand %p18828_p5, %p18822_p2 }
 0x6ac   :  { %6071 = vmatpush1.bf16.msra.mxu0 %v17677_v53  ;;  %6177 = vmatpush1.bf16.msra.mxu1 %v17680_v62 }
 0x6ad   :  { %6072 = vmatprep.subr.bf16.mxu0 %v17685_v24  ;;  %6178 = vmatprep.subr.bf16.mxu1 %v17688_v55  ;;  %v18602_v55 = vld [vmem:[#allocation2] sm:$0xff] }
 0x6b0   :  { %6073 = vmatpush1.bf16.msra.mxu0 %v17683_v15  ;;  %6179 = vmatpush1.bf16.msra.mxu1 %v17686_v56 }
 0x6d2   :  { %v16898_v23 = vpop.permute.xlu1 %16897 }
 0x6d3   :  { %v16900_v52 = vunpack.i.h.bf16 %v16898_v23  ;;  %v16899_v2 = vunpack.i.l.bf16 %v16898_v23 }
 0x6d5   :  { %v5189_v38 = vsel %vm3187_vm1, %v19808_v20, %v16899_v2  ;;  %v5190_v36 = vsel %vm3187_vm1, %v19810_v42, %v16900_v52  ;;  %v18603_v2 = vld [vmem:[#allocation2 + $0x8] sm:$0xff] }
 0x6d6   :  { %v16908_v41 = vpop.permute.xlu1 %16907  ;;  %v5201_v44 = vpack.c.bf16 %v5190_v36, %v5189_v38 }
 0x6d7   :  { %v16910_v63 = vunpack.i.h.bf16 %v16908_v41  ;;  %v16909_v59 = vunpack.i.l.bf16 %v16908_v41 }
 0x6d9   :  { %v4187_v57 = vsel %vm3187_vm1, %v19796_v47, %v16910_v63  ;;  %v4186_v25 = vsel %vm3187_vm1, %v19794_v4, %v16909_v59  ;;  %v18604_v63 = vld [vmem:[#allocation2 + $0x20] sm:$0xff] }
 0x6da   :  { %v5199_v17 = vpack.c.bf16 %v4187_v57, %v4186_v25  ;;  %v18605_v57 = vld [vmem:[#allocation2 + $0x10] sm:$0xff] }
 0x6ef   :  { %v16893_v12 = vpop.permute.xlu0 %16892 }
 0x6f0   :  { %v16895_v19 = vunpack.i.h.bf16 %v16893_v12  ;;  %v16894_v40 = vunpack.i.l.bf16 %v16893_v12  ;;  %v18606_v12 = vld [vmem:[#allocation2 + $0x28] sm:$0xff] }
 0x6f2   :  { %v5191_v20 = vsel %vm3187_vm1, %v19813_v35, %v16894_v40  ;;  %v5192_v42 = vsel %vm3187_vm1, %v19816_v54, %v16895_v19 }
 0x6f3   :  { %v16903_v32 = vpop.permute.xlu0 %16902  ;;  %v5202_v30 = vpack.c.bf16 %v5192_v42, %v5191_v20  ;;  %v18607_v20 = vld [vmem:[#allocation2 + $0x18] sm:$0xff] }
 0x6f4   :  { %v16905_v11 = vunpack.i.h.bf16 %v16903_v32  ;;  %v16904_v50 = vunpack.i.l.bf16 %v16903_v32  ;;  %v18608_v32 = vld [vmem:[#allocation2 + $0x30] sm:$0xff] }
 0x6f5   :  { %6031 = vmatprep.mubr.bf16.mxu0 %v5202_v30  ;;  %6137 = vmatprep.mubr.bf16.mxu1 %v5202_v30 }
 0x6f6   :  { %6032 = vmatmul.mubr.bf16.gmra.mrb[92].mxu0 %v5201_v44  ;;  %6138 = vmatmul.mubr.bf16.gmra.mrb[92].mxu1 %v5201_v44  ;;  %v4188_v4 = vsel %vm3187_vm1, %v19798_v39, %v16904_v50  ;;  %v4189_v47 = vsel %vm3187_vm1, %v19800_v49, %v16905_v11 }
 0x6f7   :  { %v5200_v22 = vpack.c.bf16 %v4189_v47, %v4188_v4  ;;  %v18609_v4 = vld [vmem:[#allocation2 + $0x38] sm:$0xff] }
 0x6f9   :  { %6074 = vmatprep.mubr.bf16.mxu0 %v5200_v22  ;;  %6180 = vmatprep.mubr.bf16.mxu1 %v5200_v22 }
 0x6fe   :  { %6075 = vmatmul.mubr.bf16.vlgmr.msra.gmra.mrb[88].mxu0 %v5199_v17  ;;  %6181 = vmatmul.mubr.bf16.vlgmr.msra.gmra.mrb[88].mxu1 %v5199_v17 }
 0x707   :  { %v16918_v35 = vpop.permute.xlu1 %16917 }
 0x708   :  { %v16920_v54 = vunpack.i.h.bf16 %v16918_v35  ;;  %v16919_v45 = vunpack.i.l.bf16 %v16918_v35 }
 0x70a   :  { %v5193_v26 = vsel %vm3187_vm1, %v19831_v6, %v16919_v45  ;;  %v5194_v27 = vsel %vm3187_vm1, %v19833_v10, %v16920_v54  ;;  %v176_v6 = vld [vmem:[#allocation16 + $0x10] sm:$0xff]  ;;  %v5336_v10 = vrot.slane %v19865_v9, %v19102_v31 }
 0x70b   :  { %v5203_v18 = vpack.c.bf16 %v5194_v27, %v5193_v26 }
 0x717   :  { %v16913_v43 = vpop.permute.xlu0 %16912 }
 0x718   :  { %v16915_v39 = vunpack.i.h.bf16 %v16913_v43  ;;  %v16914_v29 = vunpack.i.l.bf16 %v16913_v43 }
 0x71a   :  { %v5195_v49 = vsel %vm3187_vm1, %v19836_v3, %v16914_v29  ;;  %v5196_v13 = vsel %vm3187_vm1, %v19838_v58, %v16915_v39  ;;  %v5344_v3 = vrot.slane %v176_v6, %v19102_v31  ;;  %v5340_v58 = vrot.slane %v19867_v60, %v19102_v31 }
 0x71b   :  { %v5204_v1 = vpack.c.bf16 %v5196_v13, %v5195_v49 }
 0x71d   :  { %6084 = vmatprep.mubr.bf16.mxu0 %v5204_v1  ;;  %6190 = vmatprep.mubr.bf16.mxu1 %v5204_v1  ;;  %v18610_v1 = vld [vmem:[#allocation2 + $0x40] sm:$0xff] }
 0x71e   :  { %6085 = vmatmul.mubr.bf16.gmra.mrb[92].mxu0 %v5203_v18  ;;  %6191 = vmatmul.mubr.bf16.gmra.mrb[92].mxu1 %v5203_v18 }
 0x7d1   :  { %v6076_v48 = vpop.f32.mrb[88].mxu0  ;;  %v6182_v14 = vpop.f32.mrb[88].mxu1 }
 0x7d2   :  { %v16523_v7 = vadd.f32 %v6076_v48, %v5336_v10  ;;  %v6078_v16 = vpop.f32.mrb[89].mxu0  ;;  %v6184_v61 = vpop.f32.mrb[89].mxu1  ;;  %v16531_v0 = vadd.f32 %v6182_v14, %v5344_v3 }
 0x7d3   :  { %v16524_v53 = vadd.f32 %v6078_v16, %v5340_v58  ;;  %v6080_v62 = vpop.f32.mrb[90].mxu0  ;;  %v6186_v24 = vpop.f32.mrb[90].mxu1  ;;  %v16532_v36 = vadd.f32 %v6184_v61, %v19878_v8  ;;  %v18611_v61 = vld [vmem:[#allocation2 + $0x48] sm:$0xff] }
 0x7d4   :  { %v19880_v15 = vadd.f32 %v18602_v55, %v16523_v7  ;;  %v16525_v56 = vadd.f32 %v6080_v62, %v5336_v10  ;;  %v6082_v23 = vpop.f32.mrb[91].mxu0  ;;  %v6188_v52 = vpop.f32.mrb[91].mxu1  ;;  %v16533_v41 = vadd.f32 %v6186_v24, %v5344_v3  ;;  %v19887_v25 = vadd.f32 %v18605_v57, %v16531_v0  ;;  %v18612_v24 = vld [vmem:[#allocation2 + $0x60] sm:$0xff] }
 0x7d5   :  { %v19882_v38 = vadd.f32 %v18603_v2, %v16524_v53  ;;  %v16526_v44 = vadd.f32 %v6082_v23, %v5340_v58  ;;  %v16534_v40 = vadd.f32 %v6188_v52, %v19878_v8  ;;  %v19894_v42 = vadd.f32 %v18607_v20, %v16532_v36  ;;  %v18614_v2 = vld [vmem:[#allocation2 + $0x68] sm:$0xff] }
 0x7d6   :  { %v19885_v59 = vadd.f32 %v18604_v63, %v16525_v56  ;;  %v19896_v30 = vadd.f32 %v18608_v32, %v16533_v41  ;;  %v18613_v56 = vld [vmem:[#allocation2 + $0x50] sm:$0xff] }
 0x7d7   :  { %v6217_v17 = vadd.f32 %v19882_v38, %v19880_v15  ;;  %v19891_v19 = vadd.f32 %v18606_v12, %v16526_v44  ;;  %v19901_v47 = vadd.f32 %v18609_v4, %v16534_v40  ;;  %v18616_v44 = vld [vmem:[#allocation2 + $0x70] sm:$0xff]  ;;  %v18617_v40 = vld [vmem:[#allocation2 + $0x78] sm:$0xff] }
 0x7d8   :  { %v6395_v4 = vld [vmem:[#allocation11 + $0x8] sm:$0xff] }
 0x7d9   :  { %v6222_v11 = vadd.f32 %v19891_v19, %v19885_v59  ;;  %v6218_v50 = vadd.f32 %v6217_v17, %v19887_v25 }
 0x7db   :  { %v6219_v22 = vadd.f32 %v6218_v50, %v19894_v42  ;;  %v6223_v35 = vadd.f32 %v6222_v11, %v19896_v30  ;;  %v6394_v11 = vld [vmem:[#allocation11] sm:$0xff] }
 0x7dc   :  { %v6402_v50 = vld [vmem:[#allocation11 + $0x40] sm:$0xff] }
 0x7dd   :  { %6220 = vadd.xlane.f32.xlu0 %v6219_v22  ;;  %v6224_v54 = vadd.f32 %v6223_v35, %v19901_v47  ;;  %v15195_v22 = vcombine.low %v6394_v11, %v6402_v50  ;;  %v15196_v35 = vcombine.high %v6394_v11, %v6402_v50  ;;  %v6474_v50 = vld [vmem:[#allocation11 + $0x280] sm:$0xff] }
 0x7df   :  { %6225 = vadd.xlane.f32.xlu1 %v6224_v54  ;;  %v6403_v54 = vld [vmem:[#allocation11 + $0x48] sm:$0xff]  ;;  %9550 = vmatprep.subr.bf16.mxu0 %v15196_v35 }
 0x7e0   :  { %9551 = vmatpush1.bf16.msra.mxu0 %v15195_v22  ;;  %v6475_v22 = vld [vmem:[#allocation11 + $0x288] sm:$0xff] }
 0x7e1   :  { %v6483_v35 = vld [vmem:[#allocation11 + $0x2c8] sm:$0xff] }
 0x7f1   :  { %v6086_v45 = vpop.f32.mrb[92].mxu0  ;;  %v6192_v26 = vpop.f32.mrb[92].mxu1 }
 0x7f2   :  { %v16527_v27 = vadd.f32 %v6086_v45, %v5336_v10  ;;  %v6088_v18 = vpop.f32.mrb[93].mxu0  ;;  %v6194_v43 = vpop.f32.mrb[93].mxu1  ;;  %v16535_v39 = vadd.f32 %v6192_v26, %v5344_v3  ;;  %v6418_v45 = vld [vmem:[#allocation11 + $0xc0] sm:$0xff]  ;;  %v15197_v26 = vcombine.low %v6395_v4, %v6403_v54 }
 0x7f3   :  { %v16528_v29 = vadd.f32 %v6088_v18, %v5340_v58  ;;  %v6090_v49 = vpop.f32.mrb[94].mxu0  ;;  %v6196_v13 = vpop.f32.mrb[94].mxu1  ;;  %v16536_v48 = vadd.f32 %v6194_v43, %v19878_v8  ;;  %v6411_v43 = vld [vmem:[#allocation11 + $0x88] sm:$0xff] }
 0x7f4   :  { %v19906_v6 = vadd.f32 %v18610_v1, %v16527_v27  ;;  %v16529_v14 = vadd.f32 %v6090_v49, %v5336_v10  ;;  %v6092_v7 = vpop.f32.mrb[95].mxu0  ;;  %v6198_v16 = vpop.f32.mrb[95].mxu1  ;;  %v16537_v53 = vadd.f32 %v6196_v13, %v5344_v3  ;;  %v19913_v23 = vadd.f32 %v18613_v56, %v16535_v39  ;;  %v18615_v10 = vld [vmem:[#allocation2 + $0x58] sm:$0xff]  ;;  %v6434_v13 = vld [vmem:[#allocation11 + $0x140] sm:$0xff] }
 0x7f5   :  { %v19909_v0 = vadd.f32 %v18611_v61, %v16528_v29  ;;  %v16530_v62 = vadd.f32 %v6092_v7, %v5340_v58  ;;  %v19919_v41 = vadd.f32 %v18615_v10, %v16536_v48  ;;  %v16538_v58 = vadd.f32 %v6198_v16, %v19878_v8  ;;  %v6410_v8 = vld [vmem:[#allocation11 + $0x80] sm:$0xff]  ;;  %v6419_v39 = vld [vmem:[#allocation11 + $0xc8] sm:$0xff] }
 0x7f6   :  { %v19911_v55 = vadd.f32 %v18612_v24, %v16529_v14  ;;  %v19921_v63 = vadd.f32 %v18616_v44, %v16537_v53  ;;  %v15198_v27 = vcombine.high %v6395_v4, %v6403_v54  ;;  %v15212_v18 = vcombine.high %v6410_v8, %v6418_v45  ;;  %v6426_v29 = vld [vmem:[#allocation11 + $0x100] sm:$0xff]  ;;  %v6427_v1 = vld [vmem:[#allocation11 + $0x108] sm:$0xff] }
 0x7f7   :  { %v6227_v52 = vadd.f32 %v19909_v0, %v19906_v6  ;;  %v19917_v36 = vadd.f32 %v18614_v2, %v16530_v62  ;;  %v19929_v20 = vadd.f32 %v18617_v40, %v16538_v58  ;;  %v15214_v49 = vcombine.high %v6411_v43, %v6419_v39  ;;  %v6435_v48 = vld [vmem:[#allocation11 + $0x148] sm:$0xff]  ;;  %v6442_v53 = vld [vmem:[#allocation11 + $0x180] sm:$0xff] }
 0x7f8   :  { %9656 = vmatprep.subr.bf16.mxu1 %v15198_v27  ;;  %v15211_v14 = vcombine.low %v6410_v8, %v6418_v45  ;;  %9552 = vmatprep.subr.bf16.mxu0 %v15212_v18  ;;  %v15213_v7 = vcombine.low %v6411_v43, %v6419_v39  ;;  %v15228_v16 = vcombine.high %v6426_v29, %v6434_v13  ;;  %v6450_v62 = vld [vmem:[#allocation11 + $0x1c0] sm:$0xff]  ;;  %v6443_v24 = vld [vmem:[#allocation11 + $0x188] sm:$0xff] }
 0x7f9   :  { %v6232_v3 = vadd.f32 %v19917_v36, %v19911_v55  ;;  %v6228_v57 = vadd.f32 %v6227_v52, %v19913_v23  ;;  %9657 = vmatpush1.bf16.msra.mxu1 %v15197_v26  ;;  %v15230_v61 = vcombine.high %v6427_v1, %v6435_v48  ;;  %v6451_v56 = vld [vmem:[#allocation11 + $0x1c8] sm:$0xff]  ;;  %v15227_v52 = vcombine.low %v6426_v29, %v6434_v13  ;;  %v6466_v58 = vld [vmem:[#allocation11 + $0x240] sm:$0xff] }
 0x7fa   :  { %9658 = vmatprep.subr.bf16.mxu1 %v15214_v49  ;;  %9553 = vmatpush1.bf16.msra.mxu0 %v15211_v14  ;;  %v15229_v2 = vcombine.low %v6427_v1, %v6435_v48  ;;  %v15244_v10 = vcombine.high %v6442_v53, %v6450_v62  ;;  %v15246_v44 = vcombine.high %v6443_v24, %v6451_v56  ;;  %v6482_v4 = vld [vmem:[#allocation11 + $0x2c0] sm:$0xff]  ;;  %v6491_v43 = vld [vmem:[#allocation11 + $0x308] sm:$0xff] }
 0x7fb   :  { %v6229_v17 = vadd.f32 %v6228_v57, %v19919_v41  ;;  %v6233_v12 = vadd.f32 %v6232_v3, %v19921_v63  ;;  %9554 = vmatprep.subr.bf16.mxu0 %v15228_v16  ;;  %v6458_v3 = vld [vmem:[#allocation11 + $0x200] sm:$0xff]  ;;  %v6459_v57 = vld [vmem:[#allocation11 + $0x208] sm:$0xff]  ;;  %v15245_v40 = vcombine.low %v6443_v24, %v6451_v56  ;;  %v15276_v45 = vcombine.high %v6474_v50, %v6482_v4 }
 0x7fc   :  { %v15259_v54 = vcombine.low %v6458_v3, %v6466_v58  ;;  %v15278_v26 = vcombine.high %v6475_v22, %v6483_v35  ;;  %v6490_v27 = vld [vmem:[#allocation11 + $0x300] sm:$0xff]  ;;  %v6499_v39 = vld [vmem:[#allocation11 + $0x348] sm:$0xff]  ;;  %v15275_v29 = vcombine.low %v6474_v50, %v6482_v4  ;;  %v15277_v49 = vcombine.low %v6475_v22, %v6483_v35 }
 0x7fd   :  { %6230 = vadd.xlane.f32.xlu0 %v6229_v17  ;;  %v6234_v32 = vadd.f32 %v6233_v12, %v19929_v20  ;;  %9659 = vmatpush1.bf16.msra.mxu1 %v15213_v7  ;;  %v6467_v17 = vld [vmem:[#allocation11 + $0x248] sm:$0xff]  ;;  %v15243_v12 = vcombine.low %v6442_v53, %v6450_v62  ;;  %v6498_v18 = vld [vmem:[#allocation11 + $0x340] sm:$0xff]  ;;  %v15294_v1 = vcombine.high %v6491_v43, %v6499_v39 }
 0x7fe   :  { %9660 = vmatprep.subr.bf16.mxu1 %v15230_v61  ;;  %9555 = vmatpush1.bf16.msra.mxu0 %v15227_v52  ;;  %v15262_v11 = vcombine.high %v6459_v57, %v6467_v17  ;;  %v15261_v8 = vcombine.low %v6459_v57, %v6467_v17  ;;  %v15292_v13 = vcombine.high %v6490_v27, %v6498_v18  ;;  %v6506_v48 = vld [vmem:[#allocation11 + $0x380] sm:$0xff]  ;;  %v6507_v7 = vld [vmem:[#allocation11 + $0x388] sm:$0xff] }
 0x7ff   :  { %9556 = vmatprep.subr.bf16.mxu0 %v15244_v10  ;;  %v6514_v14 = vld [vmem:[#allocation11 + $0x3c0] sm:$0xff]  ;;  %v6515_v16 = vld [vmem:[#allocation11 + $0x3c8] sm:$0xff]  ;;  %v15291_v61 = vcombine.low %v6490_v27, %v6498_v18  ;;  %v15293_v53 = vcombine.low %v6491_v43, %v6499_v39 }
 0x800   :  { %v15308_v62 = vcombine.high %v6506_v48, %v6514_v14  ;;  %v15310_v24 = vcombine.high %v6507_v7, %v6515_v16  ;;  %v6522_v56 = vld [vmem:[#allocation11 + $0x400] sm:$0xff]  ;;  %v6531_v10 = vld [vmem:[#allocation11 + $0x448] sm:$0xff] }
 0x801   :  { %6235 = vadd.xlane.f32.xlu0 %v6234_v32  ;;  %9661 = vmatpush1.bf16.msra.mxu1 %v15229_v2  ;;  %v15260_v32 = vcombine.high %v6458_v3, %v6466_v58  ;;  %v6530_v52 = vld [vmem:[#allocation11 + $0x440] sm:$0xff]  ;;  %v6523_v2 = vld [vmem:[#allocation11 + $0x408] sm:$0xff]  ;;  %v15309_v3 = vcombine.low %v6507_v7, %v6515_v16 }
 0x802   :  { %9662 = vmatprep.subr.bf16.mxu1 %v15246_v44  ;;  %9557 = vmatpush1.bf16.msra.mxu0 %v15243_v12  ;;  %v15307_v44 = vcombine.low %v6506_v48, %v6514_v14  ;;  %v15324_v58 = vcombine.high %v6522_v56, %v6530_v52  ;;  %v15326_v57 = vcombine.high %v6523_v2, %v6531_v10  ;;  %v6538_v17 = vld [vmem:[#allocation11 + $0x480] sm:$0xff] }
 0x803   :  { %9558 = vmatprep.subr.bf16.mxu0 %v15260_v32  ;;  %v6546_v12 = vld [vmem:[#allocation11 + $0x4c0] sm:$0xff]  ;;  %v6547_v32 = vld [vmem:[#allocation11 + $0x4c8] sm:$0xff]  ;;  %v15325_v50 = vcombine.low %v6523_v2, %v6531_v10 }
 0x804   :  { %v15340_v4 = vcombine.high %v6538_v17, %v6546_v12  ;;  %v15339_v35 = vcombine.low %v6538_v17, %v6546_v12  ;;  %v6563_v10 = vld [vmem:[#allocation11 + $0x548] sm:$0xff]  ;;  %v6578_v17 = vld [vmem:[#allocation11 + $0x5c0] sm:$0xff] }
 0x805   :  { %9663 = vmatpush1.bf16.msra.mxu1 %v15245_v40  ;;  %v6539_v40 = vld [vmem:[#allocation11 + $0x488] sm:$0xff] }
 0x806   :  { %9664 = vmatprep.subr.bf16.mxu1 %v15262_v11  ;;  %9559 = vmatpush1.bf16.msra.mxu0 %v15259_v54  ;;  %v15323_v11 = vcombine.low %v6522_v56, %v6530_v52  ;;  %v15342_v22 = vcombine.high %v6539_v40, %v6547_v32  ;;  %v15341_v54 = vcombine.low %v6539_v40, %v6547_v32  ;;  %v6562_v56 = vld [vmem:[#allocation11 + $0x540] sm:$0xff]  ;;  %v6555_v52 = vld [vmem:[#allocation11 + $0x508] sm:$0xff] }
 0x807   :  { %9560 = vmatprep.subr.bf16.mxu0 %v15276_v45  ;;  %v6571_v12 = vld [vmem:[#allocation11 + $0x588] sm:$0xff] }
 0x809   :  { %9665 = vmatpush1.bf16.msra.mxu1 %v15261_v8 }
 0x80a   :  { %9666 = vmatprep.subr.bf16.mxu1 %v15278_v26  ;;  %9561 = vmatpush1.bf16.msra.mxu0 %v15275_v29 }
 0x80b   :  { %9562 = vmatprep.subr.bf16.mxu0 %v15292_v13 }
 0x80d   :  { %9667 = vmatpush1.bf16.msra.mxu1 %v15277_v49 }
 0x80e   :  { %9668 = vmatprep.subr.bf16.mxu1 %v15294_v1  ;;  %9563 = vmatpush1.bf16.msra.mxu0 %v15291_v61 }
 0x80f   :  { %9564 = vmatprep.subr.bf16.mxu0 %v15308_v62 }
 0x811   :  { %9669 = vmatpush1.bf16.msra.mxu1 %v15293_v53 }
 0x812   :  { %9670 = vmatprep.subr.bf16.mxu1 %v15310_v24  ;;  %9565 = vmatpush1.bf16.msra.mxu0 %v15307_v44  ;;  %v6554_v24 = vld [vmem:[#allocation11 + $0x500] sm:$0xff] }
 0x813   :  { %9566 = vmatprep.subr.bf16.mxu0 %v15324_v58  ;;  %v15356_v2 = vcombine.high %v6554_v24, %v6562_v56  ;;  %v15355_v44 = vcombine.low %v6554_v24, %v6562_v56  ;;  %v15358_v58 = vcombine.high %v6555_v52, %v6563_v10  ;;  %v6618_v56 = vld [vmem:[#allocation11 + $0x700] sm:$0xff] }
 0x815   :  { %9671 = vmatpush1.bf16.msra.mxu1 %v15309_v3  ;;  %v15357_v3 = vcombine.low %v6555_v52, %v6563_v10  ;;  %v6626_v52 = vld [vmem:[#allocation11 + $0x740] sm:$0xff] }
 0x816   :  { %9672 = vmatprep.subr.bf16.mxu1 %v15326_v57  ;;  %9567 = vmatpush1.bf16.msra.mxu0 %v15323_v11  ;;  %v6570_v57 = vld [vmem:[#allocation11 + $0x580] sm:$0xff]  ;;  %v6579_v11 = vld [vmem:[#allocation11 + $0x5c8] sm:$0xff] }
 0x817   :  { %9568 = vmatprep.subr.bf16.mxu0 %v15340_v4  ;;  %v15372_v32 = vcombine.high %v6570_v57, %v6578_v17  ;;  %v15371_v4 = vcombine.low %v6570_v57, %v6578_v17  ;;  %v6627_v57 = vld [vmem:[#allocation11 + $0x748] sm:$0xff] }
 0x819   :  { %9673 = vmatpush1.bf16.msra.mxu1 %v15325_v50 }
 0x81a   :  { %9674 = vmatprep.subr.bf16.mxu1 %v15342_v22  ;;  %9569 = vmatpush1.bf16.msra.mxu0 %v15339_v35  ;;  %v15373_v22 = vcombine.low %v6571_v12, %v6579_v11  ;;  %v15374_v35 = vcombine.high %v6571_v12, %v6579_v11 }
 0x81b   :  { %9570 = vmatprep.subr.bf16.mxu0 %v15356_v2 }
 0x81d   :  { %9675 = vmatpush1.bf16.msra.mxu1 %v15341_v54  ;;  %v6586_v54 = vld [vmem:[#allocation11 + $0x600] sm:$0xff] }
 0x81e   :  { %9676 = vmatprep.subr.bf16.mxu1 %v15358_v58  ;;  %9571 = vmatpush1.bf16.msra.mxu0 %v15355_v44  ;;  %v6619_v58 = vld [vmem:[#allocation11 + $0x708] sm:$0xff] }
 0x81f   :  { %9572 = vmatprep.subr.bf16.mxu0 %v15372_v32  ;;  %v15420_v32 = vcombine.high %v6618_v56, %v6626_v52  ;;  %v15422_v11 = vcombine.high %v6619_v58, %v6627_v57 }
 0x821   :  { %9677 = vmatpush1.bf16.msra.mxu1 %v15357_v3 }
 0x822   :  { %9678 = vmatprep.subr.bf16.mxu1 %v15374_v35  ;;  %9573 = vmatpush1.bf16.msra.mxu0 %v15371_v4  ;;  %v6642_v4 = vld [vmem:[#allocation11 + $0x7c0] sm:$0xff] }
 0x825   :  { %9679 = vmatpush1.bf16.msra.mxu1 %v15373_v22 }
 0x86a   :  { %v6221_v8 = vpop.xlane.xlu0 %6220 }
 0x86b   :  { %v6238_v45 = vmul.f32 0.001953125, %v6221_v8  ;;  %v6594_v8 = vld [vmem:[#allocation11 + $0x640] sm:$0xff] }
 0x86c   :  { %v6226_v26 = vpop.xlane.xlu1 %6225 }
 0x86d   :  { %v19933_v27 = vsub.f32 %v19880_v15, %v6238_v45  ;;  %v19936_v18 = vsub.f32 %v19882_v38, %v6238_v45  ;;  %v6239_v43 = vmul.f32 0.001953125, %v6226_v26  ;;  %v19939_v39 = vsub.f32 %v19887_v25, %v6238_v45 }
 0x86e   :  { %v19953_v1 = vsub.f32 %v19894_v42, %v6238_v45  ;;  %v6587_v45 = vld [vmem:[#allocation11 + $0x608] sm:$0xff]  ;;  %v15388_v26 = vcombine.high %v6586_v54, %v6594_v8 }
 0x86f   :  { %v19942_v29 = vsub.f32 %v19885_v59, %v6239_v43  ;;  %v19945_v49 = vsub.f32 %v19891_v19, %v6239_v43  ;;  %v19948_v13 = vsub.f32 %v19896_v30, %v6239_v43  ;;  %v6258_v15 = vmul.f32 %v19933_v27, %v19933_v27 }
 0x870   :  { %v6259_v38 = vmul.f32 %v19936_v18, %v19936_v18  ;;  %v19958_v25 = vsub.f32 %v19901_v47, %v6239_v43  ;;  %v6260_v30 = vmul.f32 %v19939_v39, %v19939_v39  ;;  %v6261_v7 = vmul.f32 %v19953_v1, %v19953_v1  ;;  %v6595_v43 = vld [vmem:[#allocation11 + $0x648] sm:$0xff]  ;;  %9574 = vmatprep.subr.bf16.mxu0 %v15388_v26 }
 0x871   :  { %v6262_v59 = vmul.f32 %v19942_v29, %v19942_v29  ;;  %v6263_v19 = vmul.f32 %v19945_v49, %v19945_v49  ;;  %v6264_v42 = vmul.f32 %v19948_v13, %v19948_v13  ;;  %v15421_v26 = vcombine.low %v6619_v58, %v6627_v57 }
 0x872   :  { %v6274_v48 = vadd.f32 %v6259_v38, %v6258_v15  ;;  %v6265_v47 = vmul.f32 %v19958_v25, %v19958_v25  ;;  %v6602_v15 = vld [vmem:[#allocation11 + $0x680] sm:$0xff] }
 0x873   :  { %v6279_v14 = vadd.f32 %v6263_v19, %v6262_v59 }
 0x874   :  { %v6275_v16 = vadd.f32 %v6274_v48, %v6260_v30  ;;  %v15387_v30 = vcombine.low %v6586_v54, %v6594_v8  ;;  %v6610_v48 = vld [vmem:[#allocation11 + $0x6c0] sm:$0xff]  ;;  %v6635_v54 = vld [vmem:[#allocation11 + $0x788] sm:$0xff] }
 0x875   :  { %v6280_v61 = vadd.f32 %v6279_v14, %v6264_v42  ;;  %v6603_v42 = vld [vmem:[#allocation11 + $0x688] sm:$0xff]  ;;  %v15404_v24 = vcombine.high %v6602_v15, %v6610_v48 }
 0x876   :  { %v6276_v53 = vadd.f32 %v6275_v16, %v6261_v7  ;;  %v6611_v14 = vld [vmem:[#allocation11 + $0x6c8] sm:$0xff]  ;;  %9575 = vmatpush1.bf16.msra.mxu0 %v15387_v30 }
 0x877   :  { %v6281_v62 = vadd.f32 %v6280_v61, %v6265_v47  ;;  %v15389_v47 = vcombine.low %v6587_v45, %v6595_v43  ;;  %9576 = vmatprep.subr.bf16.mxu0 %v15404_v24  ;;  %v6643_v8 = vld [vmem:[#allocation11 + $0x7c8] sm:$0xff] }
 0x878   :  { %6277 = vadd.xlane.f32.xlu1 %v6276_v53 }
 0x879   :  { %6282 = vadd.xlane.f32.xlu0 %v6281_v62  ;;  %v15403_v62 = vcombine.low %v6602_v15, %v6610_v48  ;;  %v15438_v48 = vcombine.high %v6635_v54, %v6643_v8 }
 0x87b   :  { %9577 = vmatpush1.bf16.msra.mxu0 %v15403_v62 }
 0x87c   :  { %9578 = vmatprep.subr.bf16.mxu0 %v15420_v32 }
 0x88a   :  { %v6231_v40 = vpop.xlane.xlu0 %6230 }
 0x88b   :  { %v6240_v50 = vmul.f32 0.001953125, %v6231_v40  ;;  %v15405_v40 = vcombine.low %v6603_v42, %v6611_v14 }
 0x88d   :  { %v19973_v38 = vsub.f32 %v19906_v6, %v6240_v50  ;;  %v19976_v59 = vsub.f32 %v19909_v0, %v6240_v50  ;;  %v19979_v19 = vsub.f32 %v19913_v23, %v6240_v50  ;;  %v19982_v16 = vsub.f32 %v19919_v41, %v6240_v50  ;;  %v6634_v50 = vld [vmem:[#allocation11 + $0x780] sm:$0xff] }
 0x88e   :  { %v6236_v7 = vpop.xlane.xlu0 %6235  ;;  %v15390_v6 = vcombine.high %v6587_v45, %v6595_v43  ;;  %v15406_v41 = vcombine.high %v6603_v42, %v6611_v14  ;;  %v15419_v45 = vcombine.low %v6618_v56, %v6626_v52  ;;  %v15436_v30 = vcombine.high %v6634_v50, %v6642_v4 }
 0x88f   :  { %v6241_v61 = vmul.f32 0.001953125, %v6236_v7  ;;  %v6266_v0 = vmul.f32 %v19973_v38, %v19973_v38  ;;  %v6267_v23 = vmul.f32 %v19976_v59, %v19976_v59  ;;  %v6268_v53 = vmul.f32 %v19979_v19, %v19979_v19 }
 0x890   :  { %9680 = vmatprep.subr.bf16.mxu1 %v15390_v6  ;;  %v6269_v17 = vmul.f32 %v19982_v16, %v19982_v16  ;;  %9579 = vmatpush1.bf16.msra.mxu0 %v15419_v45  ;;  %v15435_v14 = vcombine.low %v6634_v50, %v6642_v4  ;;  %v15437_v7 = vcombine.low %v6635_v54, %v6643_v8  ;;  %v6658_v6 = vld [vmem:[#allocation11 + $0x840] sm:$0xff]  ;;  %v6667_v45 = vld [vmem:[#allocation11 + $0x888] sm:$0xff] }
 0x891   :  { %v19991_v2 = vsub.f32 %v19911_v55, %v6241_v61  ;;  %v19994_v10 = vsub.f32 %v19917_v36, %v6241_v61  ;;  %v19997_v44 = vsub.f32 %v19921_v63, %v6241_v61  ;;  %v6284_v3 = vadd.f32 %v6267_v23, %v6266_v0  ;;  %9681 = vmatpush1.bf16.msra.mxu1 %v15389_v47  ;;  %v6650_v47 = vld [vmem:[#allocation11 + $0x800] sm:$0xff] }
 0x892   :  { %v20002_v12 = vsub.f32 %v19929_v20, %v6241_v61  ;;  %9682 = vmatprep.subr.bf16.mxu1 %v15406_v41  ;;  %9580 = vmatprep.subr.bf16.mxu0 %v15436_v30  ;;  %v6651_v61 = vld [vmem:[#allocation11 + $0x808] sm:$0xff]  ;;  %v15451_v0 = vcombine.low %v6650_v47, %v6658_v6  ;;  %v15452_v23 = vcombine.high %v6650_v47, %v6658_v6  ;;  %v6674_v8 = vld [vmem:[#allocation11 + $0x8c0] sm:$0xff] }
 0x893   :  { %v6285_v55 = vadd.f32 %v6284_v3, %v6268_v53  ;;  %v6270_v36 = vmul.f32 %v19991_v2, %v19991_v2  ;;  %v6271_v63 = vmul.f32 %v19994_v10, %v19994_v10  ;;  %v6272_v20 = vmul.f32 %v19997_v44, %v19997_v44  ;;  %v6659_v53 = vld [vmem:[#allocation11 + $0x848] sm:$0xff] }
 0x894   :  { %v6273_v43 = vmul.f32 %v20002_v12, %v20002_v12  ;;  %9581 = vmatpush1.bf16.msra.mxu0 %v15435_v14  ;;  %v15453_v62 = vcombine.low %v6651_v61, %v6659_v53  ;;  %v15454_v24 = vcombine.high %v6651_v61, %v6659_v53  ;;  %v20034_v50 = vrot.slane %v19867_v60, %v19108_v34  ;;  %v6690_v14 = vld [vmem:[#allocation11 + $0x940] sm:$0xff]  ;;  %v6691_v47 = vld [vmem:[#allocation11 + $0x948] sm:$0xff] }
 0x895   :  { %v6286_v22 = vadd.f32 %v6285_v55, %v6269_v17  ;;  %v6289_v35 = vadd.f32 %v6271_v63, %v6270_v36  ;;  %9683 = vmatpush1.bf16.msra.mxu1 %v15405_v40  ;;  %9603 = vmatprep.subr.bf16.mxu0 %v15452_v23  ;;  %v20014_v17 = vrot.slane %v19865_v9, %v19105_v33 }
 0x896   :  { %9684 = vmatprep.subr.bf16.mxu1 %v15422_v11  ;;  %v20018_v40 = vrot.slane %v19867_v60, %v19105_v33  ;;  %v20030_v11 = vrot.slane %v19865_v9, %v19108_v34  ;;  %v6666_v9 = vld [vmem:[#allocation11 + $0x880] sm:$0xff] }
 0x897   :  { %6287 = vadd.xlane.f32.xlu1 %v6286_v22  ;;  %v6290_v15 = vadd.f32 %v6289_v35, %v6272_v20  ;;  %v15468_v30 = vcombine.high %v6666_v9, %v6674_v8  ;;  %v15467_v6 = vcombine.low %v6666_v9, %v6674_v8 }
 0x899   :  { %v6291_v42 = vadd.f32 %v6290_v15, %v6273_v43  ;;  %9685 = vmatpush1.bf16.msra.mxu1 %v15421_v26  ;;  %v6675_v26 = vld [vmem:[#allocation11 + $0x8c8] sm:$0xff] }
 0x89a   :  { %9686 = vmatprep.subr.bf16.mxu1 %v15438_v48  ;;  %v15470_v48 = vcombine.high %v6667_v45, %v6675_v26  ;;  %v15469_v61 = vcombine.low %v6667_v45, %v6675_v26 }
 0x89b   :  { %6292 = vadd.xlane.f32.xlu0 %v6291_v42  ;;  %v6682_v42 = vld [vmem:[#allocation11 + $0x900] sm:$0xff] }
 0x89c   :  { %v15484_v23 = vcombine.high %v6682_v42, %v6690_v14 }
 0x89d   :  { %9687 = vmatpush1.bf16.msra.mxu1 %v15437_v7  ;;  %v6683_v7 = vld [vmem:[#allocation11 + $0x908] sm:$0xff] }
 0x89e   :  { %9709 = vmatprep.subr.bf16.mxu1 %v15454_v24  ;;  %v15486_v53 = vcombine.high %v6683_v7, %v6691_v47  ;;  %v6698_v24 = vld [vmem:[#allocation11 + $0x980] sm:$0xff] }
 0x905   :  { %v6278_v41 = vpop.xlane.xlu1 %6277 }
 0x906   :  { %v6294_v56 = vmul.f32 0.001953125, %v6278_v41  ;;  %v6283_v52 = vpop.xlane.xlu0 %6282  ;;  %v6706_v41 = vld [vmem:[#allocation11 + $0x9c0] sm:$0xff] }
 0x907   :  { %v6295_v3 = vmul.f32 0.001953125, %v6283_v52  ;;  %v6707_v52 = vld [vmem:[#allocation11 + $0x9c8] sm:$0xff] }
 0x908   :  { %v6298_v58 = vadd.f32 1e-05, %v6294_v56  ;;  %v6699_v56 = vld [vmem:[#allocation11 + $0x988] sm:$0xff] }
 0x909   :  { %v6299_v57 = vadd.f32 1e-05, %v6295_v3  ;;  %v15501_v9 = vcombine.low %v6699_v56, %v6707_v52 }
 0x90a   :  { %18585 = vrsqrt.f32 %v6298_v58  ;;  %v15483_v58 = vcombine.low %v6682_v42, %v6690_v14  ;;  %v6731_v42 = vld [vmem:[#allocation11 + $0xa88] sm:$0xff] }
 0x90b   :  { %18587 = vrsqrt.f32 %v6299_v57  ;;  %v15485_v57 = vcombine.low %v6683_v7, %v6691_v47  ;;  %v6739_v14 = vld [vmem:[#allocation11 + $0xac8] sm:$0xff] }
 0x914   :  { %v20020_v55 = vpop.eup %18585 }
 0x915   :  { %v20022_v36 = vpop.eup %18587  ;;  %v6307_v63 = vmul.f32 %v20020_v55, %v19936_v18  ;;  %v6306_v32 = vmul.f32 %v20020_v55, %v19933_v27 }
 0x916   :  { %v6311_v4 = vmul.f32 %v20022_v36, %v19945_v49  ;;  %v6310_v22 = vmul.f32 %v20022_v36, %v19942_v29 }
 0x917   :  { %v6339_v20 = vmul.f32 %v20018_v40, %v6307_v63  ;;  %v6338_v18 = vmul.f32 %v20014_v17, %v6306_v32  ;;  %v6714_v32 = vld [vmem:[#allocation11 + $0xa00] sm:$0xff] }
 0x918   :  { %v6343_v27 = vmul.f32 %v20018_v40, %v6311_v4  ;;  %v6342_v35 = vmul.f32 %v20014_v17, %v6310_v22  ;;  %v6722_v4 = vld [vmem:[#allocation11 + $0xa40] sm:$0xff]  ;;  %v6715_v22 = vld [vmem:[#allocation11 + $0xa08] sm:$0xff] }
 0x919   :  { %v20045_v54 = vadd.f32 %v20034_v50, %v6339_v20  ;;  %v20051_v49 = vadd.f32 %v20030_v11, %v6338_v18  ;;  %v6723_v20 = vld [vmem:[#allocation11 + $0xa48] sm:$0xff]  ;;  %v15516_v45 = vcombine.high %v6714_v32, %v6722_v4  ;;  %v15515_v47 = vcombine.low %v6714_v32, %v6722_v4 }
 0x91a   :  { %v20048_v60 = vadd.f32 %v20034_v50, %v6343_v27  ;;  %v20054_v29 = vadd.f32 %v20030_v11, %v6342_v35  ;;  %v15499_v35 = vcombine.low %v6698_v24, %v6706_v41  ;;  %v15518_v26 = vcombine.high %v6715_v22, %v6723_v20  ;;  %v6771_v32 = vld [vmem:[#allocation11 + $0xbc8] sm:$0xff] }
 0x91c   :  { %v20058_v43 = vpack.c.bf16 %v20048_v60, %v20045_v54  ;;  %v20062_v15 = vpack.c.bf16 %v20054_v29, %v20051_v49 }
 0x91e   :  { %9582 = vmatprep.mubr.bf16.mxu0 %v20058_v43  ;;  %9688 = vmatprep.mubr.bf16.mxu1 %v20058_v43 }
 0x91f   :  { %9583 = vmatmul.mubr.bf16.vlgmr.msra.gmra.mrb[96].mxu0 %v20062_v15  ;;  %9689 = vmatmul.mubr.bf16.vlgmr.msra.gmra.mrb[96].mxu1 %v20062_v15 }
 0x920   :  { %9604 = vmatpush1.bf16.msra.mxu0 %v15451_v0  ;;  %9710 = vmatpush1.bf16.msra.mxu1 %v15453_v62  ;;  %v15500_v0 = vcombine.high %v6698_v24, %v6706_v41  ;;  %v15502_v62 = vcombine.high %v6699_v56, %v6707_v52  ;;  %v6754_v24 = vld [vmem:[#allocation11 + $0xb40] sm:$0xff]  ;;  %v6747_v41 = vld [vmem:[#allocation11 + $0xb08] sm:$0xff] }
 0x921   :  { %9605 = vmatprep.subr.bf16.mxu0 %v15468_v30  ;;  %9711 = vmatprep.subr.bf16.mxu1 %v15470_v48  ;;  %v6730_v30 = vld [vmem:[#allocation11 + $0xa80] sm:$0xff]  ;;  %v6755_v56 = vld [vmem:[#allocation11 + $0xb48] sm:$0xff] }
 0x922   :  { %v6738_v48 = vld [vmem:[#allocation11 + $0xac0] sm:$0xff] }
 0x923   :  { %v15531_v52 = vcombine.low %v6730_v30, %v6738_v48 }
 0x924   :  { %9606 = vmatpush1.bf16.msra.mxu0 %v15467_v6  ;;  %9712 = vmatpush1.bf16.msra.mxu1 %v15469_v61  ;;  %v6288_v3 = vpop.xlane.xlu1 %6287  ;;  %v15517_v6 = vcombine.low %v6715_v22, %v6723_v20  ;;  %v15532_v61 = vcombine.high %v6730_v30, %v6738_v48  ;;  %v15549_v20 = vcombine.low %v6747_v41, %v6755_v56  ;;  %v6786_v30 = vld [vmem:[#allocation11 + $0xc40] sm:$0xff]  ;;  %v6779_v48 = vld [vmem:[#allocation11 + $0xc08] sm:$0xff] }
 0x925   :  { %v6296_v63 = vmul.f32 0.001953125, %v6288_v3  ;;  %9607 = vmatprep.subr.bf16.mxu0 %v15484_v23  ;;  %9713 = vmatprep.subr.bf16.mxu1 %v15486_v53  ;;  %v15534_v23 = vcombine.high %v6731_v42, %v6739_v14  ;;  %v6746_v53 = vld [vmem:[#allocation11 + $0xb00] sm:$0xff]  ;;  %v15533_v3 = vcombine.low %v6731_v42, %v6739_v14  ;;  %v6787_v42 = vld [vmem:[#allocation11 + $0xc48] sm:$0xff] }
 0x926   :  { %v15547_v22 = vcombine.low %v6746_v53, %v6754_v24 }
 0x927   :  { %v6300_v18 = vadd.f32 1e-05, %v6296_v63  ;;  %v6762_v63 = vld [vmem:[#allocation11 + $0xb80] sm:$0xff] }
 0x928   :  { %9608 = vmatpush1.bf16.msra.mxu0 %v15483_v58  ;;  %9714 = vmatpush1.bf16.msra.mxu1 %v15485_v57  ;;  %v6293_v27 = vpop.xlane.xlu0 %6292  ;;  %v15548_v58 = vcombine.high %v6746_v53, %v6754_v24  ;;  %v15550_v57 = vcombine.high %v6747_v41, %v6755_v56  ;;  %v15582_v53 = vcombine.high %v6779_v48, %v6787_v42 }
 0x929   :  { %18589 = vrsqrt.f32 %v6300_v18  ;;  %v6297_v8 = vmul.f32 0.001953125, %v6293_v27  ;;  %9609 = vmatprep.subr.bf16.mxu0 %v15500_v0  ;;  %9715 = vmatprep.subr.bf16.mxu1 %v15502_v62  ;;  %v6770_v0 = vld [vmem:[#allocation11 + $0xbc0] sm:$0xff]  ;;  %v6763_v62 = vld [vmem:[#allocation11 + $0xb88] sm:$0xff]  ;;  %v20093_v41 = vrot.slane %v19871_v21, %v19108_v34 }
 0x92b   :  { %v6301_v7 = vadd.f32 1e-05, %v6297_v8  ;;  %v6778_v8 = vld [vmem:[#allocation11 + $0xc00] sm:$0xff] }
 0x92c   :  { %9610 = vmatpush1.bf16.msra.mxu0 %v15499_v35  ;;  %9716 = vmatpush1.bf16.msra.mxu1 %v15501_v9  ;;  %v15564_v35 = vcombine.high %v6762_v63, %v6770_v0  ;;  %v15566_v9 = vcombine.high %v6763_v62, %v6771_v32 }
 0x92d   :  { %18591 = vrsqrt.f32 %v6301_v7  ;;  %9611 = vmatprep.subr.bf16.mxu0 %v15516_v45  ;;  %9717 = vmatprep.subr.bf16.mxu1 %v15518_v26  ;;  %v6313_v45 = vmul.f32 %v20022_v36, %v19958_v25  ;;  %v20078_v26 = vrot.slane %v19871_v21, %v19105_v33  ;;  %v15565_v7 = vcombine.low %v6763_v62, %v6771_v32  ;;  %v6803_v62 = vld [vmem:[#allocation11 + $0xcc8] sm:$0xff] }
 0x92f   :  { %v6345_v24 = vmul.f32 %v20078_v26, %v6313_v45 }
 0x930   :  { %9612 = vmatpush1.bf16.msra.mxu0 %v15515_v47  ;;  %9718 = vmatpush1.bf16.msra.mxu1 %v15517_v6  ;;  %v6309_v47 = vmul.f32 %v20020_v55, %v19953_v1 }
 0x931   :  { %9613 = vmatprep.subr.bf16.mxu0 %v15532_v61  ;;  %9719 = vmatprep.subr.bf16.mxu1 %v15534_v23  ;;  %v15580_v23 = vcombine.high %v6778_v8, %v6786_v30 }
 0x933   :  { %v20068_v4 = vpop.eup %18589 }
 0x934   :  { %9614 = vmatpush1.bf16.msra.mxu0 %v15531_v52  ;;  %9720 = vmatpush1.bf16.msra.mxu1 %v15533_v3  ;;  %v6315_v18 = vmul.f32 %v20068_v4, %v19976_v59  ;;  %v6314_v27 = vmul.f32 %v20068_v4, %v19973_v38  ;;  %v15563_v59 = vcombine.low %v6762_v63, %v6770_v0  ;;  %v6795_v0 = vld [vmem:[#allocation11 + $0xc88] sm:$0xff] }
 0x935   :  { %9615 = vmatprep.subr.bf16.mxu0 %v15548_v58  ;;  %9721 = vmatprep.subr.bf16.mxu1 %v15550_v57  ;;  %v15581_v52 = vcombine.low %v6779_v48, %v6787_v42  ;;  %v6341_v3 = vmul.f32 %v20078_v26, %v6309_v47  ;;  %v20111_v63 = vadd.f32 %v20093_v41, %v6345_v24  ;;  %v6835_v47 = vld [vmem:[#allocation11 + $0xdc8] sm:$0xff]  ;;  %v6850_v24 = vld [vmem:[#allocation11 + $0xe40] sm:$0xff] }
 0x936   :  { %v6347_v38 = vmul.f32 %v20018_v40, %v6315_v18  ;;  %v6346_v61 = vmul.f32 %v20014_v17, %v6314_v27  ;;  %v6818_v18 = vld [vmem:[#allocation11 + $0xd40] sm:$0xff]  ;;  %v6811_v27 = vld [vmem:[#allocation11 + $0xd08] sm:$0xff] }
 0x937   :  { %v20080_v14 = vpop.eup %18591  ;;  %20672 = vst [vmem:[#allocation28_spill] sm:$0xff] %v20111_v63 }
 0x938   :  { %9616 = vmatpush1.bf16.msra.mxu0 %v15547_v22  ;;  %9722 = vmatpush1.bf16.msra.mxu1 %v15549_v20  ;;  %v6319_v25 = vmul.f32 %v20080_v14, %v19994_v10  ;;  %v6318_v6 = vmul.f32 %v20080_v14, %v19991_v2  ;;  %v15579_v10 = vcombine.low %v6778_v8, %v6786_v30  ;;  %v6810_v22 = vld [vmem:[#allocation11 + $0xd00] sm:$0xff] }
 0x939   :  { %9617 = vmatprep.subr.bf16.mxu0 %v15564_v35  ;;  %9723 = vmatprep.subr.bf16.mxu1 %v15566_v9  ;;  %v20098_v2 = vadd.f32 %v20034_v50, %v6347_v38  ;;  %v20105_v57 = vadd.f32 %v20030_v11, %v6346_v61  ;;  %v20122_v20 = vadd.f32 %v20093_v41, %v6341_v3  ;;  %v6819_v35 = vld [vmem:[#allocation11 + $0xd48] sm:$0xff] }
 0x93a   :  { %v6351_v1 = vmul.f32 %v20018_v40, %v6319_v25  ;;  %v6350_v56 = vmul.f32 %v20014_v17, %v6318_v6  ;;  %v6794_v40 = vld [vmem:[#allocation11 + $0xc80] sm:$0xff]  ;;  %v15598_v9 = vcombine.high %v6795_v0, %v6803_v62  ;;  %v15597_v30 = vcombine.low %v6795_v0, %v6803_v62  ;;  %v6827_v38 = vld [vmem:[#allocation11 + $0xd88] sm:$0xff] }
 0x93b   :  { %20668 = vst [vmem:[#allocation24_spill] sm:$0xff] %v20098_v2  ;;  %20670 = vst [vmem:[#allocation26_spill] sm:$0xff] %v20105_v57  ;;  %v6802_v17 = vld [vmem:[#allocation11 + $0xcc0] sm:$0xff]  ;;  %v20128_v45 = vpack.c.bf16 %v20111_v63, %v20122_v20  ;;  %v15612_v48 = vcombine.high %v6810_v22, %v6818_v18  ;;  %v15614_v42 = vcombine.high %v6811_v27, %v6819_v35  ;;  %v6859_v62 = vld [vmem:[#allocation11 + $0xe88] sm:$0xff] }
 0x93c   :  { %9618 = vmatpush1.bf16.msra.mxu0 %v15563_v59  ;;  %9724 = vmatpush1.bf16.msra.mxu1 %v15565_v7  ;;  %v20102_v58 = vadd.f32 %v20034_v50, %v6351_v1  ;;  %v20108_v21 = vadd.f32 %v20030_v11, %v6350_v56  ;;  %v15596_v11 = vcombine.high %v6794_v40, %v6802_v17  ;;  %v6826_v59 = vld [vmem:[#allocation11 + $0xd80] sm:$0xff]  ;;  %v6843_v1 = vld [vmem:[#allocation11 + $0xe08] sm:$0xff] }
 0x93d   :  { %9619 = vmatprep.subr.bf16.mxu0 %v15580_v23  ;;  %9725 = vmatprep.subr.bf16.mxu1 %v15582_v53  ;;  %v15595_v8 = vcombine.low %v6794_v40, %v6802_v17  ;;  %v6834_v7 = vld [vmem:[#allocation11 + $0xdc0] sm:$0xff]  ;;  %v15611_v25 = vcombine.low %v6810_v22, %v6818_v18  ;;  %v15613_v6 = vcombine.low %v6811_v27, %v6819_v35  ;;  %v6851_v56 = vld [vmem:[#allocation11 + $0xe48] sm:$0xff] }
 0x93e   :  { %20669 = vst [vmem:[#allocation25_spill] sm:$0xff] %v20102_v58  ;;  %20671 = vst [vmem:[#allocation27_spill] sm:$0xff] %v20108_v21  ;;  %v20115_v32 = vpack.c.bf16 %v20102_v58, %v20098_v2  ;;  %v20119_v50 = vpack.c.bf16 %v20108_v21, %v20105_v57  ;;  %v15628_v61 = vcombine.high %v6826_v59, %v6834_v7  ;;  %v6842_v53 = vld [vmem:[#allocation11 + $0xe00] sm:$0xff]  ;;  %v6867_v22 = vld [vmem:[#allocation11 + $0xec8] sm:$0xff] }
 0x93f   :  { %v15630_v23 = vcombine.high %v6827_v38, %v6835_v47  ;;  %v15644_v3 = vcombine.high %v6842_v53, %v6850_v24  ;;  %v15646_v40 = vcombine.high %v6843_v1, %v6851_v56  ;;  %v6858_v17 = vld [vmem:[#allocation11 + $0xe80] sm:$0xff]  ;;  %v15645_v18 = vcombine.low %v6843_v1, %v6851_v56 }
 0x940   :  { %9620 = vmatpush1.bf16.msra.mxu0 %v15579_v10  ;;  %9726 = vmatpush1.bf16.msra.mxu1 %v15581_v52  ;;  %v15627_v10 = vcombine.low %v6826_v59, %v6834_v7  ;;  %v15629_v52 = vcombine.low %v6827_v38, %v6835_v47  ;;  %v6866_v0 = vld [vmem:[#allocation11 + $0xec0] sm:$0xff]  ;;  %v15662_v35 = vcombine.high %v6859_v62, %v6867_v22 }
 0x941   :  { %9592 = vmatprep.mubr.bf16.mxu0 %v20115_v32  ;;  %9698 = vmatprep.mubr.bf16.mxu1 %v20115_v32  ;;  %v15660_v27 = vcombine.high %v6858_v17, %v6866_v0  ;;  %v15661_v59 = vcombine.low %v6859_v62, %v6867_v22  ;;  %v6890_v47 = vld [vmem:[#allocation11 + $0xf80] sm:$0xff]  ;;  %v6308_v56 = vmul.f32 %v20020_v55, %v19939_v39  ;;  %v6405_v62 = vld [vmem:[#allocation11 + $0x58] sm:$0xff] }
 0x942   :  { %9593 = vmatmul.mubr.bf16.gmra.mrb[100].mxu0 %v20119_v50  ;;  %9699 = vmatmul.mubr.bf16.gmra.mrb[100].mxu1 %v20119_v50 }
 0x943   :  { %9621 = vmatprep.subr.bf16.mxu0 %v15596_v11  ;;  %9635 = vmatprep.mubr.bf16.mxu0 %v20128_v45  ;;  %v15643_v11 = vcombine.low %v6842_v53, %v6850_v24  ;;  %v6321_v53 = vmul.f32 %v20080_v14, %v20002_v12  ;;  %v18618_v24 = vld [vmem:[#allocation16 + $0x10] sm:$0xff]  ;;  %v6404_v12 = vld [vmem:[#allocation11 + $0x50] sm:$0xff] }
 0x944   :  { %9727 = vmatprep.subr.bf16.mxu1 %v15598_v9  ;;  %9741 = vmatprep.mubr.bf16.mxu1 %v20128_v45  ;;  %v6874_v9 = vld [vmem:[#allocation11 + $0xf00] sm:$0xff]  ;;  %v6333_v1 = vrot.slane %v18618_v24, %v19105_v33  ;;  %v6365_v39 = vrot.slane %v18618_v24, %v19108_v34  ;;  %v6429_v24 = vld [vmem:[#allocation11 + $0x118] sm:$0xff] }
 0x945   :  { %9622 = vmatpush1.bf16.msra.mxu0 %v15595_v8  ;;  %9728 = vmatpush1.bf16.msra.mxu1 %v15597_v30  ;;  %v6882_v8 = vld [vmem:[#allocation11 + $0xf40] sm:$0xff]  ;;  %v6875_v30 = vld [vmem:[#allocation11 + $0xf08] sm:$0xff]  ;;  %v6353_v22 = vmul.f32 %v20078_v26, %v6321_v53  ;;  %v6436_v53 = vld [vmem:[#allocation11 + $0x150] sm:$0xff] }
 0x946   :  { %9623 = vmatprep.subr.bf16.mxu0 %v15612_v48  ;;  %9729 = vmatprep.subr.bf16.mxu1 %v15614_v42  ;;  %v6883_v48 = vld [vmem:[#allocation11 + $0xf48] sm:$0xff]  ;;  %v15659_v42 = vcombine.low %v6858_v17, %v6866_v0  ;;  %v15676_v7 = vcombine.high %v6874_v9, %v6882_v8  ;;  %v6396_v17 = vld [vmem:[#allocation11 + $0x10] sm:$0xff]  ;;  %v6397_v0 = vld [vmem:[#allocation11 + $0x18] sm:$0xff] }
 0x947   :  { %v15678_v38 = vcombine.high %v6875_v30, %v6883_v48 }
 0x949   :  { %9624 = vmatpush1.bf16.msra.mxu0 %v15611_v25  ;;  %9730 = vmatpush1.bf16.msra.mxu1 %v15613_v6  ;;  %v6312_v25 = vmul.f32 %v20022_v36, %v19948_v13  ;;  %v6898_v6 = vld [vmem:[#allocation11 + $0xfc0] sm:$0xff] }
 0x94a   :  { %9625 = vmatprep.subr.bf16.mxu0 %v15628_v61  ;;  %9731 = vmatprep.subr.bf16.mxu1 %v15630_v23  ;;  %v6891_v61 = vld [vmem:[#allocation11 + $0xf88] sm:$0xff]  ;;  %v15692_v13 = vcombine.high %v6890_v47, %v6898_v6  ;;  %v15691_v55 = vcombine.low %v6890_v47, %v6898_v6  ;;  %v15199_v47 = vcombine.low %v6396_v17, %v6404_v12 }
 0x94b   :  { %v6899_v23 = vld [vmem:[#allocation11 + $0xfc8] sm:$0xff] }
 0x94c   :  { %v15694_v36 = vcombine.high %v6891_v61, %v6899_v23 }
 0x94d   :  { %9626 = vmatpush1.bf16.msra.mxu0 %v15627_v10  ;;  %9732 = vmatpush1.bf16.msra.mxu1 %v15629_v52  ;;  %v15675_v10 = vcombine.low %v6874_v9, %v6882_v8  ;;  %v15677_v52 = vcombine.low %v6875_v30, %v6883_v48  ;;  %v15202_v9 = vcombine.high %v6397_v0, %v6405_v62  ;;  %v6412_v48 = vld [vmem:[#allocation11 + $0x90] sm:$0xff] }
 0x94e   :  { %9627 = vmatprep.subr.bf16.mxu0 %v15644_v3  ;;  %9733 = vmatprep.subr.bf16.mxu1 %v15646_v40  ;;  %v6317_v3 = vmul.f32 %v20068_v4, %v19982_v16  ;;  %v6344_v40 = vmul.f32 %v6333_v1, %v6312_v25  ;;  %v6320_v8 = vmul.f32 %v20080_v14, %v19997_v44 }
 0x94f   :  { %v20151_v30 = vadd.f32 %v20093_v41, %v6353_v22  ;;  %v15201_v14 = vcombine.low %v6397_v0, %v6405_v62  ;;  %v6453_v0 = vld [vmem:[#allocation11 + $0x1d8] sm:$0xff] }
 0x950   :  { %v6349_v16 = vmul.f32 %v20078_v26, %v6317_v3  ;;  %v6316_v26 = vmul.f32 %v20068_v4, %v19979_v19  ;;  %v6352_v6 = vmul.f32 %v6333_v1, %v6320_v8  ;;  %v6428_v4 = vld [vmem:[#allocation11 + $0x110] sm:$0xff] }
 0x951   :  { %9628 = vmatpush1.bf16.msra.mxu0 %v15643_v11  ;;  %9734 = vmatpush1.bf16.msra.mxu1 %v15645_v18  ;;  %v6340_v11 = vmul.f32 %v6333_v1, %v6308_v56  ;;  %v15693_v18 = vcombine.low %v6891_v61, %v6899_v23  ;;  %20673 = vst [vmem:[#allocation29_spill] sm:$0xff] %v20151_v30  ;;  %v6437_v56 = vld [vmem:[#allocation11 + $0x158] sm:$0xff] }
 0x952   :  { %9629 = vmatprep.subr.bf16.mxu0 %v15660_v27  ;;  %9735 = vmatprep.subr.bf16.mxu1 %v15662_v35  ;;  %v15200_v27 = vcombine.high %v6396_v17, %v6404_v12  ;;  %v20146_v35 = vadd.f32 %v6365_v39, %v6344_v40  ;;  %v20158_v25 = vadd.f32 %v20093_v41, %v6349_v16  ;;  %v6444_v40 = vld [vmem:[#allocation11 + $0x190] sm:$0xff]  ;;  %v6445_v12 = vld [vmem:[#allocation11 + $0x198] sm:$0xff] }
 0x953   :  { %v6348_v41 = vmul.f32 %v6333_v1, %v6316_v26  ;;  %v20172_v3 = vadd.f32 %v6365_v39, %v6352_v6  ;;  %v6452_v1 = vld [vmem:[#allocation11 + $0x1d0] sm:$0xff]  ;;  %v15231_v22 = vcombine.low %v6428_v4, %v6436_v53  ;;  %v6461_v16 = vld [vmem:[#allocation11 + $0x218] sm:$0xff] }
 0x954   :  { %20674 = vst [vmem:[#allocation30_spill] sm:$0xff] %v20158_v25  ;;  %v20166_v61 = vpack.c.bf16 %v20151_v30, %v20158_v25  ;;  %v15247_v8 = vcombine.low %v6444_v40, %v6452_v1  ;;  %v6484_v26 = vld [vmem:[#allocation11 + $0x2d0] sm:$0xff] }
 0x955   :  { %9630 = vmatpush1.bf16.msra.mxu0 %v15659_v42  ;;  %9736 = vmatpush1.bf16.msra.mxu1 %v15661_v59  ;;  %v20153_v42 = vadd.f32 %v6365_v39, %v6340_v11  ;;  %v6420_v59 = vld [vmem:[#allocation11 + $0xd0] sm:$0xff]  ;;  %20675 = vst [vmem:[#allocation31_spill] sm:$0xff] %v20172_v3  ;;  %v20174_v17 = vadd.f32 %v6365_v39, %v6348_v41 }
 0x956   :  { %9631 = vmatprep.subr.bf16.mxu0 %v15676_v7  ;;  %9737 = vmatprep.subr.bf16.mxu1 %v15678_v38  ;;  %v6413_v7 = vld [vmem:[#allocation11 + $0x98] sm:$0xff]  ;;  %v15216_v23 = vcombine.high %v6412_v48, %v6420_v59  ;;  %v15248_v11 = vcombine.high %v6444_v40, %v6452_v1  ;;  %v6468_v39 = vld [vmem:[#allocation11 + $0x250] sm:$0xff] }
 0x957   :  { %v6421_v38 = vld [vmem:[#allocation11 + $0xd8] sm:$0xff]  ;;  %v20162_v44 = vpack.c.bf16 %v20146_v35, %v20153_v42  ;;  %20676 = vst [vmem:[#allocation32_spill] sm:$0xff] %v20174_v17  ;;  %v20178_v62 = vpack.c.bf16 %v20172_v3, %v20174_v17  ;;  %v6492_v41 = vld [vmem:[#allocation11 + $0x310] sm:$0xff]  ;;  %v6790_v17 = vld [vmem:[#allocation11 + $0xc60] sm:$0xff] }
 0x958   :  { %v15218_v19 = vcombine.high %v6413_v7, %v6421_v38  ;;  %v6508_v40 = vld [vmem:[#allocation11 + $0x390] sm:$0xff] }
 0x959   :  { %9632 = vmatpush1.bf16.msra.mxu0 %v15675_v10  ;;  %9738 = vmatpush1.bf16.msra.mxu1 %v15677_v52  ;;  %v15215_v10 = vcombine.low %v6412_v48, %v6420_v59  ;;  %v15217_v52 = vcombine.low %v6413_v7, %v6421_v38  ;;  %v15249_v48 = vcombine.low %v6445_v12, %v6453_v0  ;;  %v6476_v38 = vld [vmem:[#allocation11 + $0x290] sm:$0xff] }
 0x95a   :  { %9633 = vmatprep.subr.bf16.mxu0 %v15692_v13  ;;  %9739 = vmatprep.subr.bf16.mxu1 %v15694_v36  ;;  %v15232_v13 = vcombine.high %v6428_v4, %v6436_v53  ;;  %v15234_v36 = vcombine.high %v6429_v24, %v6437_v56  ;;  %v6500_v53 = vld [vmem:[#allocation11 + $0x350] sm:$0xff] }
 0x95b   :  { %v6516_v1 = vld [vmem:[#allocation11 + $0x3d0] sm:$0xff] }
 0x95d   :  { %9634 = vmatpush1.bf16.msra.mxu0 %v15691_v55  ;;  %9740 = vmatpush1.bf16.msra.mxu1 %v15693_v18  ;;  %v15233_v55 = vcombine.low %v6429_v24, %v6437_v56  ;;  %v15250_v18 = vcombine.high %v6445_v12, %v6453_v0  ;;  %v6493_v24 = vld [vmem:[#allocation11 + $0x318] sm:$0xff] }
 0x95e   :  { %9762 = vmatprep.subr.bf16.mxu0 %v15200_v27  ;;  %9868 = vmatprep.subr.bf16.mxu1 %v15202_v9  ;;  %v6460_v27 = vld [vmem:[#allocation11 + $0x210] sm:$0xff]  ;;  %v6469_v9 = vld [vmem:[#allocation11 + $0x258] sm:$0xff] }
 0x95f   :  { %v15264_v59 = vcombine.high %v6460_v27, %v6468_v39  ;;  %v15266_v7 = vcombine.high %v6461_v16, %v6469_v9  ;;  %v15263_v6 = vcombine.low %v6460_v27, %v6468_v39  ;;  %v6501_v56 = vld [vmem:[#allocation11 + $0x358] sm:$0xff]  ;;  %v6524_v27 = vld [vmem:[#allocation11 + $0x410] sm:$0xff] }
 0x960   :  { %9636 = vmatmul.mubr.bf16.vlgmr.msra.gmra.mrb[96].mxu0 %v20162_v44  ;;  %9742 = vmatmul.mubr.bf16.vlgmr.msra.gmra.mrb[96].mxu1 %v20162_v44  ;;  %v6509_v12 = vld [vmem:[#allocation11 + $0x398] sm:$0xff]  ;;  %v6532_v39 = vld [vmem:[#allocation11 + $0x450] sm:$0xff] }
 0x961   :  { %9645 = vmatprep.mubr.bf16.mxu0 %v20166_v61  ;;  %9751 = vmatprep.mubr.bf16.mxu1 %v20166_v61  ;;  %v6517_v0 = vld [vmem:[#allocation11 + $0x3d8] sm:$0xff] }
 0x962   :  { %9763 = vmatpush1.bf16.msra.mxu0 %v15199_v47  ;;  %9869 = vmatpush1.bf16.msra.mxu1 %v15201_v14  ;;  %v6477_v47 = vld [vmem:[#allocation11 + $0x298] sm:$0xff] }
 0x963   :  { %9764 = vmatprep.subr.bf16.mxu0 %v15216_v23  ;;  %9870 = vmatprep.subr.bf16.mxu1 %v15218_v19  ;;  %v6485_v14 = vld [vmem:[#allocation11 + $0x2d8] sm:$0xff]  ;;  %v15265_v23 = vcombine.low %v6461_v16, %v6469_v9  ;;  %v15280_v19 = vcombine.high %v6476_v38, %v6484_v26 }
 0x964   :  { %v15282_v4 = vcombine.high %v6477_v47, %v6485_v14  ;;  %v6525_v16 = vld [vmem:[#allocation11 + $0x418] sm:$0xff] }
 0x965   :  { %v6533_v9 = vld [vmem:[#allocation11 + $0x458] sm:$0xff] }
 0x966   :  { %9765 = vmatpush1.bf16.msra.mxu0 %v15215_v10  ;;  %9871 = vmatpush1.bf16.msra.mxu1 %v15217_v52  ;;  %v15279_v10 = vcombine.low %v6476_v38, %v6484_v26  ;;  %v15281_v52 = vcombine.low %v6477_v47, %v6485_v14  ;;  %v6540_v38 = vld [vmem:[#allocation11 + $0x490] sm:$0xff]  ;;  %v6541_v47 = vld [vmem:[#allocation11 + $0x498] sm:$0xff] }
 0x967   :  { %9766 = vmatprep.subr.bf16.mxu0 %v15232_v13  ;;  %9872 = vmatprep.subr.bf16.mxu1 %v15234_v36  ;;  %v15296_v13 = vcombine.high %v6492_v41, %v6500_v53  ;;  %v15298_v36 = vcombine.high %v6493_v24, %v6501_v56  ;;  %v6548_v26 = vld [vmem:[#allocation11 + $0x4d0] sm:$0xff]  ;;  %v6549_v14 = vld [vmem:[#allocation11 + $0x4d8] sm:$0xff] }
 0x968   :  { %9646 = vmatmul.mubr.bf16.gmra.mrb[100].mxu0 %v20178_v62  ;;  %9752 = vmatmul.mubr.bf16.gmra.mrb[100].mxu1 %v20178_v62 }
 0x969   :  { %9794 = vmatprep.mubr.bf16.mxu0 %v20058_v43  ;;  %9900 = vmatprep.mubr.bf16.mxu1 %v20058_v43 }
 0x96a   :  { %9767 = vmatpush1.bf16.msra.mxu0 %v15231_v22  ;;  %9873 = vmatpush1.bf16.msra.mxu1 %v15233_v55  ;;  %v15295_v22 = vcombine.low %v6492_v41, %v6500_v53  ;;  %v15297_v55 = vcombine.low %v6493_v24, %v6501_v56  ;;  %v6556_v41 = vld [vmem:[#allocation11 + $0x510] sm:$0xff]  ;;  %v6557_v24 = vld [vmem:[#allocation11 + $0x518] sm:$0xff] }
 0x96b   :  { %9768 = vmatprep.subr.bf16.mxu0 %v15248_v11  ;;  %9874 = vmatprep.subr.bf16.mxu1 %v15250_v18  ;;  %v15312_v11 = vcombine.high %v6508_v40, %v6516_v1  ;;  %v15314_v18 = vcombine.high %v6509_v12, %v6517_v0  ;;  %v6564_v53 = vld [vmem:[#allocation11 + $0x550] sm:$0xff]  ;;  %v6565_v56 = vld [vmem:[#allocation11 + $0x558] sm:$0xff] }
 0x96e   :  { %9769 = vmatpush1.bf16.msra.mxu0 %v15247_v8  ;;  %9875 = vmatpush1.bf16.msra.mxu1 %v15249_v48  ;;  %v15311_v8 = vcombine.low %v6508_v40, %v6516_v1  ;;  %v15313_v48 = vcombine.low %v6509_v12, %v6517_v0  ;;  %v6572_v40 = vld [vmem:[#allocation11 + $0x590] sm:$0xff]  ;;  %v6573_v12 = vld [vmem:[#allocation11 + $0x598] sm:$0xff] }
 0x96f   :  { %9770 = vmatprep.subr.bf16.mxu0 %v15264_v59  ;;  %9876 = vmatprep.subr.bf16.mxu1 %v15266_v7  ;;  %v15328_v59 = vcombine.high %v6524_v27, %v6532_v39  ;;  %v15330_v7 = vcombine.high %v6525_v16, %v6533_v9  ;;  %v6580_v1 = vld [vmem:[#allocation11 + $0x5d0] sm:$0xff]  ;;  %v6581_v0 = vld [vmem:[#allocation11 + $0x5d8] sm:$0xff] }
 0x972   :  { %9771 = vmatpush1.bf16.msra.mxu0 %v15263_v6  ;;  %9877 = vmatpush1.bf16.msra.mxu1 %v15265_v23  ;;  %v15327_v6 = vcombine.low %v6524_v27, %v6532_v39  ;;  %v15329_v23 = vcombine.low %v6525_v16, %v6533_v9  ;;  %v6588_v27 = vld [vmem:[#allocation11 + $0x610] sm:$0xff]  ;;  %v6589_v16 = vld [vmem:[#allocation11 + $0x618] sm:$0xff] }
 0x973   :  { %9772 = vmatprep.subr.bf16.mxu0 %v15280_v19  ;;  %9878 = vmatprep.subr.bf16.mxu1 %v15282_v4  ;;  %v15344_v19 = vcombine.high %v6540_v38, %v6548_v26  ;;  %v15346_v4 = vcombine.high %v6541_v47, %v6549_v14  ;;  %v6596_v39 = vld [vmem:[#allocation11 + $0x650] sm:$0xff]  ;;  %v6597_v9 = vld [vmem:[#allocation11 + $0x658] sm:$0xff] }
 0x976   :  { %9773 = vmatpush1.bf16.msra.mxu0 %v15279_v10  ;;  %9879 = vmatpush1.bf16.msra.mxu1 %v15281_v52  ;;  %v15343_v10 = vcombine.low %v6540_v38, %v6548_v26  ;;  %v15345_v52 = vcombine.low %v6541_v47, %v6549_v14  ;;  %v6604_v38 = vld [vmem:[#allocation11 + $0x690] sm:$0xff]  ;;  %v6605_v47 = vld [vmem:[#allocation11 + $0x698] sm:$0xff] }
 0x977   :  { %9774 = vmatprep.subr.bf16.mxu0 %v15296_v13  ;;  %9880 = vmatprep.subr.bf16.mxu1 %v15298_v36  ;;  %v15360_v13 = vcombine.high %v6556_v41, %v6564_v53  ;;  %v15362_v36 = vcombine.high %v6557_v24, %v6565_v56  ;;  %v6612_v26 = vld [vmem:[#allocation11 + $0x6d0] sm:$0xff]  ;;  %v6613_v14 = vld [vmem:[#allocation11 + $0x6d8] sm:$0xff] }
 0x97a   :  { %9775 = vmatpush1.bf16.msra.mxu0 %v15295_v22  ;;  %9881 = vmatpush1.bf16.msra.mxu1 %v15297_v55  ;;  %v15359_v22 = vcombine.low %v6556_v41, %v6564_v53  ;;  %v15361_v55 = vcombine.low %v6557_v24, %v6565_v56  ;;  %v6620_v41 = vld [vmem:[#allocation11 + $0x710] sm:$0xff]  ;;  %v6621_v24 = vld [vmem:[#allocation11 + $0x718] sm:$0xff] }
 0x97b   :  { %9776 = vmatprep.subr.bf16.mxu0 %v15312_v11  ;;  %9882 = vmatprep.subr.bf16.mxu1 %v15314_v18  ;;  %v15376_v11 = vcombine.high %v6572_v40, %v6580_v1  ;;  %v15378_v18 = vcombine.high %v6573_v12, %v6581_v0  ;;  %v6628_v53 = vld [vmem:[#allocation11 + $0x750] sm:$0xff]  ;;  %v6629_v56 = vld [vmem:[#allocation11 + $0x758] sm:$0xff] }
 0x97e   :  { %9777 = vmatpush1.bf16.msra.mxu0 %v15311_v8  ;;  %9883 = vmatpush1.bf16.msra.mxu1 %v15313_v48  ;;  %v15375_v8 = vcombine.low %v6572_v40, %v6580_v1  ;;  %v15377_v48 = vcombine.low %v6573_v12, %v6581_v0  ;;  %v6636_v40 = vld [vmem:[#allocation11 + $0x790] sm:$0xff]  ;;  %v6637_v12 = vld [vmem:[#allocation11 + $0x798] sm:$0xff] }
 0x97f   :  { %9778 = vmatprep.subr.bf16.mxu0 %v15328_v59  ;;  %9884 = vmatprep.subr.bf16.mxu1 %v15330_v7  ;;  %v15392_v59 = vcombine.high %v6588_v27, %v6596_v39  ;;  %v15394_v7 = vcombine.high %v6589_v16, %v6597_v9  ;;  %v6644_v1 = vld [vmem:[#allocation11 + $0x7d0] sm:$0xff]  ;;  %v6645_v0 = vld [vmem:[#allocation11 + $0x7d8] sm:$0xff] }
 0x982   :  { %9779 = vmatpush1.bf16.msra.mxu0 %v15327_v6  ;;  %9885 = vmatpush1.bf16.msra.mxu1 %v15329_v23  ;;  %v15391_v6 = vcombine.low %v6588_v27, %v6596_v39  ;;  %v15393_v23 = vcombine.low %v6589_v16, %v6597_v9  ;;  %v6652_v27 = vld [vmem:[#allocation11 + $0x810] sm:$0xff]  ;;  %v6653_v16 = vld [vmem:[#allocation11 + $0x818] sm:$0xff] }
 0x983   :  { %9780 = vmatprep.subr.bf16.mxu0 %v15344_v19  ;;  %9886 = vmatprep.subr.bf16.mxu1 %v15346_v4  ;;  %v15408_v19 = vcombine.high %v6604_v38, %v6612_v26  ;;  %v15410_v4 = vcombine.high %v6605_v47, %v6613_v14  ;;  %v6660_v39 = vld [vmem:[#allocation11 + $0x850] sm:$0xff]  ;;  %v6661_v9 = vld [vmem:[#allocation11 + $0x858] sm:$0xff] }
 0x986   :  { %9781 = vmatpush1.bf16.msra.mxu0 %v15343_v10  ;;  %9887 = vmatpush1.bf16.msra.mxu1 %v15345_v52  ;;  %v15407_v10 = vcombine.low %v6604_v38, %v6612_v26  ;;  %v15409_v52 = vcombine.low %v6605_v47, %v6613_v14  ;;  %v6668_v38 = vld [vmem:[#allocation11 + $0x890] sm:$0xff]  ;;  %v6669_v47 = vld [vmem:[#allocation11 + $0x898] sm:$0xff] }
 0x987   :  { %9782 = vmatprep.subr.bf16.mxu0 %v15360_v13  ;;  %9888 = vmatprep.subr.bf16.mxu1 %v15362_v36  ;;  %v15424_v13 = vcombine.high %v6620_v41, %v6628_v53  ;;  %v15426_v36 = vcombine.high %v6621_v24, %v6629_v56  ;;  %v6676_v26 = vld [vmem:[#allocation11 + $0x8d0] sm:$0xff]  ;;  %v6677_v14 = vld [vmem:[#allocation11 + $0x8d8] sm:$0xff] }
 0x98a   :  { %9783 = vmatpush1.bf16.msra.mxu0 %v15359_v22  ;;  %9889 = vmatpush1.bf16.msra.mxu1 %v15361_v55  ;;  %v15423_v22 = vcombine.low %v6620_v41, %v6628_v53  ;;  %v15425_v55 = vcombine.low %v6621_v24, %v6629_v56  ;;  %v6684_v41 = vld [vmem:[#allocation11 + $0x910] sm:$0xff]  ;;  %v6685_v24 = vld [vmem:[#allocation11 + $0x918] sm:$0xff] }
 0x98b   :  { %9784 = vmatprep.subr.bf16.mxu0 %v15376_v11  ;;  %9890 = vmatprep.subr.bf16.mxu1 %v15378_v18  ;;  %v15440_v11 = vcombine.high %v6636_v40, %v6644_v1  ;;  %v15442_v18 = vcombine.high %v6637_v12, %v6645_v0  ;;  %v6692_v53 = vld [vmem:[#allocation11 + $0x950] sm:$0xff]  ;;  %v6693_v56 = vld [vmem:[#allocation11 + $0x958] sm:$0xff] }
 0x98e   :  { %9785 = vmatpush1.bf16.msra.mxu0 %v15375_v8  ;;  %9891 = vmatpush1.bf16.msra.mxu1 %v15377_v48  ;;  %v15439_v8 = vcombine.low %v6636_v40, %v6644_v1  ;;  %v15441_v48 = vcombine.low %v6637_v12, %v6645_v0  ;;  %v6700_v40 = vld [vmem:[#allocation11 + $0x990] sm:$0xff]  ;;  %v6701_v12 = vld [vmem:[#allocation11 + $0x998] sm:$0xff] }
 0x98f   :  { %9786 = vmatprep.subr.bf16.mxu0 %v15392_v59  ;;  %9892 = vmatprep.subr.bf16.mxu1 %v15394_v7  ;;  %v15456_v59 = vcombine.high %v6652_v27, %v6660_v39  ;;  %v15458_v7 = vcombine.high %v6653_v16, %v6661_v9  ;;  %v6708_v1 = vld [vmem:[#allocation11 + $0x9d0] sm:$0xff]  ;;  %v6709_v0 = vld [vmem:[#allocation11 + $0x9d8] sm:$0xff] }
 0x992   :  { %9787 = vmatpush1.bf16.msra.mxu0 %v15391_v6  ;;  %9893 = vmatpush1.bf16.msra.mxu1 %v15393_v23  ;;  %v15455_v6 = vcombine.low %v6652_v27, %v6660_v39  ;;  %v15457_v23 = vcombine.low %v6653_v16, %v6661_v9  ;;  %v6716_v27 = vld [vmem:[#allocation11 + $0xa10] sm:$0xff]  ;;  %v6717_v16 = vld [vmem:[#allocation11 + $0xa18] sm:$0xff] }
 0x993   :  { %9788 = vmatprep.subr.bf16.mxu0 %v15408_v19  ;;  %9894 = vmatprep.subr.bf16.mxu1 %v15410_v4  ;;  %v15472_v19 = vcombine.high %v6668_v38, %v6676_v26  ;;  %v15474_v4 = vcombine.high %v6669_v47, %v6677_v14  ;;  %v6724_v39 = vld [vmem:[#allocation11 + $0xa50] sm:$0xff]  ;;  %v6725_v9 = vld [vmem:[#allocation11 + $0xa58] sm:$0xff] }
 0x996   :  { %9789 = vmatpush1.bf16.msra.mxu0 %v15407_v10  ;;  %9895 = vmatpush1.bf16.msra.mxu1 %v15409_v52  ;;  %v15471_v10 = vcombine.low %v6668_v38, %v6676_v26  ;;  %v15473_v52 = vcombine.low %v6669_v47, %v6677_v14  ;;  %v6732_v38 = vld [vmem:[#allocation11 + $0xa90] sm:$0xff]  ;;  %v6733_v47 = vld [vmem:[#allocation11 + $0xa98] sm:$0xff] }
 0x997   :  { %9790 = vmatprep.subr.bf16.mxu0 %v15424_v13  ;;  %9896 = vmatprep.subr.bf16.mxu1 %v15426_v36  ;;  %v15488_v13 = vcombine.high %v6684_v41, %v6692_v53  ;;  %v15490_v36 = vcombine.high %v6685_v24, %v6693_v56  ;;  %v6740_v26 = vld [vmem:[#allocation11 + $0xad0] sm:$0xff]  ;;  %v6741_v14 = vld [vmem:[#allocation11 + $0xad8] sm:$0xff] }
 0x99a   :  { %9791 = vmatpush1.bf16.msra.mxu0 %v15423_v22  ;;  %9897 = vmatpush1.bf16.msra.mxu1 %v15425_v55  ;;  %v15487_v22 = vcombine.low %v6684_v41, %v6692_v53  ;;  %v15489_v55 = vcombine.low %v6685_v24, %v6693_v56  ;;  %v6748_v41 = vld [vmem:[#allocation11 + $0xb10] sm:$0xff]  ;;  %v6749_v24 = vld [vmem:[#allocation11 + $0xb18] sm:$0xff] }
 0x99b   :  { %9792 = vmatprep.subr.bf16.mxu0 %v15440_v11  ;;  %9898 = vmatprep.subr.bf16.mxu1 %v15442_v18  ;;  %v15504_v11 = vcombine.high %v6700_v40, %v6708_v1  ;;  %v15506_v18 = vcombine.high %v6701_v12, %v6709_v0  ;;  %v6756_v53 = vld [vmem:[#allocation11 + $0xb50] sm:$0xff]  ;;  %v6757_v56 = vld [vmem:[#allocation11 + $0xb58] sm:$0xff] }
 0x99e   :  { %9793 = vmatpush1.bf16.msra.mxu0 %v15439_v8  ;;  %9899 = vmatpush1.bf16.msra.mxu1 %v15441_v48  ;;  %v15503_v8 = vcombine.low %v6700_v40, %v6708_v1  ;;  %v15505_v48 = vcombine.low %v6701_v12, %v6709_v0  ;;  %v6764_v40 = vld [vmem:[#allocation11 + $0xb90] sm:$0xff]  ;;  %v6765_v12 = vld [vmem:[#allocation11 + $0xb98] sm:$0xff] }
 0x99f   :  { %9815 = vmatprep.subr.bf16.mxu0 %v15456_v59  ;;  %9921 = vmatprep.subr.bf16.mxu1 %v15458_v7  ;;  %v15520_v59 = vcombine.high %v6716_v27, %v6724_v39  ;;  %v15522_v7 = vcombine.high %v6717_v16, %v6725_v9  ;;  %v6772_v1 = vld [vmem:[#allocation11 + $0xbd0] sm:$0xff]  ;;  %v6773_v0 = vld [vmem:[#allocation11 + $0xbd8] sm:$0xff] }
 0x9a1   :  { %9795 = vmatmul.mubr.bf16.vlgmr.msra.gmra.mrb[104].mxu0 %v20062_v15  ;;  %9901 = vmatmul.mubr.bf16.vlgmr.msra.gmra.mrb[104].mxu1 %v20062_v15 }
 0x9a2   :  { %9804 = vmatprep.mubr.bf16.mxu0 %v20115_v32  ;;  %9816 = vmatpush1.bf16.msra.mxu0 %v15455_v6  ;;  %v15519_v6 = vcombine.low %v6716_v27, %v6724_v39  ;;  %v6780_v27 = vld [vmem:[#allocation11 + $0xc10] sm:$0xff] }
 0x9a3   :  { %9910 = vmatprep.mubr.bf16.mxu1 %v20115_v32  ;;  %9922 = vmatpush1.bf16.msra.mxu1 %v15457_v23  ;;  %v15521_v23 = vcombine.low %v6717_v16, %v6725_v9  ;;  %v6788_v39 = vld [vmem:[#allocation11 + $0xc50] sm:$0xff]  ;;  %v6781_v16 = vld [vmem:[#allocation11 + $0xc18] sm:$0xff] }
 0x9a4   :  { %9817 = vmatprep.subr.bf16.mxu0 %v15472_v19  ;;  %9923 = vmatprep.subr.bf16.mxu1 %v15474_v4  ;;  %v15536_v19 = vcombine.high %v6732_v38, %v6740_v26  ;;  %v15538_v4 = vcombine.high %v6733_v47, %v6741_v14  ;;  %v6789_v9 = vld [vmem:[#allocation11 + $0xc58] sm:$0xff] }
 0x9a6   :  { %9818 = vmatpush1.bf16.msra.mxu0 %v15471_v10  ;;  %v15535_v10 = vcombine.low %v6732_v38, %v6740_v26  ;;  %v6796_v38 = vld [vmem:[#allocation11 + $0xc90] sm:$0xff] }
 0x9a7   :  { %9924 = vmatpush1.bf16.msra.mxu1 %v15473_v52  ;;  %9819 = vmatprep.subr.bf16.mxu0 %v15488_v13  ;;  %v15537_v52 = vcombine.low %v6733_v47, %v6741_v14  ;;  %v15552_v13 = vcombine.high %v6748_v41, %v6756_v53  ;;  %v6804_v26 = vld [vmem:[#allocation11 + $0xcd0] sm:$0xff]  ;;  %v6797_v47 = vld [vmem:[#allocation11 + $0xc98] sm:$0xff] }
 0x9a8   :  { %9925 = vmatprep.subr.bf16.mxu1 %v15490_v36  ;;  %v15554_v36 = vcombine.high %v6749_v24, %v6757_v56  ;;  %v6805_v14 = vld [vmem:[#allocation11 + $0xcd8] sm:$0xff] }
 0x9a9   :  { %9805 = vmatmul.mubr.bf16.gmra.mrb[108].mxu0 %v20119_v50  ;;  %9911 = vmatmul.mubr.bf16.gmra.mrb[108].mxu1 %v20119_v50 }
 0x9aa   :  { %9820 = vmatpush1.bf16.msra.mxu0 %v15487_v22  ;;  %9847 = vmatprep.mubr.bf16.mxu0 %v20128_v45  ;;  %v15551_v22 = vcombine.low %v6748_v41, %v6756_v53  ;;  %v6812_v41 = vld [vmem:[#allocation11 + $0xd10] sm:$0xff] }
 0x9ab   :  { %9926 = vmatpush1.bf16.msra.mxu1 %v15489_v55  ;;  %9953 = vmatprep.mubr.bf16.mxu1 %v20128_v45  ;;  %v15553_v55 = vcombine.low %v6749_v24, %v6757_v56  ;;  %v6820_v53 = vld [vmem:[#allocation11 + $0xd50] sm:$0xff]  ;;  %v6813_v24 = vld [vmem:[#allocation11 + $0xd18] sm:$0xff] }
 0x9ac   :  { %9821 = vmatprep.subr.bf16.mxu0 %v15504_v11  ;;  %9927 = vmatprep.subr.bf16.mxu1 %v15506_v18  ;;  %v15568_v11 = vcombine.high %v6764_v40, %v6772_v1  ;;  %v15570_v18 = vcombine.high %v6765_v12, %v6773_v0  ;;  %v6821_v56 = vld [vmem:[#allocation11 + $0xd58] sm:$0xff] }
 0x9ae   :  { %9822 = vmatpush1.bf16.msra.mxu0 %v15503_v8  ;;  %v15567_v8 = vcombine.low %v6764_v40, %v6772_v1  ;;  %v6828_v40 = vld [vmem:[#allocation11 + $0xd90] sm:$0xff] }
 0x9af   :  { %9928 = vmatpush1.bf16.msra.mxu1 %v15505_v48  ;;  %9823 = vmatprep.subr.bf16.mxu0 %v15520_v59  ;;  %v15569_v48 = vcombine.low %v6765_v12, %v6773_v0  ;;  %v15584_v59 = vcombine.high %v6780_v27, %v6788_v39  ;;  %v6836_v1 = vld [vmem:[#allocation11 + $0xdd0] sm:$0xff]  ;;  %v6829_v12 = vld [vmem:[#allocation11 + $0xd98] sm:$0xff] }
 0x9b0   :  { %9929 = vmatprep.subr.bf16.mxu1 %v15522_v7  ;;  %v15586_v7 = vcombine.high %v6781_v16, %v6789_v9  ;;  %v6837_v0 = vld [vmem:[#allocation11 + $0xdd8] sm:$0xff] }
 0x9b2   :  { %9824 = vmatpush1.bf16.msra.mxu0 %v15519_v6  ;;  %v15583_v6 = vcombine.low %v6780_v27, %v6788_v39  ;;  %v6844_v27 = vld [vmem:[#allocation11 + $0xe10] sm:$0xff] }
 0x9b3   :  { %9930 = vmatpush1.bf16.msra.mxu1 %v15521_v23  ;;  %9825 = vmatprep.subr.bf16.mxu0 %v15536_v19  ;;  %v15585_v23 = vcombine.low %v6781_v16, %v6789_v9  ;;  %v15600_v19 = vcombine.high %v6796_v38, %v6804_v26  ;;  %v6852_v39 = vld [vmem:[#allocation11 + $0xe50] sm:$0xff]  ;;  %v6845_v16 = vld [vmem:[#allocation11 + $0xe18] sm:$0xff] }
 0x9b4   :  { %9931 = vmatprep.subr.bf16.mxu1 %v15538_v4  ;;  %v15602_v4 = vcombine.high %v6797_v47, %v6805_v14  ;;  %v6853_v9 = vld [vmem:[#allocation11 + $0xe58] sm:$0xff] }
 0x9b6   :  { %9826 = vmatpush1.bf16.msra.mxu0 %v15535_v10  ;;  %v15599_v10 = vcombine.low %v6796_v38, %v6804_v26  ;;  %v6860_v38 = vld [vmem:[#allocation11 + $0xe90] sm:$0xff] }
 0x9b7   :  { %9932 = vmatpush1.bf16.msra.mxu1 %v15537_v52  ;;  %9827 = vmatprep.subr.bf16.mxu0 %v15552_v13  ;;  %v15601_v52 = vcombine.low %v6797_v47, %v6805_v14  ;;  %v15616_v13 = vcombine.high %v6812_v41, %v6820_v53  ;;  %v6868_v26 = vld [vmem:[#allocation11 + $0xed0] sm:$0xff]  ;;  %v6861_v47 = vld [vmem:[#allocation11 + $0xe98] sm:$0xff] }
 0x9b8   :  { %9933 = vmatprep.subr.bf16.mxu1 %v15554_v36  ;;  %v15618_v36 = vcombine.high %v6813_v24, %v6821_v56  ;;  %v6869_v14 = vld [vmem:[#allocation11 + $0xed8] sm:$0xff] }
 0x9ba   :  { %9828 = vmatpush1.bf16.msra.mxu0 %v15551_v22  ;;  %v15615_v22 = vcombine.low %v6812_v41, %v6820_v53  ;;  %v6876_v41 = vld [vmem:[#allocation11 + $0xf10] sm:$0xff] }
 0x9bb   :  { %9934 = vmatpush1.bf16.msra.mxu1 %v15553_v55  ;;  %9829 = vmatprep.subr.bf16.mxu0 %v15568_v11  ;;  %v15617_v55 = vcombine.low %v6813_v24, %v6821_v56  ;;  %v15632_v11 = vcombine.high %v6828_v40, %v6836_v1  ;;  %v6884_v53 = vld [vmem:[#allocation11 + $0xf50] sm:$0xff]  ;;  %v6877_v24 = vld [vmem:[#allocation11 + $0xf18] sm:$0xff] }
 0x9bc   :  { %9935 = vmatprep.subr.bf16.mxu1 %v15570_v18  ;;  %v15634_v18 = vcombine.high %v6829_v12, %v6837_v0  ;;  %v6885_v56 = vld [vmem:[#allocation11 + $0xf58] sm:$0xff] }
 0x9be   :  { %9830 = vmatpush1.bf16.msra.mxu0 %v15567_v8  ;;  %v15631_v8 = vcombine.low %v6828_v40, %v6836_v1  ;;  %v6892_v40 = vld [vmem:[#allocation11 + $0xf90] sm:$0xff] }
 0x9bf   :  { %9936 = vmatpush1.bf16.msra.mxu1 %v15569_v48  ;;  %9831 = vmatprep.subr.bf16.mxu0 %v15584_v59  ;;  %v15633_v48 = vcombine.low %v6829_v12, %v6837_v0  ;;  %v15648_v59 = vcombine.high %v6844_v27, %v6852_v39  ;;  %v6900_v1 = vld [vmem:[#allocation11 + $0xfd0] sm:$0xff]  ;;  %v6893_v12 = vld [vmem:[#allocation11 + $0xf98] sm:$0xff] }
 0x9c0   :  { %9937 = vmatprep.subr.bf16.mxu1 %v15586_v7  ;;  %v15650_v7 = vcombine.high %v6845_v16, %v6853_v9  ;;  %v6901_v0 = vld [vmem:[#allocation11 + $0xfd8] sm:$0xff] }
 0x9c2   :  { %9832 = vmatpush1.bf16.msra.mxu0 %v15583_v6  ;;  %v15647_v6 = vcombine.low %v6844_v27, %v6852_v39  ;;  %v6398_v27 = vld [vmem:[#allocation11 + $0x20] sm:$0xff] }
 0x9c3   :  { %9938 = vmatpush1.bf16.msra.mxu1 %v15585_v23  ;;  %9833 = vmatprep.subr.bf16.mxu0 %v15600_v19  ;;  %v15649_v23 = vcombine.low %v6845_v16, %v6853_v9  ;;  %v15664_v19 = vcombine.high %v6860_v38, %v6868_v26  ;;  %v6406_v39 = vld [vmem:[#allocation11 + $0x60] sm:$0xff]  ;;  %v6399_v16 = vld [vmem:[#allocation11 + $0x28] sm:$0xff] }
 0x9c4   :  { %9939 = vmatprep.subr.bf16.mxu1 %v15602_v4  ;;  %v15666_v4 = vcombine.high %v6861_v47, %v6869_v14  ;;  %v6407_v9 = vld [vmem:[#allocation11 + $0x68] sm:$0xff] }
 0x9c6   :  { %9834 = vmatpush1.bf16.msra.mxu0 %v15599_v10  ;;  %v15663_v10 = vcombine.low %v6860_v38, %v6868_v26  ;;  %v6414_v38 = vld [vmem:[#allocation11 + $0xa0] sm:$0xff] }
 0x9c7   :  { %9940 = vmatpush1.bf16.msra.mxu1 %v15601_v52  ;;  %9835 = vmatprep.subr.bf16.mxu0 %v15616_v13  ;;  %v15665_v52 = vcombine.low %v6861_v47, %v6869_v14  ;;  %v15680_v13 = vcombine.high %v6876_v41, %v6884_v53  ;;  %v6422_v26 = vld [vmem:[#allocation11 + $0xe0] sm:$0xff]  ;;  %v6415_v47 = vld [vmem:[#allocation11 + $0xa8] sm:$0xff] }
 0x9c8   :  { %9941 = vmatprep.subr.bf16.mxu1 %v15618_v36  ;;  %v15682_v36 = vcombine.high %v6877_v24, %v6885_v56  ;;  %v6423_v14 = vld [vmem:[#allocation11 + $0xe8] sm:$0xff] }
 0x9ca   :  { %9836 = vmatpush1.bf16.msra.mxu0 %v15615_v22  ;;  %v15679_v22 = vcombine.low %v6876_v41, %v6884_v53  ;;  %v6430_v41 = vld [vmem:[#allocation11 + $0x120] sm:$0xff] }
 0x9cb   :  { %9942 = vmatpush1.bf16.msra.mxu1 %v15617_v55  ;;  %9837 = vmatprep.subr.bf16.mxu0 %v15632_v11  ;;  %v15681_v55 = vcombine.low %v6877_v24, %v6885_v56  ;;  %v15696_v11 = vcombine.high %v6892_v40, %v6900_v1  ;;  %v6438_v53 = vld [vmem:[#allocation11 + $0x160] sm:$0xff]  ;;  %v6431_v24 = vld [vmem:[#allocation11 + $0x128] sm:$0xff] }
 0x9cc   :  { %9943 = vmatprep.subr.bf16.mxu1 %v15634_v18  ;;  %v15698_v18 = vcombine.high %v6893_v12, %v6901_v0  ;;  %v6439_v56 = vld [vmem:[#allocation11 + $0x168] sm:$0xff] }
 0x9ce   :  { %9838 = vmatpush1.bf16.msra.mxu0 %v15631_v8  ;;  %v15695_v8 = vcombine.low %v6892_v40, %v6900_v1  ;;  %v6446_v40 = vld [vmem:[#allocation11 + $0x1a0] sm:$0xff] }
 0x9cf   :  { %9944 = vmatpush1.bf16.msra.mxu1 %v15633_v48  ;;  %9839 = vmatprep.subr.bf16.mxu0 %v15648_v59  ;;  %v15697_v48 = vcombine.low %v6893_v12, %v6901_v0  ;;  %v15204_v59 = vcombine.high %v6398_v27, %v6406_v39  ;;  %v6454_v1 = vld [vmem:[#allocation11 + $0x1e0] sm:$0xff]  ;;  %v6447_v12 = vld [vmem:[#allocation11 + $0x1a8] sm:$0xff] }
 0x9d0   :  { %9945 = vmatprep.subr.bf16.mxu1 %v15650_v7  ;;  %v15206_v7 = vcombine.high %v6399_v16, %v6407_v9  ;;  %v6455_v0 = vld [vmem:[#allocation11 + $0x1e8] sm:$0xff] }
 0x9d2   :  { %9840 = vmatpush1.bf16.msra.mxu0 %v15647_v6  ;;  %v15203_v6 = vcombine.low %v6398_v27, %v6406_v39  ;;  %v6462_v27 = vld [vmem:[#allocation11 + $0x220] sm:$0xff] }
 0x9d3   :  { %9946 = vmatpush1.bf16.msra.mxu1 %v15649_v23  ;;  %9841 = vmatprep.subr.bf16.mxu0 %v15664_v19  ;;  %v15205_v23 = vcombine.low %v6399_v16, %v6407_v9  ;;  %v15220_v19 = vcombine.high %v6414_v38, %v6422_v26  ;;  %v6470_v39 = vld [vmem:[#allocation11 + $0x260] sm:$0xff]  ;;  %v6463_v16 = vld [vmem:[#allocation11 + $0x228] sm:$0xff] }
 0x9d4   :  { %9947 = vmatprep.subr.bf16.mxu1 %v15666_v4  ;;  %v15222_v4 = vcombine.high %v6415_v47, %v6423_v14  ;;  %v6471_v9 = vld [vmem:[#allocation11 + $0x268] sm:$0xff] }
 0x9d6   :  { %9842 = vmatpush1.bf16.msra.mxu0 %v15663_v10  ;;  %v15219_v10 = vcombine.low %v6414_v38, %v6422_v26  ;;  %v6478_v38 = vld [vmem:[#allocation11 + $0x2a0] sm:$0xff] }
 0x9d7   :  { %9948 = vmatpush1.bf16.msra.mxu1 %v15665_v52  ;;  %9843 = vmatprep.subr.bf16.mxu0 %v15680_v13  ;;  %v15221_v52 = vcombine.low %v6415_v47, %v6423_v14  ;;  %v15236_v13 = vcombine.high %v6430_v41, %v6438_v53  ;;  %v6486_v26 = vld [vmem:[#allocation11 + $0x2e0] sm:$0xff]  ;;  %v6479_v47 = vld [vmem:[#allocation11 + $0x2a8] sm:$0xff] }
 0x9d8   :  { %9949 = vmatprep.subr.bf16.mxu1 %v15682_v36  ;;  %v15238_v36 = vcombine.high %v6431_v24, %v6439_v56  ;;  %v6487_v14 = vld [vmem:[#allocation11 + $0x2e8] sm:$0xff] }
 0x9da   :  { %9844 = vmatpush1.bf16.msra.mxu0 %v15679_v22  ;;  %v15235_v22 = vcombine.low %v6430_v41, %v6438_v53  ;;  %v6494_v41 = vld [vmem:[#allocation11 + $0x320] sm:$0xff] }
 0x9db   :  { %9950 = vmatpush1.bf16.msra.mxu1 %v15681_v55  ;;  %9845 = vmatprep.subr.bf16.mxu0 %v15696_v11  ;;  %v15237_v55 = vcombine.low %v6431_v24, %v6439_v56  ;;  %v15252_v11 = vcombine.high %v6446_v40, %v6454_v1  ;;  %v6502_v53 = vld [vmem:[#allocation11 + $0x360] sm:$0xff]  ;;  %v6495_v24 = vld [vmem:[#allocation11 + $0x328] sm:$0xff] }
 0x9dc   :  { %9951 = vmatprep.subr.bf16.mxu1 %v15698_v18  ;;  %v15254_v18 = vcombine.high %v6447_v12, %v6455_v0  ;;  %v6503_v56 = vld [vmem:[#allocation11 + $0x368] sm:$0xff] }
 0x9de   :  { %9846 = vmatpush1.bf16.msra.mxu0 %v15695_v8  ;;  %v15251_v8 = vcombine.low %v6446_v40, %v6454_v1  ;;  %v6510_v40 = vld [vmem:[#allocation11 + $0x3a0] sm:$0xff] }
 0x9df   :  { %9952 = vmatpush1.bf16.msra.mxu1 %v15697_v48  ;;  %9974 = vmatprep.subr.bf16.mxu0 %v15204_v59  ;;  %v15253_v48 = vcombine.low %v6447_v12, %v6455_v0  ;;  %v15268_v59 = vcombine.high %v6462_v27, %v6470_v39  ;;  %v6518_v1 = vld [vmem:[#allocation11 + $0x3e0] sm:$0xff]  ;;  %v6511_v12 = vld [vmem:[#allocation11 + $0x3a8] sm:$0xff] }
 0x9e0   :  { %10080 = vmatprep.subr.bf16.mxu1 %v15206_v7  ;;  %v15270_v7 = vcombine.high %v6463_v16, %v6471_v9  ;;  %v6519_v0 = vld [vmem:[#allocation11 + $0x3e8] sm:$0xff] }
 0x9e1   :  { %9848 = vmatmul.mubr.bf16.vlgmr.msra.gmra.mrb[104].mxu0 %v20162_v44 }
 0x9e2   :  { %9954 = vmatmul.mubr.bf16.vlgmr.msra.gmra.mrb[104].mxu1 %v20162_v44  ;;  %9857 = vmatprep.mubr.bf16.mxu0 %v20166_v61 }
 0x9e3   :  { %9963 = vmatprep.mubr.bf16.mxu1 %v20166_v61  ;;  %9975 = vmatpush1.bf16.msra.mxu0 %v15203_v6  ;;  %v15267_v6 = vcombine.low %v6462_v27, %v6470_v39  ;;  %v6526_v27 = vld [vmem:[#allocation11 + $0x420] sm:$0xff] }
 0x9e4   :  { %10081 = vmatpush1.bf16.msra.mxu1 %v15205_v23  ;;  %9976 = vmatprep.subr.bf16.mxu0 %v15220_v19  ;;  %v15269_v23 = vcombine.low %v6463_v16, %v6471_v9  ;;  %v15284_v19 = vcombine.high %v6478_v38, %v6486_v26  ;;  %v6534_v39 = vld [vmem:[#allocation11 + $0x460] sm:$0xff]  ;;  %v6527_v16 = vld [vmem:[#allocation11 + $0x428] sm:$0xff] }
 0x9e5   :  { %10082 = vmatprep.subr.bf16.mxu1 %v15222_v4  ;;  %v15286_v4 = vcombine.high %v6479_v47, %v6487_v14  ;;  %v6535_v9 = vld [vmem:[#allocation11 + $0x468] sm:$0xff] }
 0x9e7   :  { %9977 = vmatpush1.bf16.msra.mxu0 %v15219_v10  ;;  %v15283_v10 = vcombine.low %v6478_v38, %v6486_v26  ;;  %v6542_v38 = vld [vmem:[#allocation11 + $0x4a0] sm:$0xff] }
 0x9e8   :  { %10083 = vmatpush1.bf16.msra.mxu1 %v15221_v52  ;;  %9978 = vmatprep.subr.bf16.mxu0 %v15236_v13  ;;  %v15285_v52 = vcombine.low %v6479_v47, %v6487_v14  ;;  %v15300_v13 = vcombine.high %v6494_v41, %v6502_v53  ;;  %v6550_v26 = vld [vmem:[#allocation11 + $0x4e0] sm:$0xff]  ;;  %v6543_v47 = vld [vmem:[#allocation11 + $0x4a8] sm:$0xff] }
 0x9e9   :  { %9858 = vmatmul.mubr.bf16.gmra.mrb[108].mxu0 %v20178_v62  ;;  %10084 = vmatprep.subr.bf16.mxu1 %v15238_v36  ;;  %v15302_v36 = vcombine.high %v6495_v24, %v6503_v56  ;;  %v6551_v14 = vld [vmem:[#allocation11 + $0x4e8] sm:$0xff] }
 0x9ea   :  { %9964 = vmatmul.mubr.bf16.gmra.mrb[108].mxu1 %v20178_v62  ;;  %10006 = vmatprep.mubr.bf16.mxu0 %v20058_v43 }
 0x9eb   :  { %9979 = vmatpush1.bf16.msra.mxu0 %v15235_v22  ;;  %10112 = vmatprep.mubr.bf16.mxu1 %v20058_v43  ;;  %v15299_v22 = vcombine.low %v6494_v41, %v6502_v53  ;;  %v6558_v41 = vld [vmem:[#allocation11 + $0x520] sm:$0xff] }
 0x9ec   :  { %10085 = vmatpush1.bf16.msra.mxu1 %v15237_v55  ;;  %9980 = vmatprep.subr.bf16.mxu0 %v15252_v11  ;;  %v15301_v55 = vcombine.low %v6495_v24, %v6503_v56  ;;  %v15316_v11 = vcombine.high %v6510_v40, %v6518_v1  ;;  %v6566_v53 = vld [vmem:[#allocation11 + $0x560] sm:$0xff]  ;;  %v6559_v24 = vld [vmem:[#allocation11 + $0x528] sm:$0xff] }
 0x9ed   :  { %10086 = vmatprep.subr.bf16.mxu1 %v15254_v18  ;;  %v15318_v18 = vcombine.high %v6511_v12, %v6519_v0  ;;  %v6567_v56 = vld [vmem:[#allocation11 + $0x568] sm:$0xff] }
 0x9ef   :  { %9981 = vmatpush1.bf16.msra.mxu0 %v15251_v8  ;;  %v15315_v8 = vcombine.low %v6510_v40, %v6518_v1  ;;  %v6574_v40 = vld [vmem:[#allocation11 + $0x5a0] sm:$0xff] }
 0x9f0   :  { %10087 = vmatpush1.bf16.msra.mxu1 %v15253_v48  ;;  %9982 = vmatprep.subr.bf16.mxu0 %v15268_v59  ;;  %v15317_v48 = vcombine.low %v6511_v12, %v6519_v0  ;;  %v15332_v59 = vcombine.high %v6526_v27, %v6534_v39  ;;  %v6582_v1 = vld [vmem:[#allocation11 + $0x5e0] sm:$0xff]  ;;  %v6575_v12 = vld [vmem:[#allocation11 + $0x5a8] sm:$0xff] }
 0x9f1   :  { %10088 = vmatprep.subr.bf16.mxu1 %v15270_v7  ;;  %v15334_v7 = vcombine.high %v6527_v16, %v6535_v9  ;;  %v6583_v0 = vld [vmem:[#allocation11 + $0x5e8] sm:$0xff] }
 0x9f3   :  { %9983 = vmatpush1.bf16.msra.mxu0 %v15267_v6  ;;  %v15331_v6 = vcombine.low %v6526_v27, %v6534_v39  ;;  %v6590_v27 = vld [vmem:[#allocation11 + $0x620] sm:$0xff] }
 0x9f4   :  { %10089 = vmatpush1.bf16.msra.mxu1 %v15269_v23  ;;  %9984 = vmatprep.subr.bf16.mxu0 %v15284_v19  ;;  %v15333_v23 = vcombine.low %v6527_v16, %v6535_v9  ;;  %v15348_v19 = vcombine.high %v6542_v38, %v6550_v26  ;;  %v6598_v39 = vld [vmem:[#allocation11 + $0x660] sm:$0xff]  ;;  %v6591_v16 = vld [vmem:[#allocation11 + $0x628] sm:$0xff] }
 0x9f5   :  { %10090 = vmatprep.subr.bf16.mxu1 %v15286_v4  ;;  %v15350_v4 = vcombine.high %v6543_v47, %v6551_v14  ;;  %v6599_v9 = vld [vmem:[#allocation11 + $0x668] sm:$0xff] }
 0x9f7   :  { %9985 = vmatpush1.bf16.msra.mxu0 %v15283_v10  ;;  %v15347_v10 = vcombine.low %v6542_v38, %v6550_v26  ;;  %v6606_v38 = vld [vmem:[#allocation11 + $0x6a0] sm:$0xff] }
 0x9f8   :  { %10091 = vmatpush1.bf16.msra.mxu1 %v15285_v52  ;;  %9986 = vmatprep.subr.bf16.mxu0 %v15300_v13  ;;  %v15349_v52 = vcombine.low %v6543_v47, %v6551_v14  ;;  %v15364_v13 = vcombine.high %v6558_v41, %v6566_v53  ;;  %v6614_v26 = vld [vmem:[#allocation11 + $0x6e0] sm:$0xff]  ;;  %v6607_v47 = vld [vmem:[#allocation11 + $0x6a8] sm:$0xff] }
 0x9f9   :  { %10092 = vmatprep.subr.bf16.mxu1 %v15302_v36  ;;  %v15366_v36 = vcombine.high %v6559_v24, %v6567_v56  ;;  %v6615_v14 = vld [vmem:[#allocation11 + $0x6e8] sm:$0xff] }
 0x9fb   :  { %9987 = vmatpush1.bf16.msra.mxu0 %v15299_v22  ;;  %v15363_v22 = vcombine.low %v6558_v41, %v6566_v53  ;;  %v6622_v41 = vld [vmem:[#allocation11 + $0x720] sm:$0xff] }
 0x9fc   :  { %10093 = vmatpush1.bf16.msra.mxu1 %v15301_v55  ;;  %9988 = vmatprep.subr.bf16.mxu0 %v15316_v11  ;;  %v15365_v55 = vcombine.low %v6559_v24, %v6567_v56  ;;  %v15380_v11 = vcombine.high %v6574_v40, %v6582_v1  ;;  %v6630_v53 = vld [vmem:[#allocation11 + $0x760] sm:$0xff]  ;;  %v6623_v24 = vld [vmem:[#allocation11 + $0x728] sm:$0xff] }
 0x9fd   :  { %10094 = vmatprep.subr.bf16.mxu1 %v15318_v18  ;;  %v15382_v18 = vcombine.high %v6575_v12, %v6583_v0  ;;  %v6631_v56 = vld [vmem:[#allocation11 + $0x768] sm:$0xff] }
 0x9ff   :  { %9989 = vmatpush1.bf16.msra.mxu0 %v15315_v8  ;;  %v15379_v8 = vcombine.low %v6574_v40, %v6582_v1  ;;  %v6638_v40 = vld [vmem:[#allocation11 + $0x7a0] sm:$0xff] }
 0xa00   :  { %10095 = vmatpush1.bf16.msra.mxu1 %v15317_v48  ;;  %9990 = vmatprep.subr.bf16.mxu0 %v15332_v59  ;;  %v15381_v48 = vcombine.low %v6575_v12, %v6583_v0  ;;  %v15396_v59 = vcombine.high %v6590_v27, %v6598_v39  ;;  %v6646_v1 = vld [vmem:[#allocation11 + $0x7e0] sm:$0xff]  ;;  %v6639_v12 = vld [vmem:[#allocation11 + $0x7a8] sm:$0xff] }
 0xa01   :  { %10096 = vmatprep.subr.bf16.mxu1 %v15334_v7  ;;  %v15398_v7 = vcombine.high %v6591_v16, %v6599_v9  ;;  %v6647_v0 = vld [vmem:[#allocation11 + $0x7e8] sm:$0xff] }
 0xa03   :  { %9991 = vmatpush1.bf16.msra.mxu0 %v15331_v6  ;;  %v15395_v6 = vcombine.low %v6590_v27, %v6598_v39  ;;  %v6654_v27 = vld [vmem:[#allocation11 + $0x820] sm:$0xff] }
 0xa04   :  { %10097 = vmatpush1.bf16.msra.mxu1 %v15333_v23  ;;  %9992 = vmatprep.subr.bf16.mxu0 %v15348_v19  ;;  %v15397_v23 = vcombine.low %v6591_v16, %v6599_v9  ;;  %v15412_v19 = vcombine.high %v6606_v38, %v6614_v26  ;;  %v6662_v39 = vld [vmem:[#allocation11 + $0x860] sm:$0xff]  ;;  %v6655_v16 = vld [vmem:[#allocation11 + $0x828] sm:$0xff] }
 0xa05   :  { %10098 = vmatprep.subr.bf16.mxu1 %v15350_v4  ;;  %v15414_v4 = vcombine.high %v6607_v47, %v6615_v14  ;;  %v6663_v9 = vld [vmem:[#allocation11 + $0x868] sm:$0xff] }
 0xa07   :  { %9993 = vmatpush1.bf16.msra.mxu0 %v15347_v10  ;;  %v15411_v10 = vcombine.low %v6606_v38, %v6614_v26  ;;  %v6670_v38 = vld [vmem:[#allocation11 + $0x8a0] sm:$0xff] }
 0xa08   :  { %10099 = vmatpush1.bf16.msra.mxu1 %v15349_v52  ;;  %9994 = vmatprep.subr.bf16.mxu0 %v15364_v13  ;;  %v15413_v52 = vcombine.low %v6607_v47, %v6615_v14  ;;  %v15428_v13 = vcombine.high %v6622_v41, %v6630_v53  ;;  %v6678_v26 = vld [vmem:[#allocation11 + $0x8e0] sm:$0xff]  ;;  %v6671_v47 = vld [vmem:[#allocation11 + $0x8a8] sm:$0xff] }
 0xa09   :  { %10100 = vmatprep.subr.bf16.mxu1 %v15366_v36  ;;  %v15430_v36 = vcombine.high %v6623_v24, %v6631_v56  ;;  %v6679_v14 = vld [vmem:[#allocation11 + $0x8e8] sm:$0xff] }
 0xa0b   :  { %9995 = vmatpush1.bf16.msra.mxu0 %v15363_v22  ;;  %v15427_v22 = vcombine.low %v6622_v41, %v6630_v53  ;;  %v6686_v41 = vld [vmem:[#allocation11 + $0x920] sm:$0xff] }
 0xa0c   :  { %10101 = vmatpush1.bf16.msra.mxu1 %v15365_v55  ;;  %9996 = vmatprep.subr.bf16.mxu0 %v15380_v11  ;;  %v15429_v55 = vcombine.low %v6623_v24, %v6631_v56  ;;  %v15444_v11 = vcombine.high %v6638_v40, %v6646_v1  ;;  %v6694_v53 = vld [vmem:[#allocation11 + $0x960] sm:$0xff]  ;;  %v6687_v24 = vld [vmem:[#allocation11 + $0x928] sm:$0xff] }
 0xa0d   :  { %10102 = vmatprep.subr.bf16.mxu1 %v15382_v18  ;;  %v15446_v18 = vcombine.high %v6639_v12, %v6647_v0  ;;  %v6695_v56 = vld [vmem:[#allocation11 + $0x968] sm:$0xff] }
 0xa0f   :  { %9997 = vmatpush1.bf16.msra.mxu0 %v15379_v8  ;;  %v15443_v8 = vcombine.low %v6638_v40, %v6646_v1  ;;  %v6702_v40 = vld [vmem:[#allocation11 + $0x9a0] sm:$0xff] }
 0xa10   :  { %10103 = vmatpush1.bf16.msra.mxu1 %v15381_v48  ;;  %9998 = vmatprep.subr.bf16.mxu0 %v15396_v59  ;;  %v15445_v48 = vcombine.low %v6639_v12, %v6647_v0  ;;  %v15460_v59 = vcombine.high %v6654_v27, %v6662_v39  ;;  %v6710_v1 = vld [vmem:[#allocation11 + $0x9e0] sm:$0xff]  ;;  %v6703_v12 = vld [vmem:[#allocation11 + $0x9a8] sm:$0xff] }
 0xa11   :  { %10104 = vmatprep.subr.bf16.mxu1 %v15398_v7  ;;  %v15462_v7 = vcombine.high %v6655_v16, %v6663_v9  ;;  %v6711_v0 = vld [vmem:[#allocation11 + $0x9e8] sm:$0xff] }
 0xa13   :  { %9999 = vmatpush1.bf16.msra.mxu0 %v15395_v6  ;;  %v15459_v6 = vcombine.low %v6654_v27, %v6662_v39  ;;  %v6718_v27 = vld [vmem:[#allocation11 + $0xa20] sm:$0xff] }
 0xa14   :  { %10105 = vmatpush1.bf16.msra.mxu1 %v15397_v23  ;;  %10000 = vmatprep.subr.bf16.mxu0 %v15412_v19  ;;  %v15461_v23 = vcombine.low %v6655_v16, %v6663_v9  ;;  %v15476_v19 = vcombine.high %v6670_v38, %v6678_v26  ;;  %v6726_v39 = vld [vmem:[#allocation11 + $0xa60] sm:$0xff]  ;;  %v6719_v16 = vld [vmem:[#allocation11 + $0xa28] sm:$0xff] }
 0xa15   :  { %10106 = vmatprep.subr.bf16.mxu1 %v15414_v4  ;;  %v15478_v4 = vcombine.high %v6671_v47, %v6679_v14  ;;  %v6727_v9 = vld [vmem:[#allocation11 + $0xa68] sm:$0xff] }
 0xa17   :  { %10001 = vmatpush1.bf16.msra.mxu0 %v15411_v10  ;;  %v15475_v10 = vcombine.low %v6670_v38, %v6678_v26  ;;  %v15526_v38 = vcombine.high %v6719_v16, %v6727_v9  ;;  %v6734_v26 = vld [vmem:[#allocation11 + $0xaa0] sm:$0xff] }
 0xa18   :  { %10107 = vmatpush1.bf16.msra.mxu1 %v15413_v52  ;;  %10002 = vmatprep.subr.bf16.mxu0 %v15428_v13  ;;  %v15477_v52 = vcombine.low %v6671_v47, %v6679_v14  ;;  %v15492_v13 = vcombine.high %v6686_v41, %v6694_v53  ;;  %v6742_v47 = vld [vmem:[#allocation11 + $0xae0] sm:$0xff]  ;;  %v6735_v14 = vld [vmem:[#allocation11 + $0xaa8] sm:$0xff] }
 0xa19   :  { %10108 = vmatprep.subr.bf16.mxu1 %v15430_v36  ;;  %v15494_v36 = vcombine.high %v6687_v24, %v6695_v56 }
 0xa1b   :  { %10003 = vmatpush1.bf16.msra.mxu0 %v15427_v22  ;;  %v15491_v22 = vcombine.low %v6686_v41, %v6694_v53 }
 0xa1c   :  { %10109 = vmatpush1.bf16.msra.mxu1 %v15429_v55  ;;  %10004 = vmatprep.subr.bf16.mxu0 %v15444_v11  ;;  %v15493_v55 = vcombine.low %v6687_v24, %v6695_v56  ;;  %v15508_v11 = vcombine.high %v6702_v40, %v6710_v1  ;;  %v15540_v56 = vcombine.high %v6734_v26, %v6742_v47 }
 0xa1d   :  { %10110 = vmatprep.subr.bf16.mxu1 %v15446_v18  ;;  %v15510_v18 = vcombine.high %v6703_v12, %v6711_v0 }
 0xa1f   :  { %10005 = vmatpush1.bf16.msra.mxu0 %v15443_v8  ;;  %v15507_v8 = vcombine.low %v6702_v40, %v6710_v1  ;;  %v20226_v1 = vld [vmem:[#allocation11 + $0xb28] sm:$0xff] }
 0xa20   :  { %10111 = vmatpush1.bf16.msra.mxu1 %v15445_v48  ;;  %10027 = vmatprep.subr.bf16.mxu0 %v15460_v59  ;;  %v15509_v48 = vcombine.low %v6703_v12, %v6711_v0  ;;  %v15524_v59 = vcombine.high %v6718_v27, %v6726_v39  ;;  %v6759_v12 = vld [vmem:[#allocation11 + $0xb68] sm:$0xff] }
 0xa21   :  { %10133 = vmatprep.subr.bf16.mxu1 %v15462_v7  ;;  %v20208_v7 = vld [vmem:[#allocation13] sm:$0xff] }
 0xa22   :  { %10007 = vmatmul.mubr.bf16.vlgmr.msra.gmra.mrb[112].mxu0 %v20062_v15  ;;  %v20216_v41 = vrot.slane %v20208_v7, %v19108_v34  ;;  %v20220_v53 = vrot.slane %v20208_v7, %v19105_v33  ;;  %v20224_v24 = vrot.slane %v20208_v7, %v19111_v37 }
 0xa23   :  { %10113 = vmatmul.mubr.bf16.vlgmr.msra.gmra.mrb[112].mxu1 %v20062_v15  ;;  %10016 = vmatprep.mubr.bf16.mxu0 %v20115_v32 }
 0xa24   :  { %10028 = vmatpush1.bf16.msra.mxu0 %v15459_v6  ;;  %10122 = vmatprep.mubr.bf16.mxu1 %v20115_v32  ;;  %v6743_v6 = vld [vmem:[#allocation11 + $0xae8] sm:$0xff] }
 0xa25   :  { %10134 = vmatpush1.bf16.msra.mxu1 %v15461_v23  ;;  %10029 = vmatprep.subr.bf16.mxu0 %v15476_v19  ;;  %v15523_v23 = vcombine.low %v6718_v27, %v6726_v39  ;;  %v15525_v19 = vcombine.low %v6719_v16, %v6727_v9  ;;  %v15541_v27 = vcombine.low %v6735_v14, %v6743_v6  ;;  %v20230_v39 = vld [vmem:[#allocation11 + $0xba0] sm:$0xff] }
 0xa26   :  { %10135 = vmatprep.subr.bf16.mxu1 %v15478_v4  ;;  %v20212_v4 = vrot.slane %v20208_v7, %v19102_v31  ;;  %v20232_v16 = vld [vmem:[#allocation11 + $0xbe0] sm:$0xff] }
 0xa28   :  { %10030 = vmatpush1.bf16.msra.mxu0 %v15475_v10  ;;  %v15542_v10 = vcombine.high %v6735_v14, %v6743_v6  ;;  %v15558_v6 = vcombine.high %v20226_v1, %v6759_v12 }
 0xa29   :  { %10136 = vmatpush1.bf16.msra.mxu1 %v15477_v52  ;;  %10031 = vmatprep.subr.bf16.mxu0 %v15492_v13  ;;  %v6750_v52 = vld [vmem:[#allocation11 + $0xb20] sm:$0xff] }
 0xa2a   :  { %10017 = vmatmul.mubr.bf16.gmra.mrb[116].mxu0 %v20119_v50  ;;  %10137 = vmatprep.subr.bf16.mxu1 %v15494_v36  ;;  %v6758_v13 = vld [vmem:[#allocation11 + $0xb60] sm:$0xff] }
 0xa2b   :  { %10123 = vmatmul.mubr.bf16.gmra.mrb[116].mxu1 %v20119_v50  ;;  %10059 = vmatprep.mubr.bf16.mxu0 %v20128_v45  ;;  %v15555_v14 = vcombine.low %v6750_v52, %v6758_v13 }
 0xa2c   :  { %10032 = vmatpush1.bf16.msra.mxu0 %v15491_v22  ;;  %10165 = vmatprep.mubr.bf16.mxu1 %v20128_v45 }
 0xa2d   :  { %10138 = vmatpush1.bf16.msra.mxu1 %v15493_v55  ;;  %10033 = vmatprep.subr.bf16.mxu0 %v15508_v11 }
 0xa2e   :  { %10139 = vmatprep.subr.bf16.mxu1 %v15510_v18  ;;  %v15539_v18 = vcombine.low %v6734_v26, %v6742_v47 }
 0xa30   :  { %10034 = vmatpush1.bf16.msra.mxu0 %v15507_v8 }
 0xa31   :  { %10140 = vmatpush1.bf16.msra.mxu1 %v15509_v48  ;;  %10035 = vmatprep.subr.bf16.mxu0 %v15524_v59 }
 0xa32   :  { %10141 = vmatprep.subr.bf16.mxu1 %v15526_v38  ;;  %v15556_v38 = vcombine.high %v6750_v52, %v6758_v13 }
 0xa33   :  { %v9637_v36 = vpop.f32.mrb[96].mxu0  ;;  %v9743_v40 = vpop.f32.mrb[96].mxu1 }
 0xa34   :  { %10036 = vmatpush1.bf16.msra.mxu0 %v15523_v23  ;;  %v16539_v0 = vadd.f32 %v9637_v36, %v20212_v4  ;;  %v16547_v22 = vadd.f32 %v9743_v40, %v20216_v41  ;;  %v9639_v55 = vpop.f32.mrb[97].mxu0  ;;  %v9745_v11 = vpop.f32.mrb[97].mxu1 }
 0xa35   :  { %10142 = vmatpush1.bf16.msra.mxu1 %v15525_v19  ;;  %v16540_v9 = vadd.f32 %v9639_v55, %v20220_v53  ;;  %v16548_v8 = vadd.f32 %v9745_v11, %v20224_v24  ;;  %10037 = vmatprep.subr.bf16.mxu0 %v15540_v56  ;;  %v9641_v48 = vpop.f32.mrb[98].mxu0  ;;  %v9747_v59 = vpop.f32.mrb[98].mxu1  ;;  %v15557_v55 = vcombine.low %v20226_v1, %v6759_v12  ;;  %v6767_v11 = vld [vmem:[#allocation11 + $0xba8] sm:$0xff]  ;;  %v6782_v12 = vld [vmem:[#allocation11 + $0xc20] sm:$0xff] }
 0xa36   :  { %10143 = vmatprep.subr.bf16.mxu1 %v15542_v10  ;;  %v16541_v23 = vadd.f32 %v9641_v48, %v20212_v4  ;;  %v16549_v36 = vadd.f32 %v9747_v59, %v20216_v41  ;;  %v9643_v26 = vpop.f32.mrb[99].mxu0  ;;  %v9749_v47 = vpop.f32.mrb[99].mxu1  ;;  %v15572_v56 = vcombine.high %v20230_v39, %v20232_v16  ;;  %v6775_v10 = vld [vmem:[#allocation11 + $0xbe8] sm:$0xff]  ;;  %v10398_v30 = vmax.f32 %v16539_v0, 0.0 }
 0xa37   :  { %v16542_v19 = vadd.f32 %v9643_v26, %v20220_v53  ;;  %v16550_v40 = vadd.f32 %v9749_v47, %v20224_v24  ;;  %v10400_v48 = vmax.f32 %v16547_v22, 0.0  ;;  %v10399_v25 = vmax.f32 %v16540_v9, 0.0  ;;  %v6783_v9 = vld [vmem:[#allocation11 + $0xc28] sm:$0xff] }
 0xa38   :  { %v10414_v3 = vmax.f32 %v16541_v23, 0.0  ;;  %v10416_v59 = vmax.f32 %v16549_v36, 0.0  ;;  %10038 = vmatpush1.bf16.msra.mxu0 %v15539_v18  ;;  %v10401_v52 = vmax.f32 %v16548_v8, 0.0  ;;  %v15574_v1 = vcombine.high %v6767_v11, %v6775_v10  ;;  %v6791_v8 = vld [vmem:[#allocation11 + $0xc68] sm:$0xff] }
 0xa39   :  { %10144 = vmatpush1.bf16.msra.mxu1 %v15541_v27  ;;  %v10415_v13 = vmax.f32 %v16542_v19, 0.0  ;;  %v10417_v58 = vmax.f32 %v16550_v40, 0.0  ;;  %10039 = vmatprep.subr.bf16.mxu0 %v15556_v38  ;;  %v15571_v23 = vcombine.low %v20230_v39, %v20232_v16  ;;  %v15573_v36 = vcombine.low %v6767_v11, %v6775_v10 }
 0xa3a   :  { %v20244_v26 = vpack.c.bf16 %v10414_v3, %v10398_v30  ;;  %v20246_v47 = vpack.c.bf16 %v10416_v59, %v10400_v48  ;;  %10145 = vmatprep.subr.bf16.mxu1 %v15558_v6  ;;  %v6798_v6 = vld [vmem:[#allocation11 + $0xca0] sm:$0xff]  ;;  %v15588_v48 = vcombine.high %v6782_v12, %v6790_v17  ;;  %v15587_v39 = vcombine.low %v6782_v12, %v6790_v17 }
 0xa3b   :  { %v20248_v21 = vpack.c.bf16 %v10415_v13, %v10399_v25  ;;  %v20250_v0 = vpack.c.bf16 %v10417_v58, %v10401_v52  ;;  %v9647_v22 = vpop.f32.mrb[100].mxu0  ;;  %v9753_v18 = vpop.f32.mrb[100].mxu1  ;;  %v6806_v25 = vld [vmem:[#allocation11 + $0xce0] sm:$0xff]  ;;  %v15590_v16 = vcombine.high %v6783_v9, %v6791_v8  ;;  %v15589_v10 = vcombine.low %v6783_v9, %v6791_v8 }
 0xa3c   :  { %10040 = vmatpush1.bf16.msra.mxu0 %v15555_v14  ;;  %v16543_v27 = vadd.f32 %v9647_v22, %v20212_v4  ;;  %v16551_v30 = vadd.f32 %v9753_v18, %v20216_v41  ;;  %v9649_v3 = vpop.f32.mrb[101].mxu0  ;;  %v9755_v38 = vpop.f32.mrb[101].mxu1  ;;  %v15604_v18 = vcombine.high %v6798_v6, %v6806_v25  ;;  %v6814_v12 = vld [vmem:[#allocation11 + $0xd20] sm:$0xff] }
 0xa3d   :  { %10146 = vmatpush1.bf16.msra.mxu1 %v15557_v55  ;;  %v16544_v58 = vadd.f32 %v9649_v3, %v20220_v53  ;;  %v16552_v19 = vadd.f32 %v9755_v38, %v20224_v24  ;;  %10041 = vmatprep.subr.bf16.mxu0 %v15572_v56  ;;  %v9651_v40 = vpop.f32.mrb[102].mxu0  ;;  %v9757_v14 = vpop.f32.mrb[102].mxu1  ;;  %v6799_v3 = vld [vmem:[#allocation11 + $0xca8] sm:$0xff]  ;;  %v6822_v9 = vld [vmem:[#allocation11 + $0xd60] sm:$0xff] }
 0xa3e   :  { %10147 = vmatprep.subr.bf16.mxu1 %v15574_v1  ;;  %v16545_v59 = vadd.f32 %v9651_v40, %v20212_v4  ;;  %v16553_v52 = vadd.f32 %v9757_v14, %v20216_v41  ;;  %v9653_v13 = vpop.f32.mrb[103].mxu0  ;;  %v9759_v22 = vpop.f32.mrb[103].mxu1  ;;  %v6807_v56 = vld [vmem:[#allocation11 + $0xce8] sm:$0xff]  ;;  %v10430_v38 = vmax.f32 %v16543_v27, 0.0  ;;  %v10432_v2 = vmax.f32 %v16551_v30, 0.0 }
 0xa3f   :  { %v16546_v11 = vadd.f32 %v9653_v13, %v20220_v53  ;;  %v16554_v55 = vadd.f32 %v9759_v22, %v20224_v24  ;;  %v10431_v4 = vmax.f32 %v16544_v58, 0.0  ;;  %v10433_v40 = vmax.f32 %v16552_v19, 0.0  ;;  %v6815_v30 = vld [vmem:[#allocation11 + $0xd28] sm:$0xff] }
 0xa40   :  { %v10446_v57 = vmax.f32 %v16545_v59, 0.0  ;;  %v10448_v1 = vmax.f32 %v16553_v52, 0.0  ;;  %10042 = vmatpush1.bf16.msra.mxu0 %v15571_v23  ;;  %v15606_v24 = vcombine.high %v6799_v3, %v6807_v56  ;;  %v6823_v23 = vld [vmem:[#allocation11 + $0xd68] sm:$0xff]  ;;  %v15603_v58 = vcombine.low %v6798_v6, %v6806_v25  ;;  %v6854_v6 = vld [vmem:[#allocation11 + $0xe60] sm:$0xff] }
 0xa41   :  { %10148 = vmatpush1.bf16.msra.mxu1 %v15573_v36  ;;  %v10447_v41 = vmax.f32 %v16546_v11, 0.0  ;;  %v10449_v14 = vmax.f32 %v16554_v55, 0.0  ;;  %10043 = vmatprep.subr.bf16.mxu0 %v15588_v48  ;;  %v15605_v36 = vcombine.low %v6799_v3, %v6807_v56  ;;  %v15620_v19 = vcombine.high %v6814_v12, %v6822_v9  ;;  %v6838_v48 = vld [vmem:[#allocation11 + $0xde0] sm:$0xff]  ;;  %v6831_v59 = vld [vmem:[#allocation11 + $0xda8] sm:$0xff] }
 0xa42   :  { %v20262_v17 = vpack.c.bf16 %v10446_v57, %v10430_v38  ;;  %v20264_v53 = vpack.c.bf16 %v10448_v1, %v10432_v2  ;;  %10149 = vmatprep.subr.bf16.mxu1 %v15590_v16  ;;  %v15622_v57 = vcombine.high %v6815_v30, %v6823_v23  ;;  %v6830_v2 = vld [vmem:[#allocation11 + $0xda0] sm:$0xff]  ;;  %v6839_v52 = vld [vmem:[#allocation11 + $0xde8] sm:$0xff]  ;;  %v15619_v13 = vcombine.low %v6814_v12, %v6822_v9 }
 0xa43   :  { %v20266_v8 = vpack.c.bf16 %v10447_v41, %v10431_v4  ;;  %v20268_v27 = vpack.c.bf16 %v10449_v14, %v10433_v40  ;;  %v15621_v22 = vcombine.low %v6815_v30, %v6823_v23  ;;  %v15636_v16 = vcombine.high %v6830_v2, %v6838_v48  ;;  %v6847_v25 = vld [vmem:[#allocation11 + $0xe28] sm:$0xff]  ;;  %v6862_v38 = vld [vmem:[#allocation11 + $0xea0] sm:$0xff] }
 0xa44   :  { %10044 = vmatpush1.bf16.msra.mxu0 %v15587_v39  ;;  %v15638_v11 = vcombine.high %v6831_v59, %v6839_v52  ;;  %v6846_v39 = vld [vmem:[#allocation11 + $0xe20] sm:$0xff]  ;;  %v6855_v55 = vld [vmem:[#allocation11 + $0xe68] sm:$0xff] }
 0xa45   :  { %10150 = vmatpush1.bf16.msra.mxu1 %v15589_v10  ;;  %10045 = vmatprep.subr.bf16.mxu0 %v15604_v18  ;;  %v15635_v10 = vcombine.low %v6830_v2, %v6838_v48  ;;  %v15637_v18 = vcombine.low %v6831_v59, %v6839_v52  ;;  %v15652_v3 = vcombine.high %v6846_v39, %v6854_v6  ;;  %v6870_v1 = vld [vmem:[#allocation11 + $0xee0] sm:$0xff]  ;;  %v6863_v4 = vld [vmem:[#allocation11 + $0xea8] sm:$0xff] }
 0xa46   :  { %10151 = vmatprep.subr.bf16.mxu1 %v15606_v24  ;;  %v15654_v56 = vcombine.high %v6847_v25, %v6855_v55  ;;  %v6871_v40 = vld [vmem:[#allocation11 + $0xee8] sm:$0xff]  ;;  %v15651_v41 = vcombine.low %v6846_v39, %v6854_v6  ;;  %v15653_v14 = vcombine.low %v6847_v25, %v6855_v55  ;;  %v15668_v24 = vcombine.high %v6862_v38, %v6870_v1  ;;  %v6878_v9 = vld [vmem:[#allocation11 + $0xf20] sm:$0xff]  ;;  %v6400_v6 = vld [vmem:[#allocation11 + $0x30] sm:$0xff] }
 0xa47   :  { %v15670_v12 = vcombine.high %v6863_v4, %v6871_v40  ;;  %v6886_v30 = vld [vmem:[#allocation11 + $0xf60] sm:$0xff]  ;;  %v6879_v23 = vld [vmem:[#allocation11 + $0xf28] sm:$0xff]  ;;  %v6408_v25 = vld [vmem:[#allocation11 + $0x70] sm:$0xff] }
 0xa48   :  { %10046 = vmatpush1.bf16.msra.mxu0 %v15603_v58  ;;  %v6887_v58 = vld [vmem:[#allocation11 + $0xf68] sm:$0xff]  ;;  %v6894_v48 = vld [vmem:[#allocation11 + $0xfa0] sm:$0xff]  ;;  %v6401_v55 = vld [vmem:[#allocation11 + $0x38] sm:$0xff] }
 0xa49   :  { %10152 = vmatpush1.bf16.msra.mxu1 %v15605_v36  ;;  %10047 = vmatprep.subr.bf16.mxu0 %v15620_v19  ;;  %v15667_v36 = vcombine.low %v6862_v38, %v6870_v1  ;;  %v15669_v19 = vcombine.low %v6863_v4, %v6871_v40  ;;  %v15686_v2 = vcombine.high %v6879_v23, %v6887_v58  ;;  %v6902_v59 = vld [vmem:[#allocation11 + $0xfe0] sm:$0xff]  ;;  %v6895_v52 = vld [vmem:[#allocation11 + $0xfa8] sm:$0xff]  ;;  %v6416_v1 = vld [vmem:[#allocation11 + $0xb0] sm:$0xff] }
 0xa4a   :  { %10153 = vmatprep.subr.bf16.mxu1 %v15622_v57  ;;  %v15684_v57 = vcombine.high %v6878_v9, %v6886_v30  ;;  %v6424_v4 = vld [vmem:[#allocation11 + $0xf0] sm:$0xff]  ;;  %v6417_v40 = vld [vmem:[#allocation11 + $0xb8] sm:$0xff] }
 0xa4c   :  { %10048 = vmatpush1.bf16.msra.mxu0 %v15619_v13  ;;  %v6903_v13 = vld [vmem:[#allocation11 + $0xfe8] sm:$0xff] }
 0xa4d   :  { %10154 = vmatpush1.bf16.msra.mxu1 %v15621_v22  ;;  %10049 = vmatprep.subr.bf16.mxu0 %v15636_v16  ;;  %v15683_v22 = vcombine.low %v6878_v9, %v6886_v30  ;;  %v15685_v16 = vcombine.low %v6879_v23, %v6887_v58  ;;  %v15702_v39 = vcombine.high %v6895_v52, %v6903_v13  ;;  %v6432_v30 = vld [vmem:[#allocation11 + $0x130] sm:$0xff]  ;;  %v6433_v58 = vld [vmem:[#allocation11 + $0x138] sm:$0xff] }
 0xa4e   :  { %10155 = vmatprep.subr.bf16.mxu1 %v15638_v11  ;;  %v15700_v11 = vcombine.high %v6894_v48, %v6902_v59  ;;  %v6440_v23 = vld [vmem:[#allocation11 + $0x170] sm:$0xff] }
 0xa50   :  { %10050 = vmatpush1.bf16.msra.mxu0 %v15635_v10  ;;  %v6409_v10 = vld [vmem:[#allocation11 + $0x78] sm:$0xff] }
 0xa51   :  { %10156 = vmatpush1.bf16.msra.mxu1 %v15637_v18  ;;  %10051 = vmatprep.subr.bf16.mxu0 %v15652_v3  ;;  %v15699_v18 = vcombine.low %v6894_v48, %v6902_v59  ;;  %v15701_v3 = vcombine.low %v6895_v52, %v6903_v13  ;;  %v15210_v38 = vcombine.high %v6401_v55, %v6409_v10  ;;  %v6448_v59 = vld [vmem:[#allocation11 + $0x1b0] sm:$0xff]  ;;  %v6449_v13 = vld [vmem:[#allocation11 + $0x1b8] sm:$0xff] }
 0xa52   :  { %10157 = vmatprep.subr.bf16.mxu1 %v15654_v56  ;;  %v15208_v56 = vcombine.high %v6400_v6, %v6408_v25  ;;  %v6456_v52 = vld [vmem:[#allocation11 + $0x1f0] sm:$0xff] }
 0xa54   :  { %10052 = vmatpush1.bf16.msra.mxu0 %v15651_v41  ;;  %v6425_v41 = vld [vmem:[#allocation11 + $0xf8] sm:$0xff] }
 0xa55   :  { %10158 = vmatpush1.bf16.msra.mxu1 %v15653_v14  ;;  %10053 = vmatprep.subr.bf16.mxu0 %v15668_v24  ;;  %v15207_v14 = vcombine.low %v6400_v6, %v6408_v25  ;;  %v15209_v24 = vcombine.low %v6401_v55, %v6409_v10  ;;  %v15226_v9 = vcombine.high %v6417_v40, %v6425_v41  ;;  %v6464_v25 = vld [vmem:[#allocation11 + $0x230] sm:$0xff]  ;;  %v6465_v10 = vld [vmem:[#allocation11 + $0x238] sm:$0xff] }
 0xa56   :  { %10159 = vmatprep.subr.bf16.mxu1 %v15670_v12  ;;  %v15224_v12 = vcombine.high %v6416_v1, %v6424_v4  ;;  %v6472_v55 = vld [vmem:[#allocation11 + $0x270] sm:$0xff] }
 0xa58   :  { %10054 = vmatpush1.bf16.msra.mxu0 %v15667_v36  ;;  %v6441_v36 = vld [vmem:[#allocation11 + $0x178] sm:$0xff] }
 0xa59   :  { %10160 = vmatpush1.bf16.msra.mxu1 %v15669_v19  ;;  %10055 = vmatprep.subr.bf16.mxu0 %v15684_v57  ;;  %v15223_v19 = vcombine.low %v6416_v1, %v6424_v4  ;;  %v15225_v57 = vcombine.low %v6417_v40, %v6425_v41  ;;  %v15242_v48 = vcombine.high %v6433_v58, %v6441_v36  ;;  %v6480_v4 = vld [vmem:[#allocation11 + $0x2b0] sm:$0xff]  ;;  %v6481_v41 = vld [vmem:[#allocation11 + $0x2b8] sm:$0xff] }
 0xa5a   :  { %10161 = vmatprep.subr.bf16.mxu1 %v15686_v2  ;;  %v15240_v2 = vcombine.high %v6432_v30, %v6440_v23  ;;  %v6488_v40 = vld [vmem:[#allocation11 + $0x2f0] sm:$0xff] }
 0xa5c   :  { %10056 = vmatpush1.bf16.msra.mxu0 %v15683_v22  ;;  %v6457_v22 = vld [vmem:[#allocation11 + $0x1f8] sm:$0xff] }
 0xa5d   :  { %10162 = vmatpush1.bf16.msra.mxu1 %v15685_v16  ;;  %10057 = vmatprep.subr.bf16.mxu0 %v15700_v11  ;;  %v15239_v16 = vcombine.low %v6432_v30, %v6440_v23  ;;  %v15241_v11 = vcombine.low %v6433_v58, %v6441_v36  ;;  %v15258_v6 = vcombine.high %v6449_v13, %v6457_v22  ;;  %v6504_v23 = vld [vmem:[#allocation11 + $0x370] sm:$0xff]  ;;  %v6497_v58 = vld [vmem:[#allocation11 + $0x338] sm:$0xff] }
 0xa5e   :  { %10163 = vmatprep.subr.bf16.mxu1 %v15702_v39  ;;  %v15256_v39 = vcombine.high %v6448_v59, %v6456_v52  ;;  %v6505_v36 = vld [vmem:[#allocation11 + $0x378] sm:$0xff] }
 0xa60   :  { %10058 = vmatpush1.bf16.msra.mxu0 %v15699_v18  ;;  %v6473_v18 = vld [vmem:[#allocation11 + $0x278] sm:$0xff] }
 0xa61   :  { %10164 = vmatpush1.bf16.msra.mxu1 %v15701_v3  ;;  %10186 = vmatprep.subr.bf16.mxu0 %v15208_v56  ;;  %v15255_v3 = vcombine.low %v6448_v59, %v6456_v52  ;;  %v15257_v56 = vcombine.low %v6449_v13, %v6457_v22  ;;  %v15274_v1 = vcombine.high %v6465_v10, %v6473_v18  ;;  %v6512_v59 = vld [vmem:[#allocation11 + $0x3b0] sm:$0xff]  ;;  %v6513_v13 = vld [vmem:[#allocation11 + $0x3b8] sm:$0xff] }
 0xa62   :  { %10292 = vmatprep.subr.bf16.mxu1 %v15210_v38  ;;  %v15272_v38 = vcombine.high %v6464_v25, %v6472_v55  ;;  %v6520_v52 = vld [vmem:[#allocation11 + $0x3f0] sm:$0xff]  ;;  %v6521_v22 = vld [vmem:[#allocation11 + $0x3f8] sm:$0xff] }
 0xa63   :  { %10060 = vmatmul.mubr.bf16.vlgmr.msra.gmra.mrb[112].mxu0 %v20162_v44 }
 0xa64   :  { %10166 = vmatmul.mubr.bf16.vlgmr.msra.gmra.mrb[112].mxu1 %v20162_v44  ;;  %10069 = vmatprep.mubr.bf16.mxu0 %v20166_v61 }
 0xa65   :  { %10175 = vmatprep.mubr.bf16.mxu1 %v20166_v61  ;;  %10187 = vmatpush1.bf16.msra.mxu0 %v15207_v14  ;;  %v6489_v14 = vld [vmem:[#allocation11 + $0x2f8] sm:$0xff] }
 0xa66   :  { %10293 = vmatpush1.bf16.msra.mxu1 %v15209_v24  ;;  %10188 = vmatprep.subr.bf16.mxu0 %v15224_v12  ;;  %v15271_v24 = vcombine.low %v6464_v25, %v6472_v55  ;;  %v15273_v12 = vcombine.low %v6465_v10, %v6473_v18  ;;  %v15290_v30 = vcombine.high %v6481_v41, %v6489_v14  ;;  %v6528_v25 = vld [vmem:[#allocation11 + $0x430] sm:$0xff]  ;;  %v6529_v10 = vld [vmem:[#allocation11 + $0x438] sm:$0xff] }
 0xa67   :  { %10294 = vmatprep.subr.bf16.mxu1 %v15226_v9  ;;  %v15288_v9 = vcombine.high %v6480_v4, %v6488_v40  ;;  %v6536_v55 = vld [vmem:[#allocation11 + $0x470] sm:$0xff]  ;;  %v6537_v18 = vld [vmem:[#allocation11 + $0x478] sm:$0xff] }
 0xa69   :  { %10189 = vmatpush1.bf16.msra.mxu0 %v15223_v19  ;;  %v15287_v19 = vcombine.low %v6480_v4, %v6488_v40  ;;  %v6544_v4 = vld [vmem:[#allocation11 + $0x4b0] sm:$0xff] }
 0xa6a   :  { %10295 = vmatpush1.bf16.msra.mxu1 %v15225_v57  ;;  %10190 = vmatprep.subr.bf16.mxu0 %v15240_v2  ;;  %v15289_v57 = vcombine.low %v6481_v41, %v6489_v14  ;;  %v6552_v40 = vld [vmem:[#allocation11 + $0x4f0] sm:$0xff]  ;;  %v6545_v41 = vld [vmem:[#allocation11 + $0x4b8] sm:$0xff] }
 0xa6b   :  { %10070 = vmatmul.mubr.bf16.gmra.mrb[116].mxu0 %v20178_v62  ;;  %10296 = vmatprep.subr.bf16.mxu1 %v15242_v48  ;;  %v15306_v48 = vcombine.high %v6497_v58, %v6505_v36  ;;  %v6553_v14 = vld [vmem:[#allocation11 + $0x4f8] sm:$0xff] }
 0xa6c   :  { %10176 = vmatmul.mubr.bf16.gmra.mrb[116].mxu1 %v20178_v62  ;;  %10218 = vmatprep.mubr.bf16.mxu0 %v20058_v43 }
 0xa6d   :  { %10191 = vmatpush1.bf16.msra.mxu0 %v15239_v16  ;;  %10324 = vmatprep.mubr.bf16.mxu1 %v20058_v43  ;;  %v6496_v43 = vld [vmem:[#allocation11 + $0x330] sm:$0xff] }
 0xa6e   :  { %10297 = vmatpush1.bf16.msra.mxu1 %v15241_v11  ;;  %10192 = vmatprep.subr.bf16.mxu0 %v15256_v39  ;;  %v15304_v2 = vcombine.high %v6496_v43, %v6504_v23  ;;  %v15303_v16 = vcombine.low %v6496_v43, %v6504_v23  ;;  %v15305_v11 = vcombine.low %v6497_v58, %v6505_v36  ;;  %v6560_v43 = vld [vmem:[#allocation11 + $0x530] sm:$0xff]  ;;  %v6561_v58 = vld [vmem:[#allocation11 + $0x538] sm:$0xff] }
 0xa6f   :  { %10298 = vmatprep.subr.bf16.mxu1 %v15258_v6  ;;  %v15320_v39 = vcombine.high %v6512_v59, %v6520_v52  ;;  %v15322_v6 = vcombine.high %v6513_v13, %v6521_v22  ;;  %v6568_v23 = vld [vmem:[#allocation11 + $0x570] sm:$0xff]  ;;  %v6569_v36 = vld [vmem:[#allocation11 + $0x578] sm:$0xff] }
 0xa71   :  { %10193 = vmatpush1.bf16.msra.mxu0 %v15255_v3  ;;  %v15319_v3 = vcombine.low %v6512_v59, %v6520_v52  ;;  %v6576_v59 = vld [vmem:[#allocation11 + $0x5b0] sm:$0xff] }
 0xa72   :  { %10299 = vmatpush1.bf16.msra.mxu1 %v15257_v56  ;;  %10194 = vmatprep.subr.bf16.mxu0 %v15272_v38  ;;  %v15321_v56 = vcombine.low %v6513_v13, %v6521_v22  ;;  %v15336_v38 = vcombine.high %v6528_v25, %v6536_v55  ;;  %v6584_v52 = vld [vmem:[#allocation11 + $0x5f0] sm:$0xff]  ;;  %v6577_v13 = vld [vmem:[#allocation11 + $0x5b8] sm:$0xff] }
 0xa73   :  { %10300 = vmatprep.subr.bf16.mxu1 %v15274_v1  ;;  %v15338_v1 = vcombine.high %v6529_v10, %v6537_v18  ;;  %v6585_v22 = vld [vmem:[#allocation11 + $0x5f8] sm:$0xff] }
 0xa75   :  { %10195 = vmatpush1.bf16.msra.mxu0 %v15271_v24  ;;  %v15335_v24 = vcombine.low %v6528_v25, %v6536_v55  ;;  %v6592_v25 = vld [vmem:[#allocation11 + $0x630] sm:$0xff] }
 0xa76   :  { %10301 = vmatpush1.bf16.msra.mxu1 %v15273_v12  ;;  %10196 = vmatprep.subr.bf16.mxu0 %v15288_v9  ;;  %v15337_v12 = vcombine.low %v6529_v10, %v6537_v18  ;;  %v15352_v9 = vcombine.high %v6544_v4, %v6552_v40  ;;  %v6600_v55 = vld [vmem:[#allocation11 + $0x670] sm:$0xff]  ;;  %v6593_v10 = vld [vmem:[#allocation11 + $0x638] sm:$0xff] }
 0xa77   :  { %10302 = vmatprep.subr.bf16.mxu1 %v15290_v30  ;;  %v15354_v30 = vcombine.high %v6545_v41, %v6553_v14  ;;  %v6601_v18 = vld [vmem:[#allocation11 + $0x678] sm:$0xff] }
 0xa79   :  { %10197 = vmatpush1.bf16.msra.mxu0 %v15287_v19  ;;  %v15351_v19 = vcombine.low %v6544_v4, %v6552_v40  ;;  %v6608_v4 = vld [vmem:[#allocation11 + $0x6b0] sm:$0xff] }
 0xa7a   :  { %10303 = vmatpush1.bf16.msra.mxu1 %v15289_v57  ;;  %10198 = vmatprep.subr.bf16.mxu0 %v15304_v2  ;;  %v15353_v57 = vcombine.low %v6545_v41, %v6553_v14  ;;  %v15368_v2 = vcombine.high %v6560_v43, %v6568_v23  ;;  %v6616_v40 = vld [vmem:[#allocation11 + $0x6f0] sm:$0xff]  ;;  %v6609_v41 = vld [vmem:[#allocation11 + $0x6b8] sm:$0xff] }
 0xa7b   :  { %10304 = vmatprep.subr.bf16.mxu1 %v15306_v48  ;;  %v15370_v48 = vcombine.high %v6561_v58, %v6569_v36  ;;  %v6617_v14 = vld [vmem:[#allocation11 + $0x6f8] sm:$0xff] }
 0xa7d   :  { %10199 = vmatpush1.bf16.msra.mxu0 %v15303_v16  ;;  %v15367_v16 = vcombine.low %v6560_v43, %v6568_v23  ;;  %v6624_v43 = vld [vmem:[#allocation11 + $0x730] sm:$0xff] }
 0xa7e   :  { %10305 = vmatpush1.bf16.msra.mxu1 %v15305_v11  ;;  %10200 = vmatprep.subr.bf16.mxu0 %v15320_v39  ;;  %v15369_v11 = vcombine.low %v6561_v58, %v6569_v36  ;;  %v15384_v39 = vcombine.high %v6576_v59, %v6584_v52  ;;  %v6632_v23 = vld [vmem:[#allocation11 + $0x770] sm:$0xff]  ;;  %v6625_v58 = vld [vmem:[#allocation11 + $0x738] sm:$0xff] }
 0xa7f   :  { %10306 = vmatprep.subr.bf16.mxu1 %v15322_v6  ;;  %v15386_v6 = vcombine.high %v6577_v13, %v6585_v22  ;;  %v6633_v36 = vld [vmem:[#allocation11 + $0x778] sm:$0xff] }
 0xa81   :  { %10201 = vmatpush1.bf16.msra.mxu0 %v15319_v3  ;;  %v15383_v3 = vcombine.low %v6576_v59, %v6584_v52  ;;  %v6640_v59 = vld [vmem:[#allocation11 + $0x7b0] sm:$0xff] }
 0xa82   :  { %10307 = vmatpush1.bf16.msra.mxu1 %v15321_v56  ;;  %10202 = vmatprep.subr.bf16.mxu0 %v15336_v38  ;;  %v15385_v56 = vcombine.low %v6577_v13, %v6585_v22  ;;  %v15400_v38 = vcombine.high %v6592_v25, %v6600_v55  ;;  %v6648_v52 = vld [vmem:[#allocation11 + $0x7f0] sm:$0xff]  ;;  %v6641_v13 = vld [vmem:[#allocation11 + $0x7b8] sm:$0xff] }
 0xa83   :  { %10308 = vmatprep.subr.bf16.mxu1 %v15338_v1  ;;  %v15402_v1 = vcombine.high %v6593_v10, %v6601_v18  ;;  %v6649_v22 = vld [vmem:[#allocation11 + $0x7f8] sm:$0xff] }
 0xa85   :  { %10203 = vmatpush1.bf16.msra.mxu0 %v15335_v24  ;;  %v15399_v24 = vcombine.low %v6592_v25, %v6600_v55  ;;  %v6656_v25 = vld [vmem:[#allocation11 + $0x830] sm:$0xff] }
 0xa86   :  { %10309 = vmatpush1.bf16.msra.mxu1 %v15337_v12  ;;  %10204 = vmatprep.subr.bf16.mxu0 %v15352_v9  ;;  %v15401_v12 = vcombine.low %v6593_v10, %v6601_v18  ;;  %v15416_v9 = vcombine.high %v6608_v4, %v6616_v40  ;;  %v6664_v55 = vld [vmem:[#allocation11 + $0x870] sm:$0xff]  ;;  %v6657_v10 = vld [vmem:[#allocation11 + $0x838] sm:$0xff] }
 0xa87   :  { %10310 = vmatprep.subr.bf16.mxu1 %v15354_v30  ;;  %v15418_v30 = vcombine.high %v6609_v41, %v6617_v14  ;;  %v6665_v18 = vld [vmem:[#allocation11 + $0x878] sm:$0xff] }
 0xa89   :  { %10205 = vmatpush1.bf16.msra.mxu0 %v15351_v19  ;;  %v15415_v19 = vcombine.low %v6608_v4, %v6616_v40  ;;  %v6672_v4 = vld [vmem:[#allocation11 + $0x8b0] sm:$0xff] }
 0xa8a   :  { %10311 = vmatpush1.bf16.msra.mxu1 %v15353_v57  ;;  %10206 = vmatprep.subr.bf16.mxu0 %v15368_v2  ;;  %v15417_v57 = vcombine.low %v6609_v41, %v6617_v14  ;;  %v15432_v2 = vcombine.high %v6624_v43, %v6632_v23  ;;  %v6680_v40 = vld [vmem:[#allocation11 + $0x8f0] sm:$0xff]  ;;  %v6673_v41 = vld [vmem:[#allocation11 + $0x8b8] sm:$0xff] }
 0xa8b   :  { %10312 = vmatprep.subr.bf16.mxu1 %v15370_v48  ;;  %v15434_v48 = vcombine.high %v6625_v58, %v6633_v36  ;;  %v6681_v14 = vld [vmem:[#allocation11 + $0x8f8] sm:$0xff] }
 0xa8d   :  { %10207 = vmatpush1.bf16.msra.mxu0 %v15367_v16  ;;  %v15431_v16 = vcombine.low %v6624_v43, %v6632_v23  ;;  %v6688_v43 = vld [vmem:[#allocation11 + $0x930] sm:$0xff] }
 0xa8e   :  { %10313 = vmatpush1.bf16.msra.mxu1 %v15369_v11  ;;  %10208 = vmatprep.subr.bf16.mxu0 %v15384_v39  ;;  %v15433_v11 = vcombine.low %v6625_v58, %v6633_v36  ;;  %v15448_v39 = vcombine.high %v6640_v59, %v6648_v52  ;;  %v6696_v23 = vld [vmem:[#allocation11 + $0x970] sm:$0xff]  ;;  %v6689_v58 = vld [vmem:[#allocation11 + $0x938] sm:$0xff] }
 0xa8f   :  { %10314 = vmatprep.subr.bf16.mxu1 %v15386_v6  ;;  %v15450_v6 = vcombine.high %v6641_v13, %v6649_v22  ;;  %v6697_v36 = vld [vmem:[#allocation11 + $0x978] sm:$0xff] }
 0xa91   :  { %10209 = vmatpush1.bf16.msra.mxu0 %v15383_v3  ;;  %v15447_v3 = vcombine.low %v6640_v59, %v6648_v52  ;;  %v6704_v59 = vld [vmem:[#allocation11 + $0x9b0] sm:$0xff] }
 0xa92   :  { %10315 = vmatpush1.bf16.msra.mxu1 %v15385_v56  ;;  %10210 = vmatprep.subr.bf16.mxu0 %v15400_v38  ;;  %v15449_v56 = vcombine.low %v6641_v13, %v6649_v22  ;;  %v15464_v38 = vcombine.high %v6656_v25, %v6664_v55  ;;  %v6712_v52 = vld [vmem:[#allocation11 + $0x9f0] sm:$0xff]  ;;  %v6705_v13 = vld [vmem:[#allocation11 + $0x9b8] sm:$0xff] }
 0xa93   :  { %10316 = vmatprep.subr.bf16.mxu1 %v15402_v1  ;;  %v15466_v1 = vcombine.high %v6657_v10, %v6665_v18  ;;  %v6713_v22 = vld [vmem:[#allocation11 + $0x9f8] sm:$0xff] }
 0xa95   :  { %10211 = vmatpush1.bf16.msra.mxu0 %v15399_v24  ;;  %v15463_v24 = vcombine.low %v6656_v25, %v6664_v55  ;;  %v6721_v25 = vld [vmem:[#allocation11 + $0xa38] sm:$0xff] }
 0xa96   :  { %10317 = vmatpush1.bf16.msra.mxu1 %v15401_v12  ;;  %10212 = vmatprep.subr.bf16.mxu0 %v15416_v9  ;;  %v15465_v12 = vcombine.low %v6657_v10, %v6665_v18  ;;  %v15480_v9 = vcombine.high %v6672_v4, %v6680_v40  ;;  %v6729_v55 = vld [vmem:[#allocation11 + $0xa78] sm:$0xff]  ;;  %v15511_v10 = vcombine.low %v6704_v59, %v6712_v52 }
 0xa97   :  { %10318 = vmatprep.subr.bf16.mxu1 %v15418_v30  ;;  %v15482_v30 = vcombine.high %v6673_v41, %v6681_v14  ;;  %v15513_v18 = vcombine.low %v6705_v13, %v6713_v22 }
 0xa99   :  { %10213 = vmatpush1.bf16.msra.mxu0 %v15415_v19  ;;  %v15479_v19 = vcombine.low %v6672_v4, %v6680_v40  ;;  %v20288_v4 = vrot.slane %v20208_v7, %v19144_v46  ;;  %v6745_v40 = vld [vmem:[#allocation11 + $0xaf8] sm:$0xff] }
 0xa9a   :  { %10319 = vmatpush1.bf16.msra.mxu1 %v15417_v57  ;;  %10214 = vmatprep.subr.bf16.mxu0 %v15432_v2  ;;  %v15481_v57 = vcombine.low %v6673_v41, %v6681_v14  ;;  %v15496_v2 = vcombine.high %v6688_v43, %v6696_v23  ;;  %v20296_v14 = vrot.slane %v20208_v7, %v19147_v5 }
 0xa9b   :  { %10320 = vmatprep.subr.bf16.mxu1 %v15434_v48  ;;  %v15498_v48 = vcombine.high %v6689_v58, %v6697_v36 }
 0xa9d   :  { %10215 = vmatpush1.bf16.msra.mxu0 %v15431_v16  ;;  %v15497_v16 = vcombine.low %v6689_v58, %v6697_v36  ;;  %v6760_v58 = vld [vmem:[#allocation11 + $0xb70] sm:$0xff] }
 0xa9e   :  { %10321 = vmatpush1.bf16.msra.mxu1 %v15433_v11  ;;  %10216 = vmatprep.subr.bf16.mxu0 %v15448_v39  ;;  %v15512_v11 = vcombine.high %v6704_v59, %v6712_v52  ;;  %v6720_v39 = vld [vmem:[#allocation11 + $0xa30] sm:$0xff] }
 0xa9f   :  { %10322 = vmatprep.subr.bf16.mxu1 %v15450_v6  ;;  %v6728_v6 = vld [vmem:[#allocation11 + $0xa70] sm:$0xff] }
 0xaa0   :  { %v15527_v41 = vcombine.low %v6720_v39, %v6728_v6 }
 0xaa1   :  { %10217 = vmatpush1.bf16.msra.mxu0 %v15447_v3  ;;  %v15528_v3 = vcombine.high %v6720_v39, %v6728_v6 }
 0xaa2   :  { %10323 = vmatpush1.bf16.msra.mxu1 %v15449_v56  ;;  %10239 = vmatprep.subr.bf16.mxu0 %v15464_v38  ;;  %v15530_v56 = vcombine.high %v6721_v25, %v6729_v55  ;;  %v6736_v38 = vld [vmem:[#allocation11 + $0xab0] sm:$0xff] }
 0xaa3   :  { %10345 = vmatprep.subr.bf16.mxu1 %v15466_v1  ;;  %v6744_v1 = vld [vmem:[#allocation11 + $0xaf0] sm:$0xff] }
 0xaa4   :  { %10219 = vmatmul.mubr.bf16.vlgmr.msra.gmra.mrb[120].mxu0 %v20062_v15 }
 0xaa5   :  { %10325 = vmatmul.mubr.bf16.vlgmr.msra.gmra.mrb[120].mxu1 %v20062_v15  ;;  %10228 = vmatprep.mubr.bf16.mxu0 %v20115_v32  ;;  %v15495_v15 = vcombine.low %v6688_v43, %v6696_v23  ;;  %v6752_v23 = vld [vmem:[#allocation11 + $0xb30] sm:$0xff] }
 0xaa6   :  { %10240 = vmatpush1.bf16.msra.mxu0 %v15463_v24  ;;  %10334 = vmatprep.mubr.bf16.mxu1 %v20115_v32  ;;  %v15514_v32 = vcombine.high %v6705_v13, %v6713_v22  ;;  %v15529_v24 = vcombine.low %v6721_v25, %v6729_v55  ;;  %v15560_v6 = vcombine.high %v6752_v23, %v6760_v58 }
 0xaa7   :  { %10346 = vmatpush1.bf16.msra.mxu1 %v15465_v12  ;;  %10241 = vmatprep.subr.bf16.mxu0 %v15480_v9  ;;  %v20300_v12 = vrot.slane %v20208_v7, %v19153_v51  ;;  %v15544_v9 = vcombine.high %v6736_v38, %v6744_v1 }
 0xaa8   :  { %10347 = vmatprep.subr.bf16.mxu1 %v15482_v30 }
 0xaaa   :  { %10242 = vmatpush1.bf16.msra.mxu0 %v15479_v19 }
 0xaab   :  { %10348 = vmatpush1.bf16.msra.mxu1 %v15481_v57  ;;  %10243 = vmatprep.subr.bf16.mxu0 %v15496_v2  ;;  %v6753_v2 = vld [vmem:[#allocation11 + $0xb38] sm:$0xff] }
 0xaac   :  { %10229 = vmatmul.mubr.bf16.gmra.mrb[124].mxu0 %v20119_v50  ;;  %10349 = vmatprep.subr.bf16.mxu1 %v15498_v48  ;;  %v6761_v48 = vld [vmem:[#allocation11 + $0xb78] sm:$0xff] }
 0xaad   :  { %10335 = vmatmul.mubr.bf16.gmra.mrb[124].mxu1 %v20119_v50  ;;  %10271 = vmatprep.mubr.bf16.mxu0 %v20128_v45  ;;  %v6737_v50 = vld [vmem:[#allocation11 + $0xab8] sm:$0xff] }
 0xaae   :  { %10244 = vmatpush1.bf16.msra.mxu0 %v15495_v15  ;;  %10377 = vmatprep.mubr.bf16.mxu1 %v20128_v45  ;;  %v20292_v45 = vrot.slane %v20208_v7, %v19150_v28  ;;  %v15546_v43 = vcombine.high %v6737_v50, %v6745_v40  ;;  %v15543_v7 = vcombine.low %v6736_v38, %v6744_v1  ;;  %v6776_v38 = vld [vmem:[#allocation11 + $0xbf0] sm:$0xff] }
 0xaaf   :  { %10350 = vmatpush1.bf16.msra.mxu1 %v15497_v16  ;;  %10245 = vmatprep.subr.bf16.mxu0 %v15512_v11  ;;  %v15545_v22 = vcombine.low %v6737_v50, %v6745_v40 }
 0xab0   :  { %10351 = vmatprep.subr.bf16.mxu1 %v15514_v32 }
 0xab2   :  { %10246 = vmatpush1.bf16.msra.mxu0 %v15511_v10 }
 0xab3   :  { %10352 = vmatpush1.bf16.msra.mxu1 %v15513_v18  ;;  %10247 = vmatprep.subr.bf16.mxu0 %v15528_v3  ;;  %v15559_v18 = vcombine.low %v6752_v23, %v6760_v58  ;;  %v15562_v3 = vcombine.high %v6753_v2, %v6761_v48 }
 0xab4   :  { %10353 = vmatprep.subr.bf16.mxu1 %v15530_v56  ;;  %v9849_v30 = vpop.f32.mrb[104].mxu0  ;;  %v20309_v56 = vld [vmem:[#allocation11 + $0xbb0] sm:$0xff] }
 0xab5   :  { %v16555_v36 = vadd.f32 %v9849_v30, %v20288_v4  ;;  %v9955_v19 = vpop.f32.mrb[104].mxu1  ;;  %v9851_v57 = vpop.f32.mrb[105].mxu0  ;;  %v15576_v58 = vcombine.high %v20309_v56, %v6776_v38 }
 0xab6   :  { %10248 = vmatpush1.bf16.msra.mxu0 %v15527_v41  ;;  %v16563_v59 = vadd.f32 %v9955_v19, %v20292_v45  ;;  %v16556_v52 = vadd.f32 %v9851_v57, %v20296_v14  ;;  %v9957_v13 = vpop.f32.mrb[105].mxu1  ;;  %v9853_v15 = vpop.f32.mrb[106].mxu0  ;;  %v15561_v41 = vcombine.low %v6753_v2, %v6761_v48 }
 0xab7   :  { %10354 = vmatpush1.bf16.msra.mxu1 %v15529_v24  ;;  %v16564_v16 = vadd.f32 %v9957_v13, %v20300_v12  ;;  %10249 = vmatprep.subr.bf16.mxu0 %v15544_v9  ;;  %v16557_v11 = vadd.f32 %v9853_v15, %v20288_v4  ;;  %v9959_v32 = vpop.f32.mrb[106].mxu1  ;;  %v9855_v39 = vpop.f32.mrb[107].mxu0  ;;  %v10402_v1 = vmax.f32 %v16555_v36, 0.0  ;;  %v6769_v24 = vld [vmem:[#allocation11 + $0xbb8] sm:$0xff] }
 0xab8   :  { %10355 = vmatprep.subr.bf16.mxu1 %v15546_v43  ;;  %v16565_v25 = vadd.f32 %v9959_v32, %v20292_v45  ;;  %v16558_v55 = vadd.f32 %v9855_v39, %v20296_v14  ;;  %v9961_v10 = vpop.f32.mrb[107].mxu1  ;;  %v6777_v9 = vld [vmem:[#allocation11 + $0xbf8] sm:$0xff]  ;;  %v10404_v30 = vmax.f32 %v16563_v59, 0.0  ;;  %v10403_v19 = vmax.f32 %v16556_v52, 0.0  ;;  %v6784_v59 = vld [vmem:[#allocation11 + $0xc30] sm:$0xff] }
 0xab9   :  { %v10418_v50 = vmax.f32 %v16557_v11, 0.0  ;;  %v16566_v40 = vadd.f32 %v9961_v10, %v20300_v12  ;;  %v10405_v13 = vmax.f32 %v16564_v16, 0.0  ;;  %v15578_v48 = vcombine.high %v6769_v24, %v6777_v9  ;;  %v6792_v52 = vld [vmem:[#allocation11 + $0xc70] sm:$0xff] }
 0xaba   :  { %v10420_v43 = vmax.f32 %v16565_v25, 0.0  ;;  %10250 = vmatpush1.bf16.msra.mxu0 %v15543_v7  ;;  %v10419_v57 = vmax.f32 %v16558_v55, 0.0  ;;  %v6793_v25 = vld [vmem:[#allocation11 + $0xc78] sm:$0xff] }
 0xabb   :  { %v20312_v15 = vpack.c.bf16 %v10418_v50, %v10402_v1  ;;  %10356 = vmatpush1.bf16.msra.mxu1 %v15545_v22  ;;  %v10421_v23 = vmax.f32 %v16566_v40, 0.0  ;;  %10251 = vmatprep.subr.bf16.mxu0 %v15560_v6  ;;  %v6785_v22 = vld [vmem:[#allocation11 + $0xc38] sm:$0xff]  ;;  %v15577_v1 = vcombine.low %v6769_v24, %v6777_v9 }
 0xabc   :  { %v20315_v36 = vpack.c.bf16 %v10420_v43, %v10404_v30  ;;  %v20317_v11 = vpack.c.bf16 %v10419_v57, %v10403_v19  ;;  %10357 = vmatprep.subr.bf16.mxu1 %v15562_v3  ;;  %v9859_v2 = vpop.f32.mrb[108].mxu0  ;;  %v15575_v3 = vcombine.low %v20309_v56, %v6776_v38  ;;  %v15592_v57 = vcombine.high %v6784_v59, %v6792_v52  ;;  %v6800_v56 = vld [vmem:[#allocation11 + $0xcb0] sm:$0xff] }
 0xabd   :  { %v20319_v32 = vpack.c.bf16 %v10421_v23, %v10405_v13  ;;  %v16559_v7 = vadd.f32 %v9859_v2, %v20288_v4  ;;  %v9965_v16 = vpop.f32.mrb[108].mxu1  ;;  %v9861_v39 = vpop.f32.mrb[109].mxu0  ;;  %v15591_v2 = vcombine.low %v6784_v59, %v6792_v52  ;;  %v6808_v38 = vld [vmem:[#allocation11 + $0xcf0] sm:$0xff] }
 0xabe   :  { %10252 = vmatpush1.bf16.msra.mxu0 %v15559_v18  ;;  %v16567_v6 = vadd.f32 %v9965_v16, %v20292_v45  ;;  %v16560_v55 = vadd.f32 %v9861_v39, %v20296_v14  ;;  %v9967_v10 = vpop.f32.mrb[109].mxu1  ;;  %v9863_v50 = vpop.f32.mrb[110].mxu0  ;;  %v15594_v16 = vcombine.high %v6785_v22, %v6793_v25  ;;  %v6801_v39 = vld [vmem:[#allocation11 + $0xcb8] sm:$0xff]  ;;  %v15608_v59 = vcombine.high %v6800_v56, %v6808_v38 }
 0xabf   :  { %10358 = vmatpush1.bf16.msra.mxu1 %v15561_v41  ;;  %v16568_v40 = vadd.f32 %v9967_v10, %v20300_v12  ;;  %10253 = vmatprep.subr.bf16.mxu0 %v15576_v58  ;;  %v16561_v30 = vadd.f32 %v9863_v50, %v20288_v4  ;;  %v9969_v19 = vpop.f32.mrb[110].mxu1  ;;  %v9865_v43 = vpop.f32.mrb[111].mxu0  ;;  %v10434_v24 = vmax.f32 %v16559_v7, 0.0  ;;  %v15593_v58 = vcombine.low %v6785_v22, %v6793_v25  ;;  %v6809_v4 = vld [vmem:[#allocation11 + $0xcf8] sm:$0xff]  ;;  %v6816_v22 = vld [vmem:[#allocation11 + $0xd30] sm:$0xff] }
 0xac0   :  { %10359 = vmatprep.subr.bf16.mxu1 %v15578_v48  ;;  %v16569_v18 = vadd.f32 %v9969_v19, %v20292_v45  ;;  %v16562_v13 = vadd.f32 %v9865_v43, %v20296_v14  ;;  %v9971_v23 = vpop.f32.mrb[111].mxu1  ;;  %v10436_v10 = vmax.f32 %v16567_v6, 0.0  ;;  %v10435_v50 = vmax.f32 %v16560_v55, 0.0  ;;  %v6824_v25 = vld [vmem:[#allocation11 + $0xd70] sm:$0xff]  ;;  %v6817_v55 = vld [vmem:[#allocation11 + $0xd38] sm:$0xff] }
 0xac1   :  { %v10450_v41 = vmax.f32 %v16561_v30, 0.0  ;;  %v16570_v9 = vadd.f32 %v9971_v23, %v20300_v12  ;;  %v10437_v45 = vmax.f32 %v16568_v40, 0.0  ;;  %v15610_v12 = vcombine.high %v6801_v39, %v6809_v4 }
 0xac2   :  { %v10452_v63 = vmax.f32 %v16569_v18, 0.0  ;;  %10254 = vmatpush1.bf16.msra.mxu0 %v15575_v3  ;;  %v10451_v48 = vmax.f32 %v16562_v13, 0.0  ;;  %v6825_v3 = vld [vmem:[#allocation11 + $0xd78] sm:$0xff]  ;;  %v15607_v40 = vcombine.low %v6800_v56, %v6808_v38  ;;  %v15624_v30 = vcombine.high %v6816_v22, %v6824_v25  ;;  %v6856_v56 = vld [vmem:[#allocation11 + $0xe70] sm:$0xff] }
 0xac3   :  { %v20330_v19 = vpack.c.bf16 %v10450_v41, %v10434_v24  ;;  %10360 = vmatpush1.bf16.msra.mxu1 %v15577_v1  ;;  %v10453_v14 = vmax.f32 %v16570_v9, 0.0  ;;  %10255 = vmatprep.subr.bf16.mxu0 %v15592_v57  ;;  %v15609_v1 = vcombine.low %v6801_v39, %v6809_v4  ;;  %v15626_v43 = vcombine.high %v6817_v55, %v6825_v3  ;;  %v6840_v57 = vld [vmem:[#allocation11 + $0xdf0] sm:$0xff]  ;;  %v6833_v18 = vld [vmem:[#allocation11 + $0xdb8] sm:$0xff] }
 0xac4   :  { %v20332_v52 = vpack.c.bf16 %v10452_v63, %v10436_v10  ;;  %v20334_v7 = vpack.c.bf16 %v10451_v48, %v10435_v50  ;;  %10361 = vmatprep.subr.bf16.mxu1 %v15594_v16  ;;  %v6832_v63 = vld [vmem:[#allocation11 + $0xdb0] sm:$0xff]  ;;  %v6841_v13 = vld [vmem:[#allocation11 + $0xdf8] sm:$0xff]  ;;  %v15623_v23 = vcombine.low %v6816_v22, %v6824_v25  ;;  %v15625_v16 = vcombine.low %v6817_v55, %v6825_v3 }
 0xac5   :  { %v20336_v6 = vpack.c.bf16 %v10453_v14, %v10437_v45  ;;  %v15640_v24 = vcombine.high %v6832_v63, %v6840_v57  ;;  %v15642_v41 = vcombine.high %v6833_v18, %v6841_v13  ;;  %v6849_v38 = vld [vmem:[#allocation11 + $0xe38] sm:$0xff]  ;;  %v15641_v39 = vcombine.low %v6833_v18, %v6841_v13  ;;  %v6864_v50 = vld [vmem:[#allocation11 + $0xeb0] sm:$0xff] }
 0xac6   :  { %10256 = vmatpush1.bf16.msra.mxu0 %v15591_v2  ;;  %v6848_v2 = vld [vmem:[#allocation11 + $0xe30] sm:$0xff]  ;;  %v6857_v9 = vld [vmem:[#allocation11 + $0xe78] sm:$0xff] }
 0xac7   :  { %10362 = vmatpush1.bf16.msra.mxu1 %v15593_v58  ;;  %10257 = vmatprep.subr.bf16.mxu0 %v15608_v59  ;;  %v15639_v58 = vcombine.low %v6832_v63, %v6840_v57  ;;  %v15656_v4 = vcombine.high %v6848_v2, %v6856_v56  ;;  %v15658_v10 = vcombine.high %v6849_v38, %v6857_v9  ;;  %v6872_v48 = vld [vmem:[#allocation11 + $0xef0] sm:$0xff]  ;;  %v6865_v45 = vld [vmem:[#allocation11 + $0xeb8] sm:$0xff] }
 0xac8   :  { %10363 = vmatprep.subr.bf16.mxu1 %v15610_v12  ;;  %v6873_v14 = vld [vmem:[#allocation11 + $0xef8] sm:$0xff]  ;;  %v15655_v59 = vcombine.low %v6848_v2, %v6856_v56  ;;  %v15657_v12 = vcombine.low %v6849_v38, %v6857_v9  ;;  %v15672_v22 = vcombine.high %v6864_v50, %v6872_v48  ;;  %v6880_v55 = vld [vmem:[#allocation11 + $0xf30] sm:$0xff] }
 0xac9   :  { %v15674_v25 = vcombine.high %v6865_v45, %v6873_v14  ;;  %v6888_v3 = vld [vmem:[#allocation11 + $0xf70] sm:$0xff] }
 0xaca   :  { %10258 = vmatpush1.bf16.msra.mxu0 %v15607_v40  ;;  %v6881_v40 = vld [vmem:[#allocation11 + $0xf38] sm:$0xff]  ;;  %v15688_v63 = vcombine.high %v6880_v55, %v6888_v3  ;;  %v6896_v18 = vld [vmem:[#allocation11 + $0xfb0] sm:$0xff] }
 0xacb   :  { %10364 = vmatpush1.bf16.msra.mxu1 %v15609_v1  ;;  %10259 = vmatprep.subr.bf16.mxu0 %v15624_v30  ;;  %v6889_v1 = vld [vmem:[#allocation11 + $0xf78] sm:$0xff]  ;;  %v15671_v30 = vcombine.low %v6864_v50, %v6872_v48  ;;  %v6904_v13 = vld [vmem:[#allocation11 + $0xff0] sm:$0xff] }
 0xacc   :  { %10365 = vmatprep.subr.bf16.mxu1 %v15626_v43  ;;  %v15673_v43 = vcombine.low %v6865_v45, %v6873_v14  ;;  %v15690_v57 = vcombine.high %v6881_v40, %v6889_v1  ;;  %v15704_v2 = vcombine.high %v6896_v18, %v6904_v13  ;;  %v15703_v38 = vcombine.low %v6896_v18, %v6904_v13  ;;  %v17697_v50 = vld [vmem:[#allocation14 + $0x24] ss:$16 sps:$4 sm:$0xff]   ;;  %v17700_v48 = vld [vmem:[#allocation14 + $0x2c] ss:$16 sps:$4 sm:$0xff]   ;;  %v17695_v45 = vld [vmem:[#allocation14 + $0x20] ss:$16 sps:$4 sm:$0xff]  }
 0xacd   :  { %v17698_v14 = vld [vmem:[#allocation14 + $0x28] ss:$16 sps:$4 sm:$0xff]   ;;  %v17727_v18 = vld [vmem:[#allocation14 + $0xc4] ss:$16 sps:$4 sm:$0xff]   ;;  %v17730_v13 = vld [vmem:[#allocation14 + $0xcc] ss:$16 sps:$4 sm:$0xff]  }
 0xace   :  { %10260 = vmatpush1.bf16.msra.mxu0 %v15623_v23  ;;  %v6897_v23 = vld [vmem:[#allocation11 + $0xfb8] sm:$0xff] }
 0xacf   :  { %10366 = vmatpush1.bf16.msra.mxu1 %v15625_v16  ;;  %10261 = vmatprep.subr.bf16.mxu0 %v15640_v24  ;;  %v6905_v16 = vld [vmem:[#allocation11 + $0xff8] sm:$0xff]  ;;  %v15687_v24 = vcombine.low %v6880_v55, %v6888_v3  ;;  %v17709_v55 = vld [vmem:[#allocation14 + $0x64] ss:$16 sps:$4 sm:$0xff]  }
 0xad0   :  { %10367 = vmatprep.subr.bf16.mxu1 %v15642_v41  ;;  %v15689_v41 = vcombine.low %v6881_v40, %v6889_v1  ;;  %v15706_v56 = vcombine.high %v6897_v23, %v6905_v16  ;;  %v15705_v9 = vcombine.low %v6897_v23, %v6905_v16  ;;  %v17710_v3 = vld [vmem:[#allocation14 + $0x68] ss:$16 sps:$4 sm:$0xff]   ;;  %v17715_v40 = vld [vmem:[#allocation14 + $0x84] ss:$16 sps:$4 sm:$0xff]   ;;  %v17718_v1 = vld [vmem:[#allocation14 + $0x8c] ss:$16 sps:$4 sm:$0xff]  }
 0xad1   :  { %v17725_v23 = vld [vmem:[#allocation14 + $0xc0] ss:$16 sps:$4 sm:$0xff]   ;;  %v17728_v16 = vld [vmem:[#allocation14 + $0xc8] ss:$16 sps:$4 sm:$0xff]  }
 0xad2   :  { %10262 = vmatpush1.bf16.msra.mxu0 %v15639_v58  ;;  %v17691_v58 = vld [vmem:[#allocation14 + $0x4] ss:$16 sps:$4 sm:$0xff]  }
 0xad3   :  { %10368 = vmatpush1.bf16.msra.mxu1 %v15641_v39  ;;  %10263 = vmatprep.subr.bf16.mxu0 %v15656_v4  ;;  %v17694_v39 = vld [vmem:[#allocation14 + $0xc] ss:$16 sps:$4 sm:$0xff]   ;;  %v17689_v4 = vld [vmem:[#allocation14] ss:$16 sps:$4 sm:$0xff]  }
 0xad4   :  { %10369 = vmatprep.subr.bf16.mxu1 %v15658_v10  ;;  %v17692_v10 = vld [vmem:[#allocation14 + $0x8] ss:$16 sps:$4 sm:$0xff]  }
 0xad6   :  { %10264 = vmatpush1.bf16.msra.mxu0 %v15655_v59  ;;  %v17703_v59 = vld [vmem:[#allocation14 + $0x44] ss:$16 sps:$4 sm:$0xff]  }
 0xad7   :  { %10370 = vmatpush1.bf16.msra.mxu1 %v15657_v12  ;;  %10265 = vmatprep.subr.bf16.mxu0 %v15672_v22  ;;  %v17706_v12 = vld [vmem:[#allocation14 + $0x4c] ss:$16 sps:$4 sm:$0xff]   ;;  %v17701_v22 = vld [vmem:[#allocation14 + $0x40] ss:$16 sps:$4 sm:$0xff]  }
 0xad8   :  { %10371 = vmatprep.subr.bf16.mxu1 %v15674_v25  ;;  %v17704_v25 = vld [vmem:[#allocation14 + $0x48] ss:$16 sps:$4 sm:$0xff]  }
 0xada   :  { %10266 = vmatpush1.bf16.msra.mxu0 %v15671_v30  ;;  %v17713_v30 = vld [vmem:[#allocation14 + $0x80] ss:$16 sps:$4 sm:$0xff]  }
 0xadb   :  { %10372 = vmatpush1.bf16.msra.mxu1 %v15673_v43  ;;  %10267 = vmatprep.subr.bf16.mxu0 %v15688_v63  ;;  %v17716_v43 = vld [vmem:[#allocation14 + $0x88] ss:$16 sps:$4 sm:$0xff]   ;;  %v17721_v63 = vld [vmem:[#allocation14 + $0xa4] ss:$16 sps:$4 sm:$0xff]  }
 0xadc   :  { %10373 = vmatprep.subr.bf16.mxu1 %v15690_v57  ;;  %v17719_v57 = vld [vmem:[#allocation14 + $0xa0] ss:$16 sps:$4 sm:$0xff]  }
 0xade   :  { %10268 = vmatpush1.bf16.msra.mxu0 %v15687_v24  ;;  %v17733_v24 = vld [vmem:[#allocation14 + $0xe4] ss:$16 sps:$4 sm:$0xff]  }
 0xadf   :  { %10374 = vmatpush1.bf16.msra.mxu1 %v15689_v41  ;;  %10269 = vmatprep.subr.bf16.mxu0 %v15704_v2  ;;  %v17736_v41 = vld [vmem:[#allocation14 + $0xec] ss:$16 sps:$4 sm:$0xff]   ;;  %v17731_v2 = vld [vmem:[#allocation14 + $0xe0] ss:$16 sps:$4 sm:$0xff]  }
 0xae0   :  { %10375 = vmatprep.subr.bf16.mxu1 %v15706_v56  ;;  %v17734_v56 = vld [vmem:[#allocation14 + $0xe8] ss:$16 sps:$4 sm:$0xff]  }
 0xae2   :  { %10270 = vmatpush1.bf16.msra.mxu0 %v15703_v38  ;;  %v17739_v38 = vld [vmem:[#allocation14 + $0x104] ss:$16 sps:$4 sm:$0xff]  }
 0xae3   :  { %10376 = vmatpush1.bf16.msra.mxu1 %v15705_v9  ;;  %13582 = vmatprep.subr.bf16.mxu0 %v17691_v58  ;;  %v17742_v9 = vld [vmem:[#allocation14 + $0x10c] ss:$16 sps:$4 sm:$0xff]   ;;  %v17737_v58 = vld [vmem:[#allocation14 + $0x100] ss:$16 sps:$4 sm:$0xff]  }
 0xae4   :  { %14006 = vmatprep.subr.bf16.mxu1 %v17694_v39  ;;  %v17740_v39 = vld [vmem:[#allocation14 + $0x108] ss:$16 sps:$4 sm:$0xff]  }
 0xae5   :  { %10272 = vmatmul.mubr.bf16.vlgmr.msra.gmra.mrb[120].mxu0 %v20162_v44 }
 0xae6   :  { %10378 = vmatmul.mubr.bf16.vlgmr.msra.gmra.mrb[120].mxu1 %v20162_v44  ;;  %10281 = vmatprep.mubr.bf16.mxu0 %v20166_v61  ;;  %v17712_v44 = vld [vmem:[#allocation14 + $0x6c] ss:$16 sps:$4 sm:$0xff]  }
 0xae7   :  { %10387 = vmatprep.mubr.bf16.mxu1 %v20166_v61  ;;  %13583 = vmatpush1.bf16.msra.mxu0 %v17689_v4  ;;  %v17707_v61 = vld [vmem:[#allocation14 + $0x60] ss:$16 sps:$4 sm:$0xff]   ;;  %v17745_v4 = vld [vmem:[#allocation14 + $0x124] ss:$16 sps:$4 sm:$0xff]  }
 0xae8   :  { %14007 = vmatpush1.bf16.msra.mxu1 %v17692_v10  ;;  %13584 = vmatprep.subr.bf16.mxu0 %v17697_v50  ;;  %v17748_v10 = vld [vmem:[#allocation14 + $0x12c] ss:$16 sps:$4 sm:$0xff]   ;;  %v17743_v50 = vld [vmem:[#allocation14 + $0x120] ss:$16 sps:$4 sm:$0xff]  }
 0xae9   :  { %14008 = vmatprep.subr.bf16.mxu1 %v17700_v48  ;;  %v17746_v48 = vld [vmem:[#allocation14 + $0x128] ss:$16 sps:$4 sm:$0xff]  }
 0xaeb   :  { %13585 = vmatpush1.bf16.msra.mxu0 %v17695_v45  ;;  %v17751_v45 = vld [vmem:[#allocation14 + $0x144] ss:$16 sps:$4 sm:$0xff]  }
 0xaec   :  { %14009 = vmatpush1.bf16.msra.mxu1 %v17698_v14  ;;  %13586 = vmatprep.subr.bf16.mxu0 %v17703_v59  ;;  %v17754_v14 = vld [vmem:[#allocation14 + $0x14c] ss:$16 sps:$4 sm:$0xff]   ;;  %v17749_v59 = vld [vmem:[#allocation14 + $0x140] ss:$16 sps:$4 sm:$0xff]  }
 0xaed   :  { %10282 = vmatmul.mubr.bf16.gmra.mrb[124].mxu0 %v20178_v62  ;;  %14010 = vmatprep.subr.bf16.mxu1 %v17706_v12  ;;  %v17752_v12 = vld [vmem:[#allocation14 + $0x148] ss:$16 sps:$4 sm:$0xff]  }
 0xaee   :  { %10388 = vmatmul.mubr.bf16.gmra.mrb[124].mxu1 %v20178_v62  ;;  %13614 = vmatprep.mubr.bf16.mxu0 %v20248_v21  ;;  %v17724_v62 = vld [vmem:[#allocation14 + $0xac] ss:$16 sps:$4 sm:$0xff]  }
 0xaef   :  { %13587 = vmatpush1.bf16.msra.mxu0 %v17701_v22  ;;  %14038 = vmatprep.mubr.bf16.mxu1 %v20248_v21  ;;  %v17722_v21 = vld [vmem:[#allocation14 + $0xa8] ss:$16 sps:$4 sm:$0xff]   ;;  %v17757_v22 = vld [vmem:[#allocation14 + $0x164] ss:$16 sps:$4 sm:$0xff]  }
 0xaf0   :  { %14011 = vmatpush1.bf16.msra.mxu1 %v17704_v25  ;;  %13588 = vmatprep.subr.bf16.mxu0 %v17709_v55  ;;  %v17760_v25 = vld [vmem:[#allocation14 + $0x16c] ss:$16 sps:$4 sm:$0xff]   ;;  %v17755_v55 = vld [vmem:[#allocation14 + $0x160] ss:$16 sps:$4 sm:$0xff]  }
 0xaf1   :  { %14012 = vmatprep.subr.bf16.mxu1 %v17712_v44  ;;  %v17758_v44 = vld [vmem:[#allocation14 + $0x168] ss:$16 sps:$4 sm:$0xff]  }
 0xaf3   :  { %13589 = vmatpush1.bf16.msra.mxu0 %v17707_v61  ;;  %v17763_v61 = vld [vmem:[#allocation14 + $0x184] ss:$16 sps:$4 sm:$0xff]  }
 0xaf4   :  { %14013 = vmatpush1.bf16.msra.mxu1 %v17710_v3  ;;  %13590 = vmatprep.subr.bf16.mxu0 %v17715_v40  ;;  %v17766_v3 = vld [vmem:[#allocation14 + $0x18c] ss:$16 sps:$4 sm:$0xff]   ;;  %v17761_v40 = vld [vmem:[#allocation14 + $0x180] ss:$16 sps:$4 sm:$0xff]  }
 0xaf5   :  { %14014 = vmatprep.subr.bf16.mxu1 %v17718_v1  ;;  %v17764_v1 = vld [vmem:[#allocation14 + $0x188] ss:$16 sps:$4 sm:$0xff]  }
 0xaf7   :  { %13591 = vmatpush1.bf16.msra.mxu0 %v17713_v30  ;;  %v17769_v30 = vld [vmem:[#allocation14 + $0x1a4] ss:$16 sps:$4 sm:$0xff]  }
 0xaf8   :  { %14015 = vmatpush1.bf16.msra.mxu1 %v17716_v43  ;;  %13592 = vmatprep.subr.bf16.mxu0 %v17721_v63  ;;  %v17772_v43 = vld [vmem:[#allocation14 + $0x1ac] ss:$16 sps:$4 sm:$0xff]   ;;  %v17767_v63 = vld [vmem:[#allocation14 + $0x1a0] ss:$16 sps:$4 sm:$0xff]  }
 0xaf9   :  { %14016 = vmatprep.subr.bf16.mxu1 %v17724_v62  ;;  %v17770_v62 = vld [vmem:[#allocation14 + $0x1a8] ss:$16 sps:$4 sm:$0xff]  }
 0xafb   :  { %13593 = vmatpush1.bf16.msra.mxu0 %v17719_v57  ;;  %v17775_v57 = vld [vmem:[#allocation14 + $0x1c4] ss:$16 sps:$4 sm:$0xff]  }
 0xafc   :  { %14017 = vmatpush1.bf16.msra.mxu1 %v17722_v21  ;;  %13594 = vmatprep.subr.bf16.mxu0 %v17727_v18  ;;  %v17778_v21 = vld [vmem:[#allocation14 + $0x1cc] ss:$16 sps:$4 sm:$0xff]   ;;  %v17773_v18 = vld [vmem:[#allocation14 + $0x1c0] ss:$16 sps:$4 sm:$0xff]  }
 0xafd   :  { %14018 = vmatprep.subr.bf16.mxu1 %v17730_v13  ;;  %v17776_v13 = vld [vmem:[#allocation14 + $0x1c8] ss:$16 sps:$4 sm:$0xff]  }
 0xaff   :  { %13595 = vmatpush1.bf16.msra.mxu0 %v17725_v23  ;;  %v17781_v23 = vld [vmem:[#allocation14 + $0x1e4] ss:$16 sps:$4 sm:$0xff]  }
 0xb00   :  { %14019 = vmatpush1.bf16.msra.mxu1 %v17728_v16  ;;  %13596 = vmatprep.subr.bf16.mxu0 %v17733_v24  ;;  %v17784_v16 = vld [vmem:[#allocation14 + $0x1ec] ss:$16 sps:$4 sm:$0xff]   ;;  %v17779_v24 = vld [vmem:[#allocation14 + $0x1e0] ss:$16 sps:$4 sm:$0xff]  }
 0xb01   :  { %14020 = vmatprep.subr.bf16.mxu1 %v17736_v41  ;;  %v17782_v41 = vld [vmem:[#allocation14 + $0x1e8] ss:$16 sps:$4 sm:$0xff]  }
 0xb03   :  { %13597 = vmatpush1.bf16.msra.mxu0 %v17731_v2  ;;  %v17787_v2 = vld [vmem:[#allocation14 + $0x204] ss:$16 sps:$4 sm:$0xff]  }
 0xb04   :  { %14021 = vmatpush1.bf16.msra.mxu1 %v17734_v56  ;;  %13598 = vmatprep.subr.bf16.mxu0 %v17739_v38  ;;  %v17790_v56 = vld [vmem:[#allocation14 + $0x20c] ss:$16 sps:$4 sm:$0xff]   ;;  %v17785_v38 = vld [vmem:[#allocation14 + $0x200] ss:$16 sps:$4 sm:$0xff]  }
 0xb05   :  { %14022 = vmatprep.subr.bf16.mxu1 %v17742_v9  ;;  %v17788_v9 = vld [vmem:[#allocation14 + $0x208] ss:$16 sps:$4 sm:$0xff]  }
 0xb07   :  { %13599 = vmatpush1.bf16.msra.mxu0 %v17737_v58  ;;  %v17793_v58 = vld [vmem:[#allocation14 + $0x224] ss:$16 sps:$4 sm:$0xff]  }
 0xb08   :  { %14023 = vmatpush1.bf16.msra.mxu1 %v17740_v39  ;;  %13600 = vmatprep.subr.bf16.mxu0 %v17745_v4  ;;  %v17796_v39 = vld [vmem:[#allocation14 + $0x22c] ss:$16 sps:$4 sm:$0xff]   ;;  %v17791_v4 = vld [vmem:[#allocation14 + $0x220] ss:$16 sps:$4 sm:$0xff]  }
 0xb09   :  { %14024 = vmatprep.subr.bf16.mxu1 %v17748_v10  ;;  %v17794_v10 = vld [vmem:[#allocation14 + $0x228] ss:$16 sps:$4 sm:$0xff]  }
 0xb0b   :  { %13601 = vmatpush1.bf16.msra.mxu0 %v17743_v50  ;;  %v17799_v50 = vld [vmem:[#allocation14 + $0x244] ss:$16 sps:$4 sm:$0xff]  }
 0xb0c   :  { %14025 = vmatpush1.bf16.msra.mxu1 %v17746_v48  ;;  %13602 = vmatprep.subr.bf16.mxu0 %v17751_v45  ;;  %v17802_v48 = vld [vmem:[#allocation14 + $0x24c] ss:$16 sps:$4 sm:$0xff]   ;;  %v17797_v45 = vld [vmem:[#allocation14 + $0x240] ss:$16 sps:$4 sm:$0xff]  }
 0xb0d   :  { %14026 = vmatprep.subr.bf16.mxu1 %v17754_v14  ;;  %v17800_v14 = vld [vmem:[#allocation14 + $0x248] ss:$16 sps:$4 sm:$0xff]  }
 0xb0f   :  { %13603 = vmatpush1.bf16.msra.mxu0 %v17749_v59  ;;  %v17805_v59 = vld [vmem:[#allocation14 + $0x264] ss:$16 sps:$4 sm:$0xff]  }
 0xb10   :  { %14027 = vmatpush1.bf16.msra.mxu1 %v17752_v12  ;;  %13604 = vmatprep.subr.bf16.mxu0 %v17757_v22  ;;  %v20354_v12 = vld [vmem:[#allocation13 + $0x8] sm:$0xff] }
 0xb11   :  { %14028 = vmatprep.subr.bf16.mxu1 %v17760_v25  ;;  %v17806_v22 = vld [vmem:[#allocation14 + $0x268] ss:$16 sps:$4 sm:$0xff]   ;;  %v17811_v25 = vld [vmem:[#allocation14 + $0x284] ss:$16 sps:$4 sm:$0xff]  }
 0xb13   :  { %13605 = vmatpush1.bf16.msra.mxu0 %v17755_v55  ;;  %v17814_v55 = vld [vmem:[#allocation14 + $0x28c] ss:$16 sps:$4 sm:$0xff]  }
 0xb14   :  { %14029 = vmatpush1.bf16.msra.mxu1 %v17758_v44  ;;  %13606 = vmatprep.subr.bf16.mxu0 %v17763_v61  ;;  %v20358_v44 = vrot.slane %v20354_v12, %v19102_v31  ;;  %v20362_v61 = vrot.slane %v20354_v12, %v19108_v34 }
 0xb15   :  { %14030 = vmatprep.subr.bf16.mxu1 %v17766_v3  ;;  %v17812_v3 = vld [vmem:[#allocation14 + $0x288] ss:$16 sps:$4 sm:$0xff]  }
 0xb17   :  { %13607 = vmatpush1.bf16.msra.mxu0 %v17761_v40  ;;  %v20370_v40 = vrot.slane %v20354_v12, %v19111_v37 }
 0xb18   :  { %14031 = vmatpush1.bf16.msra.mxu1 %v17764_v1  ;;  %13608 = vmatprep.subr.bf16.mxu0 %v17769_v30  ;;  %v17817_v1 = vld [vmem:[#allocation14 + $0x2a4] ss:$16 sps:$4 sm:$0xff]   ;;  %v17820_v30 = vld [vmem:[#allocation14 + $0x2ac] ss:$16 sps:$4 sm:$0xff]  }
 0xb19   :  { %14032 = vmatprep.subr.bf16.mxu1 %v17772_v43 }
 0xb1b   :  { %13609 = vmatpush1.bf16.msra.mxu0 %v17767_v63 }
 0xb1c   :  { %14033 = vmatpush1.bf16.msra.mxu1 %v17770_v62  ;;  %13610 = vmatprep.subr.bf16.mxu0 %v17775_v57 }
 0xb1d   :  { %14034 = vmatprep.subr.bf16.mxu1 %v17778_v21  ;;  %v17815_v21 = vld [vmem:[#allocation14 + $0x2a0] ss:$16 sps:$4 sm:$0xff]  }
 0xb1f   :  { %13611 = vmatpush1.bf16.msra.mxu0 %v17773_v18 }
 0xb20   :  { %14035 = vmatpush1.bf16.msra.mxu1 %v17776_v13  ;;  %13612 = vmatprep.subr.bf16.mxu0 %v17781_v23  ;;  %v17818_v23 = vld [vmem:[#allocation14 + $0x2a8] ss:$16 sps:$4 sm:$0xff]  }
 0xb21   :  { %14036 = vmatprep.subr.bf16.mxu1 %v17784_v16 }
 0xb23   :  { %13613 = vmatpush1.bf16.msra.mxu0 %v17779_v24 }
 0xb24   :  { %14037 = vmatpush1.bf16.msra.mxu1 %v17782_v41  ;;  %13635 = vmatprep.subr.bf16.mxu0 %v17787_v2  ;;  %v17823_v2 = vld [vmem:[#allocation14 + $0x2c4] ss:$16 sps:$4 sm:$0xff]  }
 0xb25   :  { %14059 = vmatprep.subr.bf16.mxu1 %v17790_v56 }
 0xb26   :  { %13615 = vmatmul.mubr.bf16.vlgmr.msra.gmra.mrb[128].mxu0 %v20244_v26 }
 0xb27   :  { %14039 = vmatmul.mubr.bf16.vlgmr.msra.gmra.mrb[128].mxu1 %v20244_v26  ;;  %13624 = vmatprep.mubr.bf16.mxu0 %v20266_v8  ;;  %v17808_v26 = vld [vmem:[#allocation14 + $0x26c] ss:$16 sps:$4 sm:$0xff]  }
 0xb28   :  { %13636 = vmatpush1.bf16.msra.mxu0 %v17785_v38  ;;  %14048 = vmatprep.mubr.bf16.mxu1 %v20266_v8  ;;  %v17803_v8 = vld [vmem:[#allocation14 + $0x260] ss:$16 sps:$4 sm:$0xff]  }
 0xb29   :  { %14060 = vmatpush1.bf16.msra.mxu1 %v17788_v9  ;;  %13637 = vmatprep.subr.bf16.mxu0 %v17793_v58  ;;  %v17826_v58 = vld [vmem:[#allocation14 + $0x2cc] ss:$16 sps:$4 sm:$0xff]  }
 0xb2a   :  { %14061 = vmatprep.subr.bf16.mxu1 %v17796_v39 }
 0xb2c   :  { %13638 = vmatpush1.bf16.msra.mxu0 %v17791_v4 }
 0xb2d   :  { %14062 = vmatpush1.bf16.msra.mxu1 %v17794_v10  ;;  %13639 = vmatprep.subr.bf16.mxu0 %v17799_v50 }
 0xb2e   :  { %13625 = vmatmul.mubr.bf16.gmra.mrb[132].mxu0 %v20262_v17  ;;  %14063 = vmatprep.subr.bf16.mxu1 %v17802_v48 }
 0xb2f   :  { %14049 = vmatmul.mubr.bf16.gmra.mrb[132].mxu1 %v20262_v17  ;;  %13667 = vmatprep.mubr.bf16.mxu0 %v20250_v0  ;;  %v17809_v17 = vld [vmem:[#allocation14 + $0x280] ss:$16 sps:$4 sm:$0xff]  }
 0xb30   :  { %13640 = vmatpush1.bf16.msra.mxu0 %v17797_v45  ;;  %14091 = vmatprep.mubr.bf16.mxu1 %v20250_v0  ;;  %v20366_v0 = vrot.slane %v20354_v12, %v19105_v33 }
 0xb31   :  { %14064 = vmatpush1.bf16.msra.mxu1 %v17800_v14  ;;  %13641 = vmatprep.subr.bf16.mxu0 %v17805_v59  ;;  %v17821_v59 = vld [vmem:[#allocation14 + $0x2c0] ss:$16 sps:$4 sm:$0xff]  }
 0xb32   :  { %14065 = vmatprep.subr.bf16.mxu1 %v17808_v26 }
 0xb34   :  { %13642 = vmatpush1.bf16.msra.mxu0 %v17803_v8 }
 0xb35   :  { %14066 = vmatpush1.bf16.msra.mxu1 %v17806_v22  ;;  %13643 = vmatprep.subr.bf16.mxu0 %v17811_v25  ;;  %v17824_v25 = vld [vmem:[#allocation14 + $0x2c8] ss:$16 sps:$4 sm:$0xff]  }
 0xb36   :  { %14067 = vmatprep.subr.bf16.mxu1 %v17814_v55  ;;  %v10061_v31 = vpop.f32.mrb[112].mxu0  ;;  %v17829_v55 = vld [vmem:[#allocation14 + $0x2e4] ss:$16 sps:$4 sm:$0xff]  }
 0xb37   :  { %v16571_v43 = vadd.f32 %v10061_v31, %v20358_v44  ;;  %v10167_v63 = vpop.f32.mrb[112].mxu1  ;;  %v10063_v34 = vpop.f32.mrb[113].mxu0  ;;  %v17832_v31 = vld [vmem:[#allocation14 + $0x2ec] ss:$16 sps:$4 sm:$0xff]  }
 0xb38   :  { %13644 = vmatpush1.bf16.msra.mxu0 %v17809_v17  ;;  %v16579_v62 = vadd.f32 %v10167_v63, %v20362_v61  ;;  %v16572_v33 = vadd.f32 %v10063_v34, %v20366_v0  ;;  %v10169_v57 = vpop.f32.mrb[113].mxu1  ;;  %v10065_v18 = vpop.f32.mrb[114].mxu0 }
 0xb39   :  { %14068 = vmatpush1.bf16.msra.mxu1 %v17812_v3  ;;  %v16580_v13 = vadd.f32 %v10169_v57, %v20370_v40  ;;  %13645 = vmatprep.subr.bf16.mxu0 %v17817_v1  ;;  %v16573_v16 = vadd.f32 %v10065_v18, %v20358_v44  ;;  %v10171_v24 = vpop.f32.mrb[114].mxu1  ;;  %v10067_v41 = vpop.f32.mrb[115].mxu0  ;;  %v10406_v39 = vmax.f32 %v16571_v43, 0.0 }
 0xb3a   :  { %14069 = vmatprep.subr.bf16.mxu1 %v17820_v30  ;;  %v16581_v56 = vadd.f32 %v10171_v24, %v20362_v61  ;;  %v16574_v38 = vadd.f32 %v10067_v41, %v20366_v0  ;;  %v10173_v9 = vpop.f32.mrb[115].mxu1  ;;  %v10408_v50 = vmax.f32 %v16579_v62, 0.0  ;;  %v10407_v48 = vmax.f32 %v16572_v33, 0.0 }
 0xb3b   :  { %v10422_v4 = vmax.f32 %v16573_v16, 0.0  ;;  %v16582_v10 = vadd.f32 %v10173_v9, %v20370_v40  ;;  %v10409_v26 = vmax.f32 %v16580_v13, 0.0 }
 0xb3c   :  { %v10424_v45 = vmax.f32 %v16581_v56, 0.0  ;;  %13646 = vmatpush1.bf16.msra.mxu0 %v17815_v21  ;;  %v10423_v14 = vmax.f32 %v16574_v38, 0.0  ;;  %v17827_v21 = vld [vmem:[#allocation14 + $0x2e0] ss:$16 sps:$4 sm:$0xff]  }
 0xb3d   :  { %v20380_v8 = vpack.c.bf16 %v10422_v4, %v10406_v39  ;;  %14070 = vmatpush1.bf16.msra.mxu1 %v17818_v23  ;;  %v10425_v22 = vmax.f32 %v16582_v10, 0.0  ;;  %13647 = vmatprep.subr.bf16.mxu0 %v17823_v2  ;;  %v17830_v23 = vld [vmem:[#allocation14 + $0x2e8] ss:$16 sps:$4 sm:$0xff]   ;;  %v17835_v2 = vld [vmem:[#allocation14 + $0x304] ss:$16 sps:$4 sm:$0xff]  }
 0xb3e   :  { %v20382_v17 = vpack.c.bf16 %v10424_v45, %v10408_v50  ;;  %v20384_v3 = vpack.c.bf16 %v10423_v14, %v10407_v48  ;;  %14071 = vmatprep.subr.bf16.mxu1 %v17826_v58  ;;  %v10071_v1 = vpop.f32.mrb[116].mxu0  ;;  %v17838_v58 = vld [vmem:[#allocation14 + $0x30c] ss:$16 sps:$4 sm:$0xff]  }
 0xb3f   :  { %v20386_v30 = vpack.c.bf16 %v10425_v22, %v10409_v26  ;;  %v16575_v43 = vadd.f32 %v10071_v1, %v20358_v44  ;;  %v10177_v63 = vpop.f32.mrb[116].mxu1  ;;  %v10073_v34 = vpop.f32.mrb[117].mxu0 }
 0xb40   :  { %13648 = vmatpush1.bf16.msra.mxu0 %v17821_v59  ;;  %v16583_v62 = vadd.f32 %v10177_v63, %v20362_v61  ;;  %v16576_v33 = vadd.f32 %v10073_v34, %v20366_v0  ;;  %v10179_v57 = vpop.f32.mrb[117].mxu1  ;;  %v10075_v18 = vpop.f32.mrb[118].mxu0  ;;  %v17847_v63 = vld [vmem:[#allocation14 + $0x344] ss:$16 sps:$4 sm:$0xff]   ;;  %v17850_v34 = vld [vmem:[#allocation14 + $0x34c] ss:$16 sps:$4 sm:$0xff]  }
 0xb41   :  { %14072 = vmatpush1.bf16.msra.mxu1 %v17824_v25  ;;  %v16584_v13 = vadd.f32 %v10179_v57, %v20370_v40  ;;  %13649 = vmatprep.subr.bf16.mxu0 %v17829_v55  ;;  %v16577_v16 = vadd.f32 %v10075_v18, %v20358_v44  ;;  %v10181_v24 = vpop.f32.mrb[118].mxu1  ;;  %v10077_v41 = vpop.f32.mrb[119].mxu0  ;;  %v10438_v39 = vmax.f32 %v16575_v43, 0.0  ;;  %v17833_v44 = vld [vmem:[#allocation14 + $0x300] ss:$16 sps:$4 sm:$0xff]  }
 0xb42   :  { %14073 = vmatprep.subr.bf16.mxu1 %v17832_v31  ;;  %v16585_v56 = vadd.f32 %v10181_v24, %v20362_v61  ;;  %v16578_v38 = vadd.f32 %v10077_v41, %v20366_v0  ;;  %v10183_v9 = vpop.f32.mrb[119].mxu1  ;;  %v10440_v50 = vmax.f32 %v16583_v62, 0.0  ;;  %v10439_v48 = vmax.f32 %v16576_v33, 0.0  ;;  %v17836_v61 = vld [vmem:[#allocation14 + $0x308] ss:$16 sps:$4 sm:$0xff]  }
 0xb43   :  { %v10454_v4 = vmax.f32 %v16577_v16, 0.0  ;;  %v16586_v10 = vadd.f32 %v10183_v9, %v20370_v40  ;;  %v10441_v59 = vmax.f32 %v16584_v13, 0.0  ;;  %v17841_v0 = vld [vmem:[#allocation14 + $0x324] ss:$16 sps:$4 sm:$0xff]   ;;  %v17844_v40 = vld [vmem:[#allocation14 + $0x32c] ss:$16 sps:$4 sm:$0xff]  }
 0xb44   :  { %v10456_v45 = vmax.f32 %v16585_v56, 0.0  ;;  %13650 = vmatpush1.bf16.msra.mxu0 %v17827_v21  ;;  %v10455_v14 = vmax.f32 %v16578_v38, 0.0  ;;  %v17839_v31 = vld [vmem:[#allocation14 + $0x320] ss:$16 sps:$4 sm:$0xff]   ;;  %v17842_v43 = vld [vmem:[#allocation14 + $0x328] ss:$16 sps:$4 sm:$0xff]  }
 0xb45   :  { %v20396_v26 = vpack.c.bf16 %v10454_v4, %v10438_v39  ;;  %14074 = vmatpush1.bf16.msra.mxu1 %v17830_v23  ;;  %v10457_v22 = vmax.f32 %v16586_v10, 0.0  ;;  %13651 = vmatprep.subr.bf16.mxu0 %v17835_v2  ;;  %v17845_v62 = vld [vmem:[#allocation14 + $0x340] ss:$16 sps:$4 sm:$0xff]   ;;  %v17848_v33 = vld [vmem:[#allocation14 + $0x348] ss:$16 sps:$4 sm:$0xff]  }
 0xb46   :  { %v20398_v25 = vpack.c.bf16 %v10456_v45, %v10440_v50  ;;  %v20400_v55 = vpack.c.bf16 %v10455_v14, %v10439_v48  ;;  %14075 = vmatprep.subr.bf16.mxu1 %v17838_v58  ;;  %v17853_v57 = vld [vmem:[#allocation14 + $0x364] ss:$16 sps:$4 sm:$0xff]   ;;  %v17856_v21 = vld [vmem:[#allocation14 + $0x36c] ss:$16 sps:$4 sm:$0xff]   ;;  %v17851_v18 = vld [vmem:[#allocation14 + $0x360] ss:$16 sps:$4 sm:$0xff]  }
 0xb47   :  { %v20402_v1 = vpack.c.bf16 %v10457_v22, %v10441_v59  ;;  %v17854_v13 = vld [vmem:[#allocation14 + $0x368] ss:$16 sps:$4 sm:$0xff]   ;;  %v17859_v23 = vld [vmem:[#allocation14 + $0x384] ss:$16 sps:$4 sm:$0xff]   ;;  %v17862_v16 = vld [vmem:[#allocation14 + $0x38c] ss:$16 sps:$4 sm:$0xff]  }
 0xb48   :  { %13652 = vmatpush1.bf16.msra.mxu0 %v17833_v44  ;;  %v17857_v24 = vld [vmem:[#allocation14 + $0x380] ss:$16 sps:$4 sm:$0xff]   ;;  %v17860_v41 = vld [vmem:[#allocation14 + $0x388] ss:$16 sps:$4 sm:$0xff]   ;;  %v17865_v2 = vld [vmem:[#allocation14 + $0x3a4] ss:$16 sps:$4 sm:$0xff]  }
 0xb49   :  { %14076 = vmatpush1.bf16.msra.mxu1 %v17836_v61  ;;  %13653 = vmatprep.subr.bf16.mxu0 %v17841_v0  ;;  %v17868_v56 = vld [vmem:[#allocation14 + $0x3ac] ss:$16 sps:$4 sm:$0xff]   ;;  %v17863_v38 = vld [vmem:[#allocation14 + $0x3a0] ss:$16 sps:$4 sm:$0xff]   ;;  %v17866_v9 = vld [vmem:[#allocation14 + $0x3a8] ss:$16 sps:$4 sm:$0xff]  }
 0xb4a   :  { %14077 = vmatprep.subr.bf16.mxu1 %v17844_v40  ;;  %v17871_v58 = vld [vmem:[#allocation14 + $0x3c4] ss:$16 sps:$4 sm:$0xff]   ;;  %v17874_v39 = vld [vmem:[#allocation14 + $0x3cc] ss:$16 sps:$4 sm:$0xff]   ;;  %v17869_v4 = vld [vmem:[#allocation14 + $0x3c0] ss:$16 sps:$4 sm:$0xff]  }
 0xb4b   :  { %v17872_v10 = vld [vmem:[#allocation14 + $0x3c8] ss:$16 sps:$4 sm:$0xff]   ;;  %v17877_v50 = vld [vmem:[#allocation14 + $0x3e4] ss:$16 sps:$4 sm:$0xff]   ;;  %v17880_v48 = vld [vmem:[#allocation14 + $0x3ec] ss:$16 sps:$4 sm:$0xff]  }
 0xb4c   :  { %13654 = vmatpush1.bf16.msra.mxu0 %v17839_v31  ;;  %v17875_v45 = vld [vmem:[#allocation14 + $0x3e0] ss:$16 sps:$4 sm:$0xff]   ;;  %v17878_v14 = vld [vmem:[#allocation14 + $0x3e8] ss:$16 sps:$4 sm:$0xff]   ;;  %v17883_v44 = vld [vmem:[#allocation14 + $0x404] ss:$16 sps:$4 sm:$0xff]  }
 0xb4d   :  { %14078 = vmatpush1.bf16.msra.mxu1 %v17842_v43  ;;  %13655 = vmatprep.subr.bf16.mxu0 %v17847_v63  ;;  %v17886_v59 = vld [vmem:[#allocation14 + $0x40c] ss:$16 sps:$4 sm:$0xff]   ;;  %v17881_v22 = vld [vmem:[#allocation14 + $0x400] ss:$16 sps:$4 sm:$0xff]   ;;  %v17884_v61 = vld [vmem:[#allocation14 + $0x408] ss:$16 sps:$4 sm:$0xff]  }
 0xb4e   :  { %14079 = vmatprep.subr.bf16.mxu1 %v17850_v34  ;;  %v17889_v0 = vld [vmem:[#allocation14 + $0x424] ss:$16 sps:$4 sm:$0xff]   ;;  %v17892_v40 = vld [vmem:[#allocation14 + $0x42c] ss:$16 sps:$4 sm:$0xff]   ;;  %v17887_v31 = vld [vmem:[#allocation14 + $0x420] ss:$16 sps:$4 sm:$0xff]  }
 0xb4f   :  { %v17890_v43 = vld [vmem:[#allocation14 + $0x428] ss:$16 sps:$4 sm:$0xff]   ;;  %v17895_v63 = vld [vmem:[#allocation14 + $0x444] ss:$16 sps:$4 sm:$0xff]   ;;  %v17898_v34 = vld [vmem:[#allocation14 + $0x44c] ss:$16 sps:$4 sm:$0xff]  }
 0xb50   :  { %13656 = vmatpush1.bf16.msra.mxu0 %v17845_v62  ;;  %v17893_v62 = vld [vmem:[#allocation14 + $0x440] ss:$16 sps:$4 sm:$0xff]  }
 0xb51   :  { %14080 = vmatpush1.bf16.msra.mxu1 %v17848_v33  ;;  %13657 = vmatprep.subr.bf16.mxu0 %v17853_v57  ;;  %v17896_v33 = vld [vmem:[#allocation14 + $0x448] ss:$16 sps:$4 sm:$0xff]   ;;  %v17901_v57 = vld [vmem:[#allocation14 + $0x464] ss:$16 sps:$4 sm:$0xff]  }
 0xb52   :  { %14081 = vmatprep.subr.bf16.mxu1 %v17856_v21  ;;  %v17902_v21 = vld [vmem:[#allocation14 + $0x468] ss:$16 sps:$4 sm:$0xff]  }
 0xb54   :  { %13658 = vmatpush1.bf16.msra.mxu0 %v17851_v18  ;;  %v17907_v18 = vld [vmem:[#allocation14 + $0x484] ss:$16 sps:$4 sm:$0xff]  }
 0xb55   :  { %14082 = vmatpush1.bf16.msra.mxu1 %v17854_v13  ;;  %13659 = vmatprep.subr.bf16.mxu0 %v17859_v23  ;;  %v17910_v13 = vld [vmem:[#allocation14 + $0x48c] ss:$16 sps:$4 sm:$0xff]   ;;  %v17905_v23 = vld [vmem:[#allocation14 + $0x480] ss:$16 sps:$4 sm:$0xff]  }
 0xb56   :  { %14083 = vmatprep.subr.bf16.mxu1 %v17862_v16  ;;  %v17908_v16 = vld [vmem:[#allocation14 + $0x488] ss:$16 sps:$4 sm:$0xff]  }
 0xb58   :  { %13660 = vmatpush1.bf16.msra.mxu0 %v17857_v24  ;;  %v17913_v24 = vld [vmem:[#allocation14 + $0x4a4] ss:$16 sps:$4 sm:$0xff]  }
 0xb59   :  { %14084 = vmatpush1.bf16.msra.mxu1 %v17860_v41  ;;  %13661 = vmatprep.subr.bf16.mxu0 %v17865_v2  ;;  %v17911_v41 = vld [vmem:[#allocation14 + $0x4a0] ss:$16 sps:$4 sm:$0xff]   ;;  %v17919_v2 = vld [vmem:[#allocation14 + $0x4c4] ss:$16 sps:$4 sm:$0xff]  }
 0xb5a   :  { %14085 = vmatprep.subr.bf16.mxu1 %v17868_v56  ;;  %v17922_v56 = vld [vmem:[#allocation14 + $0x4cc] ss:$16 sps:$4 sm:$0xff]  }
 0xb5c   :  { %13662 = vmatpush1.bf16.msra.mxu0 %v17863_v38  ;;  %v17917_v38 = vld [vmem:[#allocation14 + $0x4c0] ss:$16 sps:$4 sm:$0xff]  }
 0xb5d   :  { %14086 = vmatpush1.bf16.msra.mxu1 %v17866_v9  ;;  %13663 = vmatprep.subr.bf16.mxu0 %v17871_v58  ;;  %v17920_v9 = vld [vmem:[#allocation14 + $0x4c8] ss:$16 sps:$4 sm:$0xff]   ;;  %v17925_v58 = vld [vmem:[#allocation14 + $0x4e4] ss:$16 sps:$4 sm:$0xff]  }
 0xb5e   :  { %14087 = vmatprep.subr.bf16.mxu1 %v17874_v39  ;;  %v17928_v39 = vld [vmem:[#allocation14 + $0x4ec] ss:$16 sps:$4 sm:$0xff]  }
 0xb60   :  { %13664 = vmatpush1.bf16.msra.mxu0 %v17869_v4  ;;  %v17923_v4 = vld [vmem:[#allocation14 + $0x4e0] ss:$16 sps:$4 sm:$0xff]  }
 0xb61   :  { %14088 = vmatpush1.bf16.msra.mxu1 %v17872_v10  ;;  %13665 = vmatprep.subr.bf16.mxu0 %v17877_v50  ;;  %v17926_v10 = vld [vmem:[#allocation14 + $0x4e8] ss:$16 sps:$4 sm:$0xff]   ;;  %v17931_v50 = vld [vmem:[#allocation14 + $0x504] ss:$16 sps:$4 sm:$0xff]  }
 0xb62   :  { %14089 = vmatprep.subr.bf16.mxu1 %v17880_v48  ;;  %v17934_v48 = vld [vmem:[#allocation14 + $0x50c] ss:$16 sps:$4 sm:$0xff]  }
 0xb64   :  { %13666 = vmatpush1.bf16.msra.mxu0 %v17875_v45  ;;  %v17929_v45 = vld [vmem:[#allocation14 + $0x500] ss:$16 sps:$4 sm:$0xff]  }
 0xb65   :  { %14090 = vmatpush1.bf16.msra.mxu1 %v17878_v14  ;;  %13688 = vmatprep.subr.bf16.mxu0 %v17883_v44  ;;  %v17932_v14 = vld [vmem:[#allocation14 + $0x508] ss:$16 sps:$4 sm:$0xff]   ;;  %v17937_v44 = vld [vmem:[#allocation14 + $0x524] ss:$16 sps:$4 sm:$0xff]  }
 0xb66   :  { %14112 = vmatprep.subr.bf16.mxu1 %v17886_v59  ;;  %v17940_v59 = vld [vmem:[#allocation14 + $0x52c] ss:$16 sps:$4 sm:$0xff]  }
 0xb67   :  { %13668 = vmatmul.mubr.bf16.vlgmr.msra.gmra.mrb[128].mxu0 %v20246_v47 }
 0xb68   :  { %14092 = vmatmul.mubr.bf16.vlgmr.msra.gmra.mrb[128].mxu1 %v20246_v47  ;;  %13677 = vmatprep.mubr.bf16.mxu0 %v20268_v27  ;;  %v17904_v47 = vld [vmem:[#allocation14 + $0x46c] ss:$16 sps:$4 sm:$0xff]  }
 0xb69   :  { %13689 = vmatpush1.bf16.msra.mxu0 %v17881_v22  ;;  %14101 = vmatprep.mubr.bf16.mxu1 %v20268_v27  ;;  %v17899_v27 = vld [vmem:[#allocation14 + $0x460] ss:$16 sps:$4 sm:$0xff]  }
 0xb6a   :  { %14113 = vmatpush1.bf16.msra.mxu1 %v17884_v61  ;;  %13690 = vmatprep.subr.bf16.mxu0 %v17889_v0  ;;  %v17935_v22 = vld [vmem:[#allocation14 + $0x520] ss:$16 sps:$4 sm:$0xff]   ;;  %v17938_v61 = vld [vmem:[#allocation14 + $0x528] ss:$16 sps:$4 sm:$0xff]   ;;  %v17943_v0 = vld [vmem:[#allocation14 + $0x544] ss:$16 sps:$4 sm:$0xff]  }
 0xb6b   :  { %14114 = vmatprep.subr.bf16.mxu1 %v17892_v40  ;;  %v17946_v40 = vld [vmem:[#allocation14 + $0x54c] ss:$16 sps:$4 sm:$0xff]  }
 0xb6d   :  { %13691 = vmatpush1.bf16.msra.mxu0 %v17887_v31  ;;  %v17941_v31 = vld [vmem:[#allocation14 + $0x540] ss:$16 sps:$4 sm:$0xff]  }
 0xb6e   :  { %14115 = vmatpush1.bf16.msra.mxu1 %v17890_v43  ;;  %13692 = vmatprep.subr.bf16.mxu0 %v17895_v63  ;;  %v17944_v43 = vld [vmem:[#allocation14 + $0x548] ss:$16 sps:$4 sm:$0xff]   ;;  %v17949_v63 = vld [vmem:[#allocation14 + $0x564] ss:$16 sps:$4 sm:$0xff]  }
 0xb6f   :  { %13678 = vmatmul.mubr.bf16.gmra.mrb[132].mxu0 %v20264_v53  ;;  %14116 = vmatprep.subr.bf16.mxu1 %v17898_v34  ;;  %v17952_v34 = vld [vmem:[#allocation14 + $0x56c] ss:$16 sps:$4 sm:$0xff]  }
 0xb70   :  { %14102 = vmatmul.mubr.bf16.gmra.mrb[132].mxu1 %v20264_v53  ;;  %13720 = vmatprep.mubr.bf16.mxu0 %v20317_v11  ;;  %v17916_v53 = vld [vmem:[#allocation14 + $0x4ac] ss:$16 sps:$4 sm:$0xff]  }
 0xb71   :  { %13693 = vmatpush1.bf16.msra.mxu0 %v17893_v62  ;;  %14144 = vmatprep.mubr.bf16.mxu1 %v20317_v11  ;;  %v17914_v11 = vld [vmem:[#allocation14 + $0x4a8] ss:$16 sps:$4 sm:$0xff]   ;;  %v17947_v62 = vld [vmem:[#allocation14 + $0x560] ss:$16 sps:$4 sm:$0xff]  }
 0xb72   :  { %14117 = vmatpush1.bf16.msra.mxu1 %v17896_v33  ;;  %13694 = vmatprep.subr.bf16.mxu0 %v17901_v57  ;;  %v17950_v33 = vld [vmem:[#allocation14 + $0x568] ss:$16 sps:$4 sm:$0xff]   ;;  %v17955_v57 = vld [vmem:[#allocation14 + $0x584] ss:$16 sps:$4 sm:$0xff]  }
 0xb73   :  { %14118 = vmatprep.subr.bf16.mxu1 %v17904_v47  ;;  %v17958_v47 = vld [vmem:[#allocation14 + $0x58c] ss:$16 sps:$4 sm:$0xff]  }
 0xb75   :  { %13695 = vmatpush1.bf16.msra.mxu0 %v17899_v27  ;;  %v17953_v27 = vld [vmem:[#allocation14 + $0x580] ss:$16 sps:$4 sm:$0xff]  }
 0xb76   :  { %14119 = vmatpush1.bf16.msra.mxu1 %v17902_v21  ;;  %13696 = vmatprep.subr.bf16.mxu0 %v17907_v18  ;;  %v17956_v21 = vld [vmem:[#allocation14 + $0x588] ss:$16 sps:$4 sm:$0xff]   ;;  %v17961_v18 = vld [vmem:[#allocation14 + $0x5a4] ss:$16 sps:$4 sm:$0xff]  }
 0xb77   :  { %14120 = vmatprep.subr.bf16.mxu1 %v17910_v13  ;;  %v17964_v13 = vld [vmem:[#allocation14 + $0x5ac] ss:$16 sps:$4 sm:$0xff]  }
 0xb79   :  { %13697 = vmatpush1.bf16.msra.mxu0 %v17905_v23  ;;  %v17959_v23 = vld [vmem:[#allocation14 + $0x5a0] ss:$16 sps:$4 sm:$0xff]  }
 0xb7a   :  { %14121 = vmatpush1.bf16.msra.mxu1 %v17908_v16  ;;  %13698 = vmatprep.subr.bf16.mxu0 %v17913_v24  ;;  %v17962_v16 = vld [vmem:[#allocation14 + $0x5a8] ss:$16 sps:$4 sm:$0xff]   ;;  %v17967_v24 = vld [vmem:[#allocation14 + $0x5c4] ss:$16 sps:$4 sm:$0xff]  }
 0xb7b   :  { %14122 = vmatprep.subr.bf16.mxu1 %v17916_v53  ;;  %v17970_v53 = vld [vmem:[#allocation14 + $0x5cc] ss:$16 sps:$4 sm:$0xff]  }
 0xb7d   :  { %13699 = vmatpush1.bf16.msra.mxu0 %v17911_v41  ;;  %v17965_v41 = vld [vmem:[#allocation14 + $0x5c0] ss:$16 sps:$4 sm:$0xff]  }
 0xb7e   :  { %14123 = vmatpush1.bf16.msra.mxu1 %v17914_v11  ;;  %13700 = vmatprep.subr.bf16.mxu0 %v17919_v2  ;;  %v17968_v11 = vld [vmem:[#allocation14 + $0x5c8] ss:$16 sps:$4 sm:$0xff]   ;;  %v17973_v2 = vld [vmem:[#allocation14 + $0x5e4] ss:$16 sps:$4 sm:$0xff]  }
 0xb7f   :  { %14124 = vmatprep.subr.bf16.mxu1 %v17922_v56  ;;  %v17976_v56 = vld [vmem:[#allocation14 + $0x5ec] ss:$16 sps:$4 sm:$0xff]  }
 0xb81   :  { %13701 = vmatpush1.bf16.msra.mxu0 %v17917_v38  ;;  %v17971_v38 = vld [vmem:[#allocation14 + $0x5e0] ss:$16 sps:$4 sm:$0xff]  }
 0xb82   :  { %14125 = vmatpush1.bf16.msra.mxu1 %v17920_v9  ;;  %13702 = vmatprep.subr.bf16.mxu0 %v17925_v58  ;;  %v17974_v9 = vld [vmem:[#allocation14 + $0x5e8] ss:$16 sps:$4 sm:$0xff]   ;;  %v17979_v58 = vld [vmem:[#allocation14 + $0x604] ss:$16 sps:$4 sm:$0xff]  }
 0xb83   :  { %14126 = vmatprep.subr.bf16.mxu1 %v17928_v39  ;;  %v17982_v39 = vld [vmem:[#allocation14 + $0x60c] ss:$16 sps:$4 sm:$0xff]  }
 0xb85   :  { %13703 = vmatpush1.bf16.msra.mxu0 %v17923_v4  ;;  %v17977_v4 = vld [vmem:[#allocation14 + $0x600] ss:$16 sps:$4 sm:$0xff]  }
 0xb86   :  { %14127 = vmatpush1.bf16.msra.mxu1 %v17926_v10  ;;  %13704 = vmatprep.subr.bf16.mxu0 %v17931_v50  ;;  %v17980_v10 = vld [vmem:[#allocation14 + $0x608] ss:$16 sps:$4 sm:$0xff]   ;;  %v17985_v50 = vld [vmem:[#allocation14 + $0x624] ss:$16 sps:$4 sm:$0xff]  }
 0xb87   :  { %14128 = vmatprep.subr.bf16.mxu1 %v17934_v48  ;;  %v17988_v48 = vld [vmem:[#allocation14 + $0x62c] ss:$16 sps:$4 sm:$0xff]  }
 0xb89   :  { %13705 = vmatpush1.bf16.msra.mxu0 %v17929_v45  ;;  %v17983_v45 = vld [vmem:[#allocation14 + $0x620] ss:$16 sps:$4 sm:$0xff]  }
 0xb8a   :  { %14129 = vmatpush1.bf16.msra.mxu1 %v17932_v14  ;;  %13706 = vmatprep.subr.bf16.mxu0 %v17937_v44  ;;  %v17986_v14 = vld [vmem:[#allocation14 + $0x628] ss:$16 sps:$4 sm:$0xff]   ;;  %v17991_v44 = vld [vmem:[#allocation14 + $0x644] ss:$16 sps:$4 sm:$0xff]  }
 0xb8b   :  { %14130 = vmatprep.subr.bf16.mxu1 %v17940_v59  ;;  %v17994_v59 = vld [vmem:[#allocation14 + $0x64c] ss:$16 sps:$4 sm:$0xff]  }
 0xb8d   :  { %13707 = vmatpush1.bf16.msra.mxu0 %v17935_v22  ;;  %v17989_v22 = vld [vmem:[#allocation14 + $0x640] ss:$16 sps:$4 sm:$0xff]  }
 0xb8e   :  { %14131 = vmatpush1.bf16.msra.mxu1 %v17938_v61  ;;  %13708 = vmatprep.subr.bf16.mxu0 %v17943_v0  ;;  %v17992_v61 = vld [vmem:[#allocation14 + $0x648] ss:$16 sps:$4 sm:$0xff]   ;;  %v17997_v0 = vld [vmem:[#allocation14 + $0x664] ss:$16 sps:$4 sm:$0xff]  }
 0xb8f   :  { %14132 = vmatprep.subr.bf16.mxu1 %v17946_v40  ;;  %v17998_v40 = vld [vmem:[#allocation14 + $0x668] ss:$16 sps:$4 sm:$0xff]  }
 0xb91   :  { %13709 = vmatpush1.bf16.msra.mxu0 %v17941_v31  ;;  %v18003_v31 = vld [vmem:[#allocation14 + $0x684] ss:$16 sps:$4 sm:$0xff]  }
 0xb92   :  { %14133 = vmatpush1.bf16.msra.mxu1 %v17944_v43  ;;  %13710 = vmatprep.subr.bf16.mxu0 %v17949_v63  ;;  %v18006_v43 = vld [vmem:[#allocation14 + $0x68c] ss:$16 sps:$4 sm:$0xff]   ;;  %v20422_v63 = vrot.slane %v20354_v12, %v19144_v46 }
 0xb93   :  { %14134 = vmatprep.subr.bf16.mxu1 %v17952_v34  ;;  %v18001_v34 = vld [vmem:[#allocation14 + $0x680] ss:$16 sps:$4 sm:$0xff]  }
 0xb95   :  { %13711 = vmatpush1.bf16.msra.mxu0 %v17947_v62  ;;  %v18004_v62 = vld [vmem:[#allocation14 + $0x688] ss:$16 sps:$4 sm:$0xff]  }
 0xb96   :  { %14135 = vmatpush1.bf16.msra.mxu1 %v17950_v33  ;;  %13712 = vmatprep.subr.bf16.mxu0 %v17955_v57  ;;  %v20434_v33 = vrot.slane %v20354_v12, %v19153_v51  ;;  %v18009_v57 = vld [vmem:[#allocation14 + $0x6a4] ss:$16 sps:$4 sm:$0xff]  }
 0xb97   :  { %14136 = vmatprep.subr.bf16.mxu1 %v17958_v47 }
 0xb99   :  { %13713 = vmatpush1.bf16.msra.mxu0 %v17953_v27  ;;  %v18012_v27 = vld [vmem:[#allocation14 + $0x6ac] ss:$16 sps:$4 sm:$0xff]  }
 0xb9a   :  { %14137 = vmatpush1.bf16.msra.mxu1 %v17956_v21  ;;  %13714 = vmatprep.subr.bf16.mxu0 %v17961_v18 }
 0xb9b   :  { %14138 = vmatprep.subr.bf16.mxu1 %v17964_v13 }
 0xb9d   :  { %13715 = vmatpush1.bf16.msra.mxu0 %v17959_v23 }
 0xb9e   :  { %14139 = vmatpush1.bf16.msra.mxu1 %v17962_v16  ;;  %13716 = vmatprep.subr.bf16.mxu0 %v17967_v24  ;;  %v18007_v24 = vld [vmem:[#allocation14 + $0x6a0] ss:$16 sps:$4 sm:$0xff]  }
 0xb9f   :  { %14140 = vmatprep.subr.bf16.mxu1 %v17970_v53 }
 0xba1   :  { %13717 = vmatpush1.bf16.msra.mxu0 %v17965_v41 }
 0xba2   :  { %14141 = vmatpush1.bf16.msra.mxu1 %v17968_v11  ;;  %13718 = vmatprep.subr.bf16.mxu0 %v17973_v2 }
 0xba3   :  { %14142 = vmatprep.subr.bf16.mxu1 %v17976_v56  ;;  %v18015_v56 = vld [vmem:[#allocation14 + $0x6c4] ss:$16 sps:$4 sm:$0xff]  }
 0xba5   :  { %13719 = vmatpush1.bf16.msra.mxu0 %v17971_v38 }
 0xba6   :  { %14143 = vmatpush1.bf16.msra.mxu1 %v17974_v9  ;;  %13741 = vmatprep.subr.bf16.mxu0 %v17979_v58 }
 0xba7   :  { %14165 = vmatprep.subr.bf16.mxu1 %v17982_v39  ;;  %v18018_v39 = vld [vmem:[#allocation14 + $0x6cc] ss:$16 sps:$4 sm:$0xff]  }
 0xba8   :  { %13721 = vmatmul.mubr.bf16.vlgmr.msra.gmra.mrb[128].mxu0 %v20312_v15 }
 0xba9   :  { %14145 = vmatmul.mubr.bf16.vlgmr.msra.gmra.mrb[128].mxu1 %v20312_v15  ;;  %13730 = vmatprep.mubr.bf16.mxu0 %v20334_v7  ;;  %v18000_v15 = vld [vmem:[#allocation14 + $0x66c] ss:$16 sps:$4 sm:$0xff]  }
 0xbaa   :  { %13742 = vmatpush1.bf16.msra.mxu0 %v17977_v4  ;;  %14154 = vmatprep.mubr.bf16.mxu1 %v20334_v7  ;;  %v17995_v7 = vld [vmem:[#allocation14 + $0x660] ss:$16 sps:$4 sm:$0xff]  }
 0xbab   :  { %14166 = vmatpush1.bf16.msra.mxu1 %v17980_v10  ;;  %13743 = vmatprep.subr.bf16.mxu0 %v17985_v50 }
 0xbac   :  { %14167 = vmatprep.subr.bf16.mxu1 %v17988_v48 }
 0xbae   :  { %13744 = vmatpush1.bf16.msra.mxu0 %v17983_v45 }
 0xbaf   :  { %14168 = vmatpush1.bf16.msra.mxu1 %v17986_v14  ;;  %13745 = vmatprep.subr.bf16.mxu0 %v17991_v44 }
 0xbb0   :  { %13731 = vmatmul.mubr.bf16.gmra.mrb[132].mxu0 %v20330_v19  ;;  %14169 = vmatprep.subr.bf16.mxu1 %v17994_v59  ;;  %v18013_v59 = vld [vmem:[#allocation14 + $0x6c0] ss:$16 sps:$4 sm:$0xff]  }
 0xbb1   :  { %14155 = vmatmul.mubr.bf16.gmra.mrb[132].mxu1 %v20330_v19  ;;  %13773 = vmatprep.mubr.bf16.mxu0 %v20319_v32  ;;  %v20426_v19 = vrot.slane %v20354_v12, %v19150_v28 }
 0xbb2   :  { %13746 = vmatpush1.bf16.msra.mxu0 %v17989_v22  ;;  %14197 = vmatprep.mubr.bf16.mxu1 %v20319_v32  ;;  %v20430_v32 = vrot.slane %v20354_v12, %v19147_v5  ;;  %v18010_v12 = vld [vmem:[#allocation14 + $0x6a8] ss:$16 sps:$4 sm:$0xff]  }
 0xbb3   :  { %14170 = vmatpush1.bf16.msra.mxu1 %v17992_v61  ;;  %13747 = vmatprep.subr.bf16.mxu0 %v17997_v0 }
 0xbb4   :  { %14171 = vmatprep.subr.bf16.mxu1 %v18000_v15  ;;  %v18016_v15 = vld [vmem:[#allocation14 + $0x6c8] ss:$16 sps:$4 sm:$0xff]  }
 0xbb6   :  { %13748 = vmatpush1.bf16.msra.mxu0 %v17995_v7  ;;  %v18021_v7 = vld [vmem:[#allocation14 + $0x6e4] ss:$16 sps:$4 sm:$0xff]  }
 0xbb7   :  { %14172 = vmatpush1.bf16.msra.mxu1 %v17998_v40  ;;  %13749 = vmatprep.subr.bf16.mxu0 %v18003_v31 }
 0xbb8   :  { %14173 = vmatprep.subr.bf16.mxu1 %v18006_v43  ;;  %v10273_v47 = vpop.f32.mrb[120].mxu0 }
 0xbb9   :  { %v16587_v21 = vadd.f32 %v10273_v47, %v20422_v63  ;;  %v10379_v18 = vpop.f32.mrb[120].mxu1  ;;  %v10275_v28 = vpop.f32.mrb[121].mxu0 }
 0xbba   :  { %13750 = vmatpush1.bf16.msra.mxu0 %v18001_v34  ;;  %v16595_v13 = vadd.f32 %v10379_v18, %v20426_v19  ;;  %v16588_v23 = vadd.f32 %v10275_v28, %v20430_v32  ;;  %v10381_v16 = vpop.f32.mrb[121].mxu1  ;;  %v10277_v53 = vpop.f32.mrb[122].mxu0  ;;  %v18024_v34 = vld [vmem:[#allocation14 + $0x6ec] ss:$16 sps:$4 sm:$0xff]  }
 0xbbb   :  { %14174 = vmatpush1.bf16.msra.mxu1 %v18004_v62  ;;  %v16596_v51 = vadd.f32 %v10381_v16, %v20434_v33  ;;  %13751 = vmatprep.subr.bf16.mxu0 %v18009_v57  ;;  %v16589_v41 = vadd.f32 %v10277_v53, %v20422_v63  ;;  %v10383_v11 = vpop.f32.mrb[122].mxu1  ;;  %v10279_v2 = vpop.f32.mrb[123].mxu0  ;;  %v10410_v4 = vmax.f32 %v16587_v21, 0.0 }
 0xbbc   :  { %14175 = vmatprep.subr.bf16.mxu1 %v18012_v27  ;;  %v16597_v38 = vadd.f32 %v10383_v11, %v20426_v19  ;;  %v16590_v9 = vadd.f32 %v10279_v2, %v20430_v32  ;;  %v10385_v58 = vpop.f32.mrb[123].mxu1  ;;  %v10412_v48 = vmax.f32 %v16595_v13, 0.0  ;;  %v10411_v45 = vmax.f32 %v16588_v23, 0.0  ;;  %v18019_v13 = vld [vmem:[#allocation14 + $0x6e0] ss:$16 sps:$4 sm:$0xff]  }
 0xbbd   :  { %v10426_v10 = vmax.f32 %v16589_v41, 0.0  ;;  %v16598_v50 = vadd.f32 %v10385_v58, %v20434_v33  ;;  %v10413_v22 = vmax.f32 %v16596_v51, 0.0  ;;  %v18027_v41 = vld [vmem:[#allocation14 + $0x704] ss:$16 sps:$4 sm:$0xff]  }
 0xbbe   :  { %v10428_v14 = vmax.f32 %v16597_v38, 0.0  ;;  %13752 = vmatpush1.bf16.msra.mxu0 %v18007_v24  ;;  %v10427_v44 = vmax.f32 %v16590_v9, 0.0  ;;  %v18022_v24 = vld [vmem:[#allocation14 + $0x6e8] ss:$16 sps:$4 sm:$0xff]   ;;  %v18030_v38 = vld [vmem:[#allocation14 + $0x70c] ss:$16 sps:$4 sm:$0xff]  }
 0xbbf   :  { %v20444_v61 = vpack.c.bf16 %v10426_v10, %v10410_v4  ;;  %14176 = vmatpush1.bf16.msra.mxu1 %v18010_v12  ;;  %v10429_v0 = vmax.f32 %v16598_v50, 0.0  ;;  %13753 = vmatprep.subr.bf16.mxu0 %v18015_v56 }
 0xbc0   :  { %v20446_v40 = vpack.c.bf16 %v10428_v14, %v10412_v48  ;;  %v20448_v31 = vpack.c.bf16 %v10427_v44, %v10411_v45  ;;  %14177 = vmatprep.subr.bf16.mxu1 %v18018_v39  ;;  %v10283_v43 = vpop.f32.mrb[124].mxu0 }
 0xbc1   :  { %v20450_v62 = vpack.c.bf16 %v10429_v0, %v10413_v22  ;;  %v16591_v57 = vadd.f32 %v10283_v43, %v20422_v63  ;;  %v10389_v47 = vpop.f32.mrb[124].mxu1  ;;  %v10285_v27 = vpop.f32.mrb[125].mxu0  ;;  %v18039_v43 = vld [vmem:[#allocation14 + $0x744] ss:$16 sps:$4 sm:$0xff]  }
 0xbc2   :  { %13754 = vmatpush1.bf16.msra.mxu0 %v18013_v59  ;;  %v16599_v21 = vadd.f32 %v10389_v47, %v20426_v19  ;;  %v16592_v18 = vadd.f32 %v10285_v27, %v20430_v32  ;;  %v10391_v28 = vpop.f32.mrb[125].mxu1  ;;  %v10287_v23 = vpop.f32.mrb[126].mxu0  ;;  %v18040_v47 = vld [vmem:[#allocation14 + $0x748] ss:$16 sps:$4 sm:$0xff]   ;;  %v18045_v27 = vld [vmem:[#allocation14 + $0x764] ss:$16 sps:$4 sm:$0xff]  }
 0xbc3   :  { %14178 = vmatpush1.bf16.msra.mxu1 %v18016_v15  ;;  %v16600_v16 = vadd.f32 %v10391_v28, %v20434_v33  ;;  %13755 = vmatprep.subr.bf16.mxu0 %v18021_v7  ;;  %v16593_v53 = vadd.f32 %v10287_v23, %v20422_v63  ;;  %v10393_v51 = vpop.f32.mrb[126].mxu1  ;;  %v10289_v12 = vpop.f32.mrb[127].mxu0  ;;  %v10442_v9 = vmax.f32 %v16591_v57, 0.0  ;;  %v18025_v63 = vld [vmem:[#allocation14 + $0x700] ss:$16 sps:$4 sm:$0xff]  }
 0xbc4   :  { %14179 = vmatprep.subr.bf16.mxu1 %v18024_v34  ;;  %v16601_v11 = vadd.f32 %v10393_v51, %v20426_v19  ;;  %v16594_v2 = vadd.f32 %v10289_v12, %v20430_v32  ;;  %v10395_v56 = vpop.f32.mrb[127].mxu1  ;;  %v10444_v4 = vmax.f32 %v16599_v21, 0.0  ;;  %v10443_v10 = vmax.f32 %v16592_v18, 0.0  ;;  %v18028_v19 = vld [vmem:[#allocation14 + $0x708] ss:$16 sps:$4 sm:$0xff]  }
 0xbc5   :  { %v10458_v58 = vmax.f32 %v16593_v53, 0.0  ;;  %v16602_v39 = vadd.f32 %v10395_v56, %v20434_v33  ;;  %v10445_v45 = vmax.f32 %v16600_v16, 0.0  ;;  %v18033_v32 = vld [vmem:[#allocation14 + $0x724] ss:$16 sps:$4 sm:$0xff]   ;;  %v18036_v33 = vld [vmem:[#allocation14 + $0x72c] ss:$16 sps:$4 sm:$0xff]  }
 0xbc6   :  { %v10460_v50 = vmax.f32 %v16601_v11, 0.0  ;;  %13756 = vmatpush1.bf16.msra.mxu0 %v18019_v13  ;;  %v10459_v48 = vmax.f32 %v16594_v2, 0.0  ;;  %v18031_v15 = vld [vmem:[#allocation14 + $0x720] ss:$16 sps:$4 sm:$0xff]   ;;  %v18034_v7 = vld [vmem:[#allocation14 + $0x728] ss:$16 sps:$4 sm:$0xff]  }
 0xbc7   :  { %v20460_v14 = vpack.c.bf16 %v10458_v58, %v10442_v9  ;;  %14180 = vmatpush1.bf16.msra.mxu1 %v18022_v24  ;;  %v10461_v44 = vmax.f32 %v16602_v39, 0.0  ;;  %13757 = vmatprep.subr.bf16.mxu0 %v18027_v41  ;;  %v18042_v34 = vld [vmem:[#allocation14 + $0x74c] ss:$16 sps:$4 sm:$0xff]   ;;  %v18037_v57 = vld [vmem:[#allocation14 + $0x740] ss:$16 sps:$4 sm:$0xff]  }
 0xbc8   :  { %v20462_v59 = vpack.c.bf16 %v10460_v50, %v10444_v4  ;;  %v20464_v22 = vpack.c.bf16 %v10459_v48, %v10443_v10  ;;  %14181 = vmatprep.subr.bf16.mxu1 %v18030_v38  ;;  %v18048_v21 = vld [vmem:[#allocation14 + $0x76c] ss:$16 sps:$4 sm:$0xff]   ;;  %v18043_v18 = vld [vmem:[#allocation14 + $0x760] ss:$16 sps:$4 sm:$0xff]   ;;  %v18046_v28 = vld [vmem:[#allocation14 + $0x768] ss:$16 sps:$4 sm:$0xff]  }
 0xbc9   :  { %v20466_v0 = vpack.c.bf16 %v10461_v44, %v10445_v45  ;;  %v18051_v13 = vld [vmem:[#allocation14 + $0x784] ss:$16 sps:$4 sm:$0xff]   ;;  %v18054_v23 = vld [vmem:[#allocation14 + $0x78c] ss:$16 sps:$4 sm:$0xff]   ;;  %v18049_v16 = vld [vmem:[#allocation14 + $0x780] ss:$16 sps:$4 sm:$0xff]  }
 0xbca   :  { %13758 = vmatpush1.bf16.msra.mxu0 %v18025_v63  ;;  %v18052_v24 = vld [vmem:[#allocation14 + $0x788] ss:$16 sps:$4 sm:$0xff]   ;;  %v18057_v53 = vld [vmem:[#allocation14 + $0x7a4] ss:$16 sps:$4 sm:$0xff]   ;;  %v18060_v51 = vld [vmem:[#allocation14 + $0x7ac] ss:$16 sps:$4 sm:$0xff]  }
 0xbcb   :  { %14182 = vmatpush1.bf16.msra.mxu1 %v18028_v19  ;;  %13759 = vmatprep.subr.bf16.mxu0 %v18033_v32  ;;  %v18055_v12 = vld [vmem:[#allocation14 + $0x7a0] ss:$16 sps:$4 sm:$0xff]   ;;  %v18058_v41 = vld [vmem:[#allocation14 + $0x7a8] ss:$16 sps:$4 sm:$0xff]   ;;  %v18063_v11 = vld [vmem:[#allocation14 + $0x7c4] ss:$16 sps:$4 sm:$0xff]  }
 0xbcc   :  { %14183 = vmatprep.subr.bf16.mxu1 %v18036_v33  ;;  %v18066_v2 = vld [vmem:[#allocation14 + $0x7cc] ss:$16 sps:$4 sm:$0xff]   ;;  %v18061_v56 = vld [vmem:[#allocation14 + $0x7c0] ss:$16 sps:$4 sm:$0xff]   ;;  %v18064_v38 = vld [vmem:[#allocation14 + $0x7c8] ss:$16 sps:$4 sm:$0xff]  }
 0xbcd   :  { %v18069_v9 = vld [vmem:[#allocation14 + $0x7e4] ss:$16 sps:$4 sm:$0xff]   ;;  %v18072_v58 = vld [vmem:[#allocation14 + $0x7ec] ss:$16 sps:$4 sm:$0xff]   ;;  %v18067_v39 = vld [vmem:[#allocation14 + $0x7e0] ss:$16 sps:$4 sm:$0xff]  }
 0xbce   :  { %13760 = vmatpush1.bf16.msra.mxu0 %v18031_v15  ;;  %v18070_v4 = vld [vmem:[#allocation14 + $0x7e8] ss:$16 sps:$4 sm:$0xff]   ;;  %v18075_v10 = vld [vmem:[#allocation14 + $0x804] ss:$16 sps:$4 sm:$0xff]   ;;  %v18078_v50 = vld [vmem:[#allocation14 + $0x80c] ss:$16 sps:$4 sm:$0xff]  }
 0xbcf   :  { %14184 = vmatpush1.bf16.msra.mxu1 %v18034_v7  ;;  %13761 = vmatprep.subr.bf16.mxu0 %v18039_v43  ;;  %v18073_v48 = vld [vmem:[#allocation14 + $0x800] ss:$16 sps:$4 sm:$0xff]   ;;  %v18076_v63 = vld [vmem:[#allocation14 + $0x808] ss:$16 sps:$4 sm:$0xff]   ;;  %v18081_v45 = vld [vmem:[#allocation14 + $0x824] ss:$16 sps:$4 sm:$0xff]  }
 0xbd0   :  { %14185 = vmatprep.subr.bf16.mxu1 %v18042_v34  ;;  %v18084_v44 = vld [vmem:[#allocation14 + $0x82c] ss:$16 sps:$4 sm:$0xff]   ;;  %v18079_v19 = vld [vmem:[#allocation14 + $0x820] ss:$16 sps:$4 sm:$0xff]   ;;  %v18082_v32 = vld [vmem:[#allocation14 + $0x828] ss:$16 sps:$4 sm:$0xff]  }
 0xbd1   :  { %v18087_v33 = vld [vmem:[#allocation14 + $0x844] ss:$16 sps:$4 sm:$0xff]   ;;  %v18090_v15 = vld [vmem:[#allocation14 + $0x84c] ss:$16 sps:$4 sm:$0xff]   ;;  %v18085_v7 = vld [vmem:[#allocation14 + $0x840] ss:$16 sps:$4 sm:$0xff]  }
 0xbd2   :  { %13762 = vmatpush1.bf16.msra.mxu0 %v18037_v57  ;;  %v18088_v43 = vld [vmem:[#allocation14 + $0x848] ss:$16 sps:$4 sm:$0xff]   ;;  %v18093_v34 = vld [vmem:[#allocation14 + $0x864] ss:$16 sps:$4 sm:$0xff]  }
 0xbd3   :  { %14186 = vmatpush1.bf16.msra.mxu1 %v18040_v47  ;;  %13763 = vmatprep.subr.bf16.mxu0 %v18045_v27  ;;  %v18094_v57 = vld [vmem:[#allocation14 + $0x868] ss:$16 sps:$4 sm:$0xff]   ;;  %v18099_v47 = vld [vmem:[#allocation14 + $0x884] ss:$16 sps:$4 sm:$0xff]   ;;  %v18102_v27 = vld [vmem:[#allocation14 + $0x88c] ss:$16 sps:$4 sm:$0xff]  }
 0xbd4   :  { %14187 = vmatprep.subr.bf16.mxu1 %v18048_v21  ;;  %v18097_v21 = vld [vmem:[#allocation14 + $0x880] ss:$16 sps:$4 sm:$0xff]  }
 0xbd6   :  { %13764 = vmatpush1.bf16.msra.mxu0 %v18043_v18  ;;  %v18100_v18 = vld [vmem:[#allocation14 + $0x888] ss:$16 sps:$4 sm:$0xff]  }
 0xbd7   :  { %14188 = vmatpush1.bf16.msra.mxu1 %v18046_v28  ;;  %13765 = vmatprep.subr.bf16.mxu0 %v18051_v13  ;;  %v18105_v28 = vld [vmem:[#allocation14 + $0x8a4] ss:$16 sps:$4 sm:$0xff]   ;;  %v18103_v13 = vld [vmem:[#allocation14 + $0x8a0] ss:$16 sps:$4 sm:$0xff]  }
 0xbd8   :  { %14189 = vmatprep.subr.bf16.mxu1 %v18054_v23  ;;  %v18111_v23 = vld [vmem:[#allocation14 + $0x8c4] ss:$16 sps:$4 sm:$0xff]  }
 0xbda   :  { %13766 = vmatpush1.bf16.msra.mxu0 %v18049_v16  ;;  %v18114_v16 = vld [vmem:[#allocation14 + $0x8cc] ss:$16 sps:$4 sm:$0xff]  }
 0xbdb   :  { %14190 = vmatpush1.bf16.msra.mxu1 %v18052_v24  ;;  %13767 = vmatprep.subr.bf16.mxu0 %v18057_v53  ;;  %v18109_v24 = vld [vmem:[#allocation14 + $0x8c0] ss:$16 sps:$4 sm:$0xff]   ;;  %v18112_v53 = vld [vmem:[#allocation14 + $0x8c8] ss:$16 sps:$4 sm:$0xff]  }
 0xbdc   :  { %14191 = vmatprep.subr.bf16.mxu1 %v18060_v51  ;;  %v18117_v51 = vld [vmem:[#allocation14 + $0x8e4] ss:$16 sps:$4 sm:$0xff]  }
 0xbde   :  { %13768 = vmatpush1.bf16.msra.mxu0 %v18055_v12  ;;  %v18120_v12 = vld [vmem:[#allocation14 + $0x8ec] ss:$16 sps:$4 sm:$0xff]  }
 0xbdf   :  { %14192 = vmatpush1.bf16.msra.mxu1 %v18058_v41  ;;  %13769 = vmatprep.subr.bf16.mxu0 %v18063_v11  ;;  %v18115_v41 = vld [vmem:[#allocation14 + $0x8e0] ss:$16 sps:$4 sm:$0xff]   ;;  %v18118_v11 = vld [vmem:[#allocation14 + $0x8e8] ss:$16 sps:$4 sm:$0xff]  }
 0xbe0   :  { %14193 = vmatprep.subr.bf16.mxu1 %v18066_v2  ;;  %v18123_v2 = vld [vmem:[#allocation14 + $0x904] ss:$16 sps:$4 sm:$0xff]  }
 0xbe2   :  { %13770 = vmatpush1.bf16.msra.mxu0 %v18061_v56  ;;  %v18126_v56 = vld [vmem:[#allocation14 + $0x90c] ss:$16 sps:$4 sm:$0xff]  }
 0xbe3   :  { %14194 = vmatpush1.bf16.msra.mxu1 %v18064_v38  ;;  %13771 = vmatprep.subr.bf16.mxu0 %v18069_v9  ;;  %v18121_v38 = vld [vmem:[#allocation14 + $0x900] ss:$16 sps:$4 sm:$0xff]   ;;  %v18124_v9 = vld [vmem:[#allocation14 + $0x908] ss:$16 sps:$4 sm:$0xff]  }
 0xbe4   :  { %14195 = vmatprep.subr.bf16.mxu1 %v18072_v58  ;;  %v18129_v58 = vld [vmem:[#allocation14 + $0x924] ss:$16 sps:$4 sm:$0xff]  }
 0xbe6   :  { %13772 = vmatpush1.bf16.msra.mxu0 %v18067_v39  ;;  %v18132_v39 = vld [vmem:[#allocation14 + $0x92c] ss:$16 sps:$4 sm:$0xff]  }
 0xbe7   :  { %14196 = vmatpush1.bf16.msra.mxu1 %v18070_v4  ;;  %13794 = vmatprep.subr.bf16.mxu0 %v18075_v10  ;;  %v18127_v4 = vld [vmem:[#allocation14 + $0x920] ss:$16 sps:$4 sm:$0xff]   ;;  %v18130_v10 = vld [vmem:[#allocation14 + $0x928] ss:$16 sps:$4 sm:$0xff]  }
 0xbe8   :  { %14218 = vmatprep.subr.bf16.mxu1 %v18078_v50  ;;  %v18135_v50 = vld [vmem:[#allocation14 + $0x944] ss:$16 sps:$4 sm:$0xff]  }
 0xbe9   :  { %13774 = vmatmul.mubr.bf16.vlgmr.msra.gmra.mrb[128].mxu0 %v20315_v36 }
 0xbea   :  { %14198 = vmatmul.mubr.bf16.vlgmr.msra.gmra.mrb[128].mxu1 %v20315_v36  ;;  %13783 = vmatprep.mubr.bf16.mxu0 %v20336_v6  ;;  %v18096_v36 = vld [vmem:[#allocation14 + $0x86c] ss:$16 sps:$4 sm:$0xff]  }
 0xbeb   :  { %13795 = vmatpush1.bf16.msra.mxu0 %v18073_v48  ;;  %14207 = vmatprep.mubr.bf16.mxu1 %v20336_v6  ;;  %v18091_v6 = vld [vmem:[#allocation14 + $0x860] ss:$16 sps:$4 sm:$0xff]   ;;  %v18138_v48 = vld [vmem:[#allocation14 + $0x94c] ss:$16 sps:$4 sm:$0xff]  }
 0xbec   :  { %14219 = vmatpush1.bf16.msra.mxu1 %v18076_v63  ;;  %13796 = vmatprep.subr.bf16.mxu0 %v18081_v45  ;;  %v18133_v63 = vld [vmem:[#allocation14 + $0x940] ss:$16 sps:$4 sm:$0xff]   ;;  %v18136_v45 = vld [vmem:[#allocation14 + $0x948] ss:$16 sps:$4 sm:$0xff]  }
 0xbed   :  { %14220 = vmatprep.subr.bf16.mxu1 %v18084_v44  ;;  %v18141_v44 = vld [vmem:[#allocation14 + $0x964] ss:$16 sps:$4 sm:$0xff]  }
 0xbef   :  { %13797 = vmatpush1.bf16.msra.mxu0 %v18079_v19  ;;  %v18144_v19 = vld [vmem:[#allocation14 + $0x96c] ss:$16 sps:$4 sm:$0xff]  }
 0xbf0   :  { %14221 = vmatpush1.bf16.msra.mxu1 %v18082_v32  ;;  %13798 = vmatprep.subr.bf16.mxu0 %v18087_v33  ;;  %v18139_v32 = vld [vmem:[#allocation14 + $0x960] ss:$16 sps:$4 sm:$0xff]   ;;  %v18142_v33 = vld [vmem:[#allocation14 + $0x968] ss:$16 sps:$4 sm:$0xff]  }
 0xbf1   :  { %13784 = vmatmul.mubr.bf16.gmra.mrb[132].mxu0 %v20332_v52  ;;  %14222 = vmatprep.subr.bf16.mxu1 %v18090_v15  ;;  %v18147_v15 = vld [vmem:[#allocation14 + $0x984] ss:$16 sps:$4 sm:$0xff]  }
 0xbf2   :  { %14208 = vmatmul.mubr.bf16.gmra.mrb[132].mxu1 %v20332_v52  ;;  %13826 = vmatprep.mubr.bf16.mxu0 %v20384_v3  ;;  %v18108_v52 = vld [vmem:[#allocation14 + $0x8ac] ss:$16 sps:$4 sm:$0xff]  }
 0xbf3   :  { %13799 = vmatpush1.bf16.msra.mxu0 %v18085_v7  ;;  %14250 = vmatprep.mubr.bf16.mxu1 %v20384_v3  ;;  %v18106_v3 = vld [vmem:[#allocation14 + $0x8a8] ss:$16 sps:$4 sm:$0xff]   ;;  %v18150_v7 = vld [vmem:[#allocation14 + $0x98c] ss:$16 sps:$4 sm:$0xff]  }
 0xbf4   :  { %14223 = vmatpush1.bf16.msra.mxu1 %v18088_v43  ;;  %13800 = vmatprep.subr.bf16.mxu0 %v18093_v34  ;;  %v18145_v43 = vld [vmem:[#allocation14 + $0x980] ss:$16 sps:$4 sm:$0xff]   ;;  %v18148_v34 = vld [vmem:[#allocation14 + $0x988] ss:$16 sps:$4 sm:$0xff]  }
 0xbf5   :  { %14224 = vmatprep.subr.bf16.mxu1 %v18096_v36  ;;  %v18153_v36 = vld [vmem:[#allocation14 + $0x9a4] ss:$16 sps:$4 sm:$0xff]  }
 0xbf7   :  { %13801 = vmatpush1.bf16.msra.mxu0 %v18091_v6  ;;  %v18156_v6 = vld [vmem:[#allocation14 + $0x9ac] ss:$16 sps:$4 sm:$0xff]  }
 0xbf8   :  { %14225 = vmatpush1.bf16.msra.mxu1 %v18094_v57  ;;  %13802 = vmatprep.subr.bf16.mxu0 %v18099_v47  ;;  %v18151_v57 = vld [vmem:[#allocation14 + $0x9a0] ss:$16 sps:$4 sm:$0xff]   ;;  %v18154_v47 = vld [vmem:[#allocation14 + $0x9a8] ss:$16 sps:$4 sm:$0xff]  }
 0xbf9   :  { %14226 = vmatprep.subr.bf16.mxu1 %v18102_v27  ;;  %v18159_v27 = vld [vmem:[#allocation14 + $0x9c4] ss:$16 sps:$4 sm:$0xff]  }
 0xbfb   :  { %13803 = vmatpush1.bf16.msra.mxu0 %v18097_v21  ;;  %v18162_v21 = vld [vmem:[#allocation14 + $0x9cc] ss:$16 sps:$4 sm:$0xff]  }
 0xbfc   :  { %14227 = vmatpush1.bf16.msra.mxu1 %v18100_v18  ;;  %13804 = vmatprep.subr.bf16.mxu0 %v18105_v28  ;;  %v18157_v18 = vld [vmem:[#allocation14 + $0x9c0] ss:$16 sps:$4 sm:$0xff]   ;;  %v18160_v28 = vld [vmem:[#allocation14 + $0x9c8] ss:$16 sps:$4 sm:$0xff]  }
 0xbfd   :  { %14228 = vmatprep.subr.bf16.mxu1 %v18108_v52  ;;  %v18165_v52 = vld [vmem:[#allocation14 + $0x9e4] ss:$16 sps:$4 sm:$0xff]  }
 0xbff   :  { %13805 = vmatpush1.bf16.msra.mxu0 %v18103_v13  ;;  %v18168_v13 = vld [vmem:[#allocation14 + $0x9ec] ss:$16 sps:$4 sm:$0xff]  }
 0xc00   :  { %14229 = vmatpush1.bf16.msra.mxu1 %v18106_v3  ;;  %13806 = vmatprep.subr.bf16.mxu0 %v18111_v23  ;;  %v18163_v3 = vld [vmem:[#allocation14 + $0x9e0] ss:$16 sps:$4 sm:$0xff]   ;;  %v18166_v23 = vld [vmem:[#allocation14 + $0x9e8] ss:$16 sps:$4 sm:$0xff]  }
 0xc01   :  { %14230 = vmatprep.subr.bf16.mxu1 %v18114_v16  ;;  %v18171_v16 = vld [vmem:[#allocation14 + $0xa04] ss:$16 sps:$4 sm:$0xff]  }
 0xc03   :  { %13807 = vmatpush1.bf16.msra.mxu0 %v18109_v24  ;;  %v18174_v24 = vld [vmem:[#allocation14 + $0xa0c] ss:$16 sps:$4 sm:$0xff]  }
 0xc04   :  { %14231 = vmatpush1.bf16.msra.mxu1 %v18112_v53  ;;  %13808 = vmatprep.subr.bf16.mxu0 %v18117_v51  ;;  %v18169_v53 = vld [vmem:[#allocation14 + $0xa00] ss:$16 sps:$4 sm:$0xff]   ;;  %v18172_v51 = vld [vmem:[#allocation14 + $0xa08] ss:$16 sps:$4 sm:$0xff]  }
 0xc05   :  { %14232 = vmatprep.subr.bf16.mxu1 %v18120_v12  ;;  %v18177_v12 = vld [vmem:[#allocation14 + $0xa24] ss:$16 sps:$4 sm:$0xff]  }
 0xc07   :  { %13809 = vmatpush1.bf16.msra.mxu0 %v18115_v41  ;;  %v18180_v41 = vld [vmem:[#allocation14 + $0xa2c] ss:$16 sps:$4 sm:$0xff]  }
 0xc08   :  { %14233 = vmatpush1.bf16.msra.mxu1 %v18118_v11  ;;  %13810 = vmatprep.subr.bf16.mxu0 %v18123_v2  ;;  %v18175_v11 = vld [vmem:[#allocation14 + $0xa20] ss:$16 sps:$4 sm:$0xff]   ;;  %v18178_v2 = vld [vmem:[#allocation14 + $0xa28] ss:$16 sps:$4 sm:$0xff]  }
 0xc09   :  { %14234 = vmatprep.subr.bf16.mxu1 %v18126_v56  ;;  %v18183_v56 = vld [vmem:[#allocation14 + $0xa44] ss:$16 sps:$4 sm:$0xff]  }
 0xc0b   :  { %13811 = vmatpush1.bf16.msra.mxu0 %v18121_v38  ;;  %v18186_v38 = vld [vmem:[#allocation14 + $0xa4c] ss:$16 sps:$4 sm:$0xff]  }
 0xc0c   :  { %14235 = vmatpush1.bf16.msra.mxu1 %v18124_v9  ;;  %13812 = vmatprep.subr.bf16.mxu0 %v18129_v58  ;;  %v18181_v9 = vld [vmem:[#allocation14 + $0xa40] ss:$16 sps:$4 sm:$0xff]   ;;  %v18184_v58 = vld [vmem:[#allocation14 + $0xa48] ss:$16 sps:$4 sm:$0xff]  }
 0xc0d   :  { %14236 = vmatprep.subr.bf16.mxu1 %v18132_v39  ;;  %v18189_v39 = vld [vmem:[#allocation14 + $0xa64] ss:$16 sps:$4 sm:$0xff]  }
 0xc0f   :  { %13813 = vmatpush1.bf16.msra.mxu0 %v18127_v4  ;;  %v18190_v4 = vld [vmem:[#allocation14 + $0xa68] ss:$16 sps:$4 sm:$0xff]  }
 0xc10   :  { %14237 = vmatpush1.bf16.msra.mxu1 %v18130_v10  ;;  %13814 = vmatprep.subr.bf16.mxu0 %v18135_v50  ;;  %v18195_v10 = vld [vmem:[#allocation14 + $0xa84] ss:$16 sps:$4 sm:$0xff]   ;;  %v18198_v50 = vld [vmem:[#allocation14 + $0xa8c] ss:$16 sps:$4 sm:$0xff]  }
 0xc11   :  { %14238 = vmatprep.subr.bf16.mxu1 %v18138_v48  ;;  %v18193_v48 = vld [vmem:[#allocation14 + $0xa80] ss:$16 sps:$4 sm:$0xff]  }
 0xc13   :  { %13815 = vmatpush1.bf16.msra.mxu0 %v18133_v63  ;;  %v18196_v63 = vld [vmem:[#allocation14 + $0xa88] ss:$16 sps:$4 sm:$0xff]  }
 0xc14   :  { %14239 = vmatpush1.bf16.msra.mxu1 %v18136_v45  ;;  %13816 = vmatprep.subr.bf16.mxu0 %v18141_v44  ;;  %v18201_v45 = vld [vmem:[#allocation14 + $0xaa4] ss:$16 sps:$4 sm:$0xff]   ;;  %v18199_v44 = vld [vmem:[#allocation14 + $0xaa0] ss:$16 sps:$4 sm:$0xff]  }
 0xc15   :  { %14240 = vmatprep.subr.bf16.mxu1 %v18144_v19  ;;  %v18207_v19 = vld [vmem:[#allocation14 + $0xac4] ss:$16 sps:$4 sm:$0xff]  }
 0xc17   :  { %13817 = vmatpush1.bf16.msra.mxu0 %v18139_v32  ;;  %v18210_v32 = vld [vmem:[#allocation14 + $0xacc] ss:$16 sps:$4 sm:$0xff]  }
 0xc18   :  { %14241 = vmatpush1.bf16.msra.mxu1 %v18142_v33  ;;  %13818 = vmatprep.subr.bf16.mxu0 %v18147_v15  ;;  %v18205_v33 = vld [vmem:[#allocation14 + $0xac0] ss:$16 sps:$4 sm:$0xff]   ;;  %v18208_v15 = vld [vmem:[#allocation14 + $0xac8] ss:$16 sps:$4 sm:$0xff]  }
 0xc19   :  { %14242 = vmatprep.subr.bf16.mxu1 %v18150_v7  ;;  %v18213_v7 = vld [vmem:[#allocation14 + $0xae4] ss:$16 sps:$4 sm:$0xff]  }
 0xc1b   :  { %13819 = vmatpush1.bf16.msra.mxu0 %v18145_v43  ;;  %v18216_v43 = vld [vmem:[#allocation14 + $0xaec] ss:$16 sps:$4 sm:$0xff]  }
 0xc1c   :  { %14243 = vmatpush1.bf16.msra.mxu1 %v18148_v34  ;;  %13820 = vmatprep.subr.bf16.mxu0 %v18153_v36  ;;  %v18211_v34 = vld [vmem:[#allocation14 + $0xae0] ss:$16 sps:$4 sm:$0xff]   ;;  %v18214_v36 = vld [vmem:[#allocation14 + $0xae8] ss:$16 sps:$4 sm:$0xff]  }
 0xc1d   :  { %14244 = vmatprep.subr.bf16.mxu1 %v18156_v6  ;;  %v18219_v6 = vld [vmem:[#allocation14 + $0xb04] ss:$16 sps:$4 sm:$0xff]  }
 0xc1f   :  { %13821 = vmatpush1.bf16.msra.mxu0 %v18151_v57  ;;  %v18222_v57 = vld [vmem:[#allocation14 + $0xb0c] ss:$16 sps:$4 sm:$0xff]  }
 0xc20   :  { %14245 = vmatpush1.bf16.msra.mxu1 %v18154_v47  ;;  %13822 = vmatprep.subr.bf16.mxu0 %v18159_v27  ;;  %v18217_v47 = vld [vmem:[#allocation14 + $0xb00] ss:$16 sps:$4 sm:$0xff]   ;;  %v18220_v27 = vld [vmem:[#allocation14 + $0xb08] ss:$16 sps:$4 sm:$0xff]  }
 0xc21   :  { %14246 = vmatprep.subr.bf16.mxu1 %v18162_v21  ;;  %v18225_v21 = vld [vmem:[#allocation14 + $0xb24] ss:$16 sps:$4 sm:$0xff]  }
 0xc23   :  { %13823 = vmatpush1.bf16.msra.mxu0 %v18157_v18  ;;  %v18228_v18 = vld [vmem:[#allocation14 + $0xb2c] ss:$16 sps:$4 sm:$0xff]  }
 0xc24   :  { %14247 = vmatpush1.bf16.msra.mxu1 %v18160_v28  ;;  %13824 = vmatprep.subr.bf16.mxu0 %v18165_v52  ;;  %v18223_v28 = vld [vmem:[#allocation14 + $0xb20] ss:$16 sps:$4 sm:$0xff]   ;;  %v18226_v52 = vld [vmem:[#allocation14 + $0xb28] ss:$16 sps:$4 sm:$0xff]  }
 0xc25   :  { %14248 = vmatprep.subr.bf16.mxu1 %v18168_v13  ;;  %v18231_v13 = vld [vmem:[#allocation14 + $0xb44] ss:$16 sps:$4 sm:$0xff]  }
 0xc27   :  { %13825 = vmatpush1.bf16.msra.mxu0 %v18163_v3  ;;  %v18234_v3 = vld [vmem:[#allocation14 + $0xb4c] ss:$16 sps:$4 sm:$0xff]  }
 0xc28   :  { %14249 = vmatpush1.bf16.msra.mxu1 %v18166_v23  ;;  %13847 = vmatprep.subr.bf16.mxu0 %v18171_v16  ;;  %v18229_v23 = vld [vmem:[#allocation14 + $0xb40] ss:$16 sps:$4 sm:$0xff]   ;;  %v18232_v16 = vld [vmem:[#allocation14 + $0xb48] ss:$16 sps:$4 sm:$0xff]  }
 0xc29   :  { %14271 = vmatprep.subr.bf16.mxu1 %v18174_v24  ;;  %v18237_v24 = vld [vmem:[#allocation14 + $0xb64] ss:$16 sps:$4 sm:$0xff]  }
 0xc2a   :  { %13827 = vmatmul.mubr.bf16.vlgmr.msra.gmra.mrb[128].mxu0 %v20380_v8 }
 0xc2b   :  { %14251 = vmatmul.mubr.bf16.vlgmr.msra.gmra.mrb[128].mxu1 %v20380_v8  ;;  %13836 = vmatprep.mubr.bf16.mxu0 %v20400_v55  ;;  %v18192_v8 = vld [vmem:[#allocation14 + $0xa6c] ss:$16 sps:$4 sm:$0xff]  }
 0xc2c   :  { %13848 = vmatpush1.bf16.msra.mxu0 %v18169_v53  ;;  %14260 = vmatprep.mubr.bf16.mxu1 %v20400_v55  ;;  %v18187_v55 = vld [vmem:[#allocation14 + $0xa60] ss:$16 sps:$4 sm:$0xff]   ;;  %v18240_v53 = vld [vmem:[#allocation14 + $0xb6c] ss:$16 sps:$4 sm:$0xff]  }
 0xc2d   :  { %14272 = vmatpush1.bf16.msra.mxu1 %v18172_v51  ;;  %13849 = vmatprep.subr.bf16.mxu0 %v18177_v12  ;;  %v18235_v51 = vld [vmem:[#allocation14 + $0xb60] ss:$16 sps:$4 sm:$0xff]   ;;  %v18238_v12 = vld [vmem:[#allocation14 + $0xb68] ss:$16 sps:$4 sm:$0xff]  }
 0xc2e   :  { %14273 = vmatprep.subr.bf16.mxu1 %v18180_v41  ;;  %v18243_v41 = vld [vmem:[#allocation14 + $0xb84] ss:$16 sps:$4 sm:$0xff]  }
 0xc30   :  { %13850 = vmatpush1.bf16.msra.mxu0 %v18175_v11  ;;  %v18246_v11 = vld [vmem:[#allocation14 + $0xb8c] ss:$16 sps:$4 sm:$0xff]  }
 0xc31   :  { %14274 = vmatpush1.bf16.msra.mxu1 %v18178_v2  ;;  %13851 = vmatprep.subr.bf16.mxu0 %v18183_v56  ;;  %v18241_v2 = vld [vmem:[#allocation14 + $0xb80] ss:$16 sps:$4 sm:$0xff]   ;;  %v18244_v56 = vld [vmem:[#allocation14 + $0xb88] ss:$16 sps:$4 sm:$0xff]  }
 0xc32   :  { %13837 = vmatmul.mubr.bf16.gmra.mrb[132].mxu0 %v20396_v26  ;;  %14275 = vmatprep.subr.bf16.mxu1 %v18186_v38  ;;  %v18249_v38 = vld [vmem:[#allocation14 + $0xba4] ss:$16 sps:$4 sm:$0xff]  }
 0xc33   :  { %14261 = vmatmul.mubr.bf16.gmra.mrb[132].mxu1 %v20396_v26  ;;  %13879 = vmatprep.mubr.bf16.mxu0 %v20386_v30  ;;  %v18204_v26 = vld [vmem:[#allocation14 + $0xaac] ss:$16 sps:$4 sm:$0xff]  }
 0xc34   :  { %13852 = vmatpush1.bf16.msra.mxu0 %v18181_v9  ;;  %14303 = vmatprep.mubr.bf16.mxu1 %v20386_v30  ;;  %v18202_v30 = vld [vmem:[#allocation14 + $0xaa8] ss:$16 sps:$4 sm:$0xff]   ;;  %v18252_v9 = vld [vmem:[#allocation14 + $0xbac] ss:$16 sps:$4 sm:$0xff]  }
 0xc35   :  { %14276 = vmatpush1.bf16.msra.mxu1 %v18184_v58  ;;  %13853 = vmatprep.subr.bf16.mxu0 %v18189_v39  ;;  %v18247_v58 = vld [vmem:[#allocation14 + $0xba0] ss:$16 sps:$4 sm:$0xff]   ;;  %v18250_v39 = vld [vmem:[#allocation14 + $0xba8] ss:$16 sps:$4 sm:$0xff]  }
 0xc36   :  { %14277 = vmatprep.subr.bf16.mxu1 %v18192_v8  ;;  %v18255_v8 = vld [vmem:[#allocation14 + $0xbc4] ss:$16 sps:$4 sm:$0xff]  }
 0xc38   :  { %13854 = vmatpush1.bf16.msra.mxu0 %v18187_v55  ;;  %v18258_v55 = vld [vmem:[#allocation14 + $0xbcc] ss:$16 sps:$4 sm:$0xff]  }
 0xc39   :  { %14278 = vmatpush1.bf16.msra.mxu1 %v18190_v4  ;;  %13855 = vmatprep.subr.bf16.mxu0 %v18195_v10  ;;  %v18253_v4 = vld [vmem:[#allocation14 + $0xbc0] ss:$16 sps:$4 sm:$0xff]   ;;  %v18256_v10 = vld [vmem:[#allocation14 + $0xbc8] ss:$16 sps:$4 sm:$0xff]  }
 0xc3a   :  { %14279 = vmatprep.subr.bf16.mxu1 %v18198_v50  ;;  %v18261_v50 = vld [vmem:[#allocation14 + $0xbe4] ss:$16 sps:$4 sm:$0xff]  }
 0xc3c   :  { %13856 = vmatpush1.bf16.msra.mxu0 %v18193_v48  ;;  %v18264_v48 = vld [vmem:[#allocation14 + $0xbec] ss:$16 sps:$4 sm:$0xff]  }
 0xc3d   :  { %14280 = vmatpush1.bf16.msra.mxu1 %v18196_v63  ;;  %13857 = vmatprep.subr.bf16.mxu0 %v18201_v45  ;;  %v18259_v63 = vld [vmem:[#allocation14 + $0xbe0] ss:$16 sps:$4 sm:$0xff]   ;;  %v18262_v45 = vld [vmem:[#allocation14 + $0xbe8] ss:$16 sps:$4 sm:$0xff]  }
 0xc3e   :  { %14281 = vmatprep.subr.bf16.mxu1 %v18204_v26  ;;  %v18267_v26 = vld [vmem:[#allocation14 + $0xc04] ss:$16 sps:$4 sm:$0xff]  }
 0xc40   :  { %13858 = vmatpush1.bf16.msra.mxu0 %v18199_v44  ;;  %v18270_v44 = vld [vmem:[#allocation14 + $0xc0c] ss:$16 sps:$4 sm:$0xff]  }
 0xc41   :  { %14282 = vmatpush1.bf16.msra.mxu1 %v18202_v30  ;;  %13859 = vmatprep.subr.bf16.mxu0 %v18207_v19  ;;  %v18265_v30 = vld [vmem:[#allocation14 + $0xc00] ss:$16 sps:$4 sm:$0xff]   ;;  %v18268_v19 = vld [vmem:[#allocation14 + $0xc08] ss:$16 sps:$4 sm:$0xff]  }
 0xc42   :  { %14283 = vmatprep.subr.bf16.mxu1 %v18210_v32  ;;  %v18273_v32 = vld [vmem:[#allocation14 + $0xc24] ss:$16 sps:$4 sm:$0xff]  }
 0xc44   :  { %13860 = vmatpush1.bf16.msra.mxu0 %v18205_v33  ;;  %v18276_v33 = vld [vmem:[#allocation14 + $0xc2c] ss:$16 sps:$4 sm:$0xff]  }
 0xc45   :  { %14284 = vmatpush1.bf16.msra.mxu1 %v18208_v15  ;;  %13861 = vmatprep.subr.bf16.mxu0 %v18213_v7  ;;  %v18271_v15 = vld [vmem:[#allocation14 + $0xc20] ss:$16 sps:$4 sm:$0xff]   ;;  %v18274_v7 = vld [vmem:[#allocation14 + $0xc28] ss:$16 sps:$4 sm:$0xff]  }
 0xc46   :  { %14285 = vmatprep.subr.bf16.mxu1 %v18216_v43  ;;  %v18279_v43 = vld [vmem:[#allocation14 + $0xc44] ss:$16 sps:$4 sm:$0xff]  }
 0xc48   :  { %13862 = vmatpush1.bf16.msra.mxu0 %v18211_v34  ;;  %v18282_v34 = vld [vmem:[#allocation14 + $0xc4c] ss:$16 sps:$4 sm:$0xff]  }
 0xc49   :  { %14286 = vmatpush1.bf16.msra.mxu1 %v18214_v36  ;;  %13863 = vmatprep.subr.bf16.mxu0 %v18219_v6  ;;  %v18277_v36 = vld [vmem:[#allocation14 + $0xc40] ss:$16 sps:$4 sm:$0xff]   ;;  %v18280_v6 = vld [vmem:[#allocation14 + $0xc48] ss:$16 sps:$4 sm:$0xff]  }
 0xc4a   :  { %14287 = vmatprep.subr.bf16.mxu1 %v18222_v57  ;;  %v18285_v57 = vld [vmem:[#allocation14 + $0xc64] ss:$16 sps:$4 sm:$0xff]  }
 0xc4c   :  { %13864 = vmatpush1.bf16.msra.mxu0 %v18217_v47  ;;  %v18286_v47 = vld [vmem:[#allocation14 + $0xc68] ss:$16 sps:$4 sm:$0xff]  }
 0xc4d   :  { %14288 = vmatpush1.bf16.msra.mxu1 %v18220_v27  ;;  %13865 = vmatprep.subr.bf16.mxu0 %v18225_v21  ;;  %v18291_v27 = vld [vmem:[#allocation14 + $0xc84] ss:$16 sps:$4 sm:$0xff]   ;;  %v18294_v21 = vld [vmem:[#allocation14 + $0xc8c] ss:$16 sps:$4 sm:$0xff]  }
 0xc4e   :  { %14289 = vmatprep.subr.bf16.mxu1 %v18228_v18  ;;  %v18289_v18 = vld [vmem:[#allocation14 + $0xc80] ss:$16 sps:$4 sm:$0xff]  }
 0xc50   :  { %13866 = vmatpush1.bf16.msra.mxu0 %v18223_v28  ;;  %v18292_v28 = vld [vmem:[#allocation14 + $0xc88] ss:$16 sps:$4 sm:$0xff]  }
 0xc51   :  { %14290 = vmatpush1.bf16.msra.mxu1 %v18226_v52  ;;  %13867 = vmatprep.subr.bf16.mxu0 %v18231_v13  ;;  %v18297_v52 = vld [vmem:[#allocation14 + $0xca4] ss:$16 sps:$4 sm:$0xff]   ;;  %v18295_v13 = vld [vmem:[#allocation14 + $0xca0] ss:$16 sps:$4 sm:$0xff]  }
 0xc52   :  { %14291 = vmatprep.subr.bf16.mxu1 %v18234_v3  ;;  %v18303_v3 = vld [vmem:[#allocation14 + $0xcc4] ss:$16 sps:$4 sm:$0xff]  }
 0xc54   :  { %13868 = vmatpush1.bf16.msra.mxu0 %v18229_v23  ;;  %v18306_v23 = vld [vmem:[#allocation14 + $0xccc] ss:$16 sps:$4 sm:$0xff]  }
 0xc55   :  { %14292 = vmatpush1.bf16.msra.mxu1 %v18232_v16  ;;  %13869 = vmatprep.subr.bf16.mxu0 %v18237_v24  ;;  %v18301_v16 = vld [vmem:[#allocation14 + $0xcc0] ss:$16 sps:$4 sm:$0xff]   ;;  %v18304_v24 = vld [vmem:[#allocation14 + $0xcc8] ss:$16 sps:$4 sm:$0xff]  }
 0xc56   :  { %14293 = vmatprep.subr.bf16.mxu1 %v18240_v53  ;;  %v18309_v53 = vld [vmem:[#allocation14 + $0xce4] ss:$16 sps:$4 sm:$0xff]  }
 0xc58   :  { %13870 = vmatpush1.bf16.msra.mxu0 %v18235_v51  ;;  %v18312_v51 = vld [vmem:[#allocation14 + $0xcec] ss:$16 sps:$4 sm:$0xff]  }
 0xc59   :  { %14294 = vmatpush1.bf16.msra.mxu1 %v18238_v12  ;;  %13871 = vmatprep.subr.bf16.mxu0 %v18243_v41  ;;  %v18307_v12 = vld [vmem:[#allocation14 + $0xce0] ss:$16 sps:$4 sm:$0xff]   ;;  %v18310_v41 = vld [vmem:[#allocation14 + $0xce8] ss:$16 sps:$4 sm:$0xff]  }
 0xc5a   :  { %14295 = vmatprep.subr.bf16.mxu1 %v18246_v11  ;;  %v18315_v11 = vld [vmem:[#allocation14 + $0xd04] ss:$16 sps:$4 sm:$0xff]  }
 0xc5c   :  { %13872 = vmatpush1.bf16.msra.mxu0 %v18241_v2  ;;  %v18318_v2 = vld [vmem:[#allocation14 + $0xd0c] ss:$16 sps:$4 sm:$0xff]  }
 0xc5d   :  { %14296 = vmatpush1.bf16.msra.mxu1 %v18244_v56  ;;  %13873 = vmatprep.subr.bf16.mxu0 %v18249_v38  ;;  %v18313_v56 = vld [vmem:[#allocation14 + $0xd00] ss:$16 sps:$4 sm:$0xff]   ;;  %v18316_v38 = vld [vmem:[#allocation14 + $0xd08] ss:$16 sps:$4 sm:$0xff]  }
 0xc5e   :  { %14297 = vmatprep.subr.bf16.mxu1 %v18252_v9  ;;  %v18321_v9 = vld [vmem:[#allocation14 + $0xd24] ss:$16 sps:$4 sm:$0xff]  }
 0xc60   :  { %13874 = vmatpush1.bf16.msra.mxu0 %v18247_v58  ;;  %v18324_v58 = vld [vmem:[#allocation14 + $0xd2c] ss:$16 sps:$4 sm:$0xff]  }
 0xc61   :  { %14298 = vmatpush1.bf16.msra.mxu1 %v18250_v39  ;;  %13875 = vmatprep.subr.bf16.mxu0 %v18255_v8  ;;  %v18319_v39 = vld [vmem:[#allocation14 + $0xd20] ss:$16 sps:$4 sm:$0xff]   ;;  %v18322_v8 = vld [vmem:[#allocation14 + $0xd28] ss:$16 sps:$4 sm:$0xff]  }
 0xc62   :  { %14299 = vmatprep.subr.bf16.mxu1 %v18258_v55  ;;  %v18327_v55 = vld [vmem:[#allocation14 + $0xd44] ss:$16 sps:$4 sm:$0xff]  }
 0xc64   :  { %13876 = vmatpush1.bf16.msra.mxu0 %v18253_v4  ;;  %v18330_v4 = vld [vmem:[#allocation14 + $0xd4c] ss:$16 sps:$4 sm:$0xff]  }
 0xc65   :  { %14300 = vmatpush1.bf16.msra.mxu1 %v18256_v10  ;;  %13877 = vmatprep.subr.bf16.mxu0 %v18261_v50  ;;  %v18325_v10 = vld [vmem:[#allocation14 + $0xd40] ss:$16 sps:$4 sm:$0xff]   ;;  %v18328_v50 = vld [vmem:[#allocation14 + $0xd48] ss:$16 sps:$4 sm:$0xff]  }
 0xc66   :  { %14301 = vmatprep.subr.bf16.mxu1 %v18264_v48  ;;  %v18333_v48 = vld [vmem:[#allocation14 + $0xd64] ss:$16 sps:$4 sm:$0xff]  }
 0xc68   :  { %13878 = vmatpush1.bf16.msra.mxu0 %v18259_v63  ;;  %v18336_v63 = vld [vmem:[#allocation14 + $0xd6c] ss:$16 sps:$4 sm:$0xff]  }
 0xc69   :  { %14302 = vmatpush1.bf16.msra.mxu1 %v18262_v45  ;;  %13900 = vmatprep.subr.bf16.mxu0 %v18267_v26  ;;  %v18331_v45 = vld [vmem:[#allocation14 + $0xd60] ss:$16 sps:$4 sm:$0xff]   ;;  %v18334_v26 = vld [vmem:[#allocation14 + $0xd68] ss:$16 sps:$4 sm:$0xff]  }
 0xc6a   :  { %14324 = vmatprep.subr.bf16.mxu1 %v18270_v44  ;;  %v18339_v44 = vld [vmem:[#allocation14 + $0xd84] ss:$16 sps:$4 sm:$0xff]  }
 0xc6b   :  { %13880 = vmatmul.mubr.bf16.vlgmr.msra.gmra.mrb[128].mxu0 %v20382_v17 }
 0xc6c   :  { %14304 = vmatmul.mubr.bf16.vlgmr.msra.gmra.mrb[128].mxu1 %v20382_v17  ;;  %13889 = vmatprep.mubr.bf16.mxu0 %v20402_v1  ;;  %v18288_v17 = vld [vmem:[#allocation14 + $0xc6c] ss:$16 sps:$4 sm:$0xff]  }
 0xc6d   :  { %13901 = vmatpush1.bf16.msra.mxu0 %v18265_v30  ;;  %14313 = vmatprep.mubr.bf16.mxu1 %v20402_v1  ;;  %v18283_v1 = vld [vmem:[#allocation14 + $0xc60] ss:$16 sps:$4 sm:$0xff]   ;;  %v18342_v30 = vld [vmem:[#allocation14 + $0xd8c] ss:$16 sps:$4 sm:$0xff]  }
 0xc6e   :  { %14325 = vmatpush1.bf16.msra.mxu1 %v18268_v19  ;;  %13902 = vmatprep.subr.bf16.mxu0 %v18273_v32  ;;  %v18337_v19 = vld [vmem:[#allocation14 + $0xd80] ss:$16 sps:$4 sm:$0xff]   ;;  %v18340_v32 = vld [vmem:[#allocation14 + $0xd88] ss:$16 sps:$4 sm:$0xff]  }
 0xc6f   :  { %14326 = vmatprep.subr.bf16.mxu1 %v18276_v33  ;;  %v18345_v33 = vld [vmem:[#allocation14 + $0xda4] ss:$16 sps:$4 sm:$0xff]  }
 0xc71   :  { %13903 = vmatpush1.bf16.msra.mxu0 %v18271_v15  ;;  %v18348_v15 = vld [vmem:[#allocation14 + $0xdac] ss:$16 sps:$4 sm:$0xff]  }
 0xc72   :  { %14327 = vmatpush1.bf16.msra.mxu1 %v18274_v7  ;;  %13904 = vmatprep.subr.bf16.mxu0 %v18279_v43  ;;  %v18343_v7 = vld [vmem:[#allocation14 + $0xda0] ss:$16 sps:$4 sm:$0xff]   ;;  %v18346_v43 = vld [vmem:[#allocation14 + $0xda8] ss:$16 sps:$4 sm:$0xff]  }
 0xc73   :  { %13890 = vmatmul.mubr.bf16.gmra.mrb[132].mxu0 %v20398_v25  ;;  %14328 = vmatprep.subr.bf16.mxu1 %v18282_v34  ;;  %v18351_v34 = vld [vmem:[#allocation14 + $0xdc4] ss:$16 sps:$4 sm:$0xff]  }
 0xc74   :  { %14314 = vmatmul.mubr.bf16.gmra.mrb[132].mxu1 %v20398_v25  ;;  %13932 = vmatprep.mubr.bf16.mxu0 %v20448_v31  ;;  %v18300_v25 = vld [vmem:[#allocation14 + $0xcac] ss:$16 sps:$4 sm:$0xff]  }
 0xc75   :  { %13905 = vmatpush1.bf16.msra.mxu0 %v18277_v36  ;;  %14356 = vmatprep.mubr.bf16.mxu1 %v20448_v31  ;;  %v18298_v31 = vld [vmem:[#allocation14 + $0xca8] ss:$16 sps:$4 sm:$0xff]   ;;  %v18354_v36 = vld [vmem:[#allocation14 + $0xdcc] ss:$16 sps:$4 sm:$0xff]  }
 0xc76   :  { %14329 = vmatpush1.bf16.msra.mxu1 %v18280_v6  ;;  %13906 = vmatprep.subr.bf16.mxu0 %v18285_v57  ;;  %v18349_v6 = vld [vmem:[#allocation14 + $0xdc0] ss:$16 sps:$4 sm:$0xff]   ;;  %v18352_v57 = vld [vmem:[#allocation14 + $0xdc8] ss:$16 sps:$4 sm:$0xff]  }
 0xc77   :  { %14330 = vmatprep.subr.bf16.mxu1 %v18288_v17  ;;  %v18357_v17 = vld [vmem:[#allocation14 + $0xde4] ss:$16 sps:$4 sm:$0xff]  }
 0xc79   :  { %13907 = vmatpush1.bf16.msra.mxu0 %v18283_v1  ;;  %v18360_v1 = vld [vmem:[#allocation14 + $0xdec] ss:$16 sps:$4 sm:$0xff]  }
 0xc7a   :  { %14331 = vmatpush1.bf16.msra.mxu1 %v18286_v47  ;;  %13908 = vmatprep.subr.bf16.mxu0 %v18291_v27  ;;  %v18355_v47 = vld [vmem:[#allocation14 + $0xde0] ss:$16 sps:$4 sm:$0xff]   ;;  %v18358_v27 = vld [vmem:[#allocation14 + $0xde8] ss:$16 sps:$4 sm:$0xff]  }
 0xc7b   :  { %14332 = vmatprep.subr.bf16.mxu1 %v18294_v21  ;;  %v18363_v21 = vld [vmem:[#allocation14 + $0xe04] ss:$16 sps:$4 sm:$0xff]  }
 0xc7d   :  { %13909 = vmatpush1.bf16.msra.mxu0 %v18289_v18  ;;  %v18366_v18 = vld [vmem:[#allocation14 + $0xe0c] ss:$16 sps:$4 sm:$0xff]  }
 0xc7e   :  { %14333 = vmatpush1.bf16.msra.mxu1 %v18292_v28  ;;  %13910 = vmatprep.subr.bf16.mxu0 %v18297_v52  ;;  %v18361_v28 = vld [vmem:[#allocation14 + $0xe00] ss:$16 sps:$4 sm:$0xff]   ;;  %v18364_v52 = vld [vmem:[#allocation14 + $0xe08] ss:$16 sps:$4 sm:$0xff]  }
 0xc7f   :  { %14334 = vmatprep.subr.bf16.mxu1 %v18300_v25  ;;  %v18369_v25 = vld [vmem:[#allocation14 + $0xe24] ss:$16 sps:$4 sm:$0xff]  }
 0xc81   :  { %13911 = vmatpush1.bf16.msra.mxu0 %v18295_v13  ;;  %v18372_v13 = vld [vmem:[#allocation14 + $0xe2c] ss:$16 sps:$4 sm:$0xff]  }
 0xc82   :  { %14335 = vmatpush1.bf16.msra.mxu1 %v18298_v31  ;;  %13912 = vmatprep.subr.bf16.mxu0 %v18303_v3  ;;  %v18367_v31 = vld [vmem:[#allocation14 + $0xe20] ss:$16 sps:$4 sm:$0xff]   ;;  %v18370_v3 = vld [vmem:[#allocation14 + $0xe28] ss:$16 sps:$4 sm:$0xff]  }
 0xc83   :  { %14336 = vmatprep.subr.bf16.mxu1 %v18306_v23  ;;  %v18375_v23 = vld [vmem:[#allocation14 + $0xe44] ss:$16 sps:$4 sm:$0xff]  }
 0xc85   :  { %13913 = vmatpush1.bf16.msra.mxu0 %v18301_v16  ;;  %v18378_v16 = vld [vmem:[#allocation14 + $0xe4c] ss:$16 sps:$4 sm:$0xff]  }
 0xc86   :  { %14337 = vmatpush1.bf16.msra.mxu1 %v18304_v24  ;;  %13914 = vmatprep.subr.bf16.mxu0 %v18309_v53  ;;  %v18373_v24 = vld [vmem:[#allocation14 + $0xe40] ss:$16 sps:$4 sm:$0xff]   ;;  %v18376_v53 = vld [vmem:[#allocation14 + $0xe48] ss:$16 sps:$4 sm:$0xff]  }
 0xc87   :  { %14338 = vmatprep.subr.bf16.mxu1 %v18312_v51  ;;  %v18381_v51 = vld [vmem:[#allocation14 + $0xe64] ss:$16 sps:$4 sm:$0xff]  }
 0xc89   :  { %13915 = vmatpush1.bf16.msra.mxu0 %v18307_v12  ;;  %v18382_v12 = vld [vmem:[#allocation14 + $0xe68] ss:$16 sps:$4 sm:$0xff]  }
 0xc8a   :  { %14339 = vmatpush1.bf16.msra.mxu1 %v18310_v41  ;;  %13916 = vmatprep.subr.bf16.mxu0 %v18315_v11  ;;  %v18387_v41 = vld [vmem:[#allocation14 + $0xe84] ss:$16 sps:$4 sm:$0xff]   ;;  %v18390_v11 = vld [vmem:[#allocation14 + $0xe8c] ss:$16 sps:$4 sm:$0xff]  }
 0xc8b   :  { %14340 = vmatprep.subr.bf16.mxu1 %v18318_v2  ;;  %v18385_v2 = vld [vmem:[#allocation14 + $0xe80] ss:$16 sps:$4 sm:$0xff]  }
 0xc8d   :  { %13917 = vmatpush1.bf16.msra.mxu0 %v18313_v56  ;;  %v18388_v56 = vld [vmem:[#allocation14 + $0xe88] ss:$16 sps:$4 sm:$0xff]  }
 0xc8e   :  { %14341 = vmatpush1.bf16.msra.mxu1 %v18316_v38  ;;  %13918 = vmatprep.subr.bf16.mxu0 %v18321_v9  ;;  %v18393_v38 = vld [vmem:[#allocation14 + $0xea4] ss:$16 sps:$4 sm:$0xff]   ;;  %v18391_v9 = vld [vmem:[#allocation14 + $0xea0] ss:$16 sps:$4 sm:$0xff]  }
 0xc8f   :  { %14342 = vmatprep.subr.bf16.mxu1 %v18324_v58  ;;  %v18399_v58 = vld [vmem:[#allocation14 + $0xec4] ss:$16 sps:$4 sm:$0xff]  }
 0xc91   :  { %13919 = vmatpush1.bf16.msra.mxu0 %v18319_v39  ;;  %v18402_v39 = vld [vmem:[#allocation14 + $0xecc] ss:$16 sps:$4 sm:$0xff]  }
 0xc92   :  { %14343 = vmatpush1.bf16.msra.mxu1 %v18322_v8  ;;  %13920 = vmatprep.subr.bf16.mxu0 %v18327_v55  ;;  %v18397_v8 = vld [vmem:[#allocation14 + $0xec0] ss:$16 sps:$4 sm:$0xff]   ;;  %v18400_v55 = vld [vmem:[#allocation14 + $0xec8] ss:$16 sps:$4 sm:$0xff]  }
 0xc93   :  { %14344 = vmatprep.subr.bf16.mxu1 %v18330_v4  ;;  %v18405_v4 = vld [vmem:[#allocation14 + $0xee4] ss:$16 sps:$4 sm:$0xff]  }
 0xc95   :  { %13921 = vmatpush1.bf16.msra.mxu0 %v18325_v10  ;;  %v18408_v10 = vld [vmem:[#allocation14 + $0xeec] ss:$16 sps:$4 sm:$0xff]  }
 0xc96   :  { %14345 = vmatpush1.bf16.msra.mxu1 %v18328_v50  ;;  %13922 = vmatprep.subr.bf16.mxu0 %v18333_v48  ;;  %v18403_v50 = vld [vmem:[#allocation14 + $0xee0] ss:$16 sps:$4 sm:$0xff]   ;;  %v18406_v48 = vld [vmem:[#allocation14 + $0xee8] ss:$16 sps:$4 sm:$0xff]  }
 0xc97   :  { %14346 = vmatprep.subr.bf16.mxu1 %v18336_v63  ;;  %v18411_v63 = vld [vmem:[#allocation14 + $0xf04] ss:$16 sps:$4 sm:$0xff]  }
 0xc99   :  { %13923 = vmatpush1.bf16.msra.mxu0 %v18331_v45  ;;  %v18414_v45 = vld [vmem:[#allocation14 + $0xf0c] ss:$16 sps:$4 sm:$0xff]  }
 0xc9a   :  { %14347 = vmatpush1.bf16.msra.mxu1 %v18334_v26  ;;  %13924 = vmatprep.subr.bf16.mxu0 %v18339_v44  ;;  %v18409_v26 = vld [vmem:[#allocation14 + $0xf00] ss:$16 sps:$4 sm:$0xff]   ;;  %v18412_v44 = vld [vmem:[#allocation14 + $0xf08] ss:$16 sps:$4 sm:$0xff]  }
 0xc9b   :  { %14348 = vmatprep.subr.bf16.mxu1 %v18342_v30  ;;  %v18417_v30 = vld [vmem:[#allocation14 + $0xf24] ss:$16 sps:$4 sm:$0xff]  }
 0xc9d   :  { %13925 = vmatpush1.bf16.msra.mxu0 %v18337_v19  ;;  %v18420_v19 = vld [vmem:[#allocation14 + $0xf2c] ss:$16 sps:$4 sm:$0xff]  }
 0xc9e   :  { %14349 = vmatpush1.bf16.msra.mxu1 %v18340_v32  ;;  %13926 = vmatprep.subr.bf16.mxu0 %v18345_v33  ;;  %v18415_v32 = vld [vmem:[#allocation14 + $0xf20] ss:$16 sps:$4 sm:$0xff]   ;;  %v18418_v33 = vld [vmem:[#allocation14 + $0xf28] ss:$16 sps:$4 sm:$0xff]  }
 0xc9f   :  { %14350 = vmatprep.subr.bf16.mxu1 %v18348_v15  ;;  %v18423_v15 = vld [vmem:[#allocation14 + $0xf44] ss:$16 sps:$4 sm:$0xff]  }
 0xca1   :  { %13927 = vmatpush1.bf16.msra.mxu0 %v18343_v7  ;;  %v18426_v7 = vld [vmem:[#allocation14 + $0xf4c] ss:$16 sps:$4 sm:$0xff]  }
 0xca2   :  { %14351 = vmatpush1.bf16.msra.mxu1 %v18346_v43  ;;  %13928 = vmatprep.subr.bf16.mxu0 %v18351_v34  ;;  %v18421_v43 = vld [vmem:[#allocation14 + $0xf40] ss:$16 sps:$4 sm:$0xff]   ;;  %v18424_v34 = vld [vmem:[#allocation14 + $0xf48] ss:$16 sps:$4 sm:$0xff]  }
 0xca3   :  { %14352 = vmatprep.subr.bf16.mxu1 %v18354_v36  ;;  %v18429_v36 = vld [vmem:[#allocation14 + $0xf64] ss:$16 sps:$4 sm:$0xff]  }
 0xca5   :  { %13929 = vmatpush1.bf16.msra.mxu0 %v18349_v6  ;;  %v18432_v6 = vld [vmem:[#allocation14 + $0xf6c] ss:$16 sps:$4 sm:$0xff]  }
 0xca6   :  { %14353 = vmatpush1.bf16.msra.mxu1 %v18352_v57  ;;  %13930 = vmatprep.subr.bf16.mxu0 %v18357_v17  ;;  %v18427_v57 = vld [vmem:[#allocation14 + $0xf60] ss:$16 sps:$4 sm:$0xff]   ;;  %v18430_v17 = vld [vmem:[#allocation14 + $0xf68] ss:$16 sps:$4 sm:$0xff]  }
 0xca7   :  { %14354 = vmatprep.subr.bf16.mxu1 %v18360_v1  ;;  %v18435_v1 = vld [vmem:[#allocation14 + $0xf84] ss:$16 sps:$4 sm:$0xff]  }
 0xca9   :  { %13931 = vmatpush1.bf16.msra.mxu0 %v18355_v47  ;;  %v18438_v47 = vld [vmem:[#allocation14 + $0xf8c] ss:$16 sps:$4 sm:$0xff]  }
 0xcaa   :  { %14355 = vmatpush1.bf16.msra.mxu1 %v18358_v27  ;;  %13953 = vmatprep.subr.bf16.mxu0 %v18363_v21  ;;  %v18433_v27 = vld [vmem:[#allocation14 + $0xf80] ss:$16 sps:$4 sm:$0xff]   ;;  %v18436_v21 = vld [vmem:[#allocation14 + $0xf88] ss:$16 sps:$4 sm:$0xff]  }
 0xcab   :  { %14377 = vmatprep.subr.bf16.mxu1 %v18366_v18  ;;  %v18441_v18 = vld [vmem:[#allocation14 + $0xfa4] ss:$16 sps:$4 sm:$0xff]  }
 0xcac   :  { %13933 = vmatmul.mubr.bf16.vlgmr.msra.gmra.mrb[128].mxu0 %v20444_v61 }
 0xcad   :  { %14357 = vmatmul.mubr.bf16.vlgmr.msra.gmra.mrb[128].mxu1 %v20444_v61  ;;  %13942 = vmatprep.mubr.bf16.mxu0 %v20464_v22  ;;  %v18384_v61 = vld [vmem:[#allocation14 + $0xe6c] ss:$16 sps:$4 sm:$0xff]  }
 0xcae   :  { %13954 = vmatpush1.bf16.msra.mxu0 %v18361_v28  ;;  %14366 = vmatprep.mubr.bf16.mxu1 %v20464_v22  ;;  %v18379_v22 = vld [vmem:[#allocation14 + $0xe60] ss:$16 sps:$4 sm:$0xff]   ;;  %v18444_v28 = vld [vmem:[#allocation14 + $0xfac] ss:$16 sps:$4 sm:$0xff]  }
 0xcaf   :  { %14378 = vmatpush1.bf16.msra.mxu1 %v18364_v52  ;;  %13955 = vmatprep.subr.bf16.mxu0 %v18369_v25  ;;  %v18439_v52 = vld [vmem:[#allocation14 + $0xfa0] ss:$16 sps:$4 sm:$0xff]   ;;  %v18442_v25 = vld [vmem:[#allocation14 + $0xfa8] ss:$16 sps:$4 sm:$0xff]  }
 0xcb0   :  { %14379 = vmatprep.subr.bf16.mxu1 %v18372_v13  ;;  %v18447_v13 = vld [vmem:[#allocation14 + $0xfc4] ss:$16 sps:$4 sm:$0xff]  }
 0xcb2   :  { %13956 = vmatpush1.bf16.msra.mxu0 %v18367_v31  ;;  %v18450_v31 = vld [vmem:[#allocation14 + $0xfcc] ss:$16 sps:$4 sm:$0xff]  }
 0xcb3   :  { %14380 = vmatpush1.bf16.msra.mxu1 %v18370_v3  ;;  %13957 = vmatprep.subr.bf16.mxu0 %v18375_v23  ;;  %v18445_v3 = vld [vmem:[#allocation14 + $0xfc0] ss:$16 sps:$4 sm:$0xff]   ;;  %v18448_v23 = vld [vmem:[#allocation14 + $0xfc8] ss:$16 sps:$4 sm:$0xff]  }
 0xcb4   :  { %13943 = vmatmul.mubr.bf16.gmra.mrb[132].mxu0 %v20460_v14  ;;  %14381 = vmatprep.subr.bf16.mxu1 %v18378_v16  ;;  %v18453_v16 = vld [vmem:[#allocation14 + $0xfe4] ss:$16 sps:$4 sm:$0xff]  }
 0xcb5   :  { %14367 = vmatmul.mubr.bf16.gmra.mrb[132].mxu1 %v20460_v14  ;;  %13985 = vmatprep.mubr.bf16.mxu0 %v20450_v62  ;;  %v18396_v14 = vld [vmem:[#allocation14 + $0xeac] ss:$16 sps:$4 sm:$0xff]  }
 0xcb6   :  { %13958 = vmatpush1.bf16.msra.mxu0 %v18373_v24  ;;  %14409 = vmatprep.mubr.bf16.mxu1 %v20450_v62  ;;  %v18394_v62 = vld [vmem:[#allocation14 + $0xea8] ss:$16 sps:$4 sm:$0xff]   ;;  %v18456_v24 = vld [vmem:[#allocation14 + $0xfec] ss:$16 sps:$4 sm:$0xff]  }
 0xcb7   :  { %14382 = vmatpush1.bf16.msra.mxu1 %v18376_v53  ;;  %13959 = vmatprep.subr.bf16.mxu0 %v18381_v51  ;;  %v18451_v53 = vld [vmem:[#allocation14 + $0xfe0] ss:$16 sps:$4 sm:$0xff]   ;;  %v18454_v51 = vld [vmem:[#allocation14 + $0xfe8] ss:$16 sps:$4 sm:$0xff]  }
 0xcb8   :  { %14383 = vmatprep.subr.bf16.mxu1 %v18384_v61  ;;  %v20506_v61 = vld [vmem:[#allocation16] sm:$0xff] }
 0xcba   :  { %13960 = vmatpush1.bf16.msra.mxu0 %v18379_v22  ;;  %v11009_v22 = vrot.slane %v20506_v61, %v19111_v37 }
 0xcbb   :  { %14384 = vmatpush1.bf16.msra.mxu1 %v18382_v12  ;;  %13961 = vmatprep.subr.bf16.mxu0 %v18387_v41  ;;  %v20510_v12 = vld [vmem:[#allocation16 + $0x10] sm:$0xff] }
 0xcbc   :  { %14385 = vmatprep.subr.bf16.mxu1 %v18390_v11  ;;  %v11017_v41 = vrot.slane %v20510_v12, %v19111_v37  ;;  %v20514_v11 = vld [vmem:[#allocation16 + $0x8] sm:$0xff] }
 0xcbe   :  { %13962 = vmatpush1.bf16.msra.mxu0 %v18385_v2  ;;  %v20518_v2 = vld [vmem:[#allocation16 + $0x18] sm:$0xff] }
 0xcbf   :  { %14386 = vmatpush1.bf16.msra.mxu1 %v18388_v56  ;;  %13963 = vmatprep.subr.bf16.mxu0 %v18393_v38 }
 0xcc0   :  { %14387 = vmatprep.subr.bf16.mxu1 %v18396_v14 }
 0xcc2   :  { %13964 = vmatpush1.bf16.msra.mxu0 %v18391_v9 }
 0xcc3   :  { %14388 = vmatpush1.bf16.msra.mxu1 %v18394_v62  ;;  %13965 = vmatprep.subr.bf16.mxu0 %v18399_v58 }
 0xcc4   :  { %14389 = vmatprep.subr.bf16.mxu1 %v18402_v39 }
 0xcc6   :  { %13966 = vmatpush1.bf16.msra.mxu0 %v18397_v8 }
 0xcc7   :  { %14390 = vmatpush1.bf16.msra.mxu1 %v18400_v55  ;;  %13967 = vmatprep.subr.bf16.mxu0 %v18405_v4 }
 0xcc8   :  { %14391 = vmatprep.subr.bf16.mxu1 %v18408_v10 }
 0xcca   :  { %13968 = vmatpush1.bf16.msra.mxu0 %v18403_v50 }
 0xccb   :  { %14392 = vmatpush1.bf16.msra.mxu1 %v18406_v48  ;;  %13969 = vmatprep.subr.bf16.mxu0 %v18411_v63 }
 0xccc   :  { %14393 = vmatprep.subr.bf16.mxu1 %v18414_v45 }
 0xcce   :  { %13970 = vmatpush1.bf16.msra.mxu0 %v18409_v26 }
 0xccf   :  { %14394 = vmatpush1.bf16.msra.mxu1 %v18412_v44  ;;  %13971 = vmatprep.subr.bf16.mxu0 %v18417_v30 }
 0xcd0   :  { %14395 = vmatprep.subr.bf16.mxu1 %v18420_v19 }
 0xcd2   :  { %13972 = vmatpush1.bf16.msra.mxu0 %v18415_v32 }
 0xcd3   :  { %14396 = vmatpush1.bf16.msra.mxu1 %v18418_v33  ;;  %13973 = vmatprep.subr.bf16.mxu0 %v18423_v15 }
 0xcd4   :  { %14397 = vmatprep.subr.bf16.mxu1 %v18426_v7 }
 0xcd6   :  { %13974 = vmatpush1.bf16.msra.mxu0 %v18421_v43 }
 0xcd7   :  { %14398 = vmatpush1.bf16.msra.mxu1 %v18424_v34  ;;  %13975 = vmatprep.subr.bf16.mxu0 %v18429_v36 }
 0xcd8   :  { %14399 = vmatprep.subr.bf16.mxu1 %v18432_v6 }
 0xcda   :  { %13976 = vmatpush1.bf16.msra.mxu0 %v18427_v57 }
 0xcdb   :  { %14400 = vmatpush1.bf16.msra.mxu1 %v18430_v17  ;;  %13977 = vmatprep.subr.bf16.mxu0 %v18435_v1 }
 0xcdc   :  { %14401 = vmatprep.subr.bf16.mxu1 %v18438_v47  ;;  %v20677_v47 = vld [vmem:[#allocation28_spill] sm:$0xff] }
 0xcde   :  { %13978 = vmatpush1.bf16.msra.mxu0 %v18433_v27 }
 0xcdf   :  { %14402 = vmatpush1.bf16.msra.mxu1 %v18436_v21  ;;  %13979 = vmatprep.subr.bf16.mxu0 %v18441_v18 }
 0xce0   :  { %14403 = vmatprep.subr.bf16.mxu1 %v18444_v28 }
 0xce2   :  { %13980 = vmatpush1.bf16.msra.mxu0 %v18439_v52 }
 0xce3   :  { %14404 = vmatpush1.bf16.msra.mxu1 %v18442_v25  ;;  %13981 = vmatprep.subr.bf16.mxu0 %v18447_v13 }
 0xce4   :  { %14405 = vmatprep.subr.bf16.mxu1 %v18450_v31 }
 0xce6   :  { %13982 = vmatpush1.bf16.msra.mxu0 %v18445_v3 }
 0xce7   :  { %14406 = vmatpush1.bf16.msra.mxu1 %v18448_v23  ;;  %13983 = vmatprep.subr.bf16.mxu0 %v18453_v16  ;;  %v20680_v23 = vld [vmem:[#allocation27_spill] sm:$0xff] }
 0xce8   :  { %14407 = vmatprep.subr.bf16.mxu1 %v18456_v24 }
 0xcea   :  { %13984 = vmatpush1.bf16.msra.mxu0 %v18451_v53  ;;  %v20681_v53 = vld [vmem:[#allocation32_spill] sm:$0xff] }
 0xceb   :  { %14408 = vmatpush1.bf16.msra.mxu1 %v18454_v51 }
 0xced   :  { %13986 = vmatmul.mubr.bf16.vlgmr.msra.gmra.mrb[128].mxu0 %v20446_v40 }
 0xcee   :  { %14410 = vmatmul.mubr.bf16.vlgmr.msra.gmra.mrb[128].mxu1 %v20446_v40  ;;  %13995 = vmatprep.mubr.bf16.mxu0 %v20466_v0  ;;  %v11013_v40 = vrot.slane %v20514_v11, %v19111_v37 }
 0xcef   :  { %14419 = vmatprep.mubr.bf16.mxu1 %v20466_v0 }
 0xcf5   :  { %13996 = vmatmul.mubr.bf16.gmra.mrb[132].mxu0 %v20462_v59 }
 0xcf6   :  { %14420 = vmatmul.mubr.bf16.gmra.mrb[132].mxu1 %v20462_v59  ;;  %v11021_v59 = vrot.slane %v20518_v2, %v19111_v37 }
 0xdc0   :  { %v13987_v0 = vpop.f32.mrb[128].mxu0 }
 0xdc1   :  { %v16603_v56 = vadd.f32 %v13987_v0, %v11009_v22  ;;  %v14411_v38 = vpop.f32.mrb[128].mxu1  ;;  %v13989_v14 = vpop.f32.mrb[129].mxu0 }
 0xdc2   :  { %v16611_v9 = vadd.f32 %v14411_v38, %v11017_v41  ;;  %v16604_v62 = vadd.f32 %v13989_v14, %v11013_v40  ;;  %v14413_v58 = vpop.f32.mrb[129].mxu1  ;;  %v13991_v39 = vpop.f32.mrb[130].mxu0 }
 0xdc3   :  { %v14430_v8 = vadd.f32 %v16603_v56, %v20051_v49  ;;  %v16605_v55 = vadd.f32 %v13991_v39, %v11009_v22  ;;  %v14415_v4 = vpop.f32.mrb[130].mxu1  ;;  %v13993_v10 = vpop.f32.mrb[131].mxu0  ;;  %v16612_v48 = vadd.f32 %v14413_v58, %v11021_v59  ;;  %v20682_v56 = vld [vmem:[#allocation25_spill] sm:$0xff] }
 0xdc4   :  { %v14431_v50 = vadd.f32 %v16604_v62, %v20045_v54  ;;  %v16613_v63 = vadd.f32 %v14415_v4, %v11017_v41  ;;  %v16606_v45 = vadd.f32 %v13993_v10, %v11013_v40  ;;  %v14417_v26 = vpop.f32.mrb[131].mxu1  ;;  %v14432_v44 = vadd.f32 %v16611_v9, %v20153_v42  ;;  %v20684_v62 = vld [vmem:[#allocation31_spill] sm:$0xff] }
 0xdc5   :  { %v14434_v37 = vadd.f32 %v16605_v55, %v20054_v29  ;;  %v16614_v32 = vadd.f32 %v14417_v26, %v11021_v59  ;;  %v14433_v33 = vadd.f32 %v16612_v48, %v20122_v20 }
 0xdc6   :  { %v14446_v30 = vadd.f32 %v14431_v50, %v14430_v8  ;;  %v14435_v19 = vadd.f32 %v16606_v45, %v20048_v60  ;;  %v14436_v49 = vadd.f32 %v16613_v63, %v20146_v35  ;;  %v20678_v60 = vld [vmem:[#allocation26_spill] sm:$0xff]  ;;  %v20679_v35 = vld [vmem:[#allocation24_spill] sm:$0xff] }
 0xdc7   :  { %v14437_v27 = vadd.f32 %v16614_v32, %v20677_v47 }
 0xdc8   :  { %v14451_v15 = vadd.f32 %v14435_v19, %v14434_v37  ;;  %v13997_v7 = vpop.f32.mrb[132].mxu0  ;;  %v14447_v43 = vadd.f32 %v14446_v30, %v14432_v44 }
 0xdc9   :  { %v16607_v54 = vadd.f32 %v13997_v7, %v11009_v22  ;;  %v14421_v34 = vpop.f32.mrb[132].mxu1  ;;  %v13999_v36 = vpop.f32.mrb[133].mxu0 }
 0xdca   :  { %v16615_v6 = vadd.f32 %v14421_v34, %v11017_v41  ;;  %v16608_v57 = vadd.f32 %v13999_v36, %v11013_v40  ;;  %v14423_v17 = vpop.f32.mrb[133].mxu1  ;;  %v14001_v29 = vpop.f32.mrb[134].mxu0  ;;  %v14448_v1 = vadd.f32 %v14447_v43, %v14433_v33  ;;  %v14452_v42 = vadd.f32 %v14451_v15, %v14436_v49 }
 0xdcb   :  { %v14438_v21 = vadd.f32 %v16607_v54, %v20678_v60  ;;  %v16609_v18 = vadd.f32 %v14001_v29, %v11009_v22  ;;  %v14425_v20 = vpop.f32.mrb[134].mxu1  ;;  %v14003_v28 = vpop.f32.mrb[135].mxu0  ;;  %v16616_v25 = vadd.f32 %v14423_v17, %v11021_v59  ;;  %v20683_v22 = vld [vmem:[#allocation30_spill] sm:$0xff] }
 0xdcc   :  { %v14439_v52 = vadd.f32 %v16608_v57, %v20679_v35  ;;  %v16617_v13 = vadd.f32 %v14425_v20, %v11017_v41  ;;  %v16610_v31 = vadd.f32 %v14003_v28, %v11013_v40  ;;  %v14427_v3 = vpop.f32.mrb[135].mxu1  ;;  %14449 = vadd.xlane.f32.xlu1 %v14448_v1  ;;  %v14453_v24 = vadd.f32 %v14452_v42, %v14437_v27  ;;  %v20685_v41 = vld [vmem:[#allocation29_spill] sm:$0xff] }
 0xdcd   :  { %v14442_v16 = vadd.f32 %v16609_v18, %v20680_v23  ;;  %v14440_v51 = vadd.f32 %v16615_v6, %v20681_v53  ;;  %v16618_v14 = vadd.f32 %v14427_v3, %v11021_v59  ;;  %v14441_v9 = vadd.f32 %v16616_v25, %v20683_v22 }
 0xdce   :  { %v14456_v0 = vadd.f32 %v14439_v52, %v14438_v21  ;;  %v14443_v38 = vadd.f32 %v16610_v31, %v20682_v56  ;;  %14454 = vadd.xlane.f32.xlu0 %v14453_v24  ;;  %v14444_v58 = vadd.f32 %v16617_v13, %v20684_v62 }
 0xdcf   :  { %v14445_v40 = vadd.f32 %v16618_v14, %v20685_v41 }
 0xdd0   :  { %v14461_v39 = vadd.f32 %v14443_v38, %v14442_v16  ;;  %v14457_v55 = vadd.f32 %v14456_v0, %v14440_v51 }
 0xdd2   :  { %v14458_v4 = vadd.f32 %v14457_v55, %v14441_v9  ;;  %v14462_v10 = vadd.f32 %v14461_v39, %v14444_v58 }
 0xdd4   :  { %14459 = vadd.xlane.f32.xlu1 %v14458_v4  ;;  %v14463_v48 = vadd.f32 %v14462_v10, %v14445_v40 }
 0xdd6   :  { %14464 = vadd.xlane.f32.xlu0 %v14463_v48 }
 0xe59   :  { %v14450_v63 = vpop.xlane.xlu1 %14449 }
 0xe5a   :  { %v14466_v45 = vmul.f32 0.001953125, %v14450_v63 }
 0xe5b   :  { %v14455_v32 = vpop.xlane.xlu0 %14454 }
 0xe5c   :  { %v20538_v26 = vsub.f32 %v14430_v8, %v14466_v45  ;;  %v20540_v30 = vsub.f32 %v14431_v50, %v14466_v45  ;;  %v20542_v59 = vsub.f32 %v14432_v44, %v14466_v45  ;;  %v14467_v15 = vmul.f32 0.001953125, %v14455_v32 }
 0xe5d   :  { %v20554_v8 = vsub.f32 %v14433_v33, %v14466_v45 }
 0xe5e   :  { %v14486_v7 = vmul.f32 %v20538_v26, %v20538_v26  ;;  %v14487_v43 = vmul.f32 %v20540_v30, %v20540_v30  ;;  %v20548_v54 = vsub.f32 %v14434_v37, %v14467_v15  ;;  %v20550_v34 = vsub.f32 %v14435_v19, %v14467_v15 }
 0xe5f   :  { %v20552_v36 = vsub.f32 %v14436_v49, %v14467_v15  ;;  %v14488_v50 = vmul.f32 %v20542_v59, %v20542_v59  ;;  %v20558_v57 = vsub.f32 %v14437_v27, %v14467_v15  ;;  %v14489_v33 = vmul.f32 %v20554_v8, %v20554_v8 }
 0xe60   :  { %v14502_v44 = vadd.f32 %v14487_v43, %v14486_v7  ;;  %v14490_v17 = vmul.f32 %v20548_v54, %v20548_v54  ;;  %v14491_v37 = vmul.f32 %v20550_v34, %v20550_v34 }
 0xe61   :  { %v14460_v6 = vpop.xlane.xlu1 %14459  ;;  %v14492_v49 = vmul.f32 %v20552_v36, %v20552_v36  ;;  %v14493_v28 = vmul.f32 %v20558_v57, %v20558_v57 }
 0xe62   :  { %v14468_v29 = vmul.f32 0.001953125, %v14460_v6  ;;  %v14503_v19 = vadd.f32 %v14502_v44, %v14488_v50  ;;  %v14507_v42 = vadd.f32 %v14491_v37, %v14490_v17  ;;  %v14553_v50 = vrot.slane %v20506_v61, %v19144_v46 }
 0xe63   :  { %v14465_v1 = vpop.xlane.xlu0 %14464  ;;  %v14561_v44 = vrot.slane %v20510_v12, %v19144_v46  ;;  %v14557_v6 = vrot.slane %v20514_v11, %v19144_v46  ;;  %v14565_v17 = vrot.slane %v20518_v2, %v19144_v46 }
 0xe64   :  { %v20568_v47 = vsub.f32 %v14438_v21, %v14468_v29  ;;  %v20570_v27 = vsub.f32 %v14439_v52, %v14468_v29  ;;  %v14469_v60 = vmul.f32 0.001953125, %v14465_v1  ;;  %v20572_v18 = vsub.f32 %v14440_v51, %v14468_v29 }
 0xe65   :  { %v14504_v20 = vadd.f32 %v14503_v19, %v14489_v33  ;;  %v14508_v35 = vadd.f32 %v14507_v42, %v14492_v49  ;;  %v20584_v3 = vsub.f32 %v14441_v9, %v14468_v29  ;;  %v14585_v29 = vrot.slane %v20506_v61, %v19147_v5 }
 0xe66   :  { %v20576_v25 = vsub.f32 %v14442_v16, %v14469_v60  ;;  %v20578_v13 = vsub.f32 %v14443_v38, %v14469_v60  ;;  %v20580_v31 = vsub.f32 %v14444_v58, %v14469_v60  ;;  %v14494_v21 = vmul.f32 %v20568_v47, %v20568_v47 }
 0xe67   :  { %14505 = vadd.xlane.f32.xlu1 %v14504_v20  ;;  %v14509_v52 = vadd.f32 %v14508_v35, %v14493_v28  ;;  %v14495_v23 = vmul.f32 %v20570_v27, %v20570_v27  ;;  %v20588_v24 = vsub.f32 %v14445_v40, %v14469_v60  ;;  %v14496_v51 = vmul.f32 %v20572_v18, %v20572_v18 }
 0xe68   :  { %v14498_v16 = vmul.f32 %v20576_v25, %v20576_v25  ;;  %v14499_v53 = vmul.f32 %v20578_v13, %v20578_v13  ;;  %v14500_v56 = vmul.f32 %v20580_v31, %v20580_v31  ;;  %v14497_v14 = vmul.f32 %v20584_v3, %v20584_v3 }
 0xe69   :  { %14510 = vadd.xlane.f32.xlu0 %v14509_v52  ;;  %v14512_v0 = vadd.f32 %v14495_v23, %v14494_v21  ;;  %v14501_v9 = vmul.f32 %v20588_v24, %v20588_v24  ;;  %v14593_v19 = vrot.slane %v20510_v12, %v19147_v5  ;;  %v14589_v1 = vrot.slane %v20514_v11, %v19147_v5 }
 0xe6a   :  { %v14517_v38 = vadd.f32 %v14499_v53, %v14498_v16  ;;  %v14597_v33 = vrot.slane %v20518_v2, %v19147_v5 }
 0xe6b   :  { %v14513_v22 = vadd.f32 %v14512_v0, %v14496_v51 }
 0xe6c   :  { %v14518_v62 = vadd.f32 %v14517_v38, %v14500_v56 }
 0xe6d   :  { %v14514_v58 = vadd.f32 %v14513_v22, %v14497_v14 }
 0xe6e   :  { %v14519_v39 = vadd.f32 %v14518_v62, %v14501_v9 }
 0xe6f   :  { %14515 = vadd.xlane.f32.xlu1 %v14514_v58 }
 0xe70   :  { %14520 = vadd.xlane.f32.xlu0 %v14519_v39 }
 0xef4   :  { %v14506_v55 = vpop.xlane.xlu1 %14505 }
 0xef5   :  { %v14522_v41 = vmul.f32 0.001953125, %v14506_v55 }
 0xef6   :  { %v14511_v40 = vpop.xlane.xlu0 %14510 }
 0xef7   :  { %v14526_v4 = vadd.f32 1e-05, %v14522_v41  ;;  %v14523_v10 = vmul.f32 0.001953125, %v14511_v40 }
 0xef9   :  { %18593 = vrsqrt.f32 %v14526_v4  ;;  %v14527_v48 = vadd.f32 1e-05, %v14523_v10 }
 0xefb   :  { %18595 = vrsqrt.f32 %v14527_v48 }
 0xefc   :  { %v14516_v63 = vpop.xlane.xlu1 %14515 }
 0xefd   :  { %v14524_v45 = vmul.f32 0.001953125, %v14516_v63  ;;  %v14521_v32 = vpop.xlane.xlu0 %14520 }
 0xefe   :  { %v14525_v15 = vmul.f32 0.001953125, %v14521_v32 }
 0xeff   :  { %v14528_v7 = vadd.f32 1e-05, %v14524_v45 }
 0xf00   :  { %v14529_v43 = vadd.f32 1e-05, %v14525_v15 }
 0xf01   :  { %18597 = vrsqrt.f32 %v14528_v7 }
 0xf02   :  { %18599 = vrsqrt.f32 %v14529_v43 }
 0xf03   :  { %v18594_v37 = vpop.eup %18593 }
 0xf04   :  { %v14534_v49 = vmul.f32 %v18594_v37, %v20538_v26  ;;  %v14535_v42 = vmul.f32 %v18594_v37, %v20540_v30  ;;  %v14536_v46 = vmul.f32 %v18594_v37, %v20542_v59  ;;  %v14537_v60 = vmul.f32 %v18594_v37, %v20554_v8 }
 0xf05   :  { %v18596_v20 = vpop.eup %18595 }
 0xf06   :  { %v14566_v28 = vmul.f32 %v14553_v50, %v14534_v49  ;;  %v14567_v61 = vmul.f32 %v14557_v6, %v14535_v42  ;;  %v14568_v35 = vmul.f32 %v14561_v44, %v14536_v46  ;;  %v14569_v21 = vmul.f32 %v14565_v17, %v14537_v60 }
 0xf07   :  { %v14538_v12 = vmul.f32 %v18596_v20, %v20548_v54  ;;  %v14539_v11 = vmul.f32 %v18596_v20, %v20550_v34  ;;  %v14540_v52 = vmul.f32 %v18596_v20, %v20552_v36  ;;  %v14541_v5 = vmul.f32 %v18596_v20, %v20558_v57 }
 0xf08   :  { %v14598_v2 = vadd.f32 %v14585_v29, %v14566_v28  ;;  %v14599_v26 = vadd.f32 %v14589_v1, %v14567_v61  ;;  %v14600_v30 = vadd.f32 %v14593_v19, %v14568_v35  ;;  %v14601_v23 = vadd.f32 %v14597_v33, %v14569_v21 }
 0xf09   :  { %v14570_v59 = vmul.f32 %v14553_v50, %v14538_v12  ;;  %v14571_v16 = vmul.f32 %v14557_v6, %v14539_v11  ;;  %v14572_v8 = vmul.f32 %v14561_v44, %v14540_v52  ;;  %v14573_v53 = vmul.f32 %v14565_v17, %v14541_v5 }
 0xf0a   :  { %14614 = vst [vmem:[#allocation17] sm:$0xff] %v14598_v2  ;;  %14615 = vst [vmem:[#allocation17 + $0x8] sm:$0xff] %v14599_v26 }
 0xf0b   :  { %14616 = vst [vmem:[#allocation17 + $0x10] sm:$0xff] %v14600_v30  ;;  %14617 = vst [vmem:[#allocation17 + $0x18] sm:$0xff] %v14601_v23  ;;  %v18598_v51 = vpop.eup %18597  ;;  %v14602_v54 = vadd.f32 %v14585_v29, %v14570_v59  ;;  %v14603_v0 = vadd.f32 %v14589_v1, %v14571_v16  ;;  %v14604_v34 = vadd.f32 %v14593_v19, %v14572_v8 }
 0xf0c   :  { %v14605_v56 = vadd.f32 %v14597_v33, %v14573_v53  ;;  %v18600_v36 = vpop.eup %18599  ;;  %v14542_v57 = vmul.f32 %v18598_v51, %v20568_v47  ;;  %v14543_v38 = vmul.f32 %v18598_v51, %v20570_v27  ;;  %v14544_v14 = vmul.f32 %v18598_v51, %v20572_v18 }
 0xf0d   :  { %v14545_v22 = vmul.f32 %v18598_v51, %v20584_v3  ;;  %14618 = vst [vmem:[#allocation17 + $0x20] sm:$0xff] %v14602_v54  ;;  %14619 = vst [vmem:[#allocation17 + $0x28] sm:$0xff] %v14603_v0  ;;  %v14546_v9 = vmul.f32 %v18600_v36, %v20576_v25  ;;  %v14547_v62 = vmul.f32 %v18600_v36, %v20578_v13 }
 0xf0e   :  { %14620 = vst [vmem:[#allocation17 + $0x30] sm:$0xff] %v14604_v34  ;;  %14621 = vst [vmem:[#allocation17 + $0x38] sm:$0xff] %v14605_v56  ;;  %v14548_v58 = vmul.f32 %v18600_v36, %v20580_v31  ;;  %v14549_v39 = vmul.f32 %v18600_v36, %v20588_v24  ;;  %v14574_v55 = vmul.f32 %v14553_v50, %v14542_v57 }
 0xf0f   :  { %v14575_v47 = vmul.f32 %v14557_v6, %v14543_v38  ;;  %v14576_v41 = vmul.f32 %v14561_v44, %v14544_v14  ;;  %v14577_v27 = vmul.f32 %v14565_v17, %v14545_v22  ;;  %v14578_v18 = vmul.f32 %v14553_v50, %v14546_v9 }
 0xf10   :  { %v14579_v3 = vmul.f32 %v14557_v6, %v14547_v62  ;;  %v14580_v40 = vmul.f32 %v14561_v44, %v14548_v58  ;;  %v14581_v4 = vmul.f32 %v14565_v17, %v14549_v39  ;;  %v14606_v10 = vadd.f32 %v14585_v29, %v14574_v55 }
 0xf11   :  { %v14607_v48 = vadd.f32 %v14589_v1, %v14575_v47  ;;  %v14608_v63 = vadd.f32 %v14593_v19, %v14576_v41  ;;  %v14609_v25 = vadd.f32 %v14597_v33, %v14577_v27  ;;  %v14610_v45 = vadd.f32 %v14585_v29, %v14578_v18 }
 0xf12   :  { %v14611_v13 = vadd.f32 %v14589_v1, %v14579_v3  ;;  %v14612_v32 = vadd.f32 %v14593_v19, %v14580_v40  ;;  %v14613_v31 = vadd.f32 %v14597_v33, %v14581_v4  ;;  %14622 = vst [vmem:[#allocation17 + $0x40] sm:$0xff] %v14606_v10 }
 0xf13   :  { %14623 = vst [vmem:[#allocation17 + $0x48] sm:$0xff] %v14607_v48  ;;  %14624 = vst [vmem:[#allocation17 + $0x50] sm:$0xff] %v14608_v63 }
 0xf14   :  { %14625 = vst [vmem:[#allocation17 + $0x58] sm:$0xff] %v14609_v25  ;;  %14626 = vst [vmem:[#allocation17 + $0x60] sm:$0xff] %v14610_v45 }
 0xf15   :  { %14627 = vst [vmem:[#allocation17 + $0x68] sm:$0xff] %v14611_v13  ;;  %14628 = vst [vmem:[#allocation17 + $0x70] sm:$0xff] %v14612_v32 }
 0xf16   :  { %14629 = vst [vmem:[#allocation17 + $0x78] sm:$0xff] %v14613_v31 }
 0xf17   :  { %18832 = shalt.err (!%p18829_p6)
}
 0xf18   :  { %s18833_s15 = scalar_lea.hbm %s20658_s9, 2048 }
 0xf19   :  { %p18834_p7 = scmp.ne.s32.totalorder %s20658_s9, %s18833_s15  ;;  %p18837_p8 = scmp.lt.u32.totalorder %s18833_s15, %s20658_s9 }
 0xf1b   :  { %p18839_p9 = pnand %p18837_p8, %p18834_p7 }
 0xf1d   :  { %18842 = shalt.err (!%p18839_p9)
}
 0xf1e   :  { %14641 = dma.vmem_to_hbm [thread:$0]  %s14636_s23, 2048, %s20658_s9, [#allocation4], %s18866_s7, %s18866_s7, %s18867_s28  }
 0xf1f   :  { %18853 = dma.done.wait [#allocation4], 2048  }
 0xf20   :  { %18854 = vsyncadd [#allocation4], 4294965248 }
 0xf21   :  { %14645 = vsyncpa [#allocation3], 1 }
 0xf22   :  { %14646 = vsyncpa [#allocation6], 1 }
 0xf23   :  { %14647 = vsyncpa [#allocation9], 1 }
 0xf24   :  { %14648 = vsyncpa [#allocation12], 1 }
 0xf25   :  { %14649 = vsyncpa [#allocation15], 1 }
 0xf26   :  { %14650 = vsyncpa [#allocation4], 1 }

</bundles_post_ra>
